<compile_context>
chip_gen: v6e
topology: v6e:2x2x1
jax: 0.10.0
libtpu: 0.0.40
codegen_flags: <defaults>
</compile_context>

<pallas_src>
import jax
import jax.numpy as jnp
from jax import lax
from jax.experimental import pallas as pl
from jax.experimental.pallas import tpu as pltpu


def _round_up(x, m):
    return (x + m - 1) // m * m


def _vmem_capacity_bytes():
    """Physical VMEM of the local TPU generation (fallback: 128 MiB)."""
    try:
        cap = getattr(pltpu.get_tpu_info(), "vmem_capacity_bytes", None)
        if cap:
            return int(cap)
    except Exception:
        pass
    try:
        kind = jax.devices()[0].device_kind.lower()
        if "v7" in kind:
            return 64 * 2**20
    except Exception:
        pass
    return 128 * 2**20


# ----------------------------- fused Pallas kernel -----------------------------

_STRIP = 32   # batch sub-strip for the gate elementwise math (vreg-pressure control)


def _make_gru4rec_kernel(num_layers, Tp, Tc, B_tile, Ep, Hp):
    """Fused kernel: stacked GRU layers -> last-valid-step select -> dense."""
    n_chunks = Tp // Tc
    unroll = True if Tc <= 16 else 8

    def kernel(*refs):
        x_ref = refs[0]                      # (Tp, B_tile, Ep)  f32 time-major embeddings
        last_ref = refs[1]                   # (B_tile, 1)       i32 last valid index per row
        w_refs = refs[2:2 + 2 * num_layers]  # per layer: W_ih^T (Din_p,3Hp), W_hh^T (Hp,3Hp)
        dw_ref = refs[2 + 2 * num_layers]    # (Hp, Ep)          dense.weight^T (padded)
        db_ref = refs[3 + 2 * num_layers]    # (1, Ep)           dense.bias (padded)
        out_ref = refs[4 + 2 * num_layers]   # (B_tile, Ep)
        gi_sc = refs[5 + 2 * num_layers]     # (Tc, B_tile, 3Hp) scratch: chunked input proj.
        hseq_sc = refs[6 + 2 * num_layers] if num_layers > 1 else None

        last = last_ref[...]                 # (B_tile, 1) i32

        def gates(gi, gh, h):
            # gate order r | z | n, each a 128-aligned lane slab of Hp lanes.
            r = jax.nn.sigmoid(gi[:, :Hp] + gh[:, :Hp])
            z = jax.nn.sigmoid(gi[:, Hp:2 * Hp] + gh[:, Hp:2 * Hp])
            n = jnp.tanh(gi[:, 2 * Hp:] + r * gh[:, 2 * Hp:])
            return n + z * (h - n)           # == (1-z)*n + z*h, one fewer VPU op

        def cell(gi, gh, h):
            if B_tile <= _STRIP:
                return gates(gi, gh, h)
            parts = []
            for r0 in range(0, B_tile, _STRIP):
                sl = slice(r0, r0 + _STRIP)
                parts.append(gates(gi[sl], gh[sl], h[sl]))
            return jnp.concatenate(parts, axis=0)

        sel = jnp.zeros((B_tile, Hp), jnp.float32)
        for l in range(num_layers):
            wih = w_refs[2 * l][...]         # (Din_p, 3Hp)
            whh = w_refs[2 * l + 1][...]     # (Hp, 3Hp)
            final = l == num_layers - 1

            h = jnp.zeros((B_tile, Hp), jnp.float32)
            for c in range(n_chunks):
                t0 = c * Tc
                # Hoisted input projection for this time chunk: one MXU-friendly matmul.
                if l == 0:
                    inp = x_ref[t0:t0 + Tc].reshape(Tc * B_tile, Ep)
                else:
                    inp = hseq_sc[t0:t0 + Tc].reshape(Tc * B_tile, Hp)
                gi_sc[...] = jnp.dot(
                    inp, wih, preferred_element_type=jnp.float32
                ).reshape(Tc, B_tile, 3 * Hp)

                # TODO(synk): if the bundle dump shows a per-step RHS push, drive the
                # MXU explicitly (matmul_push_rhs once per layer + acc_lhs/pop per
                # step) to keep whh weight-stationary across the recurrence.
                if final:
                    # Fuse the last-valid-step selection into the recurrence.
                    def step(tl, carry):
                        h_c, sel_c = carry
                        gh = jnp.dot(h_c, whh, preferred_element_type=jnp.float32)
                        h_new = cell(gi_sc[tl], gh, h_c)
                        sel_c = jnp.where(last == t0 + tl, h_new, sel_c)
                        return h_new, sel_c

                    h, sel = lax.fori_loop(0, Tc, step, (h, sel), unroll=unroll)
                else:
                    def step(tl, h_c):
                        gh = jnp.dot(h_c, whh, preferred_element_type=jnp.float32)
                        h_new = cell(gi_sc[tl], gh, h_c)
                        hseq_sc[t0 + tl] = h_new
                        return h_new

                    h = lax.fori_loop(0, Tc, step, h, unroll=unroll)

        out_ref[...] = (
            jnp.dot(sel, dw_ref[...], preferred_element_type=jnp.float32) + db_ref[...]
        )

    return kernel


# ------------------------------ JAX wrapper --------------------------------

def _pad_gate_weight(w_t, din, din_pad, H, Hp):
    """w_t: (din, 3H), gates ordered r|z|n -> (din_pad, 3*Hp), lane-aligned gate slabs."""
    out = jnp.zeros((din_pad, 3 * Hp), jnp.float32)
    for g in range(3):
        out = out.at[:din, g * Hp:g * Hp + H].set(w_t[:, g * H:(g + 1) * H])
    return out


def gru4rec_forward(item_seq, params):
    """item_seq: (B, T) int32 item ids (0 == padding). Returns (B, E) f32."""
    emb_table = params["item_embedding"].astype(jnp.float32)   # (item_num+1, E)
    B, T = item_seq.shape
    E = emb_table.shape[1]
    H = params["w_hh_t"][0].shape[0]
    L = len(params["w_hh_t"])

    # Lane/sublane-aligned padded sizes.
    Ep = _round_up(E, 128)
    Hp = _round_up(H, 128)

    # Time chunking for the hoisted input projection (caps gi scratch at Tc steps).
    # Padded time steps (zero embeddings) never reach the selected output.
    Tc = T if T <= 32 else 32
    Tp = _round_up(T, Tc)

    # ------------- generation-aware VMEM budget & batch-tile sizing -------------
    vmem_cap = _vmem_capacity_bytes()
    small_vmem = vmem_cap <= 64 * 2**20            # v7x-class chip (64 MiB, 2 TCs)
    if small_vmem:
        vmem_target = min(52 * 2**20, max(vmem_cap - 12 * 2**20, 24 * 2**20))
    else:
        vmem_target = 104 * 2**20                  # v5e/v6e: 128 MiB physical

    # Weight footprint (counted double-buffered so the fallback path also fits).
    weight_elems = (Ep + (L - 1) * Hp + L * Hp) * 3 * Hp + Hp * Ep + Ep
    weight_bytes = 2 * 4 * weight_elems

    per_row_bytes = 4 * (
        2 * Tp * Ep                      # x block (double-buffered pipeline input)
        + Tc * 3 * Hp                    # gi scratch (time-chunked)
        + (Tp * Hp if L > 1 else 0)      # inter-layer hidden sequence scratch
        + 2 * Ep                         # output block (double-buffered)
        + 8 * Hp                         # h / sel / gh / gate working set
    )
    slack = 4 * 2**20
    if weight_bytes + 8 * per_row_bytes + slack > vmem_target:
        raise ValueError(
            f"GRU4REC working set (~{(weight_bytes + 8 * per_row_bytes + slack) >> 20} MiB "
            f"at b_tile=8) exceeds the VMEM target ({vmem_target >> 20} MiB); "
            f"reduce max_len / hidden_dim / num_layers.")

    b_tile = (vmem_target - weight_bytes - slack) // per_row_bytes
    b_tile = max(8, (min(256, int(b_tile)) // 8) * 8)     # >=256 fills MXU M on v6e/v7x
    b_tile = min(b_tile, _round_up(B, 8))
    if small_vmem and B >= 16:
        # v7x has 2 TensorCores: make sure the "parallel" grid has >= 2 batch tiles.
        b_tile = min(b_tile, max(8, (_round_up(B, 8) // 2 // 8) * 8))
    B_pad = _round_up(B, b_tile)

    # --- glue (JAX): time-major embedding gather, padding, last-index ---
    emb_table_p = jnp.zeros((emb_table.shape[0], Ep), jnp.float32).at[:, :E].set(emb_table)
    seq_p = jnp.zeros((B_pad, T), jnp.int32).at[:B].set(item_seq.astype(jnp.int32))
    seq_tm = jnp.zeros((Tp, B_pad), jnp.int32).at[:T].set(seq_p.T)
    x = emb_table_p[seq_tm]                                  # (Tp, B_pad, Ep) time-major
    # Dropout in eval mode is identity.
    # TODO(synk): fully-padded rows (incl. B_pad padding) get last_index = -1 and emit
    # dense-bias-only outputs; they are sliced off before returning.
    last_index = (jnp.count_nonzero(seq_p, axis=1).astype(jnp.int32) - 1).reshape(B_pad, 1)

    # --- pad weights so each gate block occupies a 128-aligned lane slab ---
    w_in = []
    for l, (wih_t, whh_t) in enumerate(zip(params["w_ih_t"], params["w_hh_t"])):
        din = E if l == 0 else H
        din_p = Ep if l == 0 else Hp
        w_in.append(_pad_gate_weight(wih_t.astype(jnp.float32), din, din_p, H, Hp))
        w_in.append(_pad_gate_weight(whh_t.astype(jnp.float32), H, Hp, H, Hp))
    dw = jnp.zeros((Hp, Ep), jnp.float32).at[:H, :E].set(
        params["dense_w_t"].astype(jnp.float32))
    db = jnp.zeros((1, Ep), jnp.float32).at[:, :E].set(
        params["dense_b"].astype(jnp.float32).reshape(1, E))

    kernel = _make_gru4rec_kernel(L, Tp, Tc, b_tile, Ep, Hp)

    scratch_shapes = [pltpu.VMEM((Tc, b_tile, 3 * Hp), jnp.float32)]
    if L > 1:
        scratch_shapes.append(pltpu.VMEM((Tp, b_tile, Hp), jnp.float32))

    # Cost estimate so XLA can schedule around the long fused call.
    flops = 2 * B_pad * Hp * Ep
    transc = 0
    for l in range(L):
        din_p = Ep if l == 0 else Hp
        flops += 2 * Tp * B_pad * (din_p * 3 * Hp + Hp * 3 * Hp)
        transc += 3 * Tp * B_pad * Hp
    bytes_accessed = 4 * (Tp * B_pad * Ep + weight_elems + B_pad * Ep + B_pad)
    cost = pl.CostEstimate(flops=int(flops), transcendentals=int(transc),
                           bytes_accessed=int(bytes_accessed))

    est_bytes = weight_bytes + b_tile * per_row_bytes + slack
    vmem_limit = int(min(vmem_target, max(est_bytes * 3 // 2, 32 * 2**20)))

    def _run(single_buffer_weights):
        def const_spec(shape):
            zeros = (0,) * len(shape)
            if single_buffer_weights:
                return pl.BlockSpec(shape, lambda b: zeros, pipeline_mode=pl.Buffered(1))
            return pl.BlockSpec(shape, lambda b: zeros)

        in_specs = [
            pl.BlockSpec((Tp, b_tile, Ep), lambda b: (0, b, 0)),   # x (time-major)
            pl.BlockSpec((b_tile, 1), lambda b: (b, 0)),           # last_index per row
        ]
        for w in w_in:
            in_specs.append(const_spec(w.shape))
        in_specs.append(const_spec((Hp, Ep)))                      # dense.weight^T
        in_specs.append(const_spec((1, Ep)))                       # dense.bias

        return pl.pallas_call(
            kernel,
            out_shape=jax.ShapeDtypeStruct((B_pad, Ep), jnp.float32),
            grid_spec=pltpu.PrefetchScalarGridSpec(
                num_scalar_prefetch=0,
                grid=(B_pad // b_tile,),
                in_specs=in_specs,
                out_specs=pl.BlockSpec((b_tile, Ep), lambda b: (b, 0)),
                scratch_shapes=scratch_shapes,
            ),
            compiler_params=pltpu.CompilerParams(
                dimension_semantics=("parallel",),
                vmem_limit_bytes=vmem_limit,
            ),
            cost_estimate=cost,
        )(x, last_index, *w_in, dw, db)

    try:
        out_pad = _run(True)      # single-buffered constant weights (saves VMEM)
    except Exception:
        out_pad = _run(False)     # fallback: default double-buffered pipeline

    return out_pad[:B, :E]


# Pure-JAX reference (mirrors PyTorch forward) for correctness checking.
def gru4rec_reference(item_seq, params):
    emb = params["item_embedding"][item_seq].astype(jnp.float32)   # (B, T, E)
    last_index = (jnp.count_nonzero(item_seq, axis=1) - 1).astype(jnp.int32)
    B, T, E = emb.shape
    H = params["w_hh_t"][0].shape[0]

    h_seq = jnp.transpose(emb, (1, 0, 2))                          # (T, B, E)
    for wih_t, whh_t in zip(params["w_ih_t"], params["w_hh_t"]):
        def step(h, x_t):
            gi = x_t @ wih_t
            gh = h @ whh_t
            r = jax.nn.sigmoid(gi[:, :H] + gh[:, :H])
            z = jax.nn.sigmoid(gi[:, H:2 * H] + gh[:, H:2 * H])
            n = jnp.tanh(gi[:, 2 * H:] + r * gh[:, 2 * H:])
            h_new = (1.0 - z) * n + z * h
            return h_new, h_new
        _, h_seq = lax.scan(step, jnp.zeros((B, H), jnp.float32), h_seq)
    h_last = h_seq[last_index, jnp.arange(B)]                      # (B, H)
    return h_last @ params["dense_w_t"] + params["dense_b"]


# ------------------------- deterministic param init ------------------------

def init_params(key, item_num, embedding_dim, hidden_dim, num_layers):
    ks = jax.random.split(key, 2 + 2 * num_layers + 2)
    E, H = embedding_dim, hidden_dim

    # nn.Embedding + xavier_normal_, row 0 (padding_idx) zeroed.
    std_emb = (2.0 / (item_num + 1 + E)) ** 0.5
    emb = std_emb * jax.random.normal(ks[0], (item_num + 1, E), jnp.float32)
    emb = emb.at[0].set(0.0)

    w_ih_t, w_hh_t = [], []
    for l in range(num_layers):
        din = E if l == 0 else H
        std_ih = (2.0 / (3 * H + din)) ** 0.5
        std_hh = (2.0 / (3 * H + H)) ** 0.5
        wih = std_ih * jax.random.normal(ks[2 + 2 * l], (3 * H, din), jnp.float32)
        whh = std_hh * jax.random.normal(ks[3 + 2 * l], (3 * H, H), jnp.float32)
        w_ih_t.append(wih.T)                                       # (din, 3H)
        w_hh_t.append(whh.T)                                       # (H, 3H)

    bound = 1.0 / (H ** 0.5)
    dense_w = jax.random.uniform(ks[-2], (E, H), jnp.float32, -bound, bound)
    dense_b = jax.random.uniform(ks[-1], (E,), jnp.float32, -bound, bound)

    return {
        "item_embedding": emb,
        "w_ih_t": w_ih_t,
        "w_hh_t": w_hh_t,
        "dense_w_t": dense_w.T,                                    # (H, E)
        "dense_b": dense_b.reshape(1, E),                          # (1, E)
    }


if __name__ == "__main__":
    item_num = 50
    embedding_dim = 32
    hidden_dim = 32
    num_layers = 2
    max_len = 8
    batch = 8

    key = jax.random.PRNGKey(0)
    k_param, k_items, k_len = jax.random.split(key, 3)
    params = init_params(k_param, item_num, embedding_dim, hidden_dim, num_layers)

    # Build sessions: item ids in [1, item_num], zero-padded tails of varying length.
    ids = jax.random.randint(k_items, (batch, max_len), 1, item_num + 1, jnp.int32)
    lengths = jax.random.randint(k_len, (batch,), 1, max_len + 1, jnp.int32)
    pos = jnp.arange(max_len)[None, :]
    item_seq = jnp.where(pos < lengths[:, None], ids, 0).astype(jnp.int32)

    out = gru4rec_forward(item_seq, params)
    out = jax.block_until_ready(out)

    ref = gru4rec_reference(item_seq, params)
    assert out.shape == (batch, embedding_dim)
    assert jnp.allclose(out, ref, atol=1e-4, rtol=1e-4), "mismatch vs JAX reference"

    print("KERNEL_OK")
</pallas_src>

<mosaic_0001>
module attributes {stable_mosaic.version = 11 : i64} {
  func.func @kernel(%arg0: i32, %arg1: memref<8x8x128xf32, #tpu.memory_space<vmem>>, %arg2: memref<8x1xi32, #tpu.memory_space<vmem>>, %arg3: memref<128x384xf32, #tpu.memory_space<vmem>>, %arg4: memref<128x384xf32, #tpu.memory_space<vmem>>, %arg5: memref<128x384xf32, #tpu.memory_space<vmem>>, %arg6: memref<128x384xf32, #tpu.memory_space<vmem>>, %arg7: memref<128x128xf32, #tpu.memory_space<vmem>>, %arg8: memref<1x128xf32, #tpu.memory_space<vmem>>, %arg9: memref<8x128xf32, #tpu.memory_space<vmem>>, %arg10: memref<8x8x384xf32, #tpu.memory_space<vmem>>, %arg11: memref<8x8x128xf32, #tpu.memory_space<vmem>>) attributes {dimension_semantics = [#tpu.dimension_semantics<parallel>], iteration_bounds = array<i64: 1>, scalar_prefetch = 0 : i64, scratch_operands = 2 : i64, tpu.core_type = #tpu.core_type<tc>, window_params = [{transform_indices = @transform_0, window_bounds = array<i64: 8, 8, 128>}, {transform_indices = @transform_1, window_bounds = array<i64: 8, 1>}, {pipeline_mode = #tpu.pipeline_mode<synchronous>, transform_indices = @transform_2, window_bounds = array<i64: 128, 384>}, {pipeline_mode = #tpu.pipeline_mode<synchronous>, transform_indices = @transform_3, window_bounds = array<i64: 128, 384>}, {pipeline_mode = #tpu.pipeline_mode<synchronous>, transform_indices = @transform_4, window_bounds = array<i64: 128, 384>}, {pipeline_mode = #tpu.pipeline_mode<synchronous>, transform_indices = @transform_5, window_bounds = array<i64: 128, 384>}, {pipeline_mode = #tpu.pipeline_mode<synchronous>, transform_indices = @transform_6, window_bounds = array<i64: 128, 128>}, {pipeline_mode = #tpu.pipeline_mode<synchronous>, transform_indices = @transform_7, window_bounds = array<i64: 1, 128>}, {transform_indices = @transform_8, window_bounds = array<i64: 8, 128>}]} {
    %c0 = arith.constant 0 : index
    %c0_0 = arith.constant 0 : index
    %0 = vector.load %arg2[%c0, %c0_0] : memref<8x1xi32, #tpu.memory_space<vmem>>, vector<8x1xi32>
    %cst = arith.constant 0.000000e+00 : f32
    %1 = vector.broadcast %cst : f32 to vector<8x128xf32>
    %c0_1 = arith.constant 0 : index
    %c0_2 = arith.constant 0 : index
    %2 = vector.load %arg3[%c0_1, %c0_2] : memref<128x384xf32, #tpu.memory_space<vmem>>, vector<128x384xf32>
    %c0_3 = arith.constant 0 : index
    %c0_4 = arith.constant 0 : index
    %3 = vector.load %arg4[%c0_3, %c0_4] : memref<128x384xf32, #tpu.memory_space<vmem>>, vector<128x384xf32>
    %cst_5 = arith.constant 0.000000e+00 : f32
    %4 = vector.broadcast %cst_5 : f32 to vector<8x128xf32>
    %c0_6 = arith.constant 0 : index
    %c0_7 = arith.constant 0 : index
    %c0_8 = arith.constant 0 : index
    %5 = vector.load %arg1[%c0_6, %c0_7, %c0_8] : memref<8x8x128xf32, #tpu.memory_space<vmem>>, vector<8x8x128xf32>
    %6 = vector.shape_cast %5 : vector<8x8x128xf32> to vector<64x128xf32>
    %cst_9 = arith.constant dense<0.000000e+00> : vector<64x384xf32>
    %7 = tpu.matmul %6, %2, %cst_9 {dimension_numbers = #tpu.dot_dimension_numbers<[1], [0], [0], [1], [0, 0, 1, 1], [], []>} : vector<64x128xf32>, vector<128x384xf32>, vector<64x384xf32> -> vector<64x384xf32>
    %8 = vector.shape_cast %7 : vector<64x384xf32> to vector<8x8x384xf32>
    %c0_10 = arith.constant 0 : index
    %c0_11 = arith.constant 0 : index
    %c0_12 = arith.constant 0 : index
    %9 = vector.load %arg10[%c0_10, %c0_11, %c0_12] : memref<8x8x384xf32, #tpu.memory_space<vmem>>, vector<8x8x384xf32>
    tpu.vector_store %arg10[%c0_10, %c0_11, %c0_12], %8 {strides = array<i32>} : memref<8x8x384xf32, #tpu.memory_space<vmem>>, vector<8x8x384xf32>,
    %c0_i32 = arith.constant 0 : i32
    %cst_13 = arith.constant dense<0.000000e+00> : vector<8x384xf32>
    %10 = tpu.matmul %4, %3, %cst_13 {dimension_numbers = #tpu.dot_dimension_numbers<[1], [0], [0], [1], [0, 0, 1, 1], [], []>} : vector<8x128xf32>, vector<128x384xf32>, vector<8x384xf32> -> vector<8x384xf32>
    %11 = arith.index_cast %c0_i32 : i32 to index
    %c0_14 = arith.constant 0 : index
    %c0_15 = arith.constant 0 : index
    %12 = vector.load %arg10[%11, %c0_14, %c0_15] : memref<8x8x384xf32, #tpu.memory_space<vmem>>, vector<1x8x384xf32>
    %13 = vector.shape_cast %12 : vector<1x8x384xf32> to vector<8x384xf32>
    %14 = vector.extract_strided_slice %13 {offsets = [0, 0], sizes = [8, 128], strides = [1, 1]} : vector<8x384xf32> to vector<8x128xf32>
    %15 = vector.extract_strided_slice %10 {offsets = [0, 0], sizes = [8, 128], strides = [1, 1]} : vector<8x384xf32> to vector<8x128xf32>
    %16 = arith.addf %14, %15 : vector<8x128xf32>
    %17 = arith.negf %16 : vector<8x128xf32>
    %18 = math.exp %17 : vector<8x128xf32>
    %cst_16 = arith.constant 1.000000e+00 : f32
    %19 = vector.broadcast %cst_16 : f32 to vector<8x128xf32>
    %20 = arith.addf %19, %18 : vector<8x128xf32>
    %21 = arith.divf %19, %20 : vector<8x128xf32>
    %22 = vector.extract_strided_slice %13 {offsets = [0, 128], sizes = [8, 128], strides = [1, 1]} : vector<8x384xf32> to vector<8x128xf32>
    %23 = vector.extract_strided_slice %10 {offsets = [0, 128], sizes = [8, 128], strides = [1, 1]} : vector<8x384xf32> to vector<8x128xf32>
    %24 = arith.addf %22, %23 : vector<8x128xf32>
    %25 = arith.negf %24 : vector<8x128xf32>
    %26 = math.exp %25 : vector<8x128xf32>
    %cst_17 = arith.constant 1.000000e+00 : f32
    %27 = vector.broadcast %cst_17 : f32 to vector<8x128xf32>
    %28 = arith.addf %27, %26 : vector<8x128xf32>
    %29 = arith.divf %27, %28 : vector<8x128xf32>
    %30 = vector.extract_strided_slice %13 {offsets = [0, 256], sizes = [8, 128], strides = [1, 1]} : vector<8x384xf32> to vector<8x128xf32>
    %31 = vector.extract_strided_slice %10 {offsets = [0, 256], sizes = [8, 128], strides = [1, 1]} : vector<8x384xf32> to vector<8x128xf32>
    %32 = arith.mulf %21, %31 : vector<8x128xf32>
    %33 = arith.addf %30, %32 : vector<8x128xf32>
    %34 = math.tanh %33 : vector<8x128xf32>
    %35 = arith.subf %4, %34 : vector<8x128xf32>
    %36 = arith.mulf %29, %35 : vector<8x128xf32>
    %37 = arith.addf %34, %36 : vector<8x128xf32>
    %c0_i32_18 = arith.constant 0 : i32
    %38 = arith.addi %c0_i32_18, %c0_i32 : i32
    %39 = arith.index_cast %38 : i32 to index
    %c0_19 = arith.constant 0 : index
    %c0_20 = arith.constant 0 : index
    %40 = vector.load %arg11[%39, %c0_19, %c0_20] : memref<8x8x128xf32, #tpu.memory_space<vmem>>, vector<1x8x128xf32>
    %41 = vector.shape_cast %40 : vector<1x8x128xf32> to vector<8x128xf32>
    %42 = vector.shape_cast %37 : vector<8x128xf32> to vector<1x8x128xf32>
    tpu.vector_store %arg11[%39, %c0_19, %c0_20], %42 {strides = array<i32>} : memref<8x8x128xf32, #tpu.memory_space<vmem>>, vector<1x8x128xf32>,
    %c1_i32 = arith.constant 1 : i32
    %cst_21 = arith.constant dense<0.000000e+00> : vector<8x384xf32>
    %43 = tpu.matmul %37, %3, %cst_21 {dimension_numbers = #tpu.dot_dimension_numbers<[1], [0], [0], [1], [0, 0, 1, 1], [], []>} : vector<8x128xf32>, vector<128x384xf32>, vector<8x384xf32> -> vector<8x384xf32>
    %44 = arith.index_cast %c1_i32 : i32 to index
    %c0_22 = arith.constant 0 : index
    %c0_23 = arith.constant 0 : index
    %45 = vector.load %arg10[%44, %c0_22, %c0_23] : memref<8x8x384xf32, #tpu.memory_space<vmem>>, vector<1x8x384xf32>
    %46 = vector.shape_cast %45 : vector<1x8x384xf32> to vector<8x384xf32>
    %47 = vector.extract_strided_slice %46 {offsets = [0, 0], sizes = [8, 128], strides = [1, 1]} : vector<8x384xf32> to vector<8x128xf32>
    %48 = vector.extract_strided_slice %43 {offsets = [0, 0], sizes = [8, 128], strides = [1, 1]} : vector<8x384xf32> to vector<8x128xf32>
    %49 = arith.addf %47, %48 : vector<8x128xf32>
    %50 = arith.negf %49 : vector<8x128xf32>
    %51 = math.exp %50 : vector<8x128xf32>
    %cst_24 = arith.constant 1.000000e+00 : f32
    %52 = vector.broadcast %cst_24 : f32 to vector<8x128xf32>
    %53 = arith.addf %52, %51 : vector<8x128xf32>
    %54 = arith.divf %52, %53 : vector<8x128xf32>
    %55 = vector.extract_strided_slice %46 {offsets = [0, 128], sizes = [8, 128], strides = [1, 1]} : vector<8x384xf32> to vector<8x128xf32>
    %56 = vector.extract_strided_slice %43 {offsets = [0, 128], sizes = [8, 128], strides = [1, 1]} : vector<8x384xf32> to vector<8x128xf32>
    %57 = arith.addf %55, %56 : vector<8x128xf32>
    %58 = arith.negf %57 : vector<8x128xf32>
    %59 = math.exp %58 : vector<8x128xf32>
    %cst_25 = arith.constant 1.000000e+00 : f32
    %60 = vector.broadcast %cst_25 : f32 to vector<8x128xf32>
    %61 = arith.addf %60, %59 : vector<8x128xf32>
    %62 = arith.divf %60, %61 : vector<8x128xf32>
    %63 = vector.extract_strided_slice %46 {offsets = [0, 256], sizes = [8, 128], strides = [1, 1]} : vector<8x384xf32> to vector<8x128xf32>
    %64 = vector.extract_strided_slice %43 {offsets = [0, 256], sizes = [8, 128], strides = [1, 1]} : vector<8x384xf32> to vector<8x128xf32>
    %65 = arith.mulf %54, %64 : vector<8x128xf32>
    %66 = arith.addf %63, %65 : vector<8x128xf32>
    %67 = math.tanh %66 : vector<8x128xf32>
    %68 = arith.subf %37, %67 : vector<8x128xf32>
    %69 = arith.mulf %62, %68 : vector<8x128xf32>
    %70 = arith.addf %67, %69 : vector<8x128xf32>
    %c0_i32_26 = arith.constant 0 : i32
    %71 = arith.addi %c0_i32_26, %c1_i32 : i32
    %72 = arith.index_cast %71 : i32 to index
    %c0_27 = arith.constant 0 : index
    %c0_28 = arith.constant 0 : index
    %73 = vector.load %arg11[%72, %c0_27, %c0_28] : memref<8x8x128xf32, #tpu.memory_space<vmem>>, vector<1x8x128xf32>
    %74 = vector.shape_cast %73 : vector<1x8x128xf32> to vector<8x128xf32>
    %75 = vector.shape_cast %70 : vector<8x128xf32> to vector<1x8x128xf32>
    tpu.vector_store %arg11[%72, %c0_27, %c0_28], %75 {strides = array<i32>} : memref<8x8x128xf32, #tpu.memory_space<vmem>>, vector<1x8x128xf32>,
    %c2_i32 = arith.constant 2 : i32
    %cst_29 = arith.constant dense<0.000000e+00> : vector<8x384xf32>
    %76 = tpu.matmul %70, %3, %cst_29 {dimension_numbers = #tpu.dot_dimension_numbers<[1], [0], [0], [1], [0, 0, 1, 1], [], []>} : vector<8x128xf32>, vector<128x384xf32>, vector<8x384xf32> -> vector<8x384xf32>
    %77 = arith.index_cast %c2_i32 : i32 to index
    %c0_30 = arith.constant 0 : index
    %c0_31 = arith.constant 0 : index
    %78 = vector.load %arg10[%77, %c0_30, %c0_31] : memref<8x8x384xf32, #tpu.memory_space<vmem>>, vector<1x8x384xf32>
    %79 = vector.shape_cast %78 : vector<1x8x384xf32> to vector<8x384xf32>
    %80 = vector.extract_strided_slice %79 {offsets = [0, 0], sizes = [8, 128], strides = [1, 1]} : vector<8x384xf32> to vector<8x128xf32>
    %81 = vector.extract_strided_slice %76 {offsets = [0, 0], sizes = [8, 128], strides = [1, 1]} : vector<8x384xf32> to vector<8x128xf32>
    %82 = arith.addf %80, %81 : vector<8x128xf32>
    %83 = arith.negf %82 : vector<8x128xf32>
    %84 = math.exp %83 : vector<8x128xf32>
    %cst_32 = arith.constant 1.000000e+00 : f32
    %85 = vector.broadcast %cst_32 : f32 to vector<8x128xf32>
    %86 = arith.addf %85, %84 : vector<8x128xf32>
    %87 = arith.divf %85, %86 : vector<8x128xf32>
    %88 = vector.extract_strided_slice %79 {offsets = [0, 128], sizes = [8, 128], strides = [1, 1]} : vector<8x384xf32> to vector<8x128xf32>
    %89 = vector.extract_strided_slice %76 {offsets = [0, 128], sizes = [8, 128], strides = [1, 1]} : vector<8x384xf32> to vector<8x128xf32>
    %90 = arith.addf %88, %89 : vector<8x128xf32>
    %91 = arith.negf %90 : vector<8x128xf32>
    %92 = math.exp %91 : vector<8x128xf32>
    %cst_33 = arith.constant 1.000000e+00 : f32
    %93 = vector.broadcast %cst_33 : f32 to vector<8x128xf32>
    %94 = arith.addf %93, %92 : vector<8x128xf32>
    %95 = arith.divf %93, %94 : vector<8x128xf32>
    %96 = vector.extract_strided_slice %79 {offsets = [0, 256], sizes = [8, 128], strides = [1, 1]} : vector<8x384xf32> to vector<8x128xf32>
    %97 = vector.extract_strided_slice %76 {offsets = [0, 256], sizes = [8, 128], strides = [1, 1]} : vector<8x384xf32> to vector<8x128xf32>
    %98 = arith.mulf %87, %97 : vector<8x128xf32>
    %99 = arith.addf %96, %98 : vector<8x128xf32>
    %100 = math.tanh %99 : vector<8x128xf32>
    %101 = arith.subf %70, %100 : vector<8x128xf32>
    %102 = arith.mulf %95, %101 : vector<8x128xf32>
    %103 = arith.addf %100, %102 : vector<8x128xf32>
    %c0_i32_34 = arith.constant 0 : i32
    %104 = arith.addi %c0_i32_34, %c2_i32 : i32
    %105 = arith.index_cast %104 : i32 to index
    %c0_35 = arith.constant 0 : index
    %c0_36 = arith.constant 0 : index
    %106 = vector.load %arg11[%105, %c0_35, %c0_36] : memref<8x8x128xf32, #tpu.memory_space<vmem>>, vector<1x8x128xf32>
    %107 = vector.shape_cast %106 : vector<1x8x128xf32> to vector<8x128xf32>
    %108 = vector.shape_cast %103 : vector<8x128xf32> to vector<1x8x128xf32>
    tpu.vector_store %arg11[%105, %c0_35, %c0_36], %108 {strides = array<i32>} : memref<8x8x128xf32, #tpu.memory_space<vmem>>, vector<1x8x128xf32>,
    %c3_i32 = arith.constant 3 : i32
    %cst_37 = arith.constant dense<0.000000e+00> : vector<8x384xf32>
    %109 = tpu.matmul %103, %3, %cst_37 {dimension_numbers = #tpu.dot_dimension_numbers<[1], [0], [0], [1], [0, 0, 1, 1], [], []>} : vector<8x128xf32>, vector<128x384xf32>, vector<8x384xf32> -> vector<8x384xf32>
    %110 = arith.index_cast %c3_i32 : i32 to index
    %c0_38 = arith.constant 0 : index
    %c0_39 = arith.constant 0 : index
    %111 = vector.load %arg10[%110, %c0_38, %c0_39] : memref<8x8x384xf32, #tpu.memory_space<vmem>>, vector<1x8x384xf32>
    %112 = vector.shape_cast %111 : vector<1x8x384xf32> to vector<8x384xf32>
    %113 = vector.extract_strided_slice %112 {offsets = [0, 0], sizes = [8, 128], strides = [1, 1]} : vector<8x384xf32> to vector<8x128xf32>
    %114 = vector.extract_strided_slice %109 {offsets = [0, 0], sizes = [8, 128], strides = [1, 1]} : vector<8x384xf32> to vector<8x128xf32>
    %115 = arith.addf %113, %114 : vector<8x128xf32>
    %116 = arith.negf %115 : vector<8x128xf32>
    %117 = math.exp %116 : vector<8x128xf32>
    %cst_40 = arith.constant 1.000000e+00 : f32
    %118 = vector.broadcast %cst_40 : f32 to vector<8x128xf32>
    %119 = arith.addf %118, %117 : vector<8x128xf32>
    %120 = arith.divf %118, %119 : vector<8x128xf32>
    %121 = vector.extract_strided_slice %112 {offsets = [0, 128], sizes = [8, 128], strides = [1, 1]} : vector<8x384xf32> to vector<8x128xf32>
    %122 = vector.extract_strided_slice %109 {offsets = [0, 128], sizes = [8, 128], strides = [1, 1]} : vector<8x384xf32> to vector<8x128xf32>
    %123 = arith.addf %121, %122 : vector<8x128xf32>
    %124 = arith.negf %123 : vector<8x128xf32>
    %125 = math.exp %124 : vector<8x128xf32>
    %cst_41 = arith.constant 1.000000e+00 : f32
    %126 = vector.broadcast %cst_41 : f32 to vector<8x128xf32>
    %127 = arith.addf %126, %125 : vector<8x128xf32>
    %128 = arith.divf %126, %127 : vector<8x128xf32>
    %129 = vector.extract_strided_slice %112 {offsets = [0, 256], sizes = [8, 128], strides = [1, 1]} : vector<8x384xf32> to vector<8x128xf32>
    %130 = vector.extract_strided_slice %109 {offsets = [0, 256], sizes = [8, 128], strides = [1, 1]} : vector<8x384xf32> to vector<8x128xf32>
    %131 = arith.mulf %120, %130 : vector<8x128xf32>
    %132 = arith.addf %129, %131 : vector<8x128xf32>
    %133 = math.tanh %132 : vector<8x128xf32>
    %134 = arith.subf %103, %133 : vector<8x128xf32>
    %135 = arith.mulf %128, %134 : vector<8x128xf32>
    %136 = arith.addf %133, %135 : vector<8x128xf32>
    %c0_i32_42 = arith.constant 0 : i32
    %137 = arith.addi %c0_i32_42, %c3_i32 : i32
    %138 = arith.index_cast %137 : i32 to index
    %c0_43 = arith.constant 0 : index
    %c0_44 = arith.constant 0 : index
    %139 = vector.load %arg11[%138, %c0_43, %c0_44] : memref<8x8x128xf32, #tpu.memory_space<vmem>>, vector<1x8x128xf32>
    %140 = vector.shape_cast %139 : vector<1x8x128xf32> to vector<8x128xf32>
    %141 = vector.shape_cast %136 : vector<8x128xf32> to vector<1x8x128xf32>
    tpu.vector_store %arg11[%138, %c0_43, %c0_44], %141 {strides = array<i32>} : memref<8x8x128xf32, #tpu.memory_space<vmem>>, vector<1x8x128xf32>,
    %c4_i32 = arith.constant 4 : i32
    %cst_45 = arith.constant dense<0.000000e+00> : vector<8x384xf32>
    %142 = tpu.matmul %136, %3, %cst_45 {dimension_numbers = #tpu.dot_dimension_numbers<[1], [0], [0], [1], [0, 0, 1, 1], [], []>} : vector<8x128xf32>, vector<128x384xf32>, vector<8x384xf32> -> vector<8x384xf32>
    %143 = arith.index_cast %c4_i32 : i32 to index
    %c0_46 = arith.constant 0 : index
    %c0_47 = arith.constant 0 : index
    %144 = vector.load %arg10[%143, %c0_46, %c0_47] : memref<8x8x384xf32, #tpu.memory_space<vmem>>, vector<1x8x384xf32>
    %145 = vector.shape_cast %144 : vector<1x8x384xf32> to vector<8x384xf32>
    %146 = vector.extract_strided_slice %145 {offsets = [0, 0], sizes = [8, 128], strides = [1, 1]} : vector<8x384xf32> to vector<8x128xf32>
    %147 = vector.extract_strided_slice %142 {offsets = [0, 0], sizes = [8, 128], strides = [1, 1]} : vector<8x384xf32> to vector<8x128xf32>
    %148 = arith.addf %146, %147 : vector<8x128xf32>
    %149 = arith.negf %148 : vector<8x128xf32>
    %150 = math.exp %149 : vector<8x128xf32>
    %cst_48 = arith.constant 1.000000e+00 : f32
    %151 = vector.broadcast %cst_48 : f32 to vector<8x128xf32>
    %152 = arith.addf %151, %150 : vector<8x128xf32>
    %153 = arith.divf %151, %152 : vector<8x128xf32>
    %154 = vector.extract_strided_slice %145 {offsets = [0, 128], sizes = [8, 128], strides = [1, 1]} : vector<8x384xf32> to vector<8x128xf32>
    %155 = vector.extract_strided_slice %142 {offsets = [0, 128], sizes = [8, 128], strides = [1, 1]} : vector<8x384xf32> to vector<8x128xf32>
    %156 = arith.addf %154, %155 : vector<8x128xf32>
    %157 = arith.negf %156 : vector<8x128xf32>
    %158 = math.exp %157 : vector<8x128xf32>
    %cst_49 = arith.constant 1.000000e+00 : f32
    %159 = vector.broadcast %cst_49 : f32 to vector<8x128xf32>
    %160 = arith.addf %159, %158 : vector<8x128xf32>
    %161 = arith.divf %159, %160 : vector<8x128xf32>
    %162 = vector.extract_strided_slice %145 {offsets = [0, 256], sizes = [8, 128], strides = [1, 1]} : vector<8x384xf32> to vector<8x128xf32>
    %163 = vector.extract_strided_slice %142 {offsets = [0, 256], sizes = [8, 128], strides = [1, 1]} : vector<8x384xf32> to vector<8x128xf32>
    %164 = arith.mulf %153, %163 : vector<8x128xf32>
    %165 = arith.addf %162, %164 : vector<8x128xf32>
    %166 = math.tanh %165 : vector<8x128xf32>
    %167 = arith.subf %136, %166 : vector<8x128xf32>
    %168 = arith.mulf %161, %167 : vector<8x128xf32>
    %169 = arith.addf %166, %168 : vector<8x128xf32>
    %c0_i32_50 = arith.constant 0 : i32
    %170 = arith.addi %c0_i32_50, %c4_i32 : i32
    %171 = arith.index_cast %170 : i32 to index
    %c0_51 = arith.constant 0 : index
    %c0_52 = arith.constant 0 : index
    %172 = vector.load %arg11[%171, %c0_51, %c0_52] : memref<8x8x128xf32, #tpu.memory_space<vmem>>, vector<1x8x128xf32>
    %173 = vector.shape_cast %172 : vector<1x8x128xf32> to vector<8x128xf32>
    %174 = vector.shape_cast %169 : vector<8x128xf32> to vector<1x8x128xf32>
    tpu.vector_store %arg11[%171, %c0_51, %c0_52], %174 {strides = array<i32>} : memref<8x8x128xf32, #tpu.memory_space<vmem>>, vector<1x8x128xf32>,
    %c5_i32 = arith.constant 5 : i32
    %cst_53 = arith.constant dense<0.000000e+00> : vector<8x384xf32>
    %175 = tpu.matmul %169, %3, %cst_53 {dimension_numbers = #tpu.dot_dimension_numbers<[1], [0], [0], [1], [0, 0, 1, 1], [], []>} : vector<8x128xf32>, vector<128x384xf32>, vector<8x384xf32> -> vector<8x384xf32>
    %176 = arith.index_cast %c5_i32 : i32 to index
    %c0_54 = arith.constant 0 : index
    %c0_55 = arith.constant 0 : index
    %177 = vector.load %arg10[%176, %c0_54, %c0_55] : memref<8x8x384xf32, #tpu.memory_space<vmem>>, vector<1x8x384xf32>
    %178 = vector.shape_cast %177 : vector<1x8x384xf32> to vector<8x384xf32>
    %179 = vector.extract_strided_slice %178 {offsets = [0, 0], sizes = [8, 128], strides = [1, 1]} : vector<8x384xf32> to vector<8x128xf32>
    %180 = vector.extract_strided_slice %175 {offsets = [0, 0], sizes = [8, 128], strides = [1, 1]} : vector<8x384xf32> to vector<8x128xf32>
    %181 = arith.addf %179, %180 : vector<8x128xf32>
    %182 = arith.negf %181 : vector<8x128xf32>
    %183 = math.exp %182 : vector<8x128xf32>
    %cst_56 = arith.constant 1.000000e+00 : f32
    %184 = vector.broadcast %cst_56 : f32 to vector<8x128xf32>
    %185 = arith.addf %184, %183 : vector<8x128xf32>
    %186 = arith.divf %184, %185 : vector<8x128xf32>
    %187 = vector.extract_strided_slice %178 {offsets = [0, 128], sizes = [8, 128], strides = [1, 1]} : vector<8x384xf32> to vector<8x128xf32>
    %188 = vector.extract_strided_slice %175 {offsets = [0, 128], sizes = [8, 128], strides = [1, 1]} : vector<8x384xf32> to vector<8x128xf32>
    %189 = arith.addf %187, %188 : vector<8x128xf32>
    %190 = arith.negf %189 : vector<8x128xf32>
    %191 = math.exp %190 : vector<8x128xf32>
    %cst_57 = arith.constant 1.000000e+00 : f32
    %192 = vector.broadcast %cst_57 : f32 to vector<8x128xf32>
    %193 = arith.addf %192, %191 : vector<8x128xf32>
    %194 = arith.divf %192, %193 : vector<8x128xf32>
    %195 = vector.extract_strided_slice %178 {offsets = [0, 256], sizes = [8, 128], strides = [1, 1]} : vector<8x384xf32> to vector<8x128xf32>
    %196 = vector.extract_strided_slice %175 {offsets = [0, 256], sizes = [8, 128], strides = [1, 1]} : vector<8x384xf32> to vector<8x128xf32>
    %197 = arith.mulf %186, %196 : vector<8x128xf32>
    %198 = arith.addf %195, %197 : vector<8x128xf32>
    %199 = math.tanh %198 : vector<8x128xf32>
    %200 = arith.subf %169, %199 : vector<8x128xf32>
    %201 = arith.mulf %194, %200 : vector<8x128xf32>
    %202 = arith.addf %199, %201 : vector<8x128xf32>
    %c0_i32_58 = arith.constant 0 : i32
    %203 = arith.addi %c0_i32_58, %c5_i32 : i32
    %204 = arith.index_cast %203 : i32 to index
    %c0_59 = arith.constant 0 : index
    %c0_60 = arith.constant 0 : index
    %205 = vector.load %arg11[%204, %c0_59, %c0_60] : memref<8x8x128xf32, #tpu.memory_space<vmem>>, vector<1x8x128xf32>
    %206 = vector.shape_cast %205 : vector<1x8x128xf32> to vector<8x128xf32>
    %207 = vector.shape_cast %202 : vector<8x128xf32> to vector<1x8x128xf32>
    tpu.vector_store %arg11[%204, %c0_59, %c0_60], %207 {strides = array<i32>} : memref<8x8x128xf32, #tpu.memory_space<vmem>>, vector<1x8x128xf32>,
    %c6_i32 = arith.constant 6 : i32
    %cst_61 = arith.constant dense<0.000000e+00> : vector<8x384xf32>
    %208 = tpu.matmul %202, %3, %cst_61 {dimension_numbers = #tpu.dot_dimension_numbers<[1], [0], [0], [1], [0, 0, 1, 1], [], []>} : vector<8x128xf32>, vector<128x384xf32>, vector<8x384xf32> -> vector<8x384xf32>
    %209 = arith.index_cast %c6_i32 : i32 to index
    %c0_62 = arith.constant 0 : index
    %c0_63 = arith.constant 0 : index
    %210 = vector.load %arg10[%209, %c0_62, %c0_63] : memref<8x8x384xf32, #tpu.memory_space<vmem>>, vector<1x8x384xf32>
    %211 = vector.shape_cast %210 : vector<1x8x384xf32> to vector<8x384xf32>
    %212 = vector.extract_strided_slice %211 {offsets = [0, 0], sizes = [8, 128], strides = [1, 1]} : vector<8x384xf32> to vector<8x128xf32>
    %213 = vector.extract_strided_slice %208 {offsets = [0, 0], sizes = [8, 128], strides = [1, 1]} : vector<8x384xf32> to vector<8x128xf32>
    %214 = arith.addf %212, %213 : vector<8x128xf32>
    %215 = arith.negf %214 : vector<8x128xf32>
    %216 = math.exp %215 : vector<8x128xf32>
    %cst_64 = arith.constant 1.000000e+00 : f32
    %217 = vector.broadcast %cst_64 : f32 to vector<8x128xf32>
    %218 = arith.addf %217, %216 : vector<8x128xf32>
    %219 = arith.divf %217, %218 : vector<8x128xf32>
    %220 = vector.extract_strided_slice %211 {offsets = [0, 128], sizes = [8, 128], strides = [1, 1]} : vector<8x384xf32> to vector<8x128xf32>
    %221 = vector.extract_strided_slice %208 {offsets = [0, 128], sizes = [8, 128], strides = [1, 1]} : vector<8x384xf32> to vector<8x128xf32>
    %222 = arith.addf %220, %221 : vector<8x128xf32>
    %223 = arith.negf %222 : vector<8x128xf32>
    %224 = math.exp %223 : vector<8x128xf32>
    %cst_65 = arith.constant 1.000000e+00 : f32
    %225 = vector.broadcast %cst_65 : f32 to vector<8x128xf32>
    %226 = arith.addf %225, %224 : vector<8x128xf32>
    %227 = arith.divf %225, %226 : vector<8x128xf32>
    %228 = vector.extract_strided_slice %211 {offsets = [0, 256], sizes = [8, 128], strides = [1, 1]} : vector<8x384xf32> to vector<8x128xf32>
    %229 = vector.extract_strided_slice %208 {offsets = [0, 256], sizes = [8, 128], strides = [1, 1]} : vector<8x384xf32> to vector<8x128xf32>
    %230 = arith.mulf %219, %229 : vector<8x128xf32>
    %231 = arith.addf %228, %230 : vector<8x128xf32>
    %232 = math.tanh %231 : vector<8x128xf32>
    %233 = arith.subf %202, %232 : vector<8x128xf32>
    %234 = arith.mulf %227, %233 : vector<8x128xf32>
    %235 = arith.addf %232, %234 : vector<8x128xf32>
    %c0_i32_66 = arith.constant 0 : i32
    %236 = arith.addi %c0_i32_66, %c6_i32 : i32
    %237 = arith.index_cast %236 : i32 to index
    %c0_67 = arith.constant 0 : index
    %c0_68 = arith.constant 0 : index
    %238 = vector.load %arg11[%237, %c0_67, %c0_68] : memref<8x8x128xf32, #tpu.memory_space<vmem>>, vector<1x8x128xf32>
    %239 = vector.shape_cast %238 : vector<1x8x128xf32> to vector<8x128xf32>
    %240 = vector.shape_cast %235 : vector<8x128xf32> to vector<1x8x128xf32>
    tpu.vector_store %arg11[%237, %c0_67, %c0_68], %240 {strides = array<i32>} : memref<8x8x128xf32, #tpu.memory_space<vmem>>, vector<1x8x128xf32>,
    %c7_i32 = arith.constant 7 : i32
    %cst_69 = arith.constant dense<0.000000e+00> : vector<8x384xf32>
    %241 = tpu.matmul %235, %3, %cst_69 {dimension_numbers = #tpu.dot_dimension_numbers<[1], [0], [0], [1], [0, 0, 1, 1], [], []>} : vector<8x128xf32>, vector<128x384xf32>, vector<8x384xf32> -> vector<8x384xf32>
    %242 = arith.index_cast %c7_i32 : i32 to index
    %c0_70 = arith.constant 0 : index
    %c0_71 = arith.constant 0 : index
    %243 = vector.load %arg10[%242, %c0_70, %c0_71] : memref<8x8x384xf32, #tpu.memory_space<vmem>>, vector<1x8x384xf32>
    %244 = vector.shape_cast %243 : vector<1x8x384xf32> to vector<8x384xf32>
    %245 = vector.extract_strided_slice %244 {offsets = [0, 0], sizes = [8, 128], strides = [1, 1]} : vector<8x384xf32> to vector<8x128xf32>
    %246 = vector.extract_strided_slice %241 {offsets = [0, 0], sizes = [8, 128], strides = [1, 1]} : vector<8x384xf32> to vector<8x128xf32>
    %247 = arith.addf %245, %246 : vector<8x128xf32>
    %248 = arith.negf %247 : vector<8x128xf32>
    %249 = math.exp %248 : vector<8x128xf32>
    %cst_72 = arith.constant 1.000000e+00 : f32
    %250 = vector.broadcast %cst_72 : f32 to vector<8x128xf32>
    %251 = arith.addf %250, %249 : vector<8x128xf32>
    %252 = arith.divf %250, %251 : vector<8x128xf32>
    %253 = vector.extract_strided_slice %244 {offsets = [0, 128], sizes = [8, 128], strides = [1, 1]} : vector<8x384xf32> to vector<8x128xf32>
    %254 = vector.extract_strided_slice %241 {offsets = [0, 128], sizes = [8, 128], strides = [1, 1]} : vector<8x384xf32> to vector<8x128xf32>
    %255 = arith.addf %253, %254 : vector<8x128xf32>
    %256 = arith.negf %255 : vector<8x128xf32>
    %257 = math.exp %256 : vector<8x128xf32>
    %cst_73 = arith.constant 1.000000e+00 : f32
    %258 = vector.broadcast %cst_73 : f32 to vector<8x128xf32>
    %259 = arith.addf %258, %257 : vector<8x128xf32>
    %260 = arith.divf %258, %259 : vector<8x128xf32>
    %261 = vector.extract_strided_slice %244 {offsets = [0, 256], sizes = [8, 128], strides = [1, 1]} : vector<8x384xf32> to vector<8x128xf32>
    %262 = vector.extract_strided_slice %241 {offsets = [0, 256], sizes = [8, 128], strides = [1, 1]} : vector<8x384xf32> to vector<8x128xf32>
    %263 = arith.mulf %252, %262 : vector<8x128xf32>
    %264 = arith.addf %261, %263 : vector<8x128xf32>
    %265 = math.tanh %264 : vector<8x128xf32>
    %266 = arith.subf %235, %265 : vector<8x128xf32>
    %267 = arith.mulf %260, %266 : vector<8x128xf32>
    %268 = arith.addf %265, %267 : vector<8x128xf32>
    %c0_i32_74 = arith.constant 0 : i32
    %269 = arith.addi %c0_i32_74, %c7_i32 : i32
    %270 = arith.index_cast %269 : i32 to index
    %c0_75 = arith.constant 0 : index
    %c0_76 = arith.constant 0 : index
    %271 = vector.load %arg11[%270, %c0_75, %c0_76] : memref<8x8x128xf32, #tpu.memory_space<vmem>>, vector<1x8x128xf32>
    %272 = vector.shape_cast %271 : vector<1x8x128xf32> to vector<8x128xf32>
    %273 = vector.shape_cast %268 : vector<8x128xf32> to vector<1x8x128xf32>
    tpu.vector_store %arg11[%270, %c0_75, %c0_76], %273 {strides = array<i32>} : memref<8x8x128xf32, #tpu.memory_space<vmem>>, vector<1x8x128xf32>,
    %c8_i32 = arith.constant 8 : i32
    %c0_77 = arith.constant 0 : index
    %c0_78 = arith.constant 0 : index
    %274 = vector.load %arg5[%c0_77, %c0_78] : memref<128x384xf32, #tpu.memory_space<vmem>>, vector<128x384xf32>
    %c0_79 = arith.constant 0 : index
    %c0_80 = arith.constant 0 : index
    %275 = vector.load %arg6[%c0_79, %c0_80] : memref<128x384xf32, #tpu.memory_space<vmem>>, vector<128x384xf32>
    %cst_81 = arith.constant 0.000000e+00 : f32
    %276 = vector.broadcast %cst_81 : f32 to vector<8x128xf32>
    %c0_82 = arith.constant 0 : index
    %c0_83 = arith.constant 0 : index
    %c0_84 = arith.constant 0 : index
    %277 = vector.load %arg11[%c0_82, %c0_83, %c0_84] : memref<8x8x128xf32, #tpu.memory_space<vmem>>, vector<8x8x128xf32>
    %278 = vector.shape_cast %277 : vector<8x8x128xf32> to vector<64x128xf32>
    %cst_85 = arith.constant dense<0.000000e+00> : vector<64x384xf32>
    %279 = tpu.matmul %278, %274, %cst_85 {dimension_numbers = #tpu.dot_dimension_numbers<[1], [0], [0], [1], [0, 0, 1, 1], [], []>} : vector<64x128xf32>, vector<128x384xf32>, vector<64x384xf32> -> vector<64x384xf32>
    %280 = vector.shape_cast %279 : vector<64x384xf32> to vector<8x8x384xf32>
    %c0_86 = arith.constant 0 : index
    %c0_87 = arith.constant 0 : index
    %c0_88 = arith.constant 0 : index
    %281 = vector.load %arg10[%c0_86, %c0_87, %c0_88] : memref<8x8x384xf32, #tpu.memory_space<vmem>>, vector<8x8x384xf32>
    tpu.vector_store %arg10[%c0_86, %c0_87, %c0_88], %280 {strides = array<i32>} : memref<8x8x384xf32, #tpu.memory_space<vmem>>, vector<8x8x384xf32>,
    %c0_i32_89 = arith.constant 0 : i32
    %cst_90 = arith.constant dense<0.000000e+00> : vector<8x384xf32>
    %282 = tpu.matmul %276, %275, %cst_90 {dimension_numbers = #tpu.dot_dimension_numbers<[1], [0], [0], [1], [0, 0, 1, 1], [], []>} : vector<8x128xf32>, vector<128x384xf32>, vector<8x384xf32> -> vector<8x384xf32>
    %283 = arith.index_cast %c0_i32_89 : i32 to index
    %c0_91 = arith.constant 0 : index
    %c0_92 = arith.constant 0 : index
    %284 = vector.load %arg10[%283, %c0_91, %c0_92] : memref<8x8x384xf32, #tpu.memory_space<vmem>>, vector<1x8x384xf32>
    %285 = vector.shape_cast %284 : vector<1x8x384xf32> to vector<8x384xf32>
    %286 = vector.extract_strided_slice %285 {offsets = [0, 0], sizes = [8, 128], strides = [1, 1]} : vector<8x384xf32> to vector<8x128xf32>
    %287 = vector.extract_strided_slice %282 {offsets = [0, 0], sizes = [8, 128], strides = [1, 1]} : vector<8x384xf32> to vector<8x128xf32>
    %288 = arith.addf %286, %287 : vector<8x128xf32>
    %289 = arith.negf %288 : vector<8x128xf32>
    %290 = math.exp %289 : vector<8x128xf32>
    %cst_93 = arith.constant 1.000000e+00 : f32
    %291 = vector.broadcast %cst_93 : f32 to vector<8x128xf32>
    %292 = arith.addf %291, %290 : vector<8x128xf32>
    %293 = arith.divf %291, %292 : vector<8x128xf32>
    %294 = vector.extract_strided_slice %285 {offsets = [0, 128], sizes = [8, 128], strides = [1, 1]} : vector<8x384xf32> to vector<8x128xf32>
    %295 = vector.extract_strided_slice %282 {offsets = [0, 128], sizes = [8, 128], strides = [1, 1]} : vector<8x384xf32> to vector<8x128xf32>
    %296 = arith.addf %294, %295 : vector<8x128xf32>
    %297 = arith.negf %296 : vector<8x128xf32>
    %298 = math.exp %297 : vector<8x128xf32>
    %cst_94 = arith.constant 1.000000e+00 : f32
    %299 = vector.broadcast %cst_94 : f32 to vector<8x128xf32>
    %300 = arith.addf %299, %298 : vector<8x128xf32>
    %301 = arith.divf %299, %300 : vector<8x128xf32>
    %302 = vector.extract_strided_slice %285 {offsets = [0, 256], sizes = [8, 128], strides = [1, 1]} : vector<8x384xf32> to vector<8x128xf32>
    %303 = vector.extract_strided_slice %282 {offsets = [0, 256], sizes = [8, 128], strides = [1, 1]} : vector<8x384xf32> to vector<8x128xf32>
    %304 = arith.mulf %293, %303 : vector<8x128xf32>
    %305 = arith.addf %302, %304 : vector<8x128xf32>
    %306 = math.tanh %305 : vector<8x128xf32>
    %307 = arith.subf %276, %306 : vector<8x128xf32>
    %308 = arith.mulf %301, %307 : vector<8x128xf32>
    %309 = arith.addf %306, %308 : vector<8x128xf32>
    %c0_i32_95 = arith.constant 0 : i32
    %310 = arith.addi %c0_i32_95, %c0_i32_89 : i32
    %311 = vector.broadcast %310 : i32 to vector<8x1xi32>
    %312 = arith.cmpi eq, %0, %311 : vector<8x1xi32>
    %313 = vector.shape_cast %312 : vector<8x1xi1> to vector<8x1xi1>
    %314 = vector.broadcast %313 : vector<8x1xi1> to vector<8x128xi1>
    %315 = arith.select %314, %309, %1 : vector<8x128xi1>, vector<8x128xf32>
    %c1_i32_96 = arith.constant 1 : i32
    %cst_97 = arith.constant dense<0.000000e+00> : vector<8x384xf32>
    %316 = tpu.matmul %309, %275, %cst_97 {dimension_numbers = #tpu.dot_dimension_numbers<[1], [0], [0], [1], [0, 0, 1, 1], [], []>} : vector<8x128xf32>, vector<128x384xf32>, vector<8x384xf32> -> vector<8x384xf32>
    %317 = arith.index_cast %c1_i32_96 : i32 to index
    %c0_98 = arith.constant 0 : index
    %c0_99 = arith.constant 0 : index
    %318 = vector.load %arg10[%317, %c0_98, %c0_99] : memref<8x8x384xf32, #tpu.memory_space<vmem>>, vector<1x8x384xf32>
    %319 = vector.shape_cast %318 : vector<1x8x384xf32> to vector<8x384xf32>
    %320 = vector.extract_strided_slice %319 {offsets = [0, 0], sizes = [8, 128], strides = [1, 1]} : vector<8x384xf32> to vector<8x128xf32>
    %321 = vector.extract_strided_slice %316 {offsets = [0, 0], sizes = [8, 128], strides = [1, 1]} : vector<8x384xf32> to vector<8x128xf32>
    %322 = arith.addf %320, %321 : vector<8x128xf32>
    %323 = arith.negf %322 : vector<8x128xf32>
    %324 = math.exp %323 : vector<8x128xf32>
    %cst_100 = arith.constant 1.000000e+00 : f32
    %325 = vector.broadcast %cst_100 : f32 to vector<8x128xf32>
    %326 = arith.addf %325, %324 : vector<8x128xf32>
    %327 = arith.divf %325, %326 : vector<8x128xf32>
    %328 = vector.extract_strided_slice %319 {offsets = [0, 128], sizes = [8, 128], strides = [1, 1]} : vector<8x384xf32> to vector<8x128xf32>
    %329 = vector.extract_strided_slice %316 {offsets = [0, 128], sizes = [8, 128], strides = [1, 1]} : vector<8x384xf32> to vector<8x128xf32>
    %330 = arith.addf %328, %329 : vector<8x128xf32>
    %331 = arith.negf %330 : vector<8x128xf32>
    %332 = math.exp %331 : vector<8x128xf32>
    %cst_101 = arith.constant 1.000000e+00 : f32
    %333 = vector.broadcast %cst_101 : f32 to vector<8x128xf32>
    %334 = arith.addf %333, %332 : vector<8x128xf32>
    %335 = arith.divf %333, %334 : vector<8x128xf32>
    %336 = vector.extract_strided_slice %319 {offsets = [0, 256], sizes = [8, 128], strides = [1, 1]} : vector<8x384xf32> to vector<8x128xf32>
    %337 = vector.extract_strided_slice %316 {offsets = [0, 256], sizes = [8, 128], strides = [1, 1]} : vector<8x384xf32> to vector<8x128xf32>
    %338 = arith.mulf %327, %337 : vector<8x128xf32>
    %339 = arith.addf %336, %338 : vector<8x128xf32>
    %340 = math.tanh %339 : vector<8x128xf32>
    %341 = arith.subf %309, %340 : vector<8x128xf32>
    %342 = arith.mulf %335, %341 : vector<8x128xf32>
    %343 = arith.addf %340, %342 : vector<8x128xf32>
    %c0_i32_102 = arith.constant 0 : i32
    %344 = arith.addi %c0_i32_102, %c1_i32_96 : i32
    %345 = vector.broadcast %344 : i32 to vector<8x1xi32>
    %346 = arith.cmpi eq, %0, %345 : vector<8x1xi32>
    %347 = vector.shape_cast %346 : vector<8x1xi1> to vector<8x1xi1>
    %348 = vector.broadcast %347 : vector<8x1xi1> to vector<8x128xi1>
    %349 = arith.select %348, %343, %315 : vector<8x128xi1>, vector<8x128xf32>
    %c2_i32_103 = arith.constant 2 : i32
    %cst_104 = arith.constant dense<0.000000e+00> : vector<8x384xf32>
    %350 = tpu.matmul %343, %275, %cst_104 {dimension_numbers = #tpu.dot_dimension_numbers<[1], [0], [0], [1], [0, 0, 1, 1], [], []>} : vector<8x128xf32>, vector<128x384xf32>, vector<8x384xf32> -> vector<8x384xf32>
    %351 = arith.index_cast %c2_i32_103 : i32 to index
    %c0_105 = arith.constant 0 : index
    %c0_106 = arith.constant 0 : index
    %352 = vector.load %arg10[%351, %c0_105, %c0_106] : memref<8x8x384xf32, #tpu.memory_space<vmem>>, vector<1x8x384xf32>
    %353 = vector.shape_cast %352 : vector<1x8x384xf32> to vector<8x384xf32>
    %354 = vector.extract_strided_slice %353 {offsets = [0, 0], sizes = [8, 128], strides = [1, 1]} : vector<8x384xf32> to vector<8x128xf32>
    %355 = vector.extract_strided_slice %350 {offsets = [0, 0], sizes = [8, 128], strides = [1, 1]} : vector<8x384xf32> to vector<8x128xf32>
    %356 = arith.addf %354, %355 : vector<8x128xf32>
    %357 = arith.negf %356 : vector<8x128xf32>
    %358 = math.exp %357 : vector<8x128xf32>
    %cst_107 = arith.constant 1.000000e+00 : f32
    %359 = vector.broadcast %cst_107 : f32 to vector<8x128xf32>
    %360 = arith.addf %359, %358 : vector<8x128xf32>
    %361 = arith.divf %359, %360 : vector<8x128xf32>
    %362 = vector.extract_strided_slice %353 {offsets = [0, 128], sizes = [8, 128], strides = [1, 1]} : vector<8x384xf32> to vector<8x128xf32>
    %363 = vector.extract_strided_slice %350 {offsets = [0, 128], sizes = [8, 128], strides = [1, 1]} : vector<8x384xf32> to vector<8x128xf32>
    %364 = arith.addf %362, %363 : vector<8x128xf32>
    %365 = arith.negf %364 : vector<8x128xf32>
    %366 = math.exp %365 : vector<8x128xf32>
    %cst_108 = arith.constant 1.000000e+00 : f32
    %367 = vector.broadcast %cst_108 : f32 to vector<8x128xf32>
    %368 = arith.addf %367, %366 : vector<8x128xf32>
    %369 = arith.divf %367, %368 : vector<8x128xf32>
    %370 = vector.extract_strided_slice %353 {offsets = [0, 256], sizes = [8, 128], strides = [1, 1]} : vector<8x384xf32> to vector<8x128xf32>
    %371 = vector.extract_strided_slice %350 {offsets = [0, 256], sizes = [8, 128], strides = [1, 1]} : vector<8x384xf32> to vector<8x128xf32>
    %372 = arith.mulf %361, %371 : vector<8x128xf32>
    %373 = arith.addf %370, %372 : vector<8x128xf32>
    %374 = math.tanh %373 : vector<8x128xf32>
    %375 = arith.subf %343, %374 : vector<8x128xf32>
    %376 = arith.mulf %369, %375 : vector<8x128xf32>
    %377 = arith.addf %374, %376 : vector<8x128xf32>
    %c0_i32_109 = arith.constant 0 : i32
    %378 = arith.addi %c0_i32_109, %c2_i32_103 : i32
    %379 = vector.broadcast %378 : i32 to vector<8x1xi32>
    %380 = arith.cmpi eq, %0, %379 : vector<8x1xi32>
    %381 = vector.shape_cast %380 : vector<8x1xi1> to vector<8x1xi1>
    %382 = vector.broadcast %381 : vector<8x1xi1> to vector<8x128xi1>
    %383 = arith.select %382, %377, %349 : vector<8x128xi1>, vector<8x128xf32>
    %c3_i32_110 = arith.constant 3 : i32
    %cst_111 = arith.constant dense<0.000000e+00> : vector<8x384xf32>
    %384 = tpu.matmul %377, %275, %cst_111 {dimension_numbers = #tpu.dot_dimension_numbers<[1], [0], [0], [1], [0, 0, 1, 1], [], []>} : vector<8x128xf32>, vector<128x384xf32>, vector<8x384xf32> -> vector<8x384xf32>
    %385 = arith.index_cast %c3_i32_110 : i32 to index
    %c0_112 = arith.constant 0 : index
    %c0_113 = arith.constant 0 : index
    %386 = vector.load %arg10[%385, %c0_112, %c0_113] : memref<8x8x384xf32, #tpu.memory_space<vmem>>, vector<1x8x384xf32>
    %387 = vector.shape_cast %386 : vector<1x8x384xf32> to vector<8x384xf32>
    %388 = vector.extract_strided_slice %387 {offsets = [0, 0], sizes = [8, 128], strides = [1, 1]} : vector<8x384xf32> to vector<8x128xf32>
    %389 = vector.extract_strided_slice %384 {offsets = [0, 0], sizes = [8, 128], strides = [1, 1]} : vector<8x384xf32> to vector<8x128xf32>
    %390 = arith.addf %388, %389 : vector<8x128xf32>
    %391 = arith.negf %390 : vector<8x128xf32>
    %392 = math.exp %391 : vector<8x128xf32>
    %cst_114 = arith.constant 1.000000e+00 : f32
    %393 = vector.broadcast %cst_114 : f32 to vector<8x128xf32>
    %394 = arith.addf %393, %392 : vector<8x128xf32>
    %395 = arith.divf %393, %394 : vector<8x128xf32>
    %396 = vector.extract_strided_slice %387 {offsets = [0, 128], sizes = [8, 128], strides = [1, 1]} : vector<8x384xf32> to vector<8x128xf32>
    %397 = vector.extract_strided_slice %384 {offsets = [0, 128], sizes = [8, 128], strides = [1, 1]} : vector<8x384xf32> to vector<8x128xf32>
    %398 = arith.addf %396, %397 : vector<8x128xf32>
    %399 = arith.negf %398 : vector<8x128xf32>
    %400 = math.exp %399 : vector<8x128xf32>
    %cst_115 = arith.constant 1.000000e+00 : f32
    %401 = vector.broadcast %cst_115 : f32 to vector<8x128xf32>
    %402 = arith.addf %401, %400 : vector<8x128xf32>
    %403 = arith.divf %401, %402 : vector<8x128xf32>
    %404 = vector.extract_strided_slice %387 {offsets = [0, 256], sizes = [8, 128], strides = [1, 1]} : vector<8x384xf32> to vector<8x128xf32>
    %405 = vector.extract_strided_slice %384 {offsets = [0, 256], sizes = [8, 128], strides = [1, 1]} : vector<8x384xf32> to vector<8x128xf32>
    %406 = arith.mulf %395, %405 : vector<8x128xf32>
    %407 = arith.addf %404, %406 : vector<8x128xf32>
    %408 = math.tanh %407 : vector<8x128xf32>
    %409 = arith.subf %377, %408 : vector<8x128xf32>
    %410 = arith.mulf %403, %409 : vector<8x128xf32>
    %411 = arith.addf %408, %410 : vector<8x128xf32>
    %c0_i32_116 = arith.constant 0 : i32
    %412 = arith.addi %c0_i32_116, %c3_i32_110 : i32
    %413 = vector.broadcast %412 : i32 to vector<8x1xi32>
    %414 = arith.cmpi eq, %0, %413 : vector<8x1xi32>
    %415 = vector.shape_cast %414 : vector<8x1xi1> to vector<8x1xi1>
    %416 = vector.broadcast %415 : vector<8x1xi1> to vector<8x128xi1>
    %417 = arith.select %416, %411, %383 : vector<8x128xi1>, vector<8x128xf32>
    %c4_i32_117 = arith.constant 4 : i32
    %cst_118 = arith.constant dense<0.000000e+00> : vector<8x384xf32>
    %418 = tpu.matmul %411, %275, %cst_118 {dimension_numbers = #tpu.dot_dimension_numbers<[1], [0], [0], [1], [0, 0, 1, 1], [], []>} : vector<8x128xf32>, vector<128x384xf32>, vector<8x384xf32> -> vector<8x384xf32>
    %419 = arith.index_cast %c4_i32_117 : i32 to index
    %c0_119 = arith.constant 0 : index
    %c0_120 = arith.constant 0 : index
    %420 = vector.load %arg10[%419, %c0_119, %c0_120] : memref<8x8x384xf32, #tpu.memory_space<vmem>>, vector<1x8x384xf32>
    %421 = vector.shape_cast %420 : vector<1x8x384xf32> to vector<8x384xf32>
    %422 = vector.extract_strided_slice %421 {offsets = [0, 0], sizes = [8, 128], strides = [1, 1]} : vector<8x384xf32> to vector<8x128xf32>
    %423 = vector.extract_strided_slice %418 {offsets = [0, 0], sizes = [8, 128], strides = [1, 1]} : vector<8x384xf32> to vector<8x128xf32>
    %424 = arith.addf %422, %423 : vector<8x128xf32>
    %425 = arith.negf %424 : vector<8x128xf32>
    %426 = math.exp %425 : vector<8x128xf32>
    %cst_121 = arith.constant 1.000000e+00 : f32
    %427 = vector.broadcast %cst_121 : f32 to vector<8x128xf32>
    %428 = arith.addf %427, %426 : vector<8x128xf32>
    %429 = arith.divf %427, %428 : vector<8x128xf32>
    %430 = vector.extract_strided_slice %421 {offsets = [0, 128], sizes = [8, 128], strides = [1, 1]} : vector<8x384xf32> to vector<8x128xf32>
    %431 = vector.extract_strided_slice %418 {offsets = [0, 128], sizes = [8, 128], strides = [1, 1]} : vector<8x384xf32> to vector<8x128xf32>
    %432 = arith.addf %430, %431 : vector<8x128xf32>
    %433 = arith.negf %432 : vector<8x128xf32>
    %434 = math.exp %433 : vector<8x128xf32>
    %cst_122 = arith.constant 1.000000e+00 : f32
    %435 = vector.broadcast %cst_122 : f32 to vector<8x128xf32>
    %436 = arith.addf %435, %434 : vector<8x128xf32>
    %437 = arith.divf %435, %436 : vector<8x128xf32>
    %438 = vector.extract_strided_slice %421 {offsets = [0, 256], sizes = [8, 128], strides = [1, 1]} : vector<8x384xf32> to vector<8x128xf32>
    %439 = vector.extract_strided_slice %418 {offsets = [0, 256], sizes = [8, 128], strides = [1, 1]} : vector<8x384xf32> to vector<8x128xf32>
    %440 = arith.mulf %429, %439 : vector<8x128xf32>
    %441 = arith.addf %438, %440 : vector<8x128xf32>
    %442 = math.tanh %441 : vector<8x128xf32>
    %443 = arith.subf %411, %442 : vector<8x128xf32>
    %444 = arith.mulf %437, %443 : vector<8x128xf32>
    %445 = arith.addf %442, %444 : vector<8x128xf32>
    %c0_i32_123 = arith.constant 0 : i32
    %446 = arith.addi %c0_i32_123, %c4_i32_117 : i32
    %447 = vector.broadcast %446 : i32 to vector<8x1xi32>
    %448 = arith.cmpi eq, %0, %447 : vector<8x1xi32>
    %449 = vector.shape_cast %448 : vector<8x1xi1> to vector<8x1xi1>
    %450 = vector.broadcast %449 : vector<8x1xi1> to vector<8x128xi1>
    %451 = arith.select %450, %445, %417 : vector<8x128xi1>, vector<8x128xf32>
    %c5_i32_124 = arith.constant 5 : i32
    %cst_125 = arith.constant dense<0.000000e+00> : vector<8x384xf32>
    %452 = tpu.matmul %445, %275, %cst_125 {dimension_numbers = #tpu.dot_dimension_numbers<[1], [0], [0], [1], [0, 0, 1, 1], [], []>} : vector<8x128xf32>, vector<128x384xf32>, vector<8x384xf32> -> vector<8x384xf32>
    %453 = arith.index_cast %c5_i32_124 : i32 to index
    %c0_126 = arith.constant 0 : index
    %c0_127 = arith.constant 0 : index
    %454 = vector.load %arg10[%453, %c0_126, %c0_127] : memref<8x8x384xf32, #tpu.memory_space<vmem>>, vector<1x8x384xf32>
    %455 = vector.shape_cast %454 : vector<1x8x384xf32> to vector<8x384xf32>
    %456 = vector.extract_strided_slice %455 {offsets = [0, 0], sizes = [8, 128], strides = [1, 1]} : vector<8x384xf32> to vector<8x128xf32>
    %457 = vector.extract_strided_slice %452 {offsets = [0, 0], sizes = [8, 128], strides = [1, 1]} : vector<8x384xf32> to vector<8x128xf32>
    %458 = arith.addf %456, %457 : vector<8x128xf32>
    %459 = arith.negf %458 : vector<8x128xf32>
    %460 = math.exp %459 : vector<8x128xf32>
    %cst_128 = arith.constant 1.000000e+00 : f32
    %461 = vector.broadcast %cst_128 : f32 to vector<8x128xf32>
    %462 = arith.addf %461, %460 : vector<8x128xf32>
    %463 = arith.divf %461, %462 : vector<8x128xf32>
    %464 = vector.extract_strided_slice %455 {offsets = [0, 128], sizes = [8, 128], strides = [1, 1]} : vector<8x384xf32> to vector<8x128xf32>
    %465 = vector.extract_strided_slice %452 {offsets = [0, 128], sizes = [8, 128], strides = [1, 1]} : vector<8x384xf32> to vector<8x128xf32>
    %466 = arith.addf %464, %465 : vector<8x128xf32>
    %467 = arith.negf %466 : vector<8x128xf32>
    %468 = math.exp %467 : vector<8x128xf32>
    %cst_129 = arith.constant 1.000000e+00 : f32
    %469 = vector.broadcast %cst_129 : f32 to vector<8x128xf32>
    %470 = arith.addf %469, %468 : vector<8x128xf32>
    %471 = arith.divf %469, %470 : vector<8x128xf32>
    %472 = vector.extract_strided_slice %455 {offsets = [0, 256], sizes = [8, 128], strides = [1, 1]} : vector<8x384xf32> to vector<8x128xf32>
    %473 = vector.extract_strided_slice %452 {offsets = [0, 256], sizes = [8, 128], strides = [1, 1]} : vector<8x384xf32> to vector<8x128xf32>
    %474 = arith.mulf %463, %473 : vector<8x128xf32>
    %475 = arith.addf %472, %474 : vector<8x128xf32>
    %476 = math.tanh %475 : vector<8x128xf32>
    %477 = arith.subf %445, %476 : vector<8x128xf32>
    %478 = arith.mulf %471, %477 : vector<8x128xf32>
    %479 = arith.addf %476, %478 : vector<8x128xf32>
    %c0_i32_130 = arith.constant 0 : i32
    %480 = arith.addi %c0_i32_130, %c5_i32_124 : i32
    %481 = vector.broadcast %480 : i32 to vector<8x1xi32>
    %482 = arith.cmpi eq, %0, %481 : vector<8x1xi32>
    %483 = vector.shape_cast %482 : vector<8x1xi1> to vector<8x1xi1>
    %484 = vector.broadcast %483 : vector<8x1xi1> to vector<8x128xi1>
    %485 = arith.select %484, %479, %451 : vector<8x128xi1>, vector<8x128xf32>
    %c6_i32_131 = arith.constant 6 : i32
    %cst_132 = arith.constant dense<0.000000e+00> : vector<8x384xf32>
    %486 = tpu.matmul %479, %275, %cst_132 {dimension_numbers = #tpu.dot_dimension_numbers<[1], [0], [0], [1], [0, 0, 1, 1], [], []>} : vector<8x128xf32>, vector<128x384xf32>, vector<8x384xf32> -> vector<8x384xf32>
    %487 = arith.index_cast %c6_i32_131 : i32 to index
    %c0_133 = arith.constant 0 : index
    %c0_134 = arith.constant 0 : index
    %488 = vector.load %arg10[%487, %c0_133, %c0_134] : memref<8x8x384xf32, #tpu.memory_space<vmem>>, vector<1x8x384xf32>
    %489 = vector.shape_cast %488 : vector<1x8x384xf32> to vector<8x384xf32>
    %490 = vector.extract_strided_slice %489 {offsets = [0, 0], sizes = [8, 128], strides = [1, 1]} : vector<8x384xf32> to vector<8x128xf32>
    %491 = vector.extract_strided_slice %486 {offsets = [0, 0], sizes = [8, 128], strides = [1, 1]} : vector<8x384xf32> to vector<8x128xf32>
    %492 = arith.addf %490, %491 : vector<8x128xf32>
    %493 = arith.negf %492 : vector<8x128xf32>
    %494 = math.exp %493 : vector<8x128xf32>
    %cst_135 = arith.constant 1.000000e+00 : f32
    %495 = vector.broadcast %cst_135 : f32 to vector<8x128xf32>
    %496 = arith.addf %495, %494 : vector<8x128xf32>
    %497 = arith.divf %495, %496 : vector<8x128xf32>
    %498 = vector.extract_strided_slice %489 {offsets = [0, 128], sizes = [8, 128], strides = [1, 1]} : vector<8x384xf32> to vector<8x128xf32>
    %499 = vector.extract_strided_slice %486 {offsets = [0, 128], sizes = [8, 128], strides = [1, 1]} : vector<8x384xf32> to vector<8x128xf32>
    %500 = arith.addf %498, %499 : vector<8x128xf32>
    %501 = arith.negf %500 : vector<8x128xf32>
    %502 = math.exp %501 : vector<8x128xf32>
    %cst_136 = arith.constant 1.000000e+00 : f32
    %503 = vector.broadcast %cst_136 : f32 to vector<8x128xf32>
    %504 = arith.addf %503, %502 : vector<8x128xf32>
    %505 = arith.divf %503, %504 : vector<8x128xf32>
    %506 = vector.extract_strided_slice %489 {offsets = [0, 256], sizes = [8, 128], strides = [1, 1]} : vector<8x384xf32> to vector<8x128xf32>
    %507 = vector.extract_strided_slice %486 {offsets = [0, 256], sizes = [8, 128], strides = [1, 1]} : vector<8x384xf32> to vector<8x128xf32>
    %508 = arith.mulf %497, %507 : vector<8x128xf32>
    %509 = arith.addf %506, %508 : vector<8x128xf32>
    %510 = math.tanh %509 : vector<8x128xf32>
    %511 = arith.subf %479, %510 : vector<8x128xf32>
    %512 = arith.mulf %505, %511 : vector<8x128xf32>
    %513 = arith.addf %510, %512 : vector<8x128xf32>
    %c0_i32_137 = arith.constant 0 : i32
    %514 = arith.addi %c0_i32_137, %c6_i32_131 : i32
    %515 = vector.broadcast %514 : i32 to vector<8x1xi32>
    %516 = arith.cmpi eq, %0, %515 : vector<8x1xi32>
    %517 = vector.shape_cast %516 : vector<8x1xi1> to vector<8x1xi1>
    %518 = vector.broadcast %517 : vector<8x1xi1> to vector<8x128xi1>
    %519 = arith.select %518, %513, %485 : vector<8x128xi1>, vector<8x128xf32>
    %c7_i32_138 = arith.constant 7 : i32
    %cst_139 = arith.constant dense<0.000000e+00> : vector<8x384xf32>
    %520 = tpu.matmul %513, %275, %cst_139 {dimension_numbers = #tpu.dot_dimension_numbers<[1], [0], [0], [1], [0, 0, 1, 1], [], []>} : vector<8x128xf32>, vector<128x384xf32>, vector<8x384xf32> -> vector<8x384xf32>
    %521 = arith.index_cast %c7_i32_138 : i32 to index
    %c0_140 = arith.constant 0 : index
    %c0_141 = arith.constant 0 : index
    %522 = vector.load %arg10[%521, %c0_140, %c0_141] : memref<8x8x384xf32, #tpu.memory_space<vmem>>, vector<1x8x384xf32>
    %523 = vector.shape_cast %522 : vector<1x8x384xf32> to vector<8x384xf32>
    %524 = vector.extract_strided_slice %523 {offsets = [0, 0], sizes = [8, 128], strides = [1, 1]} : vector<8x384xf32> to vector<8x128xf32>
    %525 = vector.extract_strided_slice %520 {offsets = [0, 0], sizes = [8, 128], strides = [1, 1]} : vector<8x384xf32> to vector<8x128xf32>
    %526 = arith.addf %524, %525 : vector<8x128xf32>
    %527 = arith.negf %526 : vector<8x128xf32>
    %528 = math.exp %527 : vector<8x128xf32>
    %cst_142 = arith.constant 1.000000e+00 : f32
    %529 = vector.broadcast %cst_142 : f32 to vector<8x128xf32>
    %530 = arith.addf %529, %528 : vector<8x128xf32>
    %531 = arith.divf %529, %530 : vector<8x128xf32>
    %532 = vector.extract_strided_slice %523 {offsets = [0, 128], sizes = [8, 128], strides = [1, 1]} : vector<8x384xf32> to vector<8x128xf32>
    %533 = vector.extract_strided_slice %520 {offsets = [0, 128], sizes = [8, 128], strides = [1, 1]} : vector<8x384xf32> to vector<8x128xf32>
    %534 = arith.addf %532, %533 : vector<8x128xf32>
    %535 = arith.negf %534 : vector<8x128xf32>
    %536 = math.exp %535 : vector<8x128xf32>
    %cst_143 = arith.constant 1.000000e+00 : f32
    %537 = vector.broadcast %cst_143 : f32 to vector<8x128xf32>
    %538 = arith.addf %537, %536 : vector<8x128xf32>
    %539 = arith.divf %537, %538 : vector<8x128xf32>
    %540 = vector.extract_strided_slice %523 {offsets = [0, 256], sizes = [8, 128], strides = [1, 1]} : vector<8x384xf32> to vector<8x128xf32>
    %541 = vector.extract_strided_slice %520 {offsets = [0, 256], sizes = [8, 128], strides = [1, 1]} : vector<8x384xf32> to vector<8x128xf32>
    %542 = arith.mulf %531, %541 : vector<8x128xf32>
    %543 = arith.addf %540, %542 : vector<8x128xf32>
    %544 = math.tanh %543 : vector<8x128xf32>
    %545 = arith.subf %513, %544 : vector<8x128xf32>
    %546 = arith.mulf %539, %545 : vector<8x128xf32>
    %547 = arith.addf %544, %546 : vector<8x128xf32>
    %c0_i32_144 = arith.constant 0 : i32
    %548 = arith.addi %c0_i32_144, %c7_i32_138 : i32
    %549 = vector.broadcast %548 : i32 to vector<8x1xi32>
    %550 = arith.cmpi eq, %0, %549 : vector<8x1xi32>
    %551 = vector.shape_cast %550 : vector<8x1xi1> to vector<8x1xi1>
    %552 = vector.broadcast %551 : vector<8x1xi1> to vector<8x128xi1>
    %553 = arith.select %552, %547, %519 : vector<8x128xi1>, vector<8x128xf32>
    %c8_i32_145 = arith.constant 8 : i32
    %c0_146 = arith.constant 0 : index
    %c0_147 = arith.constant 0 : index
    %554 = vector.load %arg7[%c0_146, %c0_147] : memref<128x128xf32, #tpu.memory_space<vmem>>, vector<128x128xf32>
    %cst_148 = arith.constant dense<0.000000e+00> : vector<8x128xf32>
    %555 = tpu.matmul %553, %554, %cst_148 {dimension_numbers = #tpu.dot_dimension_numbers<[1], [0], [0], [1], [0, 0, 1, 1], [], []>} : vector<8x128xf32>, vector<128x128xf32>, vector<8x128xf32> -> vector<8x128xf32>
    %c0_149 = arith.constant 0 : index
    %c0_150 = arith.constant 0 : index
    %556 = vector.load %arg8[%c0_149, %c0_150] : memref<1x128xf32, #tpu.memory_space<vmem>>, vector<1x128xf32>
    %557 = vector.broadcast %556 : vector<1x128xf32> to vector<8x128xf32>
    %558 = arith.addf %555, %557 : vector<8x128xf32>
    %c0_151 = arith.constant 0 : index
    %c0_152 = arith.constant 0 : index
    %559 = vector.load %arg9[%c0_151, %c0_152] : memref<8x128xf32, #tpu.memory_space<vmem>>, vector<8x128xf32>
    tpu.vector_store %arg9[%c0_151, %c0_152], %558 {strides = array<i32>} : memref<8x128xf32, #tpu.memory_space<vmem>>, vector<8x128xf32>,
    return
  }
  func.func @transform_0(%arg0: i32) -> (i32, i32, i32) {
    %c0_i32 = arith.constant 0 : i32
    %c0_i32_0 = arith.constant 0 : i32
    %c0_i32_1 = arith.constant 0 : i32
    return %c0_i32, %arg0, %c0_i32_0 : i32, i32, i32
  }
  func.func @transform_1(%arg0: i32) -> (i32, i32) {
    %c0_i32 = arith.constant 0 : i32
    %c0_i32_0 = arith.constant 0 : i32
    return %arg0, %c0_i32 : i32, i32
  }
  func.func @transform_2(%arg0: i32) -> (i32, i32) {
    %c0_i32 = arith.constant 0 : i32
    %c0_i32_0 = arith.constant 0 : i32
    %c0_i32_1 = arith.constant 0 : i32
    return %c0_i32, %c0_i32_0 : i32, i32
  }
  func.func @transform_3(%arg0: i32) -> (i32, i32) {
    %c0_i32 = arith.constant 0 : i32
    %c0_i32_0 = arith.constant 0 : i32
    %c0_i32_1 = arith.constant 0 : i32
    return %c0_i32, %c0_i32_0 : i32, i32
  }
  func.func @transform_4(%arg0: i32) -> (i32, i32) {
    %c0_i32 = arith.constant 0 : i32
    %c0_i32_0 = arith.constant 0 : i32
    %c0_i32_1 = arith.constant 0 : i32
    return %c0_i32, %c0_i32_0 : i32, i32
  }
  func.func @transform_5(%arg0: i32) -> (i32, i32) {
    %c0_i32 = arith.constant 0 : i32
    %c0_i32_0 = arith.constant 0 : i32
    %c0_i32_1 = arith.constant 0 : i32
    return %c0_i32, %c0_i32_0 : i32, i32
  }
  func.func @transform_6(%arg0: i32) -> (i32, i32) {
    %c0_i32 = arith.constant 0 : i32
    %c0_i32_0 = arith.constant 0 : i32
    %c0_i32_1 = arith.constant 0 : i32
    return %c0_i32, %c0_i32_0 : i32, i32
  }
  func.func @transform_7(%arg0: i32) -> (i32, i32) {
    %c0_i32 = arith.constant 0 : i32
    %c0_i32_0 = arith.constant 0 : i32
    %c0_i32_1 = arith.constant 0 : i32
    return %c0_i32, %c0_i32_0 : i32, i32
  }
  func.func @transform_8(%arg0: i32) -> (i32, i32) {
    %c0_i32 = arith.constant 0 : i32
    %c0_i32_0 = arith.constant 0 : i32
    return %arg0, %c0_i32 : i32, i32
  }
}

module attributes {stable_mosaic.version = 11 : i64} {
  func.func @kernel(%arg0: i32, %arg1: memref<8x8x128xf32, #tpu.memory_space<vmem>>, %arg2: memref<8x1xi32, #tpu.memory_space<vmem>>, %arg3: memref<128x384xf32, #tpu.memory_space<vmem>>, %arg4: memref<128x384xf32, #tpu.memory_space<vmem>>, %arg5: memref<128x384xf32, #tpu.memory_space<vmem>>, %arg6: memref<128x384xf32, #tpu.memory_space<vmem>>, %arg7: memref<128x128xf32, #tpu.memory_space<vmem>>, %arg8: memref<1x128xf32, #tpu.memory_space<vmem>>, %arg9: memref<8x128xf32, #tpu.memory_space<vmem>>, %arg10: memref<8x8x384xf32, #tpu.memory_space<vmem>>, %arg11: memref<8x8x128xf32, #tpu.memory_space<vmem>>) attributes {dimension_semantics = [#tpu.dimension_semantics<parallel>], iteration_bounds = array<i64: 1>, scalar_prefetch = 0 : i64, scratch_operands = 2 : i64, tpu.core_type = #tpu.core_type<tc>, window_params = [{transform_indices = @transform_0, window_bounds = array<i64: 8, 8, 128>}, {transform_indices = @transform_1, window_bounds = array<i64: 8, 1>}, {pipeline_mode = #tpu.pipeline_mode<synchronous>, transform_indices = @transform_2, window_bounds = array<i64: 128, 384>}, {pipeline_mode = #tpu.pipeline_mode<synchronous>, transform_indices = @transform_3, window_bounds = array<i64: 128, 384>}, {pipeline_mode = #tpu.pipeline_mode<synchronous>, transform_indices = @transform_4, window_bounds = array<i64: 128, 384>}, {pipeline_mode = #tpu.pipeline_mode<synchronous>, transform_indices = @transform_5, window_bounds = array<i64: 128, 384>}, {pipeline_mode = #tpu.pipeline_mode<synchronous>, transform_indices = @transform_6, window_bounds = array<i64: 128, 128>}, {pipeline_mode = #tpu.pipeline_mode<synchronous>, transform_indices = @transform_7, window_bounds = array<i64: 1, 128>}, {transform_indices = @transform_8, window_bounds = array<i64: 8, 128>}]} {
    %c0 = arith.constant 0 : index
    %c0_0 = arith.constant 0 : index
    %0 = vector.load %arg2[%c0, %c0_0] : memref<8x1xi32, #tpu.memory_space<vmem>>, vector<8x1xi32>
    %cst = arith.constant 0.000000e+00 : f32
    %1 = vector.broadcast %cst : f32 to vector<8x128xf32>
    %c0_1 = arith.constant 0 : index
    %c0_2 = arith.constant 0 : index
    %2 = vector.load %arg3[%c0_1, %c0_2] : memref<128x384xf32, #tpu.memory_space<vmem>>, vector<128x384xf32>
    %c0_3 = arith.constant 0 : index
    %c0_4 = arith.constant 0 : index
    %3 = vector.load %arg4[%c0_3, %c0_4] : memref<128x384xf32, #tpu.memory_space<vmem>>, vector<128x384xf32>
    %cst_5 = arith.constant 0.000000e+00 : f32
    %4 = vector.broadcast %cst_5 : f32 to vector<8x128xf32>
    %c0_6 = arith.constant 0 : index
    %c0_7 = arith.constant 0 : index
    %c0_8 = arith.constant 0 : index
    %5 = vector.load %arg1[%c0_6, %c0_7, %c0_8] : memref<8x8x128xf32, #tpu.memory_space<vmem>>, vector<8x8x128xf32>
    %6 = vector.shape_cast %5 : vector<8x8x128xf32> to vector<64x128xf32>
    %cst_9 = arith.constant dense<0.000000e+00> : vector<64x384xf32>
    %7 = tpu.matmul %6, %2, %cst_9 {dimension_numbers = #tpu.dot_dimension_numbers<[1], [0], [0], [1], [0, 0, 1, 1], [], []>} : vector<64x128xf32>, vector<128x384xf32>, vector<64x384xf32> -> vector<64x384xf32>
    %8 = vector.shape_cast %7 : vector<64x384xf32> to vector<8x8x384xf32>
    %c0_10 = arith.constant 0 : index
    %c0_11 = arith.constant 0 : index
    %c0_12 = arith.constant 0 : index
    %9 = vector.load %arg10[%c0_10, %c0_11, %c0_12] : memref<8x8x384xf32, #tpu.memory_space<vmem>>, vector<8x8x384xf32>
    tpu.vector_store %arg10[%c0_10, %c0_11, %c0_12], %8 {strides = array<i32>} : memref<8x8x384xf32, #tpu.memory_space<vmem>>, vector<8x8x384xf32>,
    %c0_i32 = arith.constant 0 : i32
    %cst_13 = arith.constant dense<0.000000e+00> : vector<8x384xf32>
    %10 = tpu.matmul %4, %3, %cst_13 {dimension_numbers = #tpu.dot_dimension_numbers<[1], [0], [0], [1], [0, 0, 1, 1], [], []>} : vector<8x128xf32>, vector<128x384xf32>, vector<8x384xf32> -> vector<8x384xf32>
    %11 = arith.index_cast %c0_i32 : i32 to index
    %c0_14 = arith.constant 0 : index
    %c0_15 = arith.constant 0 : index
    %12 = vector.load %arg10[%11, %c0_14, %c0_15] : memref<8x8x384xf32, #tpu.memory_space<vmem>>, vector<1x8x384xf32>
    %13 = vector.shape_cast %12 : vector<1x8x384xf32> to vector<8x384xf32>
    %14 = vector.extract_strided_slice %13 {offsets = [0, 0], sizes = [8, 128], strides = [1, 1]} : vector<8x384xf32> to vector<8x128xf32>
    %15 = vector.extract_strided_slice %10 {offsets = [0, 0], sizes = [8, 128], strides = [1, 1]} : vector<8x384xf32> to vector<8x128xf32>
    %16 = arith.addf %14, %15 : vector<8x128xf32>
    %17 = arith.negf %16 : vector<8x128xf32>
    %18 = math.exp %17 : vector<8x128xf32>
    %cst_16 = arith.constant 1.000000e+00 : f32
    %19 = vector.broadcast %cst_16 : f32 to vector<8x128xf32>
    %20 = arith.addf %19, %18 : vector<8x128xf32>
    %21 = arith.divf %19, %20 : vector<8x128xf32>
    %22 = vector.extract_strided_slice %13 {offsets = [0, 128], sizes = [8, 128], strides = [1, 1]} : vector<8x384xf32> to vector<8x128xf32>
    %23 = vector.extract_strided_slice %10 {offsets = [0, 128], sizes = [8, 128], strides = [1, 1]} : vector<8x384xf32> to vector<8x128xf32>
    %24 = arith.addf %22, %23 : vector<8x128xf32>
    %25 = arith.negf %24 : vector<8x128xf32>
    %26 = math.exp %25 : vector<8x128xf32>
    %cst_17 = arith.constant 1.000000e+00 : f32
    %27 = vector.broadcast %cst_17 : f32 to vector<8x128xf32>
    %28 = arith.addf %27, %26 : vector<8x128xf32>
    %29 = arith.divf %27, %28 : vector<8x128xf32>
    %30 = vector.extract_strided_slice %13 {offsets = [0, 256], sizes = [8, 128], strides = [1, 1]} : vector<8x384xf32> to vector<8x128xf32>
    %31 = vector.extract_strided_slice %10 {offsets = [0, 256], sizes = [8, 128], strides = [1, 1]} : vector<8x384xf32> to vector<8x128xf32>
    %32 = arith.mulf %21, %31 : vector<8x128xf32>
    %33 = arith.addf %30, %32 : vector<8x128xf32>
    %34 = math.tanh %33 : vector<8x128xf32>
    %35 = arith.subf %4, %34 : vector<8x128xf32>
    %36 = arith.mulf %29, %35 : vector<8x128xf32>
    %37 = arith.addf %34, %36 : vector<8x128xf32>
    %c0_i32_18 = arith.constant 0 : i32
    %38 = arith.addi %c0_i32_18, %c0_i32 : i32
    %39 = arith.index_cast %38 : i32 to index
    %c0_19 = arith.constant 0 : index
    %c0_20 = arith.constant 0 : index
    %40 = vector.load %arg11[%39, %c0_19, %c0_20] : memref<8x8x128xf32, #tpu.memory_space<vmem>>, vector<1x8x128xf32>
    %41 = vector.shape_cast %40 : vector<1x8x128xf32> to vector<8x128xf32>
    %42 = vector.shape_cast %37 : vector<8x128xf32> to vector<1x8x128xf32>
    tpu.vector_store %arg11[%39, %c0_19, %c0_20], %42 {strides = array<i32>} : memref<8x8x128xf32, #tpu.memory_space<vmem>>, vector<1x8x128xf32>,
    %c1_i32 = arith.constant 1 : i32
    %cst_21 = arith.constant dense<0.000000e+00> : vector<8x384xf32>
    %43 = tpu.matmul %37, %3, %cst_21 {dimension_numbers = #tpu.dot_dimension_numbers<[1], [0], [0], [1], [0, 0, 1, 1], [], []>} : vector<8x128xf32>, vector<128x384xf32>, vector<8x384xf32> -> vector<8x384xf32>
    %44 = arith.index_cast %c1_i32 : i32 to index
    %c0_22 = arith.constant 0 : index
    %c0_23 = arith.constant 0 : index
    %45 = vector.load %arg10[%44, %c0_22, %c0_23] : memref<8x8x384xf32, #tpu.memory_space<vmem>>, vector<1x8x384xf32>
    %46 = vector.shape_cast %45 : vector<1x8x384xf32> to vector<8x384xf32>
    %47 = vector.extract_strided_slice %46 {offsets = [0, 0], sizes = [8, 128], strides = [1, 1]} : vector<8x384xf32> to vector<8x128xf32>
    %48 = vector.extract_strided_slice %43 {offsets = [0, 0], sizes = [8, 128], strides = [1, 1]} : vector<8x384xf32> to vector<8x128xf32>
    %49 = arith.addf %47, %48 : vector<8x128xf32>
    %50 = arith.negf %49 : vector<8x128xf32>
    %51 = math.exp %50 : vector<8x128xf32>
    %cst_24 = arith.constant 1.000000e+00 : f32
    %52 = vector.broadcast %cst_24 : f32 to vector<8x128xf32>
    %53 = arith.addf %52, %51 : vector<8x128xf32>
    %54 = arith.divf %52, %53 : vector<8x128xf32>
    %55 = vector.extract_strided_slice %46 {offsets = [0, 128], sizes = [8, 128], strides = [1, 1]} : vector<8x384xf32> to vector<8x128xf32>
    %56 = vector.extract_strided_slice %43 {offsets = [0, 128], sizes = [8, 128], strides = [1, 1]} : vector<8x384xf32> to vector<8x128xf32>
    %57 = arith.addf %55, %56 : vector<8x128xf32>
    %58 = arith.negf %57 : vector<8x128xf32>
    %59 = math.exp %58 : vector<8x128xf32>
    %cst_25 = arith.constant 1.000000e+00 : f32
    %60 = vector.broadcast %cst_25 : f32 to vector<8x128xf32>
    %61 = arith.addf %60, %59 : vector<8x128xf32>
    %62 = arith.divf %60, %61 : vector<8x128xf32>
    %63 = vector.extract_strided_slice %46 {offsets = [0, 256], sizes = [8, 128], strides = [1, 1]} : vector<8x384xf32> to vector<8x128xf32>
    %64 = vector.extract_strided_slice %43 {offsets = [0, 256], sizes = [8, 128], strides = [1, 1]} : vector<8x384xf32> to vector<8x128xf32>
    %65 = arith.mulf %54, %64 : vector<8x128xf32>
    %66 = arith.addf %63, %65 : vector<8x128xf32>
    %67 = math.tanh %66 : vector<8x128xf32>
    %68 = arith.subf %37, %67 : vector<8x128xf32>
    %69 = arith.mulf %62, %68 : vector<8x128xf32>
    %70 = arith.addf %67, %69 : vector<8x128xf32>
    %c0_i32_26 = arith.constant 0 : i32
    %71 = arith.addi %c0_i32_26, %c1_i32 : i32
    %72 = arith.index_cast %71 : i32 to index
    %c0_27 = arith.constant 0 : index
    %c0_28 = arith.constant 0 : index
    %73 = vector.load %arg11[%72, %c0_27, %c0_28] : memref<8x8x128xf32, #tpu.memory_space<vmem>>, vector<1x8x128xf32>
    %74 = vector.shape_cast %73 : vector<1x8x128xf32> to vector<8x128xf32>
    %75 = vector.shape_cast %70 : vector<8x128xf32> to vector<1x8x128xf32>
    tpu.vector_store %arg11[%72, %c0_27, %c0_28], %75 {strides = array<i32>} : memref<8x8x128xf32, #tpu.memory_space<vmem>>, vector<1x8x128xf32>,
    %c2_i32 = arith.constant 2 : i32
    %cst_29 = arith.constant dense<0.000000e+00> : vector<8x384xf32>
    %76 = tpu.matmul %70, %3, %cst_29 {dimension_numbers = #tpu.dot_dimension_numbers<[1], [0], [0], [1], [0, 0, 1, 1], [], []>} : vector<8x128xf32>, vector<128x384xf32>, vector<8x384xf32> -> vector<8x384xf32>
    %77 = arith.index_cast %c2_i32 : i32 to index
    %c0_30 = arith.constant 0 : index
    %c0_31 = arith.constant 0 : index
    %78 = vector.load %arg10[%77, %c0_30, %c0_31] : memref<8x8x384xf32, #tpu.memory_space<vmem>>, vector<1x8x384xf32>
    %79 = vector.shape_cast %78 : vector<1x8x384xf32> to vector<8x384xf32>
    %80 = vector.extract_strided_slice %79 {offsets = [0, 0], sizes = [8, 128], strides = [1, 1]} : vector<8x384xf32> to vector<8x128xf32>
    %81 = vector.extract_strided_slice %76 {offsets = [0, 0], sizes = [8, 128], strides = [1, 1]} : vector<8x384xf32> to vector<8x128xf32>
    %82 = arith.addf %80, %81 : vector<8x128xf32>
    %83 = arith.negf %82 : vector<8x128xf32>
    %84 = math.exp %83 : vector<8x128xf32>
    %cst_32 = arith.constant 1.000000e+00 : f32
    %85 = vector.broadcast %cst_32 : f32 to vector<8x128xf32>
    %86 = arith.addf %85, %84 : vector<8x128xf32>
    %87 = arith.divf %85, %86 : vector<8x128xf32>
    %88 = vector.extract_strided_slice %79 {offsets = [0, 128], sizes = [8, 128], strides = [1, 1]} : vector<8x384xf32> to vector<8x128xf32>
    %89 = vector.extract_strided_slice %76 {offsets = [0, 128], sizes = [8, 128], strides = [1, 1]} : vector<8x384xf32> to vector<8x128xf32>
    %90 = arith.addf %88, %89 : vector<8x128xf32>
    %91 = arith.negf %90 : vector<8x128xf32>
    %92 = math.exp %91 : vector<8x128xf32>
    %cst_33 = arith.constant 1.000000e+00 : f32
    %93 = vector.broadcast %cst_33 : f32 to vector<8x128xf32>
    %94 = arith.addf %93, %92 : vector<8x128xf32>
    %95 = arith.divf %93, %94 : vector<8x128xf32>
    %96 = vector.extract_strided_slice %79 {offsets = [0, 256], sizes = [8, 128], strides = [1, 1]} : vector<8x384xf32> to vector<8x128xf32>
    %97 = vector.extract_strided_slice %76 {offsets = [0, 256], sizes = [8, 128], strides = [1, 1]} : vector<8x384xf32> to vector<8x128xf32>
    %98 = arith.mulf %87, %97 : vector<8x128xf32>
    %99 = arith.addf %96, %98 : vector<8x128xf32>
    %100 = math.tanh %99 : vector<8x128xf32>
    %101 = arith.subf %70, %100 : vector<8x128xf32>
    %102 = arith.mulf %95, %101 : vector<8x128xf32>
    %103 = arith.addf %100, %102 : vector<8x128xf32>
    %c0_i32_34 = arith.constant 0 : i32
    %104 = arith.addi %c0_i32_34, %c2_i32 : i32
    %105 = arith.index_cast %104 : i32 to index
    %c0_35 = arith.constant 0 : index
    %c0_36 = arith.constant 0 : index
    %106 = vector.load %arg11[%105, %c0_35, %c0_36] : memref<8x8x128xf32, #tpu.memory_space<vmem>>, vector<1x8x128xf32>
    %107 = vector.shape_cast %106 : vector<1x8x128xf32> to vector<8x128xf32>
    %108 = vector.shape_cast %103 : vector<8x128xf32> to vector<1x8x128xf32>
    tpu.vector_store %arg11[%105, %c0_35, %c0_36], %108 {strides = array<i32>} : memref<8x8x128xf32, #tpu.memory_space<vmem>>, vector<1x8x128xf32>,
    %c3_i32 = arith.constant 3 : i32
    %cst_37 = arith.constant dense<0.000000e+00> : vector<8x384xf32>
    %109 = tpu.matmul %103, %3, %cst_37 {dimension_numbers = #tpu.dot_dimension_numbers<[1], [0], [0], [1], [0, 0, 1, 1], [], []>} : vector<8x128xf32>, vector<128x384xf32>, vector<8x384xf32> -> vector<8x384xf32>
    %110 = arith.index_cast %c3_i32 : i32 to index
    %c0_38 = arith.constant 0 : index
    %c0_39 = arith.constant 0 : index
    %111 = vector.load %arg10[%110, %c0_38, %c0_39] : memref<8x8x384xf32, #tpu.memory_space<vmem>>, vector<1x8x384xf32>
    %112 = vector.shape_cast %111 : vector<1x8x384xf32> to vector<8x384xf32>
    %113 = vector.extract_strided_slice %112 {offsets = [0, 0], sizes = [8, 128], strides = [1, 1]} : vector<8x384xf32> to vector<8x128xf32>
    %114 = vector.extract_strided_slice %109 {offsets = [0, 0], sizes = [8, 128], strides = [1, 1]} : vector<8x384xf32> to vector<8x128xf32>
    %115 = arith.addf %113, %114 : vector<8x128xf32>
    %116 = arith.negf %115 : vector<8x128xf32>
    %117 = math.exp %116 : vector<8x128xf32>
    %cst_40 = arith.constant 1.000000e+00 : f32
    %118 = vector.broadcast %cst_40 : f32 to vector<8x128xf32>
    %119 = arith.addf %118, %117 : vector<8x128xf32>
    %120 = arith.divf %118, %119 : vector<8x128xf32>
    %121 = vector.extract_strided_slice %112 {offsets = [0, 128], sizes = [8, 128], strides = [1, 1]} : vector<8x384xf32> to vector<8x128xf32>
    %122 = vector.extract_strided_slice %109 {offsets = [0, 128], sizes = [8, 128], strides = [1, 1]} : vector<8x384xf32> to vector<8x128xf32>
    %123 = arith.addf %121, %122 : vector<8x128xf32>
    %124 = arith.negf %123 : vector<8x128xf32>
    %125 = math.exp %124 : vector<8x128xf32>
    %cst_41 = arith.constant 1.000000e+00 : f32
    %126 = vector.broadcast %cst_41 : f32 to vector<8x128xf32>
    %127 = arith.addf %126, %125 : vector<8x128xf32>
    %128 = arith.divf %126, %127 : vector<8x128xf32>
    %129 = vector.extract_strided_slice %112 {offsets = [0, 256], sizes = [8, 128], strides = [1, 1]} : vector<8x384xf32> to vector<8x128xf32>
    %130 = vector.extract_strided_slice %109 {offsets = [0, 256], sizes = [8, 128], strides = [1, 1]} : vector<8x384xf32> to vector<8x128xf32>
    %131 = arith.mulf %120, %130 : vector<8x128xf32>
    %132 = arith.addf %129, %131 : vector<8x128xf32>
    %133 = math.tanh %132 : vector<8x128xf32>
    %134 = arith.subf %103, %133 : vector<8x128xf32>
    %135 = arith.mulf %128, %134 : vector<8x128xf32>
    %136 = arith.addf %133, %135 : vector<8x128xf32>
    %c0_i32_42 = arith.constant 0 : i32
    %137 = arith.addi %c0_i32_42, %c3_i32 : i32
    %138 = arith.index_cast %137 : i32 to index
    %c0_43 = arith.constant 0 : index
    %c0_44 = arith.constant 0 : index
    %139 = vector.load %arg11[%138, %c0_43, %c0_44] : memref<8x8x128xf32, #tpu.memory_space<vmem>>, vector<1x8x128xf32>
    %140 = vector.shape_cast %139 : vector<1x8x128xf32> to vector<8x128xf32>
    %141 = vector.shape_cast %136 : vector<8x128xf32> to vector<1x8x128xf32>
    tpu.vector_store %arg11[%138, %c0_43, %c0_44], %141 {strides = array<i32>} : memref<8x8x128xf32, #tpu.memory_space<vmem>>, vector<1x8x128xf32>,
    %c4_i32 = arith.constant 4 : i32
    %cst_45 = arith.constant dense<0.000000e+00> : vector<8x384xf32>
    %142 = tpu.matmul %136, %3, %cst_45 {dimension_numbers = #tpu.dot_dimension_numbers<[1], [0], [0], [1], [0, 0, 1, 1], [], []>} : vector<8x128xf32>, vector<128x384xf32>, vector<8x384xf32> -> vector<8x384xf32>
    %143 = arith.index_cast %c4_i32 : i32 to index
    %c0_46 = arith.constant 0 : index
    %c0_47 = arith.constant 0 : index
    %144 = vector.load %arg10[%143, %c0_46, %c0_47] : memref<8x8x384xf32, #tpu.memory_space<vmem>>, vector<1x8x384xf32>
    %145 = vector.shape_cast %144 : vector<1x8x384xf32> to vector<8x384xf32>
    %146 = vector.extract_strided_slice %145 {offsets = [0, 0], sizes = [8, 128], strides = [1, 1]} : vector<8x384xf32> to vector<8x128xf32>
    %147 = vector.extract_strided_slice %142 {offsets = [0, 0], sizes = [8, 128], strides = [1, 1]} : vector<8x384xf32> to vector<8x128xf32>
    %148 = arith.addf %146, %147 : vector<8x128xf32>
    %149 = arith.negf %148 : vector<8x128xf32>
    %150 = math.exp %149 : vector<8x128xf32>
    %cst_48 = arith.constant 1.000000e+00 : f32
    %151 = vector.broadcast %cst_48 : f32 to vector<8x128xf32>
    %152 = arith.addf %151, %150 : vector<8x128xf32>
    %153 = arith.divf %151, %152 : vector<8x128xf32>
    %154 = vector.extract_strided_slice %145 {offsets = [0, 128], sizes = [8, 128], strides = [1, 1]} : vector<8x384xf32> to vector<8x128xf32>
    %155 = vector.extract_strided_slice %142 {offsets = [0, 128], sizes = [8, 128], strides = [1, 1]} : vector<8x384xf32> to vector<8x128xf32>
    %156 = arith.addf %154, %155 : vector<8x128xf32>
    %157 = arith.negf %156 : vector<8x128xf32>
    %158 = math.exp %157 : vector<8x128xf32>
    %cst_49 = arith.constant 1.000000e+00 : f32
    %159 = vector.broadcast %cst_49 : f32 to vector<8x128xf32>
    %160 = arith.addf %159, %158 : vector<8x128xf32>
    %161 = arith.divf %159, %160 : vector<8x128xf32>
    %162 = vector.extract_strided_slice %145 {offsets = [0, 256], sizes = [8, 128], strides = [1, 1]} : vector<8x384xf32> to vector<8x128xf32>
    %163 = vector.extract_strided_slice %142 {offsets = [0, 256], sizes = [8, 128], strides = [1, 1]} : vector<8x384xf32> to vector<8x128xf32>
    %164 = arith.mulf %153, %163 : vector<8x128xf32>
    %165 = arith.addf %162, %164 : vector<8x128xf32>
    %166 = math.tanh %165 : vector<8x128xf32>
    %167 = arith.subf %136, %166 : vector<8x128xf32>
    %168 = arith.mulf %161, %167 : vector<8x128xf32>
    %169 = arith.addf %166, %168 : vector<8x128xf32>
    %c0_i32_50 = arith.constant 0 : i32
    %170 = arith.addi %c0_i32_50, %c4_i32 : i32
    %171 = arith.index_cast %170 : i32 to index
    %c0_51 = arith.constant 0 : index
    %c0_52 = arith.constant 0 : index
    %172 = vector.load %arg11[%171, %c0_51, %c0_52] : memref<8x8x128xf32, #tpu.memory_space<vmem>>, vector<1x8x128xf32>
    %173 = vector.shape_cast %172 : vector<1x8x128xf32> to vector<8x128xf32>
    %174 = vector.shape_cast %169 : vector<8x128xf32> to vector<1x8x128xf32>
    tpu.vector_store %arg11[%171, %c0_51, %c0_52], %174 {strides = array<i32>} : memref<8x8x128xf32, #tpu.memory_space<vmem>>, vector<1x8x128xf32>,
    %c5_i32 = arith.constant 5 : i32
    %cst_53 = arith.constant dense<0.000000e+00> : vector<8x384xf32>
    %175 = tpu.matmul %169, %3, %cst_53 {dimension_numbers = #tpu.dot_dimension_numbers<[1], [0], [0], [1], [0, 0, 1, 1], [], []>} : vector<8x128xf32>, vector<128x384xf32>, vector<8x384xf32> -> vector<8x384xf32>
    %176 = arith.index_cast %c5_i32 : i32 to index
    %c0_54 = arith.constant 0 : index
    %c0_55 = arith.constant 0 : index
    %177 = vector.load %arg10[%176, %c0_54, %c0_55] : memref<8x8x384xf32, #tpu.memory_space<vmem>>, vector<1x8x384xf32>
    %178 = vector.shape_cast %177 : vector<1x8x384xf32> to vector<8x384xf32>
    %179 = vector.extract_strided_slice %178 {offsets = [0, 0], sizes = [8, 128], strides = [1, 1]} : vector<8x384xf32> to vector<8x128xf32>
    %180 = vector.extract_strided_slice %175 {offsets = [0, 0], sizes = [8, 128], strides = [1, 1]} : vector<8x384xf32> to vector<8x128xf32>
    %181 = arith.addf %179, %180 : vector<8x128xf32>
    %182 = arith.negf %181 : vector<8x128xf32>
    %183 = math.exp %182 : vector<8x128xf32>
    %cst_56 = arith.constant 1.000000e+00 : f32
    %184 = vector.broadcast %cst_56 : f32 to vector<8x128xf32>
    %185 = arith.addf %184, %183 : vector<8x128xf32>
    %186 = arith.divf %184, %185 : vector<8x128xf32>
    %187 = vector.extract_strided_slice %178 {offsets = [0, 128], sizes = [8, 128], strides = [1, 1]} : vector<8x384xf32> to vector<8x128xf32>
    %188 = vector.extract_strided_slice %175 {offsets = [0, 128], sizes = [8, 128], strides = [1, 1]} : vector<8x384xf32> to vector<8x128xf32>
    %189 = arith.addf %187, %188 : vector<8x128xf32>
    %190 = arith.negf %189 : vector<8x128xf32>
    %191 = math.exp %190 : vector<8x128xf32>
    %cst_57 = arith.constant 1.000000e+00 : f32
    %192 = vector.broadcast %cst_57 : f32 to vector<8x128xf32>
    %193 = arith.addf %192, %191 : vector<8x128xf32>
    %194 = arith.divf %192, %193 : vector<8x128xf32>
    %195 = vector.extract_strided_slice %178 {offsets = [0, 256], sizes = [8, 128], strides = [1, 1]} : vector<8x384xf32> to vector<8x128xf32>
    %196 = vector.extract_strided_slice %175 {offsets = [0, 256], sizes = [8, 128], strides = [1, 1]} : vector<8x384xf32> to vector<8x128xf32>
    %197 = arith.mulf %186, %196 : vector<8x128xf32>
    %198 = arith.addf %195, %197 : vector<8x128xf32>
    %199 = math.tanh %198 : vector<8x128xf32>
    %200 = arith.subf %169, %199 : vector<8x128xf32>
    %201 = arith.mulf %194, %200 : vector<8x128xf32>
    %202 = arith.addf %199, %201 : vector<8x128xf32>
    %c0_i32_58 = arith.constant 0 : i32
    %203 = arith.addi %c0_i32_58, %c5_i32 : i32
    %204 = arith.index_cast %203 : i32 to index
    %c0_59 = arith.constant 0 : index
    %c0_60 = arith.constant 0 : index
    %205 = vector.load %arg11[%204, %c0_59, %c0_60] : memref<8x8x128xf32, #tpu.memory_space<vmem>>, vector<1x8x128xf32>
    %206 = vector.shape_cast %205 : vector<1x8x128xf32> to vector<8x128xf32>
    %207 = vector.shape_cast %202 : vector<8x128xf32> to vector<1x8x128xf32>
    tpu.vector_store %arg11[%204, %c0_59, %c0_60], %207 {strides = array<i32>} : memref<8x8x128xf32, #tpu.memory_space<vmem>>, vector<1x8x128xf32>,
    %c6_i32 = arith.constant 6 : i32
    %cst_61 = arith.constant dense<0.000000e+00> : vector<8x384xf32>
    %208 = tpu.matmul %202, %3, %cst_61 {dimension_numbers = #tpu.dot_dimension_numbers<[1], [0], [0], [1], [0, 0, 1, 1], [], []>} : vector<8x128xf32>, vector<128x384xf32>, vector<8x384xf32> -> vector<8x384xf32>
    %209 = arith.index_cast %c6_i32 : i32 to index
    %c0_62 = arith.constant 0 : index
    %c0_63 = arith.constant 0 : index
    %210 = vector.load %arg10[%209, %c0_62, %c0_63] : memref<8x8x384xf32, #tpu.memory_space<vmem>>, vector<1x8x384xf32>
    %211 = vector.shape_cast %210 : vector<1x8x384xf32> to vector<8x384xf32>
    %212 = vector.extract_strided_slice %211 {offsets = [0, 0], sizes = [8, 128], strides = [1, 1]} : vector<8x384xf32> to vector<8x128xf32>
    %213 = vector.extract_strided_slice %208 {offsets = [0, 0], sizes = [8, 128], strides = [1, 1]} : vector<8x384xf32> to vector<8x128xf32>
    %214 = arith.addf %212, %213 : vector<8x128xf32>
    %215 = arith.negf %214 : vector<8x128xf32>
    %216 = math.exp %215 : vector<8x128xf32>
    %cst_64 = arith.constant 1.000000e+00 : f32
    %217 = vector.broadcast %cst_64 : f32 to vector<8x128xf32>
    %218 = arith.addf %217, %216 : vector<8x128xf32>
    %219 = arith.divf %217, %218 : vector<8x128xf32>
    %220 = vector.extract_strided_slice %211 {offsets = [0, 128], sizes = [8, 128], strides = [1, 1]} : vector<8x384xf32> to vector<8x128xf32>
    %221 = vector.extract_strided_slice %208 {offsets = [0, 128], sizes = [8, 128], strides = [1, 1]} : vector<8x384xf32> to vector<8x128xf32>
    %222 = arith.addf %220, %221 : vector<8x128xf32>
    %223 = arith.negf %222 : vector<8x128xf32>
    %224 = math.exp %223 : vector<8x128xf32>
    %cst_65 = arith.constant 1.000000e+00 : f32
    %225 = vector.broadcast %cst_65 : f32 to vector<8x128xf32>
    %226 = arith.addf %225, %224 : vector<8x128xf32>
    %227 = arith.divf %225, %226 : vector<8x128xf32>
    %228 = vector.extract_strided_slice %211 {offsets = [0, 256], sizes = [8, 128], strides = [1, 1]} : vector<8x384xf32> to vector<8x128xf32>
    %229 = vector.extract_strided_slice %208 {offsets = [0, 256], sizes = [8, 128], strides = [1, 1]} : vector<8x384xf32> to vector<8x128xf32>
    %230 = arith.mulf %219, %229 : vector<8x128xf32>
    %231 = arith.addf %228, %230 : vector<8x128xf32>
    %232 = math.tanh %231 : vector<8x128xf32>
    %233 = arith.subf %202, %232 : vector<8x128xf32>
    %234 = arith.mulf %227, %233 : vector<8x128xf32>
    %235 = arith.addf %232, %234 : vector<8x128xf32>
    %c0_i32_66 = arith.constant 0 : i32
    %236 = arith.addi %c0_i32_66, %c6_i32 : i32
    %237 = arith.index_cast %236 : i32 to index
    %c0_67 = arith.constant 0 : index
    %c0_68 = arith.constant 0 : index
    %238 = vector.load %arg11[%237, %c0_67, %c0_68] : memref<8x8x128xf32, #tpu.memory_space<vmem>>, vector<1x8x128xf32>
    %239 = vector.shape_cast %238 : vector<1x8x128xf32> to vector<8x128xf32>
    %240 = vector.shape_cast %235 : vector<8x128xf32> to vector<1x8x128xf32>
    tpu.vector_store %arg11[%237, %c0_67, %c0_68], %240 {strides = array<i32>} : memref<8x8x128xf32, #tpu.memory_space<vmem>>, vector<1x8x128xf32>,
    %c7_i32 = arith.constant 7 : i32
    %cst_69 = arith.constant dense<0.000000e+00> : vector<8x384xf32>
    %241 = tpu.matmul %235, %3, %cst_69 {dimension_numbers = #tpu.dot_dimension_numbers<[1], [0], [0], [1], [0, 0, 1, 1], [], []>} : vector<8x128xf32>, vector<128x384xf32>, vector<8x384xf32> -> vector<8x384xf32>
    %242 = arith.index_cast %c7_i32 : i32 to index
    %c0_70 = arith.constant 0 : index
    %c0_71 = arith.constant 0 : index
    %243 = vector.load %arg10[%242, %c0_70, %c0_71] : memref<8x8x384xf32, #tpu.memory_space<vmem>>, vector<1x8x384xf32>
    %244 = vector.shape_cast %243 : vector<1x8x384xf32> to vector<8x384xf32>
    %245 = vector.extract_strided_slice %244 {offsets = [0, 0], sizes = [8, 128], strides = [1, 1]} : vector<8x384xf32> to vector<8x128xf32>
    %246 = vector.extract_strided_slice %241 {offsets = [0, 0], sizes = [8, 128], strides = [1, 1]} : vector<8x384xf32> to vector<8x128xf32>
    %247 = arith.addf %245, %246 : vector<8x128xf32>
    %248 = arith.negf %247 : vector<8x128xf32>
    %249 = math.exp %248 : vector<8x128xf32>
    %cst_72 = arith.constant 1.000000e+00 : f32
    %250 = vector.broadcast %cst_72 : f32 to vector<8x128xf32>
    %251 = arith.addf %250, %249 : vector<8x128xf32>
    %252 = arith.divf %250, %251 : vector<8x128xf32>
    %253 = vector.extract_strided_slice %244 {offsets = [0, 128], sizes = [8, 128], strides = [1, 1]} : vector<8x384xf32> to vector<8x128xf32>
    %254 = vector.extract_strided_slice %241 {offsets = [0, 128], sizes = [8, 128], strides = [1, 1]} : vector<8x384xf32> to vector<8x128xf32>
    %255 = arith.addf %253, %254 : vector<8x128xf32>
    %256 = arith.negf %255 : vector<8x128xf32>
    %257 = math.exp %256 : vector<8x128xf32>
    %cst_73 = arith.constant 1.000000e+00 : f32
    %258 = vector.broadcast %cst_73 : f32 to vector<8x128xf32>
    %259 = arith.addf %258, %257 : vector<8x128xf32>
    %260 = arith.divf %258, %259 : vector<8x128xf32>
    %261 = vector.extract_strided_slice %244 {offsets = [0, 256], sizes = [8, 128], strides = [1, 1]} : vector<8x384xf32> to vector<8x128xf32>
    %262 = vector.extract_strided_slice %241 {offsets = [0, 256], sizes = [8, 128], strides = [1, 1]} : vector<8x384xf32> to vector<8x128xf32>
    %263 = arith.mulf %252, %262 : vector<8x128xf32>
    %264 = arith.addf %261, %263 : vector<8x128xf32>
    %265 = math.tanh %264 : vector<8x128xf32>
    %266 = arith.subf %235, %265 : vector<8x128xf32>
    %267 = arith.mulf %260, %266 : vector<8x128xf32>
    %268 = arith.addf %265, %267 : vector<8x128xf32>
    %c0_i32_74 = arith.constant 0 : i32
    %269 = arith.addi %c0_i32_74, %c7_i32 : i32
    %270 = arith.index_cast %269 : i32 to index
    %c0_75 = arith.constant 0 : index
    %c0_76 = arith.constant 0 : index
    %271 = vector.load %arg11[%270, %c0_75, %c0_76] : memref<8x8x128xf32, #tpu.memory_space<vmem>>, vector<1x8x128xf32>
    %272 = vector.shape_cast %271 : vector<1x8x128xf32> to vector<8x128xf32>
    %273 = vector.shape_cast %268 : vector<8x128xf32> to vector<1x8x128xf32>
    tpu.vector_store %arg11[%270, %c0_75, %c0_76], %273 {strides = array<i32>} : memref<8x8x128xf32, #tpu.memory_space<vmem>>, vector<1x8x128xf32>,
    %c8_i32 = arith.constant 8 : i32
    %c0_77 = arith.constant 0 : index
    %c0_78 = arith.constant 0 : index
    %274 = vector.load %arg5[%c0_77, %c0_78] : memref<128x384xf32, #tpu.memory_space<vmem>>, vector<128x384xf32>
    %c0_79 = arith.constant 0 : index
    %c0_80 = arith.constant 0 : index
    %275 = vector.load %arg6[%c0_79, %c0_80] : memref<128x384xf32, #tpu.memory_space<vmem>>, vector<128x384xf32>
    %cst_81 = arith.constant 0.000000e+00 : f32
    %276 = vector.broadcast %cst_81 : f32 to vector<8x128xf32>
    %c0_82 = arith.constant 0 : index
    %c0_83 = arith.constant 0 : index
    %c0_84 = arith.constant 0 : index
    %277 = vector.load %arg11[%c0_82, %c0_83, %c0_84] : memref<8x8x128xf32, #tpu.memory_space<vmem>>, vector<8x8x128xf32>
    %278 = vector.shape_cast %277 : vector<8x8x128xf32> to vector<64x128xf32>
    %cst_85 = arith.constant dense<0.000000e+00> : vector<64x384xf32>
    %279 = tpu.matmul %278, %274, %cst_85 {dimension_numbers = #tpu.dot_dimension_numbers<[1], [0], [0], [1], [0, 0, 1, 1], [], []>} : vector<64x128xf32>, vector<128x384xf32>, vector<64x384xf32> -> vector<64x384xf32>
    %280 = vector.shape_cast %279 : vector<64x384xf32> to vector<8x8x384xf32>
    %c0_86 = arith.constant 0 : index
    %c0_87 = arith.constant 0 : index
    %c0_88 = arith.constant 0 : index
    %281 = vector.load %arg10[%c0_86, %c0_87, %c0_88] : memref<8x8x384xf32, #tpu.memory_space<vmem>>, vector<8x8x384xf32>
    tpu.vector_store %arg10[%c0_86, %c0_87, %c0_88], %280 {strides = array<i32>} : memref<8x8x384xf32, #tpu.memory_space<vmem>>, vector<8x8x384xf32>,
    %c0_i32_89 = arith.constant 0 : i32
    %cst_90 = arith.constant dense<0.000000e+00> : vector<8x384xf32>
    %282 = tpu.matmul %276, %275, %cst_90 {dimension_numbers = #tpu.dot_dimension_numbers<[1], [0], [0], [1], [0, 0, 1, 1], [], []>} : vector<8x128xf32>, vector<128x384xf32>, vector<8x384xf32> -> vector<8x384xf32>
    %283 = arith.index_cast %c0_i32_89 : i32 to index
    %c0_91 = arith.constant 0 : index
    %c0_92 = arith.constant 0 : index
    %284 = vector.load %arg10[%283, %c0_91, %c0_92] : memref<8x8x384xf32, #tpu.memory_space<vmem>>, vector<1x8x384xf32>
    %285 = vector.shape_cast %284 : vector<1x8x384xf32> to vector<8x384xf32>
    %286 = vector.extract_strided_slice %285 {offsets = [0, 0], sizes = [8, 128], strides = [1, 1]} : vector<8x384xf32> to vector<8x128xf32>
    %287 = vector.extract_strided_slice %282 {offsets = [0, 0], sizes = [8, 128], strides = [1, 1]} : vector<8x384xf32> to vector<8x128xf32>
    %288 = arith.addf %286, %287 : vector<8x128xf32>
    %289 = arith.negf %288 : vector<8x128xf32>
    %290 = math.exp %289 : vector<8x128xf32>
    %cst_93 = arith.constant 1.000000e+00 : f32
    %291 = vector.broadcast %cst_93 : f32 to vector<8x128xf32>
    %292 = arith.addf %291, %290 : vector<8x128xf32>
    %293 = arith.divf %291, %292 : vector<8x128xf32>
    %294 = vector.extract_strided_slice %285 {offsets = [0, 128], sizes = [8, 128], strides = [1, 1]} : vector<8x384xf32> to vector<8x128xf32>
    %295 = vector.extract_strided_slice %282 {offsets = [0, 128], sizes = [8, 128], strides = [1, 1]} : vector<8x384xf32> to vector<8x128xf32>
    %296 = arith.addf %294, %295 : vector<8x128xf32>
    %297 = arith.negf %296 : vector<8x128xf32>
    %298 = math.exp %297 : vector<8x128xf32>
    %cst_94 = arith.constant 1.000000e+00 : f32
    %299 = vector.broadcast %cst_94 : f32 to vector<8x128xf32>
    %300 = arith.addf %299, %298 : vector<8x128xf32>
    %301 = arith.divf %299, %300 : vector<8x128xf32>
    %302 = vector.extract_strided_slice %285 {offsets = [0, 256], sizes = [8, 128], strides = [1, 1]} : vector<8x384xf32> to vector<8x128xf32>
    %303 = vector.extract_strided_slice %282 {offsets = [0, 256], sizes = [8, 128], strides = [1, 1]} : vector<8x384xf32> to vector<8x128xf32>
    %304 = arith.mulf %293, %303 : vector<8x128xf32>
    %305 = arith.addf %302, %304 : vector<8x128xf32>
    %306 = math.tanh %305 : vector<8x128xf32>
    %307 = arith.subf %276, %306 : vector<8x128xf32>
    %308 = arith.mulf %301, %307 : vector<8x128xf32>
    %309 = arith.addf %306, %308 : vector<8x128xf32>
    %c0_i32_95 = arith.constant 0 : i32
    %310 = arith.addi %c0_i32_95, %c0_i32_89 : i32
    %311 = vector.broadcast %310 : i32 to vector<8x1xi32>
    %312 = arith.cmpi eq, %0, %311 : vector<8x1xi32>
    %313 = vector.shape_cast %312 : vector<8x1xi1> to vector<8x1xi1>
    %314 = vector.broadcast %313 : vector<8x1xi1> to vector<8x128xi1>
    %315 = arith.select %314, %309, %1 : vector<8x128xi1>, vector<8x128xf32>
    %c1_i32_96 = arith.constant 1 : i32
    %cst_97 = arith.constant dense<0.000000e+00> : vector<8x384xf32>
    %316 = tpu.matmul %309, %275, %cst_97 {dimension_numbers = #tpu.dot_dimension_numbers<[1], [0], [0], [1], [0, 0, 1, 1], [], []>} : vector<8x128xf32>, vector<128x384xf32>, vector<8x384xf32> -> vector<8x384xf32>
    %317 = arith.index_cast %c1_i32_96 : i32 to index
    %c0_98 = arith.constant 0 : index
    %c0_99 = arith.constant 0 : index
    %318 = vector.load %arg10[%317, %c0_98, %c0_99] : memref<8x8x384xf32, #tpu.memory_space<vmem>>, vector<1x8x384xf32>
    %319 = vector.shape_cast %318 : vector<1x8x384xf32> to vector<8x384xf32>
    %320 = vector.extract_strided_slice %319 {offsets = [0, 0], sizes = [8, 128], strides = [1, 1]} : vector<8x384xf32> to vector<8x128xf32>
    %321 = vector.extract_strided_slice %316 {offsets = [0, 0], sizes = [8, 128], strides = [1, 1]} : vector<8x384xf32> to vector<8x128xf32>
    %322 = arith.addf %320, %321 : vector<8x128xf32>
    %323 = arith.negf %322 : vector<8x128xf32>
    %324 = math.exp %323 : vector<8x128xf32>
    %cst_100 = arith.constant 1.000000e+00 : f32
    %325 = vector.broadcast %cst_100 : f32 to vector<8x128xf32>
    %326 = arith.addf %325, %324 : vector<8x128xf32>
    %327 = arith.divf %325, %326 : vector<8x128xf32>
    %328 = vector.extract_strided_slice %319 {offsets = [0, 128], sizes = [8, 128], strides = [1, 1]} : vector<8x384xf32> to vector<8x128xf32>
    %329 = vector.extract_strided_slice %316 {offsets = [0, 128], sizes = [8, 128], strides = [1, 1]} : vector<8x384xf32> to vector<8x128xf32>
    %330 = arith.addf %328, %329 : vector<8x128xf32>
    %331 = arith.negf %330 : vector<8x128xf32>
    %332 = math.exp %331 : vector<8x128xf32>
    %cst_101 = arith.constant 1.000000e+00 : f32
    %333 = vector.broadcast %cst_101 : f32 to vector<8x128xf32>
    %334 = arith.addf %333, %332 : vector<8x128xf32>
    %335 = arith.divf %333, %334 : vector<8x128xf32>
    %336 = vector.extract_strided_slice %319 {offsets = [0, 256], sizes = [8, 128], strides = [1, 1]} : vector<8x384xf32> to vector<8x128xf32>
    %337 = vector.extract_strided_slice %316 {offsets = [0, 256], sizes = [8, 128], strides = [1, 1]} : vector<8x384xf32> to vector<8x128xf32>
    %338 = arith.mulf %327, %337 : vector<8x128xf32>
    %339 = arith.addf %336, %338 : vector<8x128xf32>
    %340 = math.tanh %339 : vector<8x128xf32>
    %341 = arith.subf %309, %340 : vector<8x128xf32>
    %342 = arith.mulf %335, %341 : vector<8x128xf32>
    %343 = arith.addf %340, %342 : vector<8x128xf32>
    %c0_i32_102 = arith.constant 0 : i32
    %344 = arith.addi %c0_i32_102, %c1_i32_96 : i32
    %345 = vector.broadcast %344 : i32 to vector<8x1xi32>
    %346 = arith.cmpi eq, %0, %345 : vector<8x1xi32>
    %347 = vector.shape_cast %346 : vector<8x1xi1> to vector<8x1xi1>
    %348 = vector.broadcast %347 : vector<8x1xi1> to vector<8x128xi1>
    %349 = arith.select %348, %343, %315 : vector<8x128xi1>, vector<8x128xf32>
    %c2_i32_103 = arith.constant 2 : i32
    %cst_104 = arith.constant dense<0.000000e+00> : vector<8x384xf32>
    %350 = tpu.matmul %343, %275, %cst_104 {dimension_numbers = #tpu.dot_dimension_numbers<[1], [0], [0], [1], [0, 0, 1, 1], [], []>} : vector<8x128xf32>, vector<128x384xf32>, vector<8x384xf32> -> vector<8x384xf32>
    %351 = arith.index_cast %c2_i32_103 : i32 to index
    %c0_105 = arith.constant 0 : index
    %c0_106 = arith.constant 0 : index
    %352 = vector.load %arg10[%351, %c0_105, %c0_106] : memref<8x8x384xf32, #tpu.memory_space<vmem>>, vector<1x8x384xf32>
    %353 = vector.shape_cast %352 : vector<1x8x384xf32> to vector<8x384xf32>
    %354 = vector.extract_strided_slice %353 {offsets = [0, 0], sizes = [8, 128], strides = [1, 1]} : vector<8x384xf32> to vector<8x128xf32>
    %355 = vector.extract_strided_slice %350 {offsets = [0, 0], sizes = [8, 128], strides = [1, 1]} : vector<8x384xf32> to vector<8x128xf32>
    %356 = arith.addf %354, %355 : vector<8x128xf32>
    %357 = arith.negf %356 : vector<8x128xf32>
    %358 = math.exp %357 : vector<8x128xf32>
    %cst_107 = arith.constant 1.000000e+00 : f32
    %359 = vector.broadcast %cst_107 : f32 to vector<8x128xf32>
    %360 = arith.addf %359, %358 : vector<8x128xf32>
    %361 = arith.divf %359, %360 : vector<8x128xf32>
    %362 = vector.extract_strided_slice %353 {offsets = [0, 128], sizes = [8, 128], strides = [1, 1]} : vector<8x384xf32> to vector<8x128xf32>
    %363 = vector.extract_strided_slice %350 {offsets = [0, 128], sizes = [8, 128], strides = [1, 1]} : vector<8x384xf32> to vector<8x128xf32>
    %364 = arith.addf %362, %363 : vector<8x128xf32>
    %365 = arith.negf %364 : vector<8x128xf32>
    %366 = math.exp %365 : vector<8x128xf32>
    %cst_108 = arith.constant 1.000000e+00 : f32
    %367 = vector.broadcast %cst_108 : f32 to vector<8x128xf32>
    %368 = arith.addf %367, %366 : vector<8x128xf32>
    %369 = arith.divf %367, %368 : vector<8x128xf32>
    %370 = vector.extract_strided_slice %353 {offsets = [0, 256], sizes = [8, 128], strides = [1, 1]} : vector<8x384xf32> to vector<8x128xf32>
    %371 = vector.extract_strided_slice %350 {offsets = [0, 256], sizes = [8, 128], strides = [1, 1]} : vector<8x384xf32> to vector<8x128xf32>
    %372 = arith.mulf %361, %371 : vector<8x128xf32>
    %373 = arith.addf %370, %372 : vector<8x128xf32>
    %374 = math.tanh %373 : vector<8x128xf32>
    %375 = arith.subf %343, %374 : vector<8x128xf32>
    %376 = arith.mulf %369, %375 : vector<8x128xf32>
    %377 = arith.addf %374, %376 : vector<8x128xf32>
    %c0_i32_109 = arith.constant 0 : i32
    %378 = arith.addi %c0_i32_109, %c2_i32_103 : i32
    %379 = vector.broadcast %378 : i32 to vector<8x1xi32>
    %380 = arith.cmpi eq, %0, %379 : vector<8x1xi32>
    %381 = vector.shape_cast %380 : vector<8x1xi1> to vector<8x1xi1>
    %382 = vector.broadcast %381 : vector<8x1xi1> to vector<8x128xi1>
    %383 = arith.select %382, %377, %349 : vector<8x128xi1>, vector<8x128xf32>
    %c3_i32_110 = arith.constant 3 : i32
    %cst_111 = arith.constant dense<0.000000e+00> : vector<8x384xf32>
    %384 = tpu.matmul %377, %275, %cst_111 {dimension_numbers = #tpu.dot_dimension_numbers<[1], [0], [0], [1], [0, 0, 1, 1], [], []>} : vector<8x128xf32>, vector<128x384xf32>, vector<8x384xf32> -> vector<8x384xf32>
    %385 = arith.index_cast %c3_i32_110 : i32 to index
    %c0_112 = arith.constant 0 : index
    %c0_113 = arith.constant 0 : index
    %386 = vector.load %arg10[%385, %c0_112, %c0_113] : memref<8x8x384xf32, #tpu.memory_space<vmem>>, vector<1x8x384xf32>
    %387 = vector.shape_cast %386 : vector<1x8x384xf32> to vector<8x384xf32>
    %388 = vector.extract_strided_slice %387 {offsets = [0, 0], sizes = [8, 128], strides = [1, 1]} : vector<8x384xf32> to vector<8x128xf32>
    %389 = vector.extract_strided_slice %384 {offsets = [0, 0], sizes = [8, 128], strides = [1, 1]} : vector<8x384xf32> to vector<8x128xf32>
    %390 = arith.addf %388, %389 : vector<8x128xf32>
    %391 = arith.negf %390 : vector<8x128xf32>
    %392 = math.exp %391 : vector<8x128xf32>
    %cst_114 = arith.constant 1.000000e+00 : f32
    %393 = vector.broadcast %cst_114 : f32 to vector<8x128xf32>
    %394 = arith.addf %393, %392 : vector<8x128xf32>
    %395 = arith.divf %393, %394 : vector<8x128xf32>
    %396 = vector.extract_strided_slice %387 {offsets = [0, 128], sizes = [8, 128], strides = [1, 1]} : vector<8x384xf32> to vector<8x128xf32>
    %397 = vector.extract_strided_slice %384 {offsets = [0, 128], sizes = [8, 128], strides = [1, 1]} : vector<8x384xf32> to vector<8x128xf32>
    %398 = arith.addf %396, %397 : vector<8x128xf32>
    %399 = arith.negf %398 : vector<8x128xf32>
    %400 = math.exp %399 : vector<8x128xf32>
    %cst_115 = arith.constant 1.000000e+00 : f32
    %401 = vector.broadcast %cst_115 : f32 to vector<8x128xf32>
    %402 = arith.addf %401, %400 : vector<8x128xf32>
    %403 = arith.divf %401, %402 : vector<8x128xf32>
    %404 = vector.extract_strided_slice %387 {offsets = [0, 256], sizes = [8, 128], strides = [1, 1]} : vector<8x384xf32> to vector<8x128xf32>
    %405 = vector.extract_strided_slice %384 {offsets = [0, 256], sizes = [8, 128], strides = [1, 1]} : vector<8x384xf32> to vector<8x128xf32>
    %406 = arith.mulf %395, %405 : vector<8x128xf32>
    %407 = arith.addf %404, %406 : vector<8x128xf32>
    %408 = math.tanh %407 : vector<8x128xf32>
    %409 = arith.subf %377, %408 : vector<8x128xf32>
    %410 = arith.mulf %403, %409 : vector<8x128xf32>
    %411 = arith.addf %408, %410 : vector<8x128xf32>
    %c0_i32_116 = arith.constant 0 : i32
    %412 = arith.addi %c0_i32_116, %c3_i32_110 : i32
    %413 = vector.broadcast %412 : i32 to vector<8x1xi32>
    %414 = arith.cmpi eq, %0, %413 : vector<8x1xi32>
    %415 = vector.shape_cast %414 : vector<8x1xi1> to vector<8x1xi1>
    %416 = vector.broadcast %415 : vector<8x1xi1> to vector<8x128xi1>
    %417 = arith.select %416, %411, %383 : vector<8x128xi1>, vector<8x128xf32>
    %c4_i32_117 = arith.constant 4 : i32
    %cst_118 = arith.constant dense<0.000000e+00> : vector<8x384xf32>
    %418 = tpu.matmul %411, %275, %cst_118 {dimension_numbers = #tpu.dot_dimension_numbers<[1], [0], [0], [1], [0, 0, 1, 1], [], []>} : vector<8x128xf32>, vector<128x384xf32>, vector<8x384xf32> -> vector<8x384xf32>
    %419 = arith.index_cast %c4_i32_117 : i32 to index
    %c0_119 = arith.constant 0 : index
    %c0_120 = arith.constant 0 : index
    %420 = vector.load %arg10[%419, %c0_119, %c0_120] : memref<8x8x384xf32, #tpu.memory_space<vmem>>, vector<1x8x384xf32>
    %421 = vector.shape_cast %420 : vector<1x8x384xf32> to vector<8x384xf32>
    %422 = vector.extract_strided_slice %421 {offsets = [0, 0], sizes = [8, 128], strides = [1, 1]} : vector<8x384xf32> to vector<8x128xf32>
    %423 = vector.extract_strided_slice %418 {offsets = [0, 0], sizes = [8, 128], strides = [1, 1]} : vector<8x384xf32> to vector<8x128xf32>
    %424 = arith.addf %422, %423 : vector<8x128xf32>
    %425 = arith.negf %424 : vector<8x128xf32>
    %426 = math.exp %425 : vector<8x128xf32>
    %cst_121 = arith.constant 1.000000e+00 : f32
    %427 = vector.broadcast %cst_121 : f32 to vector<8x128xf32>
    %428 = arith.addf %427, %426 : vector<8x128xf32>
    %429 = arith.divf %427, %428 : vector<8x128xf32>
    %430 = vector.extract_strided_slice %421 {offsets = [0, 128], sizes = [8, 128], strides = [1, 1]} : vector<8x384xf32> to vector<8x128xf32>
    %431 = vector.extract_strided_slice %418 {offsets = [0, 128], sizes = [8, 128], strides = [1, 1]} : vector<8x384xf32> to vector<8x128xf32>
    %432 = arith.addf %430, %431 : vector<8x128xf32>
    %433 = arith.negf %432 : vector<8x128xf32>
    %434 = math.exp %433 : vector<8x128xf32>
    %cst_122 = arith.constant 1.000000e+00 : f32
    %435 = vector.broadcast %cst_122 : f32 to vector<8x128xf32>
    %436 = arith.addf %435, %434 : vector<8x128xf32>
    %437 = arith.divf %435, %436 : vector<8x128xf32>
    %438 = vector.extract_strided_slice %421 {offsets = [0, 256], sizes = [8, 128], strides = [1, 1]} : vector<8x384xf32> to vector<8x128xf32>
    %439 = vector.extract_strided_slice %418 {offsets = [0, 256], sizes = [8, 128], strides = [1, 1]} : vector<8x384xf32> to vector<8x128xf32>
    %440 = arith.mulf %429, %439 : vector<8x128xf32>
    %441 = arith.addf %438, %440 : vector<8x128xf32>
    %442 = math.tanh %441 : vector<8x128xf32>
    %443 = arith.subf %411, %442 : vector<8x128xf32>
    %444 = arith.mulf %437, %443 : vector<8x128xf32>
    %445 = arith.addf %442, %444 : vector<8x128xf32>
    %c0_i32_123 = arith.constant 0 : i32
    %446 = arith.addi %c0_i32_123, %c4_i32_117 : i32
    %447 = vector.broadcast %446 : i32 to vector<8x1xi32>
    %448 = arith.cmpi eq, %0, %447 : vector<8x1xi32>
    %449 = vector.shape_cast %448 : vector<8x1xi1> to vector<8x1xi1>
    %450 = vector.broadcast %449 : vector<8x1xi1> to vector<8x128xi1>
    %451 = arith.select %450, %445, %417 : vector<8x128xi1>, vector<8x128xf32>
    %c5_i32_124 = arith.constant 5 : i32
    %cst_125 = arith.constant dense<0.000000e+00> : vector<8x384xf32>
    %452 = tpu.matmul %445, %275, %cst_125 {dimension_numbers = #tpu.dot_dimension_numbers<[1], [0], [0], [1], [0, 0, 1, 1], [], []>} : vector<8x128xf32>, vector<128x384xf32>, vector<8x384xf32> -> vector<8x384xf32>
    %453 = arith.index_cast %c5_i32_124 : i32 to index
    %c0_126 = arith.constant 0 : index
    %c0_127 = arith.constant 0 : index
    %454 = vector.load %arg10[%453, %c0_126, %c0_127] : memref<8x8x384xf32, #tpu.memory_space<vmem>>, vector<1x8x384xf32>
    %455 = vector.shape_cast %454 : vector<1x8x384xf32> to vector<8x384xf32>
    %456 = vector.extract_strided_slice %455 {offsets = [0, 0], sizes = [8, 128], strides = [1, 1]} : vector<8x384xf32> to vector<8x128xf32>
    %457 = vector.extract_strided_slice %452 {offsets = [0, 0], sizes = [8, 128], strides = [1, 1]} : vector<8x384xf32> to vector<8x128xf32>
    %458 = arith.addf %456, %457 : vector<8x128xf32>
    %459 = arith.negf %458 : vector<8x128xf32>
    %460 = math.exp %459 : vector<8x128xf32>
    %cst_128 = arith.constant 1.000000e+00 : f32
    %461 = vector.broadcast %cst_128 : f32 to vector<8x128xf32>
    %462 = arith.addf %461, %460 : vector<8x128xf32>
    %463 = arith.divf %461, %462 : vector<8x128xf32>
    %464 = vector.extract_strided_slice %455 {offsets = [0, 128], sizes = [8, 128], strides = [1, 1]} : vector<8x384xf32> to vector<8x128xf32>
    %465 = vector.extract_strided_slice %452 {offsets = [0, 128], sizes = [8, 128], strides = [1, 1]} : vector<8x384xf32> to vector<8x128xf32>
    %466 = arith.addf %464, %465 : vector<8x128xf32>
    %467 = arith.negf %466 : vector<8x128xf32>
    %468 = math.exp %467 : vector<8x128xf32>
    %cst_129 = arith.constant 1.000000e+00 : f32
    %469 = vector.broadcast %cst_129 : f32 to vector<8x128xf32>
    %470 = arith.addf %469, %468 : vector<8x128xf32>
    %471 = arith.divf %469, %470 : vector<8x128xf32>
    %472 = vector.extract_strided_slice %455 {offsets = [0, 256], sizes = [8, 128], strides = [1, 1]} : vector<8x384xf32> to vector<8x128xf32>
    %473 = vector.extract_strided_slice %452 {offsets = [0, 256], sizes = [8, 128], strides = [1, 1]} : vector<8x384xf32> to vector<8x128xf32>
    %474 = arith.mulf %463, %473 : vector<8x128xf32>
    %475 = arith.addf %472, %474 : vector<8x128xf32>
    %476 = math.tanh %475 : vector<8x128xf32>
    %477 = arith.subf %445, %476 : vector<8x128xf32>
    %478 = arith.mulf %471, %477 : vector<8x128xf32>
    %479 = arith.addf %476, %478 : vector<8x128xf32>
    %c0_i32_130 = arith.constant 0 : i32
    %480 = arith.addi %c0_i32_130, %c5_i32_124 : i32
    %481 = vector.broadcast %480 : i32 to vector<8x1xi32>
    %482 = arith.cmpi eq, %0, %481 : vector<8x1xi32>
    %483 = vector.shape_cast %482 : vector<8x1xi1> to vector<8x1xi1>
    %484 = vector.broadcast %483 : vector<8x1xi1> to vector<8x128xi1>
    %485 = arith.select %484, %479, %451 : vector<8x128xi1>, vector<8x128xf32>
    %c6_i32_131 = arith.constant 6 : i32
    %cst_132 = arith.constant dense<0.000000e+00> : vector<8x384xf32>
    %486 = tpu.matmul %479, %275, %cst_132 {dimension_numbers = #tpu.dot_dimension_numbers<[1], [0], [0], [1], [0, 0, 1, 1], [], []>} : vector<8x128xf32>, vector<128x384xf32>, vector<8x384xf32> -> vector<8x384xf32>
    %487 = arith.index_cast %c6_i32_131 : i32 to index
    %c0_133 = arith.constant 0 : index
    %c0_134 = arith.constant 0 : index
    %488 = vector.load %arg10[%487, %c0_133, %c0_134] : memref<8x8x384xf32, #tpu.memory_space<vmem>>, vector<1x8x384xf32>
    %489 = vector.shape_cast %488 : vector<1x8x384xf32> to vector<8x384xf32>
    %490 = vector.extract_strided_slice %489 {offsets = [0, 0], sizes = [8, 128], strides = [1, 1]} : vector<8x384xf32> to vector<8x128xf32>
    %491 = vector.extract_strided_slice %486 {offsets = [0, 0], sizes = [8, 128], strides = [1, 1]} : vector<8x384xf32> to vector<8x128xf32>
    %492 = arith.addf %490, %491 : vector<8x128xf32>
    %493 = arith.negf %492 : vector<8x128xf32>
    %494 = math.exp %493 : vector<8x128xf32>
    %cst_135 = arith.constant 1.000000e+00 : f32
    %495 = vector.broadcast %cst_135 : f32 to vector<8x128xf32>
    %496 = arith.addf %495, %494 : vector<8x128xf32>
    %497 = arith.divf %495, %496 : vector<8x128xf32>
    %498 = vector.extract_strided_slice %489 {offsets = [0, 128], sizes = [8, 128], strides = [1, 1]} : vector<8x384xf32> to vector<8x128xf32>
    %499 = vector.extract_strided_slice %486 {offsets = [0, 128], sizes = [8, 128], strides = [1, 1]} : vector<8x384xf32> to vector<8x128xf32>
    %500 = arith.addf %498, %499 : vector<8x128xf32>
    %501 = arith.negf %500 : vector<8x128xf32>
    %502 = math.exp %501 : vector<8x128xf32>
    %cst_136 = arith.constant 1.000000e+00 : f32
    %503 = vector.broadcast %cst_136 : f32 to vector<8x128xf32>
    %504 = arith.addf %503, %502 : vector<8x128xf32>
    %505 = arith.divf %503, %504 : vector<8x128xf32>
    %506 = vector.extract_strided_slice %489 {offsets = [0, 256], sizes = [8, 128], strides = [1, 1]} : vector<8x384xf32> to vector<8x128xf32>
    %507 = vector.extract_strided_slice %486 {offsets = [0, 256], sizes = [8, 128], strides = [1, 1]} : vector<8x384xf32> to vector<8x128xf32>
    %508 = arith.mulf %497, %507 : vector<8x128xf32>
    %509 = arith.addf %506, %508 : vector<8x128xf32>
    %510 = math.tanh %509 : vector<8x128xf32>
    %511 = arith.subf %479, %510 : vector<8x128xf32>
    %512 = arith.mulf %505, %511 : vector<8x128xf32>
    %513 = arith.addf %510, %512 : vector<8x128xf32>
    %c0_i32_137 = arith.constant 0 : i32
    %514 = arith.addi %c0_i32_137, %c6_i32_131 : i32
    %515 = vector.broadcast %514 : i32 to vector<8x1xi32>
    %516 = arith.cmpi eq, %0, %515 : vector<8x1xi32>
    %517 = vector.shape_cast %516 : vector<8x1xi1> to vector<8x1xi1>
    %518 = vector.broadcast %517 : vector<8x1xi1> to vector<8x128xi1>
    %519 = arith.select %518, %513, %485 : vector<8x128xi1>, vector<8x128xf32>
    %c7_i32_138 = arith.constant 7 : i32
    %cst_139 = arith.constant dense<0.000000e+00> : vector<8x384xf32>
    %520 = tpu.matmul %513, %275, %cst_139 {dimension_numbers = #tpu.dot_dimension_numbers<[1], [0], [0], [1], [0, 0, 1, 1], [], []>} : vector<8x128xf32>, vector<128x384xf32>, vector<8x384xf32> -> vector<8x384xf32>
    %521 = arith.index_cast %c7_i32_138 : i32 to index
    %c0_140 = arith.constant 0 : index
    %c0_141 = arith.constant 0 : index
    %522 = vector.load %arg10[%521, %c0_140, %c0_141] : memref<8x8x384xf32, #tpu.memory_space<vmem>>, vector<1x8x384xf32>
    %523 = vector.shape_cast %522 : vector<1x8x384xf32> to vector<8x384xf32>
    %524 = vector.extract_strided_slice %523 {offsets = [0, 0], sizes = [8, 128], strides = [1, 1]} : vector<8x384xf32> to vector<8x128xf32>
    %525 = vector.extract_strided_slice %520 {offsets = [0, 0], sizes = [8, 128], strides = [1, 1]} : vector<8x384xf32> to vector<8x128xf32>
    %526 = arith.addf %524, %525 : vector<8x128xf32>
    %527 = arith.negf %526 : vector<8x128xf32>
    %528 = math.exp %527 : vector<8x128xf32>
    %cst_142 = arith.constant 1.000000e+00 : f32
    %529 = vector.broadcast %cst_142 : f32 to vector<8x128xf32>
    %530 = arith.addf %529, %528 : vector<8x128xf32>
    %531 = arith.divf %529, %530 : vector<8x128xf32>
    %532 = vector.extract_strided_slice %523 {offsets = [0, 128], sizes = [8, 128], strides = [1, 1]} : vector<8x384xf32> to vector<8x128xf32>
    %533 = vector.extract_strided_slice %520 {offsets = [0, 128], sizes = [8, 128], strides = [1, 1]} : vector<8x384xf32> to vector<8x128xf32>
    %534 = arith.addf %532, %533 : vector<8x128xf32>
    %535 = arith.negf %534 : vector<8x128xf32>
    %536 = math.exp %535 : vector<8x128xf32>
    %cst_143 = arith.constant 1.000000e+00 : f32
    %537 = vector.broadcast %cst_143 : f32 to vector<8x128xf32>
    %538 = arith.addf %537, %536 : vector<8x128xf32>
    %539 = arith.divf %537, %538 : vector<8x128xf32>
    %540 = vector.extract_strided_slice %523 {offsets = [0, 256], sizes = [8, 128], strides = [1, 1]} : vector<8x384xf32> to vector<8x128xf32>
    %541 = vector.extract_strided_slice %520 {offsets = [0, 256], sizes = [8, 128], strides = [1, 1]} : vector<8x384xf32> to vector<8x128xf32>
    %542 = arith.mulf %531, %541 : vector<8x128xf32>
    %543 = arith.addf %540, %542 : vector<8x128xf32>
    %544 = math.tanh %543 : vector<8x128xf32>
    %545 = arith.subf %513, %544 : vector<8x128xf32>
    %546 = arith.mulf %539, %545 : vector<8x128xf32>
    %547 = arith.addf %544, %546 : vector<8x128xf32>
    %c0_i32_144 = arith.constant 0 : i32
    %548 = arith.addi %c0_i32_144, %c7_i32_138 : i32
    %549 = vector.broadcast %548 : i32 to vector<8x1xi32>
    %550 = arith.cmpi eq, %0, %549 : vector<8x1xi32>
    %551 = vector.shape_cast %550 : vector<8x1xi1> to vector<8x1xi1>
    %552 = vector.broadcast %551 : vector<8x1xi1> to vector<8x128xi1>
    %553 = arith.select %552, %547, %519 : vector<8x128xi1>, vector<8x128xf32>
    %c8_i32_145 = arith.constant 8 : i32
    %c0_146 = arith.constant 0 : index
    %c0_147 = arith.constant 0 : index
    %554 = vector.load %arg7[%c0_146, %c0_147] : memref<128x128xf32, #tpu.memory_space<vmem>>, vector<128x128xf32>
    %cst_148 = arith.constant dense<0.000000e+00> : vector<8x128xf32>
    %555 = tpu.matmul %553, %554, %cst_148 {dimension_numbers = #tpu.dot_dimension_numbers<[1], [0], [0], [1], [0, 0, 1, 1], [], []>} : vector<8x128xf32>, vector<128x128xf32>, vector<8x128xf32> -> vector<8x128xf32>
    %c0_149 = arith.constant 0 : index
    %c0_150 = arith.constant 0 : index
    %556 = vector.load %arg8[%c0_149, %c0_150] : memref<1x128xf32, #tpu.memory_space<vmem>>, vector<1x128xf32>
    %557 = vector.broadcast %556 : vector<1x128xf32> to vector<8x128xf32>
    %558 = arith.addf %555, %557 : vector<8x128xf32>
    %c0_151 = arith.constant 0 : index
    %c0_152 = arith.constant 0 : index
    %559 = vector.load %arg9[%c0_151, %c0_152] : memref<8x128xf32, #tpu.memory_space<vmem>>, vector<8x128xf32>
    tpu.vector_store %arg9[%c0_151, %c0_152], %558 {strides = array<i32>} : memref<8x128xf32, #tpu.memory_space<vmem>>, vector<8x128xf32>,
    return
  }
  func.func @transform_0(%arg0: i32) -> (i32, i32, i32) {
    %c0_i32 = arith.constant 0 : i32
    %c0_i32_0 = arith.constant 0 : i32
    %c0_i32_1 = arith.constant 0 : i32
    return %c0_i32, %arg0, %c0_i32_0 : i32, i32, i32
  }
  func.func @transform_1(%arg0: i32) -> (i32, i32) {
    %c0_i32 = arith.constant 0 : i32
    %c0_i32_0 = arith.constant 0 : i32
    return %arg0, %c0_i32 : i32, i32
  }
  func.func @transform_2(%arg0: i32) -> (i32, i32) {
    %c0_i32 = arith.constant 0 : i32
    %c0_i32_0 = arith.constant 0 : i32
    %c0_i32_1 = arith.constant 0 : i32
    return %c0_i32, %c0_i32_0 : i32, i32
  }
  func.func @transform_3(%arg0: i32) -> (i32, i32) {
    %c0_i32 = arith.constant 0 : i32
    %c0_i32_0 = arith.constant 0 : i32
    %c0_i32_1 = arith.constant 0 : i32
    return %c0_i32, %c0_i32_0 : i32, i32
  }
  func.func @transform_4(%arg0: i32) -> (i32, i32) {
    %c0_i32 = arith.constant 0 : i32
    %c0_i32_0 = arith.constant 0 : i32
    %c0_i32_1 = arith.constant 0 : i32
    return %c0_i32, %c0_i32_0 : i32, i32
  }
  func.func @transform_5(%arg0: i32) -> (i32, i32) {
    %c0_i32 = arith.constant 0 : i32
    %c0_i32_0 = arith.constant 0 : i32
    %c0_i32_1 = arith.constant 0 : i32
    return %c0_i32, %c0_i32_0 : i32, i32
  }
  func.func @transform_6(%arg0: i32) -> (i32, i32) {
    %c0_i32 = arith.constant 0 : i32
    %c0_i32_0 = arith.constant 0 : i32
    %c0_i32_1 = arith.constant 0 : i32
    return %c0_i32, %c0_i32_0 : i32, i32
  }
  func.func @transform_7(%arg0: i32) -> (i32, i32) {
    %c0_i32 = arith.constant 0 : i32
    %c0_i32_0 = arith.constant 0 : i32
    %c0_i32_1 = arith.constant 0 : i32
    return %c0_i32, %c0_i32_0 : i32, i32
  }
  func.func @transform_8(%arg0: i32) -> (i32, i32) {
    %c0_i32 = arith.constant 0 : i32
    %c0_i32_0 = arith.constant 0 : i32
    return %arg0, %c0_i32 : i32, i32
  }
}

</mosaic_0001>

<bundles_post_ra>
// kernel: tpu_custom_call.1
= control target key start
LH: loop header
LB: loop body
LE: loop exit
PB: predicated region body
PF: predicated region fallthrough
CT: control target
= control target key end

     0   :  { %13 = vsyncpa [#allocation5], 0  ;;  %s6955_s0 = inlined_call_operand.hbm [shape: f32[8,8,128], index: 0, kind: input, shape index: {}]   ;;  %s6956_s1 = inlined_call_operand.vmem [shape: s32[8,1], index: 1, kind: input, shape index: {}]   ;;  %s6957_s2 = inlined_call_operand.hbm [shape: f32[128,384], index: 2, kind: input, shape index: {}]   ;;  %s6958_s3 = inlined_call_operand.hbm [shape: f32[128,384], index: 3, kind: input, shape index: {}]   ;;  %s6959_s4 = inlined_call_operand.hbm [shape: f32[128,384], index: 4, kind: input, shape index: {}]   ;;  %s6960_s5 = inlined_call_operand.hbm [shape: f32[128,384], index: 5, kind: input, shape index: {}]   ;;  %s6961_s6 = inlined_call_operand.hbm [shape: f32[128,128], index: 6, kind: input, shape index: {}]   ;;  %s6962_s7 = inlined_call_operand.vmem [shape: f32[1,128], index: 7, kind: input, shape index: {}]   ;;  %s6963_s8 = inlined_call_operand.hbm [shape: f32[8,128], index: 8, kind: output, shape index: {}]  }
   0x1   :  { %14 = vsyncpa [#allocation8], 0 }
   0x2   :  { %15 = vsyncpa [#allocation11], 0 }
   0x3   :  { %16 = vsyncpa [#allocation14], 0 }
   0x4   :  { %17 = vsyncpa [#allocation6], 0  ;;  %s5095_s27 = smov [#allocation7]  }
   0x5   :  { %s37_s28 = sshll.u32 %s5095_s27, 4  ;;  %s38_s28 = int_to_ptr.vmem [resolvable:$true] %s37_s28 }
   0x6   :  { %s4953_s29 = scalar_lea.vmem %s38_s28, 6144  ;;  %p4958_p1 = scmp.lt.s32.totalorder %s38_s28, %s38_s28 }
   0x7   :  { %p4954_p0 = scmp.ne.s32.totalorder %s38_s28, %s4953_s29  ;;  %p4959_p2 = scmp.lt.s32.totalorder %s4953_s29, %s4953_s29 }
   0x9   :  { %p4960_p3 = por %p4959_p2, %p4958_p1 }
   0xb   :  { %p4961_p4 = pnand %p4960_p3, %p4954_p0 }
   0xd   :  { %4964 = shalt.err (!%p4961_p4)
}
   0xe   :  { %s5096_s30 = smov 384   ;;  %s5097_s9 = smov 24  }
   0xf   :  { %43 = dma.hbm_to_vmem [thread:$0]  %s6957_s2, 6144, %s38_s28, [#allocation8], %s5096_s30, %s5096_s30, %s5097_s9  }
  0x10   :  { %s5098_s12 = smov [#allocation10]   ;;  %s5099_s14 = smov [#allocation4]  }
  0x11   :  { %s61_s13 = sshll.u32 %s5098_s12, 4  ;;  %s23_s15 = sshll.u32 %s5099_s14, 4  ;;  %s62_s13 = int_to_ptr.vmem [resolvable:$true] %s61_s13  ;;  %s24_s15 = int_to_ptr.vmem [resolvable:$true] %s23_s15 }
  0x12   :  { %s4973_s16 = scalar_lea.vmem %s62_s13, 6144  ;;  %p4978_p6 = scmp.lt.s32.totalorder %s62_s13, %s62_s13 }
  0x13   :  { %p4974_p5 = scmp.ne.s32.totalorder %s62_s13, %s4973_s16  ;;  %p4979_p7 = scmp.lt.s32.totalorder %s4973_s16, %s4973_s16 }
  0x15   :  { %p4980_p8 = por %p4979_p7, %p4978_p6 }
  0x17   :  { %p4981_p9 = pnand %p4980_p8, %p4974_p5 }
  0x19   :  { %4984 = shalt.err (!%p4981_p9)
}
  0x1a   :  { %67 = dma.hbm_to_vmem [thread:$0]  %s6959_s4, 6144, %s62_s13, [#allocation11], %s5096_s30, %s5096_s30, %s5097_s9  }
  0x1b   :  { %s4993_s2 = scalar_lea.vmem %s24_s15, 1024  ;;  %p4998_p11 = scmp.lt.s32.totalorder %s24_s15, %s24_s15 }
  0x1c   :  { %p4994_p10 = scmp.ne.s32.totalorder %s24_s15, %s4993_s2  ;;  %p4999_p12 = scmp.lt.s32.totalorder %s4993_s2, %s4993_s2 }
  0x1e   :  { %p5000_p13 = por %p4999_p12, %p4998_p11 }
  0x20   :  { %p5001_p0 = pnand %p5000_p13, %p4994_p10 }
  0x22   :  { %5004 = shalt.err (!%p5001_p0)
}
  0x23   :  { %s5100_s19 = smov 128   ;;  %s5101_s20 = smov 8  }
  0x24   :  { %29 = dma.hbm_to_vmem [thread:$0]  %s6955_s0, 1024, %s24_s15, [#allocation5], %s5100_s19, %s5100_s19, %s5101_s20  }
  0x25   :  { %s5102_s23 = smov [#allocation9]   ;;  %s5103_s4 = smov [#allocation12]  }
  0x26   :  { %s49_s24 = sshll.u32 %s5102_s23, 4  ;;  %s73_s25 = sshll.u32 %s5103_s4, 4  ;;  %s50_s24 = int_to_ptr.vmem [resolvable:$true] %s49_s24  ;;  %s74_s25 = int_to_ptr.vmem [resolvable:$true] %s73_s25 }
  0x27   :  { %s5013_s26 = scalar_lea.vmem %s50_s24, 6144  ;;  %p5018_p2 = scmp.lt.s32.totalorder %s50_s24, %s50_s24 }
  0x28   :  { %p5014_p1 = scmp.ne.s32.totalorder %s50_s24, %s5013_s26  ;;  %p5019_p3 = scmp.lt.s32.totalorder %s5013_s26, %s5013_s26 }
  0x2a   :  { %p5020_p4 = por %p5019_p3, %p5018_p2 }
  0x2c   :  { %p5021_p5 = pnand %p5020_p4, %p5014_p1 }
  0x2e   :  { %5024 = shalt.err (!%p5021_p5)
}
  0x2f   :  { %55 = dma.hbm_to_vmem [thread:$0]  %s6958_s3, 6144, %s50_s24, [#allocation8], %s5096_s30, %s5096_s30, %s5097_s9  }
  0x30   :  { %s5033_s0 = scalar_lea.vmem %s74_s25, 6144  ;;  %p5038_p7 = scmp.lt.s32.totalorder %s74_s25, %s74_s25 }
  0x31   :  { %p5034_p6 = scmp.ne.s32.totalorder %s74_s25, %s5033_s0  ;;  %p5039_p8 = scmp.lt.s32.totalorder %s5033_s0, %s5033_s0 }
  0x33   :  { %p5040_p9 = por %p5039_p8, %p5038_p7 }
  0x35   :  { %p5041_p10 = pnand %p5040_p9, %p5034_p6 }
  0x37   :  { %5044 = shalt.err (!%p5041_p10)
}
  0x38   :  { %79 = dma.hbm_to_vmem [thread:$0]  %s6960_s5, 6144, %s74_s25, [#allocation11], %s5096_s30, %s5096_s30, %s5097_s9  }
  0x39   :  { %s5104_s11 = smov [#allocation13]  }
  0x3a   :  { %s85_s12 = sshll.u32 %s5104_s11, 4  ;;  %s86_s12 = int_to_ptr.vmem [resolvable:$true] %s85_s12 }
  0x3b   :  { %s5053_s13 = scalar_lea.vmem %s86_s12, 2048  ;;  %p5058_p12 = scmp.lt.s32.totalorder %s86_s12, %s86_s12 }
  0x3c   :  { %p5054_p11 = scmp.ne.s32.totalorder %s86_s12, %s5053_s13  ;;  %p5059_p13 = scmp.lt.s32.totalorder %s5053_s13, %s5053_s13 }
  0x3e   :  { %p5060_p0 = por %p5059_p13, %p5058_p12 }
  0x40   :  { %p5061_p1 = pnand %p5060_p0, %p5054_p11 }
  0x42   :  { %5064 = shalt.err (!%p5061_p1)
}
  0x43   :  { %91 = dma.hbm_to_vmem [thread:$0]  %s6961_s6, 2048, %s86_s12, [#allocation14], %s5100_s19, %s5100_s19, %s5101_s20  }
  0x44   :  { %5085 = dma.done.wait [#allocation5], 1024  }
  0x45   :  { %5086 = vsyncadd [#allocation5], 4294966272 }
  0x46   :  { %5087 = dma.done.wait [#allocation8], 12288  }
  0x47   :  { %5088 = vsyncadd [#allocation8], 4294955008 }
  0x48   :  { %5089 = dma.done.wait [#allocation11], 12288  }
  0x49   :  { %5090 = vsyncadd [#allocation11], 4294955008 }
  0x4a   :  { %5091 = dma.done.wait [#allocation14], 2048  }
  0x4b   :  { %5092 = vsyncadd [#allocation14], 4294965248  ;;  %v6964_v0 = vmov 0.0   ;;  %v159_v1 = vld [vmem:[#allocation7 + $0x170] sm:$0xff]  ;;  %v158_v2 = vld [vmem:[#allocation7 + $0x168] sm:$0xff]  ;;  %vm5106_vm0 = vmmov 0  }
  0x4c   :  { %281 = vmatprep.mubr.f32.mxu0 %v6964_v0  ;;  %v156_v3 = vld [vmem:[#allocation7 + $0x158] sm:$0xff]  ;;  %217 = vmatprep.subr.mxu0 %v159_v1  ;;  %v155_v4 = vld [vmem:[#allocation7 + $0x150] sm:$0xff]  ;;  %v153_v5 = vld [vmem:[#allocation7 + $0x140] sm:$0xff]  ;;  %s5108_s16 = smov [#allocation15]  }
  0x4d   :  { %218 = vmatpush1.msra.mxu0 %v158_v2  ;;  %v152_v6 = vld [vmem:[#allocation7 + $0x138] sm:$0xff]  ;;  %v150_v7 = vld [vmem:[#allocation7 + $0x128] sm:$0xff]  ;;  %v149_v8 = vld [vmem:[#allocation7 + $0x120] sm:$0xff]  ;;  %s3607_s17 = sshll.u32 %s5108_s16, 4  ;;  %s3608_s17 = int_to_ptr.vmem [resolvable:$true] %s3607_s17 }
  0x4e   :  { %219 = vmatprep.subr.mxu0 %v156_v3  ;;  %v147_v9 = vld [vmem:[#allocation7 + $0x110] sm:$0xff]  ;;  %v146_v10 = vld [vmem:[#allocation7 + $0x108] sm:$0xff]  ;;  %v144_v11 = vld [vmem:[#allocation7 + $0xf8] sm:$0xff]  ;;  %s5065_s18 = scalar_lea.vmem %s3608_s17, 128  ;;  %p5070_p3 = scmp.lt.s32.totalorder %s3608_s17, %s3608_s17 }
  0x4f   :  { %220 = vmatpush1.msra.mxu0 %v155_v4  ;;  %v143_v12 = vld [vmem:[#allocation7 + $0xf0] sm:$0xff]  ;;  %v141_v13 = vld [vmem:[#allocation7 + $0xe0] sm:$0xff]  ;;  %v140_v15 = vld [vmem:[#allocation7 + $0xd8] sm:$0xff]  ;;  %p5066_p2 = scmp.ne.s32.totalorder %s3608_s17, %s5065_s18  ;;  %p5071_p4 = scmp.lt.s32.totalorder %s5065_s18, %s5065_s18 }
  0x50   :  { %221 = vmatprep.subr.mxu0 %v153_v5  ;;  %v5191_v14 = vld [vmem:[#allocation4] sm:$0xff]  ;;  %v160_v16 = vld [vmem:[#allocation7 + $0x178] sm:$0xff]  ;;  %v138_v17 = vld [vmem:[#allocation7 + $0xc8] sm:$0xff] }
  0x51   :  { %222 = vmatpush1.msra.mxu0 %v152_v6  ;;  %4021 = vmatprep.mubr.f32.mxu1 %v5191_v14  ;;  %v157_v18 = vld [vmem:[#allocation7 + $0x160] sm:$0xff]  ;;  %v154_v20 = vld [vmem:[#allocation7 + $0x148] sm:$0xff]  ;;  %v135_v21 = vld [vmem:[#allocation7 + $0xb0] sm:$0xff]  ;;  %p5072_p5 = por %p5071_p4, %p5070_p3 }
  0x52   :  { %223 = vmatprep.subr.mxu0 %v150_v7  ;;  %3989 = vmatprep.subr.mxu1 %v160_v16  ;;  %v137_v19 = vld [vmem:[#allocation7 + $0xc0] sm:$0xff]  ;;  %v134_v22 = vld [vmem:[#allocation7 + $0xa8] sm:$0xff]  ;;  %v151_v23 = vld [vmem:[#allocation7 + $0x130] sm:$0xff] }
  0x53   :  { %224 = vmatpush1.msra.mxu0 %v149_v8  ;;  %3990 = vmatpush3.msra.mxu1 %v160_v16  ;;  %v132_v24 = vld [vmem:[#allocation7 + $0x98] sm:$0xff]  ;;  %v131_v25 = vld [vmem:[#allocation7 + $0x90] sm:$0xff]  ;;  %v129_v27 = vld [vmem:[#allocation7 + $0x80] sm:$0xff]  ;;  %p5073_p6 = pnand %p5072_p5, %p5066_p2 }
  0x54   :  { %225 = vmatprep.subr.mxu0 %v147_v9  ;;  %3991 = vmatprep.subr.mxu1 %v157_v18  ;;  %v148_v26 = vld [vmem:[#allocation7 + $0x118] sm:$0xff]  ;;  %v145_v29 = vld [vmem:[#allocation7 + $0x100] sm:$0xff]  ;;  %v126_v30 = vld [vmem:[#allocation7 + $0x68] sm:$0xff] }
  0x55   :  { %226 = vmatpush1.msra.mxu0 %v146_v10  ;;  %3992 = vmatpush3.msra.mxu1 %v157_v18  ;;  %v128_v28 = vld [vmem:[#allocation7 + $0x78] sm:$0xff]  ;;  %v125_v31 = vld [vmem:[#allocation7 + $0x60] sm:$0xff]  ;;  %v142_v32 = vld [vmem:[#allocation7 + $0xe8] sm:$0xff] }
  0x56   :  { %227 = vmatprep.subr.mxu0 %v144_v11  ;;  %3993 = vmatprep.subr.mxu1 %v154_v20  ;;  %v123_v33 = vld [vmem:[#allocation7 + $0x50] sm:$0xff]  ;;  %v122_v34 = vld [vmem:[#allocation7 + $0x48] sm:$0xff]  ;;  %v120_v36 = vld [vmem:[#allocation7 + $0x38] sm:$0xff] }
  0x57   :  { %228 = vmatpush1.msra.mxu0 %v143_v12  ;;  %3994 = vmatpush3.msra.mxu1 %v154_v20  ;;  %v139_v35 = vld [vmem:[#allocation7 + $0xd0] sm:$0xff]  ;;  %v136_v38 = vld [vmem:[#allocation7 + $0xb8] sm:$0xff]  ;;  %v117_v39 = vld [vmem:[#allocation7 + $0x20] sm:$0xff] }
  0x58   :  { %229 = vmatprep.subr.mxu0 %v141_v13  ;;  %3995 = vmatprep.subr.mxu1 %v151_v23  ;;  %v119_v37 = vld [vmem:[#allocation7 + $0x30] sm:$0xff]  ;;  %v116_v40 = vld [vmem:[#allocation7 + $0x18] sm:$0xff]  ;;  %v133_v41 = vld [vmem:[#allocation7 + $0xa0] sm:$0xff] }
  0x59   :  { %230 = vmatpush1.msra.mxu0 %v140_v15  ;;  %3996 = vmatpush3.msra.mxu1 %v151_v23  ;;  %v114_v42 = vld [vmem:[#allocation7 + $0x8] sm:$0xff]  ;;  %v113_v43 = vld [vmem:[#allocation7] sm:$0xff]  ;;  %v5194_v45 = vld [vmem:[#allocation9 + $0x170] sm:$0xff] }
  0x5a   :  { %231 = vmatprep.subr.mxu0 %v138_v17  ;;  %3997 = vmatprep.subr.mxu1 %v148_v26  ;;  %v130_v44 = vld [vmem:[#allocation7 + $0x88] sm:$0xff]  ;;  %7008 = vst [vmem:[#allocation21_spill] sm:$0xff] %v5194_v45  ;;  %v5198_v47 = vld [vmem:[#allocation9 + $0x158] sm:$0xff]  ;;  %v5202_v48 = vld [vmem:[#allocation9 + $0x150] sm:$0xff] }
  0x5b   :  { %232 = vmatpush1.msra.mxu0 %v137_v19  ;;  %3998 = vmatpush3.msra.mxu1 %v148_v26  ;;  %v5196_v46 = vld [vmem:[#allocation9 + $0x168] sm:$0xff]  ;;  %v127_v49 = vld [vmem:[#allocation7 + $0x70] sm:$0xff]  ;;  %v5208_v51 = vld [vmem:[#allocation9 + $0x140] sm:$0xff] }
  0x5c   :  { %233 = vmatprep.subr.mxu0 %v135_v21  ;;  %3999 = vmatprep.subr.mxu1 %v145_v29  ;;  %v5206_v50 = vld [vmem:[#allocation4 + $0x8] sm:$0xff]  ;;  %v5211_v52 = vld [vmem:[#allocation9 + $0x138] sm:$0xff]  ;;  %v5218_v54 = vld [vmem:[#allocation9 + $0x120] sm:$0xff] }
  0x5d   :  { %234 = vmatpush1.msra.mxu0 %v134_v22  ;;  %4000 = vmatpush3.msra.mxu1 %v145_v29  ;;  %v5214_v53 = vld [vmem:[#allocation9 + $0x128] sm:$0xff]  ;;  %v124_v55 = vld [vmem:[#allocation7 + $0x58] sm:$0xff]  ;;  %v5222_v56 = vld [vmem:[#allocation4 + $0x10] sm:$0xff] }
  0x5e   :  { %235 = vmatprep.subr.mxu0 %v132_v24  ;;  %4001 = vmatprep.subr.mxu1 %v142_v32  ;;  %v5224_v57 = vld [vmem:[#allocation9 + $0x110] sm:$0xff]  ;;  %v5227_v58 = vld [vmem:[#allocation9 + $0x108] sm:$0xff]  ;;  %v5230_v59 = vld [vmem:[#allocation9 + $0xf8] sm:$0xff] }
  0x5f   :  { %236 = vmatpush1.msra.mxu0 %v131_v25  ;;  %4002 = vmatpush3.msra.mxu1 %v142_v32  ;;  %v5234_v60 = vld [vmem:[#allocation9 + $0xf0] sm:$0xff]  ;;  %v121_v61 = vld [vmem:[#allocation7 + $0x40] sm:$0xff]  ;;  %v5238_v62 = vld [vmem:[#allocation4 + $0x18] sm:$0xff] }
  0x60   :  { %237 = vmatprep.subr.mxu0 %v129_v27  ;;  %4003 = vmatprep.subr.mxu1 %v139_v35  ;;  %v5240_v63 = vld [vmem:[#allocation9 + $0xe0] sm:$0xff]  ;;  %v5243_v1 = vld [vmem:[#allocation9 + $0xd8] sm:$0xff]  ;;  %v5246_v2 = vld [vmem:[#allocation9 + $0xc8] sm:$0xff] }
  0x61   :  { %238 = vmatpush1.msra.mxu0 %v128_v28  ;;  %4004 = vmatpush3.msra.mxu1 %v139_v35  ;;  %v5250_v3 = vld [vmem:[#allocation9 + $0xc0] sm:$0xff]  ;;  %v118_v4 = vld [vmem:[#allocation7 + $0x28] sm:$0xff]  ;;  %v5256_v6 = vld [vmem:[#allocation9 + $0xb0] sm:$0xff] }
  0x62   :  { %239 = vmatprep.subr.mxu0 %v126_v30  ;;  %4005 = vmatprep.subr.mxu1 %v136_v38  ;;  %v5254_v5 = vld [vmem:[#allocation4 + $0x20] sm:$0xff]  ;;  %v5259_v7 = vld [vmem:[#allocation9 + $0xa8] sm:$0xff]  ;;  %v5262_v8 = vld [vmem:[#allocation9 + $0x98] sm:$0xff] }
  0x63   :  { %240 = vmatpush1.msra.mxu0 %v125_v31  ;;  %4006 = vmatpush3.msra.mxu1 %v136_v38  ;;  %v5266_v9 = vld [vmem:[#allocation9 + $0x90] sm:$0xff]  ;;  %v214_v11 = vld [vmem:[#allocation4 + $0x28] sm:$0xff]  ;;  %v5270_v12 = vld [vmem:[#allocation9 + $0x80] sm:$0xff] }
  0x64   :  { %241 = vmatprep.subr.mxu0 %v123_v33  ;;  %4007 = vmatprep.subr.mxu1 %v133_v41  ;;  %v115_v10 = vld [vmem:[#allocation7 + $0x10] sm:$0xff]  ;;  %v5273_v13 = vld [vmem:[#allocation9 + $0x78] sm:$0xff]  ;;  %v5279_v15 = vld [vmem:[#allocation9 + $0x60] sm:$0xff] }
  0x65   :  { %242 = vmatpush1.msra.mxu0 %v122_v34  ;;  %4008 = vmatpush3.msra.mxu1 %v133_v41  ;;  %v215_v16 = vld [vmem:[#allocation4 + $0x30] sm:$0xff]  ;;  %v5286_v18 = vld [vmem:[#allocation9 + $0x48] sm:$0xff]  ;;  %v5289_v19 = vld [vmem:[#allocation9 + $0x38] sm:$0xff] }
  0x66   :  { %243 = vmatprep.subr.mxu0 %v120_v36  ;;  %4009 = vmatprep.subr.mxu1 %v130_v44  ;;  %v5283_v17 = vld [vmem:[#allocation9 + $0x50] sm:$0xff]  ;;  %v5295_v21 = vld [vmem:[#allocation9 + $0x178] sm:$0xff]  ;;  %v5299_v23 = vld [vmem:[#allocation9 + $0x20] sm:$0xff] }
  0x67   :  { %244 = vmatpush1.msra.mxu0 %v119_v37  ;;  %4010 = vmatpush3.msra.mxu1 %v130_v44  ;;  %v5293_v20 = vld [vmem:[#allocation9 + $0x30] sm:$0xff]  ;;  %v216_v22 = vld [vmem:[#allocation4 + $0x38] sm:$0xff]  ;;  %v5306_v25 = vld [vmem:[#allocation9 + $0x8] sm:$0xff] }
  0x68   :  { %245 = vmatprep.subr.mxu0 %v117_v39  ;;  %4011 = vmatprep.subr.mxu1 %v127_v49  ;;  %v5302_v24 = vld [vmem:[#allocation9 + $0x18] sm:$0xff]  ;;  %7009 = vst [vmem:[#allocation22_spill] sm:$0xff] %v5306_v25  ;;  %v5310_v26 = vld [vmem:[#allocation9] sm:$0xff]  ;;  %v5318_v28 = vld [vmem:[#allocation9 + $0x148] sm:$0xff] }
  0x69   :  { %246 = vmatpush1.msra.mxu0 %v116_v40  ;;  %4012 = vmatpush3.msra.mxu1 %v127_v49  ;;  %7010 = vst [vmem:[#allocation23_spill] sm:$0xff] %v5310_v26  ;;  %v5312_v27 = vld [vmem:[#allocation9 + $0x160] sm:$0xff]  ;;  %v5324_v29 = vld [vmem:[#allocation9 + $0x130] sm:$0xff]  ;;  %v5329_v30 = vld [vmem:[#allocation9 + $0x118] sm:$0xff] }
  0x6a   :  { %247 = vmatprep.subr.mxu0 %v114_v42  ;;  %4013 = vmatprep.subr.mxu1 %v124_v55  ;;  %v5335_v31 = vld [vmem:[#allocation9 + $0x100] sm:$0xff]  ;;  %v5341_v32 = vld [vmem:[#allocation9 + $0xe8] sm:$0xff]  ;;  %v5345_v33 = vld [vmem:[#allocation9 + $0xd0] sm:$0xff] }
  0x6b   :  { %248 = vmatpush1.msra.mxu0 %v113_v43  ;;  %4014 = vmatpush3.msra.mxu1 %v124_v55  ;;  %v5351_v34 = vld [vmem:[#allocation9 + $0xb8] sm:$0xff]  ;;  %v5357_v35 = vld [vmem:[#allocation9 + $0xa0] sm:$0xff]  ;;  %v5363_v36 = vld [vmem:[#allocation9 + $0x88] sm:$0xff] }
  0x6c   :  { %282 = vmatmul.mubr.f32.vlgmr.msra.gmra.mxu0 %v5191_v14  ;;  %459 = vmatprep.subr.mxu0 %v5194_v45  ;;  %v5276_v14 = vld [vmem:[#allocation9 + $0x68] sm:$0xff]  ;;  %v5369_v37 = vld [vmem:[#allocation9 + $0x70] sm:$0xff]  ;;  %v5375_v38 = vld [vmem:[#allocation9 + $0x58] sm:$0xff] }
  0x6d   :  { %460 = vmatpush1.msra.mxu0 %v5196_v46  ;;  %287 = vmatprep.mubr.f32.mxu0 %v6964_v0  ;;  %v5381_v39 = vld [vmem:[#allocation9 + $0x40] sm:$0xff]  ;;  %v5387_v40 = vld [vmem:[#allocation9 + $0x28] sm:$0xff]  ;;  %v5393_v41 = vld [vmem:[#allocation9 + $0x10] sm:$0xff] }
  0x6e   :  { %461 = vmatprep.subr.mxu0 %v5198_v47  ;;  %4015 = vmatprep.subr.mxu1 %v121_v61  ;;  %7011 = vst [vmem:[#allocation24_spill] sm:$0xff] %v5393_v41 }
  0x6f   :  { %462 = vmatpush1.msra.mxu0 %v5202_v48  ;;  %4016 = vmatpush3.msra.mxu1 %v121_v61 }
  0x70   :  { %288 = vmatmul.mubr.f32.gmra.mxu0 %v5206_v50  ;;  %463 = vmatprep.subr.mxu0 %v5208_v51 }
  0x71   :  { %464 = vmatpush1.msra.mxu0 %v5211_v52  ;;  %293 = vmatprep.mubr.f32.mxu0 %v6964_v0 }
  0x72   :  { %465 = vmatprep.subr.mxu0 %v5214_v53  ;;  %4017 = vmatprep.subr.mxu1 %v118_v4 }
  0x73   :  { %466 = vmatpush1.msra.mxu0 %v5218_v54  ;;  %4018 = vmatpush3.msra.mxu1 %v118_v4 }
  0x74   :  { %294 = vmatmul.mubr.f32.gmra.mxu0 %v5222_v56  ;;  %467 = vmatprep.subr.mxu0 %v5224_v57 }
  0x75   :  { %468 = vmatpush1.msra.mxu0 %v5227_v58  ;;  %299 = vmatprep.mubr.f32.mxu0 %v6964_v0 }
  0x76   :  { %469 = vmatprep.subr.mxu0 %v5230_v59  ;;  %4019 = vmatprep.subr.mxu1 %v115_v10 }
  0x77   :  { %470 = vmatpush1.msra.mxu0 %v5234_v60  ;;  %4020 = vmatpush3.msra.mxu1 %v115_v10 }
  0x78   :  { %300 = vmatmul.mubr.f32.gmra.mxu0 %v5238_v62  ;;  %471 = vmatprep.subr.mxu0 %v5240_v63 }
  0x79   :  { %472 = vmatpush1.msra.mxu0 %v5243_v1  ;;  %305 = vmatprep.mubr.f32.mxu0 %v6964_v0 }
  0x7a   :  { %473 = vmatprep.subr.mxu0 %v5246_v2  ;;  %4033 = vmatprep.subr.mxu1 %v6964_v0 }
  0x7b   :  { %474 = vmatpush1.msra.mxu0 %v5250_v3  ;;  %4022 = vmatmul.mubr.f32.vlgmr.msra.gmra.mxu1 %v5206_v50 }
  0x7c   :  { %306 = vmatmul.mubr.f32.gmra.mxu0 %v5254_v5  ;;  %475 = vmatprep.subr.mxu0 %v5256_v6 }
  0x7d   :  { %476 = vmatpush1.msra.mxu0 %v5259_v7  ;;  %311 = vmatprep.mubr.f32.mxu0 %v6964_v0 }
  0x7e   :  { %477 = vmatprep.subr.mxu0 %v5262_v8  ;;  %4034 = vmatpush3.msra.mxu1 %v5295_v21 }
  0x7f   :  { %478 = vmatpush1.msra.mxu0 %v5266_v9  ;;  %4035 = vmatprep.subr.mxu1 %v6964_v0 }
  0x80   :  { %312 = vmatmul.mubr.f32.gmra.mxu0 %v214_v11  ;;  %479 = vmatprep.subr.mxu0 %v5270_v12 }
  0x81   :  { %480 = vmatpush1.msra.mxu0 %v5273_v13  ;;  %317 = vmatprep.mubr.f32.mxu0 %v6964_v0 }
  0x82   :  { %481 = vmatprep.subr.mxu0 %v5276_v14  ;;  %4036 = vmatpush3.msra.mxu1 %v5312_v27 }
  0x83   :  { %482 = vmatpush1.msra.mxu0 %v5279_v15  ;;  %4037 = vmatprep.subr.mxu1 %v6964_v0 }
  0x84   :  { %318 = vmatmul.mubr.f32.gmra.mxu0 %v215_v16  ;;  %483 = vmatprep.subr.mxu0 %v5283_v17 }
  0x85   :  { %484 = vmatpush1.msra.mxu0 %v5286_v18  ;;  %323 = vmatprep.mubr.f32.mxu0 %v6964_v0 }
  0x86   :  { %485 = vmatprep.subr.mxu0 %v5289_v19  ;;  %4038 = vmatpush3.msra.mxu1 %v5318_v28 }
  0x87   :  { %486 = vmatpush1.msra.mxu0 %v5293_v20  ;;  %4024 = vmatprep.mubr.f32.mxu1 %v5222_v56 }
  0x88   :  { %324 = vmatmul.mubr.f32.gmra.mxu0 %v216_v22  ;;  %487 = vmatprep.subr.mxu0 %v5299_v23 }
  0x89   :  { %488 = vmatpush1.msra.mxu0 %v5302_v24  ;;  %523 = vmatprep.mubr.f32.mxu0 %v6964_v0 }
  0x8a   :  { %489 = vmatprep.subr.mxu0 %v5306_v25  ;;  %4039 = vmatprep.subr.mxu1 %v6964_v0 }
  0x8b   :  { %490 = vmatpush1.msra.mxu0 %v5310_v26  ;;  %4025 = vmatmul.mubr.f32.gmra.mxu1 %v5238_v62 }
  0x8c   :  { %524 = vmatmul.mubr.f32.vlgmr.msra.gmra.mxu0 %v6964_v0  ;;  %4040 = vmatpush3.msra.mxu1 %v5324_v29 }
  0x8d   :  { %4027 = vmatprep.mubr.f32.mxu1 %v5254_v5  ;;  %4041 = vmatprep.subr.mxu1 %v6964_v0 }
  0x8e   :  { %624 = vmatprep.subr.mxu0 %v5194_v45  ;;  %4042 = vmatpush3.msra.mxu1 %v5329_v30 }
  0x8f   :  { %625 = vmatpush1.msra.mxu0 %v5196_v46  ;;  %4043 = vmatprep.subr.mxu1 %v6964_v0 }
  0x90   :  { %4028 = vmatmul.mubr.f32.gmra.mxu1 %v214_v11  ;;  %626 = vmatprep.subr.mxu0 %v5198_v47 }
  0x91   :  { %4044 = vmatpush3.msra.mxu1 %v5335_v31  ;;  %4030 = vmatprep.mubr.f32.mxu1 %v215_v16 }
  0x92   :  { %4045 = vmatprep.subr.mxu1 %v6964_v0  ;;  %627 = vmatpush1.msra.mxu0 %v5202_v48 }
  0x93   :  { %4046 = vmatpush3.msra.mxu1 %v5341_v32  ;;  %628 = vmatprep.subr.mxu0 %v5208_v51 }
  0x94   :  { %4047 = vmatprep.subr.mxu1 %v6964_v0  ;;  %4031 = vmatmul.mubr.f32.gmra.mxu1 %v216_v22 }
  0x95   :  { %4048 = vmatpush3.msra.mxu1 %v5345_v33  ;;  %4065 = vmatprep.mubr.msk.f32.mxu1 %vm5106_vm0, %v6964_v0 }
  0x96   :  { %4049 = vmatprep.subr.mxu1 %v6964_v0  ;;  %629 = vmatpush1.msra.mxu0 %v5211_v52 }
  0x97   :  { %4050 = vmatpush3.msra.mxu1 %v5351_v34  ;;  %630 = vmatprep.subr.mxu0 %v5214_v53 }
  0x98   :  { %4051 = vmatprep.subr.mxu1 %v6964_v0  ;;  %631 = vmatpush1.msra.mxu0 %v5218_v54 }
  0x99   :  { %4052 = vmatpush3.msra.mxu1 %v5357_v35  ;;  %632 = vmatprep.subr.mxu0 %v5224_v57 }
  0x9a   :  { %4053 = vmatprep.subr.mxu1 %v6964_v0  ;;  %633 = vmatpush1.msra.mxu0 %v5227_v58 }
  0x9b   :  { %4054 = vmatpush3.msra.mxu1 %v5363_v36  ;;  %634 = vmatprep.subr.mxu0 %v5230_v59 }
  0x9c   :  { %4055 = vmatprep.subr.mxu1 %v6964_v0  ;;  %635 = vmatpush1.msra.mxu0 %v5234_v60 }
  0x9d   :  { %4056 = vmatpush3.msra.mxu1 %v5369_v37  ;;  %636 = vmatprep.subr.mxu0 %v5240_v63 }
  0x9e   :  { %4057 = vmatprep.subr.mxu1 %v6964_v0  ;;  %637 = vmatpush1.msra.mxu0 %v5243_v1 }
  0x9f   :  { %4058 = vmatpush3.msra.mxu1 %v5375_v38  ;;  %638 = vmatprep.subr.mxu0 %v5246_v2 }
  0xa0   :  { %4059 = vmatprep.subr.mxu1 %v6964_v0  ;;  %639 = vmatpush1.msra.mxu0 %v5250_v3 }
  0xa1   :  { %4060 = vmatpush3.msra.mxu1 %v5381_v39  ;;  %640 = vmatprep.subr.mxu0 %v5256_v6 }
  0xa2   :  { %4061 = vmatprep.subr.mxu1 %v6964_v0  ;;  %641 = vmatpush1.msra.mxu0 %v5259_v7 }
  0xa3   :  { %4062 = vmatpush3.msra.mxu1 %v5387_v40  ;;  %642 = vmatprep.subr.mxu0 %v5262_v8 }
  0xa4   :  { %4063 = vmatprep.subr.mxu1 %v6964_v0  ;;  %643 = vmatpush1.msra.mxu0 %v5266_v9 }
  0xa5   :  { %4064 = vmatpush3.msra.mxu1 %v5393_v41  ;;  %644 = vmatprep.subr.mxu0 %v5270_v12 }
  0xa6   :  { %4066 = vmatmul.mubr.f32.vlgmr.msra.gmra.mxu1 %v6964_v0  ;;  %4068 = vmatprep.subr.mxu1 %v6964_v0 }
  0xa7   :  { %4069 = vmatpush3.msra.mxu1 %v5295_v21  ;;  %645 = vmatpush1.msra.mxu0 %v5273_v13 }
  0xa8   :  { %4070 = vmatprep.subr.mxu1 %v6964_v0  ;;  %646 = vmatprep.subr.mxu0 %v5276_v14 }
  0xa9   :  { %4071 = vmatpush3.msra.mxu1 %v5312_v27  ;;  %647 = vmatpush1.msra.mxu0 %v5279_v15 }
  0xaa   :  { %4072 = vmatprep.subr.mxu1 %v6964_v0  ;;  %648 = vmatprep.subr.mxu0 %v5283_v17 }
  0xab   :  { %4073 = vmatpush3.msra.mxu1 %v5318_v28  ;;  %649 = vmatpush1.msra.mxu0 %v5286_v18 }
  0xac   :  { %4074 = vmatprep.subr.mxu1 %v6964_v0  ;;  %650 = vmatprep.subr.mxu0 %v5289_v19 }
  0xad   :  { %4075 = vmatpush3.msra.mxu1 %v5324_v29  ;;  %651 = vmatpush1.msra.mxu0 %v5293_v20 }
  0xae   :  { %4076 = vmatprep.subr.mxu1 %v6964_v0  ;;  %652 = vmatprep.subr.mxu0 %v5299_v23 }
  0xaf   :  { %4077 = vmatpush3.msra.mxu1 %v5329_v30  ;;  %653 = vmatpush1.msra.mxu0 %v5302_v24 }
  0xb0   :  { %4078 = vmatprep.subr.mxu1 %v6964_v0  ;;  %654 = vmatprep.subr.mxu0 %v5306_v25 }
  0xb1   :  { %4079 = vmatpush3.msra.mxu1 %v5335_v31  ;;  %655 = vmatpush1.msra.mxu0 %v5310_v26 }
  0xb2   :  { %4080 = vmatprep.subr.mxu1 %v6964_v0  ;;  %688 = vmatprep.mubr.f32.mxu0 %v6964_v0 }
  0xb3   :  { %4081 = vmatpush3.msra.mxu1 %v5341_v32  ;;  %4100 = vmatprep.mubr.msk.f32.mxu1 %vm5106_vm0, %v6964_v0 }
  0xb4   :  { %4082 = vmatprep.subr.mxu1 %v6964_v0  ;;  %791 = vmatprep.subr.mxu0 %v5194_v45 }
  0xb5   :  { %4083 = vmatpush3.msra.mxu1 %v5345_v33 }
  0xb6   :  { %4084 = vmatprep.subr.mxu1 %v6964_v0 }
  0xb7   :  { %4085 = vmatpush3.msra.mxu1 %v5351_v34 }
  0xb8   :  { %4086 = vmatprep.subr.mxu1 %v6964_v0 }
  0xb9   :  { %4087 = vmatpush3.msra.mxu1 %v5357_v35 }
  0xba   :  { %4088 = vmatprep.subr.mxu1 %v6964_v0 }
  0xbb   :  { %4089 = vmatpush3.msra.mxu1 %v5363_v36 }
  0xbc   :  { %4090 = vmatprep.subr.mxu1 %v6964_v0 }
  0xbd   :  { %4091 = vmatpush3.msra.mxu1 %v5369_v37 }
  0xbe   :  { %4092 = vmatprep.subr.mxu1 %v6964_v0 }
  0xbf   :  { %4093 = vmatpush3.msra.mxu1 %v5375_v38 }
  0xc0   :  { %4094 = vmatprep.subr.mxu1 %v6964_v0 }
  0xc1   :  { %4095 = vmatpush3.msra.mxu1 %v5381_v39 }
  0xc2   :  { %4096 = vmatprep.subr.mxu1 %v6964_v0 }
  0xc3   :  { %4097 = vmatpush3.msra.mxu1 %v5387_v40 }
  0xc4   :  { %4098 = vmatprep.subr.mxu1 %v6964_v0 }
  0xc5   :  { %4099 = vmatpush3.msra.mxu1 %v5393_v41 }
  0xc6   :  { %4103 = vmatprep.subr.mxu1 %v6964_v0 }
 0x12c   :  { %v283_v42 = vpop.f32.mrf.mxu0 }
 0x12e   :  { %v285_v43 = vpop.f32.mrf.mxu0 }
 0x130   :  { %v5452_v44 = vpop.f32.mrf.mxu0 }
 0x131   :  { %7012 = vst [vmem:[#allocation25_spill] sm:$0xff] %v5452_v44 }
 0x132   :  { %v5454_v49 = vpop.f32.mrf.mxu0 }
 0x133   :  { %7013 = vst [vmem:[#allocation26_spill] sm:$0xff] %v5454_v49 }
 0x134   :  { %v5456_v50 = vpop.f32.mrf.mxu0 }
 0x135   :  { %7014 = vst [vmem:[#allocation27_spill] sm:$0xff] %v5456_v50 }
 0x136   :  { %v5458_v55 = vpop.f32.mrf.mxu0 }
 0x137   :  { %7015 = vst [vmem:[#allocation28_spill] sm:$0xff] %v5458_v55 }
 0x138   :  { %v5460_v56 = vpop.f32.mrf.mxu0 }
 0x139   :  { %7016 = vst [vmem:[#allocation29_spill] sm:$0xff] %v5460_v56 }
 0x13a   :  { %v5462_v61 = vpop.f32.mrf.mxu0 }
 0x13b   :  { %7017 = vst [vmem:[#allocation30_spill] sm:$0xff] %v5462_v61  ;;  %v5480_v55 = vpop.f32.mrf.mxu1 }
 0x13c   :  { %v5464_v62 = vpop.f32.mrf.mxu0  ;;  %7026 = vst [vmem:[#allocation39_spill] sm:$0xff] %v5480_v55 }
 0x13d   :  { %7018 = vst [vmem:[#allocation31_spill] sm:$0xff] %v5464_v62  ;;  %v396_v50 = vpop.f32.mrf.mxu1 }
 0x13e   :  { %v5466_v4 = vpop.f32.mrf.mxu0 }
 0x13f   :  { %7019 = vst [vmem:[#allocation32_spill] sm:$0xff] %v5466_v4 }
 0x140   :  { %v5468_v5 = vpop.f32.mrf.mxu0 }
 0x141   :  { %7020 = vst [vmem:[#allocation33_spill] sm:$0xff] %v5468_v5 }
 0x142   :  { %v5470_v10 = vpop.f32.mrf.mxu0 }
 0x143   :  { %7021 = vst [vmem:[#allocation34_spill] sm:$0xff] %v5470_v10 }
 0x144   :  { %v5472_v11 = vpop.f32.mrf.mxu0 }
 0x145   :  { %7022 = vst [vmem:[#allocation35_spill] sm:$0xff] %v5472_v11 }
 0x146   :  { %v5474_v16 = vpop.f32.mrf.mxu0 }
 0x147   :  { %7023 = vst [vmem:[#allocation36_spill] sm:$0xff] %v5474_v16 }
 0x148   :  { %v5476_v22 = vpop.f32.mrf.mxu0 }
 0x149   :  { %7024 = vst [vmem:[#allocation37_spill] sm:$0xff] %v5476_v22 }
 0x14a   :  { %v5478_v0 = vpop.f32.mrf.mxu0 }
 0x14b   :  { %7025 = vst [vmem:[#allocation38_spill] sm:$0xff] %v5478_v0  ;;  %v5482_v49 = vpop.f32.mrf.mxu1 }
 0x14c   :  { %v525_v56 = vpop.f32.mrf.mxu0  ;;  %7027 = vst [vmem:[#allocation40_spill] sm:$0xff] %v5482_v49 }
 0x14d   :  { %v603_v61 = vadd.f32 %v525_v56, %v283_v42  ;;  %v5484_v5 = vpop.f32.mrf.mxu1 }
 0x14e   :  { %7028 = vst [vmem:[#allocation41_spill] sm:$0xff] %v5484_v5  ;;  %v527_v10 = vpop.f32.mrf.mxu0 }
 0x14f   :  { %v3619_v62 = vmul.f32 -1.442695, %v603_v61  ;;  %v610_v4 = vadd.f32 %v527_v10, %v285_v43 }
 0x150   :  { %v5486_v11 = vpop.f32.mrf.mxu1 }
 0x151   :  { %4688 = vpow2.f32 %v3619_v62  ;;  %7029 = vst [vmem:[#allocation42_spill] sm:$0xff] %v5486_v11  ;;  %v3620_v16 = vmul.f32 -1.442695, %v610_v4 }
 0x152   :  { %v5488_v44 = vpop.f32.mrf.mxu1 }
 0x153   :  { %7030 = vst [vmem:[#allocation43_spill] sm:$0xff] %v5488_v44  ;;  %4690 = vpow2.f32 %v3620_v16 }
 0x154   :  { %v5490_v55 = vpop.f32.mrf.mxu1 }
 0x155   :  { %7031 = vst [vmem:[#allocation44_spill] sm:$0xff] %v5490_v55 }
 0x156   :  { %v5492_v42 = vpop.f32.mrf.mxu1 }
 0x157   :  { %7032 = vst [vmem:[#allocation45_spill] sm:$0xff] %v5492_v42 }
 0x15e   :  { %v4689_v22 = vpop.eup %4688 }
 0x15f   :  { %v607_v0 = vadd.f32 1.0, %v4689_v22 }
 0x160   :  { %v4691_v62 = vpop.eup %4690 }
 0x161   :  { %4692 = vrcp.f32 %v607_v0  ;;  %v614_v45 = vadd.f32 1.0, %v4691_v62  ;;  %v7034_v0 = vmov 0.0  }
 0x166   :  { %v596_v56 = vpop.f32.mrf.mxu1 }
 0x168   :  { %v4067_v61 = vpop.f32.mrf.mxu1 }
 0x169   :  { %v7037_v61 = vld [vmem:[#allocation26_spill] sm:$0xff] }
 0x16e   :  { %v4693_v49 = vpop.eup %4692 }
 0x16f   :  { %v617_v5 = vmul.f32 %v4693_v49, %v596_v56 }
 0x171   :  { %v618_v43 = vadd.f32 %v617_v5, %v396_v50  ;;  %v7036_v50 = vld [vmem:[#allocation25_spill] sm:$0xff] }
 0x173   :  { %4694 = vtanh.f32 %v618_v43 }
 0x174   :  { %4696 = vrcp.f32 %v614_v45  ;;  %v7035_v45 = vld [vmem:[#allocation21_spill] sm:$0xff] }
 0x180   :  { %v4695_v4 = vpop.eup %4694 }
 0x181   :  { %v620_v10 = vsub.f32 0.0, %v4695_v4  ;;  %v4697_v11 = vpop.eup %4696 }
 0x183   :  { %v621_v44 = vmul.f32 %v4697_v11, %v620_v10 }
 0x185   :  { %v5494_v22 = vadd.f32 %v4695_v4, %v621_v44 }
 0x187   :  { %7033 = vst [vmem:[#allocation46_spill] sm:$0xff] %v5494_v22  ;;  %689 = vmatmul.mubr.f32.vlgmr.msra.gmra.mxu0 %v5494_v22  ;;  %4101 = vmatmul.mubr.f32.vlgmr.msra.gmra.mxu1 %v5494_v22 }
 0x188   :  { %792 = vmatpush1.msra.mxu0 %v5196_v46  ;;  %4104 = vmatpush3.msra.mxu1 %v5295_v21 }
 0x189   :  { %793 = vmatprep.subr.mxu0 %v5198_v47  ;;  %4105 = vmatprep.subr.mxu1 %v7034_v0 }
 0x18a   :  { %794 = vmatpush1.msra.mxu0 %v5202_v48  ;;  %4106 = vmatpush3.msra.mxu1 %v5312_v27 }
 0x18b   :  { %795 = vmatprep.subr.mxu0 %v5208_v51  ;;  %4107 = vmatprep.subr.mxu1 %v7034_v0 }
 0x18c   :  { %796 = vmatpush1.msra.mxu0 %v5211_v52  ;;  %4108 = vmatpush3.msra.mxu1 %v5318_v28 }
 0x18d   :  { %797 = vmatprep.subr.mxu0 %v5214_v53  ;;  %4109 = vmatprep.subr.mxu1 %v7034_v0 }
 0x18e   :  { %798 = vmatpush1.msra.mxu0 %v5218_v54  ;;  %4110 = vmatpush3.msra.mxu1 %v5324_v29 }
 0x18f   :  { %799 = vmatprep.subr.mxu0 %v5224_v57  ;;  %4111 = vmatprep.subr.mxu1 %v7034_v0 }
 0x190   :  { %800 = vmatpush1.msra.mxu0 %v5227_v58  ;;  %4112 = vmatpush3.msra.mxu1 %v5329_v30 }
 0x191   :  { %801 = vmatprep.subr.mxu0 %v5230_v59  ;;  %4113 = vmatprep.subr.mxu1 %v7034_v0 }
 0x192   :  { %802 = vmatpush1.msra.mxu0 %v5234_v60  ;;  %4114 = vmatpush3.msra.mxu1 %v5335_v31 }
 0x193   :  { %803 = vmatprep.subr.mxu0 %v5240_v63  ;;  %4115 = vmatprep.subr.mxu1 %v7034_v0 }
 0x194   :  { %804 = vmatpush1.msra.mxu0 %v5243_v1  ;;  %4116 = vmatpush3.msra.mxu1 %v5341_v32 }
 0x195   :  { %805 = vmatprep.subr.mxu0 %v5246_v2  ;;  %4117 = vmatprep.subr.mxu1 %v7034_v0 }
 0x196   :  { %806 = vmatpush1.msra.mxu0 %v5250_v3  ;;  %4118 = vmatpush3.msra.mxu1 %v5345_v33 }
 0x197   :  { %807 = vmatprep.subr.mxu0 %v5256_v6  ;;  %4119 = vmatprep.subr.mxu1 %v7034_v0 }
 0x198   :  { %808 = vmatpush1.msra.mxu0 %v5259_v7  ;;  %4120 = vmatpush3.msra.mxu1 %v5351_v34 }
 0x199   :  { %809 = vmatprep.subr.mxu0 %v5262_v8  ;;  %4121 = vmatprep.subr.mxu1 %v7034_v0 }
 0x19a   :  { %810 = vmatpush1.msra.mxu0 %v5266_v9  ;;  %4122 = vmatpush3.msra.mxu1 %v5357_v35 }
 0x19b   :  { %811 = vmatprep.subr.mxu0 %v5270_v12  ;;  %4123 = vmatprep.subr.mxu1 %v7034_v0 }
 0x19c   :  { %812 = vmatpush1.msra.mxu0 %v5273_v13  ;;  %4124 = vmatpush3.msra.mxu1 %v5363_v36 }
 0x19d   :  { %813 = vmatprep.subr.mxu0 %v5276_v14  ;;  %4125 = vmatprep.subr.mxu1 %v7034_v0 }
 0x19e   :  { %814 = vmatpush1.msra.mxu0 %v5279_v15  ;;  %4126 = vmatpush3.msra.mxu1 %v5369_v37 }
 0x19f   :  { %815 = vmatprep.subr.mxu0 %v5283_v17  ;;  %4127 = vmatprep.subr.mxu1 %v7034_v0 }
 0x1a0   :  { %816 = vmatpush1.msra.mxu0 %v5286_v18  ;;  %4128 = vmatpush3.msra.mxu1 %v5375_v38 }
 0x1a1   :  { %817 = vmatprep.subr.mxu0 %v5289_v19  ;;  %4129 = vmatprep.subr.mxu1 %v7034_v0 }
 0x1a2   :  { %818 = vmatpush1.msra.mxu0 %v5293_v20  ;;  %4130 = vmatpush3.msra.mxu1 %v5381_v39 }
 0x1a3   :  { %819 = vmatprep.subr.mxu0 %v5299_v23  ;;  %4131 = vmatprep.subr.mxu1 %v7034_v0 }
 0x1a4   :  { %820 = vmatpush1.msra.mxu0 %v5302_v24  ;;  %4132 = vmatpush3.msra.mxu1 %v5387_v40 }
 0x1a5   :  { %821 = vmatprep.subr.mxu0 %v5306_v25  ;;  %4133 = vmatprep.subr.mxu1 %v7034_v0 }
 0x1a6   :  { %822 = vmatpush1.msra.mxu0 %v5310_v26  ;;  %855 = vmatprep.mubr.f32.mxu0 %v7034_v0 }
 0x1a7   :  { %4134 = vmatpush3.msra.mxu1 %v5393_v41  ;;  %4135 = vmatprep.mubr.msk.f32.mxu1 %vm5106_vm0, %v7034_v0  ;;  %v7038_v41 = vld [vmem:[#allocation39_spill] sm:$0xff] }
 0x1a8   :  { %958 = vmatprep.subr.mxu0 %v7035_v45  ;;  %4138 = vmatprep.subr.mxu1 %v7034_v0 }
 0x247   :  { %v690_v44 = vpop.f32.mrf.mxu0  ;;  %v761_v49 = vpop.f32.mrf.mxu1 }
 0x248   :  { %v769_v5 = vadd.f32 %v690_v44, %v7036_v50 }
 0x249   :  { %v4102_v11 = vpop.f32.mrf.mxu1  ;;  %v692_v56 = vpop.f32.mrf.mxu0 }
 0x24a   :  { %v3621_v16 = vmul.f32 -1.442695, %v769_v5  ;;  %v776_v62 = vadd.f32 %v692_v56, %v7037_v61 }
 0x24c   :  { %4698 = vpow2.f32 %v3621_v16  ;;  %v3622_v43 = vmul.f32 -1.442695, %v776_v62 }
 0x24e   :  { %4700 = vpow2.f32 %v3622_v43 }
 0x259   :  { %v4699_v4 = vpop.eup %4698 }
 0x25a   :  { %v773_v10 = vadd.f32 1.0, %v4699_v4  ;;  %v7045_v4 = vld [vmem:[#allocation28_spill] sm:$0xff] }
 0x25b   :  { %v4701_v55 = vpop.eup %4700 }
 0x25c   :  { %4702 = vrcp.f32 %v773_v10  ;;  %v780_v25 = vadd.f32 1.0, %v4701_v55  ;;  %v7043_v55 = vld [vmem:[#allocation21_spill] sm:$0xff] }
 0x269   :  { %v4703_v42 = vpop.eup %4702 }
 0x26a   :  { %v783_v45 = vmul.f32 %v4703_v42, %v761_v49  ;;  %v7044_v49 = vld [vmem:[#allocation27_spill] sm:$0xff] }
 0x26c   :  { %v784_v26 = vadd.f32 %v7038_v41, %v783_v45  ;;  %v7042_v41 = vld [vmem:[#allocation24_spill] sm:$0xff] }
 0x26e   :  { %4704 = vtanh.f32 %v784_v26  ;;  %v7041_v26 = vld [vmem:[#allocation23_spill] sm:$0xff] }
 0x26f   :  { %4706 = vrcp.f32 %v780_v25  ;;  %v7040_v25 = vld [vmem:[#allocation22_spill] sm:$0xff] }
 0x27b   :  { %v4705_v44 = vpop.eup %4704 }
 0x27c   :  { %v786_v50 = vsub.f32 %v5494_v22, %v4705_v44  ;;  %v4707_v5 = vpop.eup %4706 }
 0x27e   :  { %v787_v11 = vmul.f32 %v4707_v5, %v786_v50 }
 0x280   :  { %v5569_v16 = vadd.f32 %v4705_v44, %v787_v11 }
 0x282   :  { %7039 = vst [vmem:[#allocation25_spill] sm:$0xff] %v5569_v16  ;;  %856 = vmatmul.mubr.f32.vlgmr.msra.gmra.mxu0 %v5569_v16  ;;  %4136 = vmatmul.mubr.f32.vlgmr.msra.gmra.mxu1 %v5569_v16 }
 0x283   :  { %959 = vmatpush1.msra.mxu0 %v5196_v46  ;;  %4139 = vmatpush3.msra.mxu1 %v5295_v21 }
 0x284   :  { %960 = vmatprep.subr.mxu0 %v5198_v47  ;;  %4140 = vmatprep.subr.mxu1 %v7034_v0 }
 0x285   :  { %961 = vmatpush1.msra.mxu0 %v5202_v48  ;;  %4141 = vmatpush3.msra.mxu1 %v5312_v27 }
 0x286   :  { %962 = vmatprep.subr.mxu0 %v5208_v51  ;;  %4142 = vmatprep.subr.mxu1 %v7034_v0 }
 0x287   :  { %963 = vmatpush1.msra.mxu0 %v5211_v52  ;;  %4143 = vmatpush3.msra.mxu1 %v5318_v28 }
 0x288   :  { %964 = vmatprep.subr.mxu0 %v5214_v53  ;;  %4144 = vmatprep.subr.mxu1 %v7034_v0 }
 0x289   :  { %965 = vmatpush1.msra.mxu0 %v5218_v54  ;;  %4145 = vmatpush3.msra.mxu1 %v5324_v29 }
 0x28a   :  { %966 = vmatprep.subr.mxu0 %v5224_v57  ;;  %4146 = vmatprep.subr.mxu1 %v7034_v0 }
 0x28b   :  { %967 = vmatpush1.msra.mxu0 %v5227_v58  ;;  %4147 = vmatpush3.msra.mxu1 %v5329_v30 }
 0x28c   :  { %968 = vmatprep.subr.mxu0 %v5230_v59  ;;  %4148 = vmatprep.subr.mxu1 %v7034_v0 }
 0x28d   :  { %969 = vmatpush1.msra.mxu0 %v5234_v60  ;;  %4149 = vmatpush3.msra.mxu1 %v5335_v31 }
 0x28e   :  { %970 = vmatprep.subr.mxu0 %v5240_v63  ;;  %4150 = vmatprep.subr.mxu1 %v7034_v0 }
 0x28f   :  { %971 = vmatpush1.msra.mxu0 %v5243_v1  ;;  %4151 = vmatpush3.msra.mxu1 %v5341_v32 }
 0x290   :  { %972 = vmatprep.subr.mxu0 %v5246_v2  ;;  %4152 = vmatprep.subr.mxu1 %v7034_v0 }
 0x291   :  { %973 = vmatpush1.msra.mxu0 %v5250_v3  ;;  %4153 = vmatpush3.msra.mxu1 %v5345_v33 }
 0x292   :  { %974 = vmatprep.subr.mxu0 %v5256_v6  ;;  %4154 = vmatprep.subr.mxu1 %v7034_v0 }
 0x293   :  { %975 = vmatpush1.msra.mxu0 %v5259_v7  ;;  %4155 = vmatpush3.msra.mxu1 %v5351_v34 }
 0x294   :  { %976 = vmatprep.subr.mxu0 %v5262_v8  ;;  %4156 = vmatprep.subr.mxu1 %v7034_v0 }
 0x295   :  { %977 = vmatpush1.msra.mxu0 %v5266_v9  ;;  %4157 = vmatpush3.msra.mxu1 %v5357_v35 }
 0x296   :  { %978 = vmatprep.subr.mxu0 %v5270_v12  ;;  %4158 = vmatprep.subr.mxu1 %v7034_v0 }
 0x297   :  { %979 = vmatpush1.msra.mxu0 %v5273_v13  ;;  %4159 = vmatpush3.msra.mxu1 %v5363_v36 }
 0x298   :  { %980 = vmatprep.subr.mxu0 %v5276_v14  ;;  %4160 = vmatprep.subr.mxu1 %v7034_v0 }
 0x299   :  { %981 = vmatpush1.msra.mxu0 %v5279_v15  ;;  %4161 = vmatpush3.msra.mxu1 %v5369_v37 }
 0x29a   :  { %982 = vmatprep.subr.mxu0 %v5283_v17  ;;  %4162 = vmatprep.subr.mxu1 %v7034_v0 }
 0x29b   :  { %983 = vmatpush1.msra.mxu0 %v5286_v18  ;;  %4163 = vmatpush3.msra.mxu1 %v5375_v38 }
 0x29c   :  { %984 = vmatprep.subr.mxu0 %v5289_v19  ;;  %4164 = vmatprep.subr.mxu1 %v7034_v0 }
 0x29d   :  { %985 = vmatpush1.msra.mxu0 %v5293_v20  ;;  %4165 = vmatpush3.msra.mxu1 %v5381_v39 }
 0x29e   :  { %986 = vmatprep.subr.mxu0 %v5299_v23  ;;  %4166 = vmatprep.subr.mxu1 %v7034_v0 }
 0x29f   :  { %987 = vmatpush1.msra.mxu0 %v5302_v24  ;;  %4167 = vmatpush3.msra.mxu1 %v5387_v40 }
 0x2a0   :  { %988 = vmatprep.subr.mxu0 %v7040_v25  ;;  %4168 = vmatprep.subr.mxu1 %v7034_v0 }
 0x2a1   :  { %989 = vmatpush1.msra.mxu0 %v7041_v26  ;;  %1022 = vmatprep.mubr.f32.mxu0 %v7034_v0 }
 0x2a2   :  { %4169 = vmatpush3.msra.mxu1 %v7042_v41  ;;  %4170 = vmatprep.mubr.msk.f32.mxu1 %vm5106_vm0, %v7034_v0  ;;  %v7046_v41 = vld [vmem:[#allocation41_spill] sm:$0xff] }
 0x2a3   :  { %1125 = vmatprep.subr.mxu0 %v7043_v55  ;;  %4173 = vmatprep.subr.mxu1 %v7034_v0 }
 0x342   :  { %v857_v42 = vpop.f32.mrf.mxu0  ;;  %v928_v45 = vpop.f32.mrf.mxu1 }
 0x343   :  { %v936_v56 = vadd.f32 %v857_v42, %v7044_v49 }
 0x344   :  { %v4137_v61 = vpop.f32.mrf.mxu1  ;;  %v859_v43 = vpop.f32.mrf.mxu0 }
 0x345   :  { %v3623_v62 = vmul.f32 -1.442695, %v936_v56  ;;  %v943_v10 = vadd.f32 %v859_v43, %v7045_v4  ;;  %v5765_v43 = vld [vmem:[#allocation9 + $0xf0] sm:$0xff]  ;;  %v5773_v4 = vld [vmem:[#allocation9 + $0xd8] sm:$0xff] }
 0x347   :  { %4708 = vpow2.f32 %v3623_v62  ;;  %v3624_v44 = vmul.f32 -1.442695, %v943_v10  ;;  %v5781_v10 = vld [vmem:[#allocation9 + $0xc0] sm:$0xff] }
 0x349   :  { %4710 = vpow2.f32 %v3624_v44  ;;  %v5789_v44 = vld [vmem:[#allocation9 + $0xa8] sm:$0xff] }
 0x354   :  { %v4709_v50 = vpop.eup %4708 }
 0x355   :  { %v940_v5 = vadd.f32 1.0, %v4709_v50  ;;  %v5797_v50 = vld [vmem:[#allocation9 + $0x90] sm:$0xff] }
 0x356   :  { %v4711_v11 = vpop.eup %4710 }
 0x357   :  { %4712 = vrcp.f32 %v940_v5  ;;  %v947_v25 = vadd.f32 1.0, %v4711_v11  ;;  %v5805_v5 = vld [vmem:[#allocation9 + $0x78] sm:$0xff]  ;;  %v5813_v11 = vld [vmem:[#allocation9 + $0x60] sm:$0xff] }
 0x364   :  { %v4713_v22 = vpop.eup %4712 }
 0x365   :  { %v950_v55 = vmul.f32 %v4713_v22, %v928_v45  ;;  %v5733_v22 = vld [vmem:[#allocation9 + $0x150] sm:$0xff]  ;;  %v5757_v45 = vld [vmem:[#allocation9 + $0x108] sm:$0xff] }
 0x367   :  { %v951_v26 = vadd.f32 %v950_v55, %v7046_v41  ;;  %v5749_v41 = vld [vmem:[#allocation9 + $0x120] sm:$0xff]  ;;  %v5821_v55 = vld [vmem:[#allocation9 + $0x48] sm:$0xff] }
 0x369   :  { %4714 = vtanh.f32 %v951_v26  ;;  %v5741_v26 = vld [vmem:[#allocation9 + $0x138] sm:$0xff] }
 0x36a   :  { %4716 = vrcp.f32 %v947_v25  ;;  %v5737_v25 = vld [vmem:[#allocation9 + $0x140] sm:$0xff] }
 0x376   :  { %v4715_v42 = vpop.eup %4714 }
 0x377   :  { %v953_v49 = vsub.f32 %v5569_v16, %v4715_v42  ;;  %v4717_v56 = vpop.eup %4716 }
 0x379   :  { %v954_v61 = vmul.f32 %v4717_v56, %v953_v49  ;;  %v5837_v49 = vld [vmem:[#allocation9 + $0x18] sm:$0xff]  ;;  %v5845_v56 = vld [vmem:[#allocation9] sm:$0xff] }
 0x37a   :  { %7056 = vst [vmem:[#allocation27_spill] sm:$0xff] %v5845_v56 }
 0x37b   :  { %v5644_v62 = vadd.f32 %v4715_v42, %v954_v61  ;;  %v5829_v42 = vld [vmem:[#allocation9 + $0x30] sm:$0xff]  ;;  %v7057_v61 = vld [vmem:[#allocation31_spill] sm:$0xff] }
 0x37d   :  { %7047 = vst [vmem:[#allocation26_spill] sm:$0xff] %v5644_v62  ;;  %1023 = vmatmul.mubr.f32.vlgmr.msra.gmra.mxu0 %v5644_v62  ;;  %4171 = vmatmul.mubr.f32.vlgmr.msra.gmra.mxu1 %v5644_v62 }
 0x37e   :  { %1126 = vmatpush1.msra.mxu0 %v5196_v46  ;;  %4174 = vmatpush3.msra.mxu1 %v5295_v21  ;;  %v7048_v46 = vld [vmem:[#allocation22_spill] sm:$0xff] }
 0x37f   :  { %1127 = vmatprep.subr.mxu0 %v5198_v47  ;;  %4175 = vmatprep.subr.mxu1 %v7034_v0  ;;  %v7049_v47 = vld [vmem:[#allocation23_spill] sm:$0xff] }
 0x380   :  { %1128 = vmatpush1.msra.mxu0 %v5202_v48  ;;  %4176 = vmatpush3.msra.mxu1 %v5312_v27  ;;  %v7050_v48 = vld [vmem:[#allocation24_spill] sm:$0xff] }
 0x381   :  { %1129 = vmatprep.subr.mxu0 %v5208_v51  ;;  %4177 = vmatprep.subr.mxu1 %v7034_v0  ;;  %v5713_v51 = vld [vmem:[#allocation9 + $0x170] sm:$0xff] }
 0x382   :  { %1130 = vmatpush1.msra.mxu0 %v5211_v52  ;;  %4178 = vmatpush3.msra.mxu1 %v5318_v28 }
 0x383   :  { %1131 = vmatprep.subr.mxu0 %v5214_v53  ;;  %4179 = vmatprep.subr.mxu1 %v7034_v0 }
 0x384   :  { %1132 = vmatpush1.msra.mxu0 %v5218_v54  ;;  %4180 = vmatpush3.msra.mxu1 %v5324_v29  ;;  %v7051_v54 = vld [vmem:[#allocation29_spill] sm:$0xff] }
 0x385   :  { %1133 = vmatprep.subr.mxu0 %v5224_v57  ;;  %4181 = vmatprep.subr.mxu1 %v7034_v0 }
 0x386   :  { %1134 = vmatpush1.msra.mxu0 %v5227_v58  ;;  %4182 = vmatpush3.msra.mxu1 %v5329_v30 }
 0x387   :  { %1135 = vmatprep.subr.mxu0 %v5230_v59  ;;  %4183 = vmatprep.subr.mxu1 %v7034_v0 }
 0x388   :  { %1136 = vmatpush1.msra.mxu0 %v5234_v60  ;;  %4184 = vmatpush3.msra.mxu1 %v5335_v31 }
 0x389   :  { %1137 = vmatprep.subr.mxu0 %v5240_v63  ;;  %4185 = vmatprep.subr.mxu1 %v7034_v0  ;;  %v7052_v63 = vld [vmem:[#allocation30_spill] sm:$0xff] }
 0x38a   :  { %1138 = vmatpush1.msra.mxu0 %v5243_v1  ;;  %4186 = vmatpush3.msra.mxu1 %v5341_v32 }
 0x38b   :  { %1139 = vmatprep.subr.mxu0 %v5246_v2  ;;  %4187 = vmatprep.subr.mxu1 %v7034_v0 }
 0x38c   :  { %1140 = vmatpush1.msra.mxu0 %v5250_v3  ;;  %4188 = vmatpush3.msra.mxu1 %v5345_v33 }
 0x38d   :  { %1141 = vmatprep.subr.mxu0 %v5256_v6  ;;  %4189 = vmatprep.subr.mxu1 %v7034_v0 }
 0x38e   :  { %1142 = vmatpush1.msra.mxu0 %v5259_v7  ;;  %4190 = vmatpush3.msra.mxu1 %v5351_v34 }
 0x38f   :  { %1143 = vmatprep.subr.mxu0 %v5262_v8  ;;  %4191 = vmatprep.subr.mxu1 %v7034_v0 }
 0x390   :  { %1144 = vmatpush1.msra.mxu0 %v5266_v9  ;;  %4192 = vmatpush3.msra.mxu1 %v5357_v35 }
 0x391   :  { %1145 = vmatprep.subr.mxu0 %v5270_v12  ;;  %4193 = vmatprep.subr.mxu1 %v7034_v0  ;;  %v7053_v12 = vld [vmem:[#allocation40_spill] sm:$0xff] }
 0x392   :  { %1146 = vmatpush1.msra.mxu0 %v5273_v13  ;;  %4194 = vmatpush3.msra.mxu1 %v5363_v36 }
 0x393   :  { %1147 = vmatprep.subr.mxu0 %v5276_v14  ;;  %4195 = vmatprep.subr.mxu1 %v7034_v0 }
 0x394   :  { %1148 = vmatpush1.msra.mxu0 %v5279_v15  ;;  %4196 = vmatpush3.msra.mxu1 %v5369_v37 }
 0x395   :  { %1149 = vmatprep.subr.mxu0 %v5283_v17  ;;  %4197 = vmatprep.subr.mxu1 %v7034_v0 }
 0x396   :  { %1150 = vmatpush1.msra.mxu0 %v5286_v18  ;;  %4198 = vmatpush3.msra.mxu1 %v5375_v38 }
 0x397   :  { %1151 = vmatprep.subr.mxu0 %v5289_v19  ;;  %4199 = vmatprep.subr.mxu1 %v7034_v0 }
 0x398   :  { %1152 = vmatpush1.msra.mxu0 %v5293_v20  ;;  %4200 = vmatpush3.msra.mxu1 %v5381_v39 }
 0x399   :  { %1153 = vmatprep.subr.mxu0 %v5299_v23  ;;  %4201 = vmatprep.subr.mxu1 %v7034_v0  ;;  %v5725_v23 = vld [vmem:[#allocation9 + $0x168] sm:$0xff] }
 0x39a   :  { %1154 = vmatpush1.msra.mxu0 %v5302_v24  ;;  %4202 = vmatpush3.msra.mxu1 %v5387_v40  ;;  %v5729_v24 = vld [vmem:[#allocation9 + $0x158] sm:$0xff] }
 0x39b   :  { %1155 = vmatprep.subr.mxu0 %v7048_v46  ;;  %4203 = vmatprep.subr.mxu1 %v7034_v0 }
 0x39c   :  { %1156 = vmatpush1.msra.mxu0 %v7049_v47  ;;  %1189 = vmatprep.mubr.f32.mxu0 %v7034_v0 }
 0x39d   :  { %4204 = vmatpush3.msra.mxu1 %v7050_v48  ;;  %4205 = vmatprep.mubr.msk.f32.mxu1 %vm5106_vm0, %v7034_v0 }
 0x39e   :  { %1292 = vmatprep.subr.mxu0 %v5713_v51  ;;  %4208 = vmatprep.subr.mxu1 %v7034_v0 }
 0x43d   :  { %v1024_v52 = vpop.f32.mrf.mxu0  ;;  %v1095_v53 = vpop.f32.mrf.mxu1 }
 0x43e   :  { %v1103_v57 = vadd.f32 %v1024_v52, %v7051_v54  ;;  %v7058_v54 = vld [vmem:[#allocation32_spill] sm:$0xff] }
 0x43f   :  { %v4172_v58 = vpop.f32.mrf.mxu1  ;;  %v1026_v60 = vpop.f32.mrf.mxu0 }
 0x440   :  { %v3625_v59 = vmul.f32 -1.442695, %v1103_v57  ;;  %v1110_v1 = vadd.f32 %v1026_v60, %v7052_v63 }
 0x442   :  { %4718 = vpow2.f32 %v3625_v59  ;;  %v3626_v2 = vmul.f32 -1.442695, %v1110_v1 }
 0x444   :  { %4720 = vpow2.f32 %v3626_v2  ;;  %v7059_v2 = vld [vmem:[#allocation43_spill] sm:$0xff] }
 0x44f   :  { %v4719_v3 = vpop.eup %4718 }
 0x450   :  { %v1107_v6 = vadd.f32 1.0, %v4719_v3 }
 0x451   :  { %v4721_v7 = vpop.eup %4720 }
 0x452   :  { %4722 = vrcp.f32 %v1107_v6  ;;  %v1114_v14 = vadd.f32 1.0, %v4721_v7 }
 0x45f   :  { %v4723_v8 = vpop.eup %4722 }
 0x460   :  { %v1117_v9 = vmul.f32 %v4723_v8, %v1095_v53 }
 0x462   :  { %v1118_v13 = vadd.f32 %v7053_v12, %v1117_v9 }
 0x464   :  { %4724 = vtanh.f32 %v1118_v13 }
 0x465   :  { %4726 = vrcp.f32 %v1114_v14  ;;  %v5863_v14 = vld [vmem:[#allocation9 + $0x178] sm:$0xff] }
 0x471   :  { %v4725_v15 = vpop.eup %4724 }
 0x472   :  { %v1120_v17 = vsub.f32 %v5644_v62, %v4725_v15  ;;  %v4727_v18 = vpop.eup %4726 }
 0x474   :  { %v1121_v19 = vmul.f32 %v4727_v18, %v1120_v17  ;;  %v5875_v17 = vld [vmem:[#allocation9 + $0x148] sm:$0xff]  ;;  %v5881_v18 = vld [vmem:[#allocation9 + $0x130] sm:$0xff] }
 0x476   :  { %v5721_v20 = vadd.f32 %v4725_v15, %v1121_v19  ;;  %v5869_v15 = vld [vmem:[#allocation9 + $0x160] sm:$0xff]  ;;  %v5887_v19 = vld [vmem:[#allocation9 + $0x118] sm:$0xff] }
 0x478   :  { %7054 = vst [vmem:[#allocation39_spill] sm:$0xff] %v5721_v20  ;;  %1190 = vmatmul.mubr.f32.vlgmr.msra.gmra.mxu0 %v5721_v20  ;;  %4206 = vmatmul.mubr.f32.vlgmr.msra.gmra.mxu1 %v5721_v20 }
 0x479   :  { %1293 = vmatpush1.msra.mxu0 %v5725_v23  ;;  %4209 = vmatpush3.msra.mxu1 %v5295_v21  ;;  %v5745_v21 = vld [vmem:[#allocation9 + $0x128] sm:$0xff] }
 0x47a   :  { %1294 = vmatprep.subr.mxu0 %v5729_v24  ;;  %4210 = vmatprep.subr.mxu1 %v7034_v0 }
 0x47b   :  { %1295 = vmatpush1.msra.mxu0 %v5733_v22  ;;  %4211 = vmatpush3.msra.mxu1 %v5312_v27  ;;  %v5753_v27 = vld [vmem:[#allocation9 + $0x110] sm:$0xff] }
 0x47c   :  { %1296 = vmatprep.subr.mxu0 %v5737_v25  ;;  %4212 = vmatprep.subr.mxu1 %v7034_v0 }
 0x47d   :  { %1297 = vmatpush1.msra.mxu0 %v5741_v26  ;;  %4213 = vmatpush3.msra.mxu1 %v5318_v28  ;;  %v5761_v28 = vld [vmem:[#allocation9 + $0xf8] sm:$0xff] }
 0x47e   :  { %1298 = vmatprep.subr.mxu0 %v5745_v21  ;;  %4214 = vmatprep.subr.mxu1 %v7034_v0 }
 0x47f   :  { %1299 = vmatpush1.msra.mxu0 %v5749_v41  ;;  %4215 = vmatpush3.msra.mxu1 %v5324_v29  ;;  %v5769_v29 = vld [vmem:[#allocation9 + $0xe0] sm:$0xff] }
 0x480   :  { %1300 = vmatprep.subr.mxu0 %v5753_v27  ;;  %4216 = vmatprep.subr.mxu1 %v7034_v0 }
 0x481   :  { %1301 = vmatpush1.msra.mxu0 %v5757_v45  ;;  %4217 = vmatpush3.msra.mxu1 %v5329_v30  ;;  %v5777_v30 = vld [vmem:[#allocation9 + $0xc8] sm:$0xff] }
 0x482   :  { %1302 = vmatprep.subr.mxu0 %v5761_v28  ;;  %4218 = vmatprep.subr.mxu1 %v7034_v0 }
 0x483   :  { %1303 = vmatpush1.msra.mxu0 %v5765_v43  ;;  %4219 = vmatpush3.msra.mxu1 %v5335_v31  ;;  %v5785_v31 = vld [vmem:[#allocation9 + $0xb0] sm:$0xff] }
 0x484   :  { %1304 = vmatprep.subr.mxu0 %v5769_v29  ;;  %4220 = vmatprep.subr.mxu1 %v7034_v0 }
 0x485   :  { %1305 = vmatpush1.msra.mxu0 %v5773_v4  ;;  %4221 = vmatpush3.msra.mxu1 %v5341_v32  ;;  %v5793_v32 = vld [vmem:[#allocation9 + $0x98] sm:$0xff] }
 0x486   :  { %1306 = vmatprep.subr.mxu0 %v5777_v30  ;;  %4222 = vmatprep.subr.mxu1 %v7034_v0 }
 0x487   :  { %1307 = vmatpush1.msra.mxu0 %v5781_v10  ;;  %4223 = vmatpush3.msra.mxu1 %v5345_v33  ;;  %v5801_v33 = vld [vmem:[#allocation9 + $0x80] sm:$0xff] }
 0x488   :  { %1308 = vmatprep.subr.mxu0 %v5785_v31  ;;  %4224 = vmatprep.subr.mxu1 %v7034_v0 }
 0x489   :  { %1309 = vmatpush1.msra.mxu0 %v5789_v44  ;;  %4225 = vmatpush3.msra.mxu1 %v5351_v34  ;;  %v5809_v34 = vld [vmem:[#allocation9 + $0x68] sm:$0xff] }
 0x48a   :  { %1310 = vmatprep.subr.mxu0 %v5793_v32  ;;  %4226 = vmatprep.subr.mxu1 %v7034_v0 }
 0x48b   :  { %1311 = vmatpush1.msra.mxu0 %v5797_v50  ;;  %4227 = vmatpush3.msra.mxu1 %v5357_v35  ;;  %v5817_v35 = vld [vmem:[#allocation9 + $0x50] sm:$0xff] }
 0x48c   :  { %1312 = vmatprep.subr.mxu0 %v5801_v33  ;;  %4228 = vmatprep.subr.mxu1 %v7034_v0 }
 0x48d   :  { %1313 = vmatpush1.msra.mxu0 %v5805_v5  ;;  %4229 = vmatpush3.msra.mxu1 %v5363_v36  ;;  %v5825_v36 = vld [vmem:[#allocation9 + $0x38] sm:$0xff] }
 0x48e   :  { %1314 = vmatprep.subr.mxu0 %v5809_v34  ;;  %4230 = vmatprep.subr.mxu1 %v7034_v0 }
 0x48f   :  { %1315 = vmatpush1.msra.mxu0 %v5813_v11  ;;  %4231 = vmatpush3.msra.mxu1 %v5369_v37  ;;  %v5833_v37 = vld [vmem:[#allocation9 + $0x20] sm:$0xff] }
 0x490   :  { %1316 = vmatprep.subr.mxu0 %v5817_v35  ;;  %4232 = vmatprep.subr.mxu1 %v7034_v0 }
 0x491   :  { %1317 = vmatpush1.msra.mxu0 %v5821_v55  ;;  %4233 = vmatpush3.msra.mxu1 %v5375_v38  ;;  %v5841_v38 = vld [vmem:[#allocation9 + $0x8] sm:$0xff] }
 0x492   :  { %1318 = vmatprep.subr.mxu0 %v5825_v36  ;;  %4234 = vmatprep.subr.mxu1 %v7034_v0  ;;  %7055 = vst [vmem:[#allocation21_spill] sm:$0xff] %v5841_v38 }
 0x493   :  { %1319 = vmatpush1.msra.mxu0 %v5829_v42  ;;  %4235 = vmatpush3.msra.mxu1 %v5381_v39 }
 0x494   :  { %1320 = vmatprep.subr.mxu0 %v5833_v37  ;;  %4236 = vmatprep.subr.mxu1 %v7034_v0 }
 0x495   :  { %1321 = vmatpush1.msra.mxu0 %v5837_v49  ;;  %4237 = vmatpush3.msra.mxu1 %v5387_v40 }
 0x496   :  { %1322 = vmatprep.subr.mxu0 %v5841_v38  ;;  %4238 = vmatprep.subr.mxu1 %v7034_v0 }
 0x497   :  { %1323 = vmatpush1.msra.mxu0 %v5845_v56  ;;  %1356 = vmatprep.mubr.f32.mxu0 %v7034_v0 }
 0x498   :  { %4239 = vmatpush3.msra.mxu1 %v7050_v48  ;;  %4240 = vmatprep.mubr.msk.f32.mxu1 %vm5106_vm0, %v7034_v0 }
 0x499   :  { %1459 = vmatprep.subr.mxu0 %v5713_v51  ;;  %4243 = vmatprep.subr.mxu1 %v7034_v0 }
 0x538   :  { %v1191_v39 = vpop.f32.mrf.mxu0  ;;  %v1262_v40 = vpop.f32.mrf.mxu1 }
 0x539   :  { %v1270_v46 = vadd.f32 %v1191_v39, %v7057_v61  ;;  %v5893_v39 = vld [vmem:[#allocation9 + $0x100] sm:$0xff]  ;;  %v5905_v61 = vld [vmem:[#allocation9 + $0xd0] sm:$0xff] }
 0x53a   :  { %v4207_v47 = vpop.f32.mrf.mxu1  ;;  %v1193_v53 = vpop.f32.mrf.mxu0 }
 0x53b   :  { %v3627_v52 = vmul.f32 -1.442695, %v1270_v46  ;;  %v1277_v57 = vadd.f32 %v1193_v53, %v7058_v54  ;;  %v5911_v46 = vld [vmem:[#allocation9 + $0xb8] sm:$0xff]  ;;  %v5917_v47 = vld [vmem:[#allocation9 + $0xa0] sm:$0xff]  ;;  %v5929_v53 = vld [vmem:[#allocation9 + $0x70] sm:$0xff] }
 0x53c   :  { %v5935_v54 = vld [vmem:[#allocation9 + $0x58] sm:$0xff] }
 0x53d   :  { %4728 = vpow2.f32 %v3627_v52  ;;  %v3628_v58 = vmul.f32 -1.442695, %v1277_v57  ;;  %v5923_v52 = vld [vmem:[#allocation9 + $0x88] sm:$0xff]  ;;  %v5941_v57 = vld [vmem:[#allocation9 + $0x40] sm:$0xff] }
 0x53f   :  { %4730 = vpow2.f32 %v3628_v58  ;;  %v5947_v58 = vld [vmem:[#allocation9 + $0x28] sm:$0xff] }
 0x54a   :  { %v4729_v59 = vpop.eup %4728 }
 0x54b   :  { %v1274_v48 = vadd.f32 1.0, %v4729_v59  ;;  %v5954_v59 = vld [vmem:[#allocation9 + $0x10] sm:$0xff] }
 0x54c   :  { %v4731_v60 = vpop.eup %4730  ;;  %7060 = vst [vmem:[#allocation28_spill] sm:$0xff] %v5954_v59 }
 0x54d   :  { %4732 = vrcp.f32 %v1274_v48  ;;  %v1281_v6 = vadd.f32 1.0, %v4731_v60 }
 0x55a   :  { %v4733_v63 = vpop.eup %4732 }
 0x55b   :  { %v1284_v1 = vmul.f32 %v4733_v63, %v1262_v40  ;;  %v5899_v40 = vld [vmem:[#allocation9 + $0xe8] sm:$0xff] }
 0x55c   :  { %v7061_v63 = vld [vmem:[#allocation33_spill] sm:$0xff] }
 0x55d   :  { %v1285_v3 = vadd.f32 %v1284_v1, %v7059_v2 }
 0x55f   :  { %4734 = vtanh.f32 %v1285_v3 }
 0x560   :  { %4736 = vrcp.f32 %v1281_v6 }
 0x56c   :  { %v4735_v7 = vpop.eup %4734 }
 0x56d   :  { %v1287_v8 = vsub.f32 %v5721_v20, %v4735_v7  ;;  %v4737_v9 = vpop.eup %4736 }
 0x56f   :  { %v1288_v12 = vmul.f32 %v4737_v9, %v1287_v8 }
 0x571   :  { %v5858_v13 = vadd.f32 %v4735_v7, %v1288_v12  ;;  %v7062_v7 = vld [vmem:[#allocation34_spill] sm:$0xff] }
 0x573   :  { %1357 = vmatmul.mubr.f32.vlgmr.msra.gmra.mxu0 %v5858_v13  ;;  %4241 = vmatmul.mubr.f32.vlgmr.msra.gmra.mxu1 %v5858_v13 }
 0x574   :  { %1460 = vmatpush1.msra.mxu0 %v5725_v23  ;;  %4244 = vmatpush3.msra.mxu1 %v5863_v14 }
 0x575   :  { %1461 = vmatprep.subr.mxu0 %v5729_v24  ;;  %4245 = vmatprep.subr.mxu1 %v7034_v0 }
 0x576   :  { %1462 = vmatpush1.msra.mxu0 %v5733_v22  ;;  %4246 = vmatpush3.msra.mxu1 %v5869_v15 }
 0x577   :  { %1463 = vmatprep.subr.mxu0 %v5737_v25  ;;  %4247 = vmatprep.subr.mxu1 %v7034_v0 }
 0x578   :  { %1464 = vmatpush1.msra.mxu0 %v5741_v26  ;;  %4248 = vmatpush3.msra.mxu1 %v5875_v17 }
 0x579   :  { %1465 = vmatprep.subr.mxu0 %v5745_v21  ;;  %4249 = vmatprep.subr.mxu1 %v7034_v0 }
 0x57a   :  { %1466 = vmatpush1.msra.mxu0 %v5749_v41  ;;  %4250 = vmatpush3.msra.mxu1 %v5881_v18 }
 0x57b   :  { %1467 = vmatprep.subr.mxu0 %v5753_v27  ;;  %4251 = vmatprep.subr.mxu1 %v7034_v0 }
 0x57c   :  { %1468 = vmatpush1.msra.mxu0 %v5757_v45  ;;  %4252 = vmatpush3.msra.mxu1 %v5887_v19 }
 0x57d   :  { %1469 = vmatprep.subr.mxu0 %v5761_v28  ;;  %4253 = vmatprep.subr.mxu1 %v7034_v0 }
 0x57e   :  { %1470 = vmatpush1.msra.mxu0 %v5765_v43  ;;  %4254 = vmatpush3.msra.mxu1 %v5893_v39 }
 0x57f   :  { %1471 = vmatprep.subr.mxu0 %v5769_v29  ;;  %4255 = vmatprep.subr.mxu1 %v7034_v0 }
 0x580   :  { %1472 = vmatpush1.msra.mxu0 %v5773_v4  ;;  %4256 = vmatpush3.msra.mxu1 %v5899_v40 }
 0x581   :  { %1473 = vmatprep.subr.mxu0 %v5777_v30  ;;  %4257 = vmatprep.subr.mxu1 %v7034_v0 }
 0x582   :  { %1474 = vmatpush1.msra.mxu0 %v5781_v10  ;;  %4258 = vmatpush3.msra.mxu1 %v5905_v61 }
 0x583   :  { %1475 = vmatprep.subr.mxu0 %v5785_v31  ;;  %4259 = vmatprep.subr.mxu1 %v7034_v0 }
 0x584   :  { %1476 = vmatpush1.msra.mxu0 %v5789_v44  ;;  %4260 = vmatpush3.msra.mxu1 %v5911_v46 }
 0x585   :  { %1477 = vmatprep.subr.mxu0 %v5793_v32  ;;  %4261 = vmatprep.subr.mxu1 %v7034_v0 }
 0x586   :  { %1478 = vmatpush1.msra.mxu0 %v5797_v50  ;;  %4262 = vmatpush3.msra.mxu1 %v5917_v47 }
 0x587   :  { %1479 = vmatprep.subr.mxu0 %v5801_v33  ;;  %4263 = vmatprep.subr.mxu1 %v7034_v0 }
 0x588   :  { %1480 = vmatpush1.msra.mxu0 %v5805_v5  ;;  %4264 = vmatpush3.msra.mxu1 %v5923_v52 }
 0x589   :  { %1481 = vmatprep.subr.mxu0 %v5809_v34  ;;  %4265 = vmatprep.subr.mxu1 %v7034_v0 }
 0x58a   :  { %1482 = vmatpush1.msra.mxu0 %v5813_v11  ;;  %4266 = vmatpush3.msra.mxu1 %v5929_v53 }
 0x58b   :  { %1483 = vmatprep.subr.mxu0 %v5817_v35  ;;  %4267 = vmatprep.subr.mxu1 %v7034_v0 }
 0x58c   :  { %1484 = vmatpush1.msra.mxu0 %v5821_v55  ;;  %4268 = vmatpush3.msra.mxu1 %v5935_v54 }
 0x58d   :  { %1485 = vmatprep.subr.mxu0 %v5825_v36  ;;  %4269 = vmatprep.subr.mxu1 %v7034_v0 }
 0x58e   :  { %1486 = vmatpush1.msra.mxu0 %v5829_v42  ;;  %4270 = vmatpush3.msra.mxu1 %v5941_v57 }
 0x58f   :  { %1487 = vmatprep.subr.mxu0 %v5833_v37  ;;  %4271 = vmatprep.subr.mxu1 %v7034_v0 }
 0x590   :  { %1488 = vmatpush1.msra.mxu0 %v5837_v49  ;;  %4272 = vmatpush3.msra.mxu1 %v5947_v58 }
 0x591   :  { %1489 = vmatprep.subr.mxu0 %v5841_v38  ;;  %4273 = vmatprep.subr.mxu1 %v7034_v0 }
 0x592   :  { %1490 = vmatpush1.msra.mxu0 %v5845_v56  ;;  %1523 = vmatprep.mubr.f32.mxu0 %v7034_v0 }
 0x593   :  { %4274 = vmatpush3.msra.mxu1 %v5954_v59  ;;  %4275 = vmatprep.mubr.msk.f32.mxu1 %vm5106_vm0, %v7034_v0  ;;  %v7063_v59 = vld [vmem:[#allocation42_spill] sm:$0xff] }
 0x594   :  { %1626 = vmatprep.subr.mxu0 %v5713_v51  ;;  %4278 = vmatprep.subr.mxu1 %v7034_v0 }
 0x633   :  { %v1358_v48 = vpop.f32.mrf.mxu0  ;;  %v1429_v60 = vpop.f32.mrf.mxu1 }
 0x634   :  { %v1437_v1 = vadd.f32 %v1358_v48, %v7061_v63 }
 0x635   :  { %v4242_v2 = vpop.f32.mrf.mxu1  ;;  %v1360_v6 = vpop.f32.mrf.mxu0 }
 0x636   :  { %v3629_v3 = vmul.f32 -1.442695, %v1437_v1  ;;  %v1444_v8 = vadd.f32 %v1360_v6, %v7062_v7  ;;  %v1815_v6 = vld [vmem:[#allocation10 + $0xb0] sm:$0xff]  ;;  %v1816_v7 = vld [vmem:[#allocation10 + $0xb8] sm:$0xff] }
 0x638   :  { %4738 = vpow2.f32 %v3629_v3  ;;  %v3630_v9 = vmul.f32 -1.442695, %v1444_v8  ;;  %v1814_v8 = vld [vmem:[#allocation10 + $0xa8] sm:$0xff] }
 0x63a   :  { %4740 = vpow2.f32 %v3630_v9  ;;  %v1812_v9 = vld [vmem:[#allocation10 + $0x98] sm:$0xff] }
 0x645   :  { %v4739_v12 = vpop.eup %4738 }
 0x646   :  { %v1441_v20 = vadd.f32 1.0, %v4739_v12  ;;  %v1813_v12 = vld [vmem:[#allocation10 + $0xa0] sm:$0xff] }
 0x647   :  { %v4741_v62 = vpop.eup %4740 }
 0x648   :  { %4742 = vrcp.f32 %v1441_v20  ;;  %v1448_v38 = vadd.f32 1.0, %v4741_v62  ;;  %v7065_v62 = vld [vmem:[#allocation27_spill] sm:$0xff]  ;;  %v7066_v20 = vld [vmem:[#allocation28_spill] sm:$0xff] }
 0x655   :  { %v4743_v16 = vpop.eup %4742 }
 0x656   :  { %v1451_v51 = vmul.f32 %v4743_v16, %v1429_v60  ;;  %v7064_v16 = vld [vmem:[#allocation21_spill] sm:$0xff]  ;;  %v1817_v60 = vld [vmem:[#allocation10 + $0xc0] sm:$0xff] }
 0x658   :  { %v1452_v56 = vadd.f32 %v7063_v59, %v1451_v51  ;;  %v1819_v59 = vld [vmem:[#allocation10 + $0xd0] sm:$0xff] }
 0x659   :  { %v1811_v51 = vld [vmem:[#allocation10 + $0x90] sm:$0xff] }
 0x65a   :  { %4744 = vtanh.f32 %v1452_v56  ;;  %v1834_v56 = vld [vmem:[#allocation10 + $0x148] sm:$0xff] }
 0x65b   :  { %4746 = vrcp.f32 %v1448_v38  ;;  %v1833_v38 = vld [vmem:[#allocation10 + $0x140] sm:$0xff] }
 0x667   :  { %v4745_v48 = vpop.eup %4744 }
 0x668   :  { %v1454_v63 = vsub.f32 %v5858_v13, %v4745_v48  ;;  %v4747_v1 = vpop.eup %4746 }
 0x66a   :  { %v1455_v2 = vmul.f32 %v4747_v1, %v1454_v63  ;;  %v1810_v63 = vld [vmem:[#allocation10 + $0x88] sm:$0xff]  ;;  %v1808_v1 = vld [vmem:[#allocation10 + $0x78] sm:$0xff] }
 0x66c   :  { %v5965_v3 = vadd.f32 %v4745_v48, %v1455_v2  ;;  %v1809_v48 = vld [vmem:[#allocation10 + $0x80] sm:$0xff]  ;;  %v1806_v2 = vld [vmem:[#allocation10 + $0x68] sm:$0xff] }
 0x66e   :  { %1524 = vmatmul.mubr.f32.vlgmr.msra.gmra.mxu0 %v5965_v3  ;;  %4276 = vmatmul.mubr.f32.vlgmr.msra.gmra.mxu1 %v5965_v3 }
 0x66f   :  { %1627 = vmatpush1.msra.mxu0 %v5725_v23  ;;  %4279 = vmatpush3.msra.mxu1 %v5863_v14  ;;  %v1839_v23 = vld [vmem:[#allocation10 + $0x170] sm:$0xff]  ;;  %v1832_v14 = vld [vmem:[#allocation10 + $0x138] sm:$0xff] }
 0x670   :  { %1628 = vmatprep.subr.mxu0 %v5729_v24  ;;  %4280 = vmatprep.subr.mxu1 %v7034_v0  ;;  %v1840_v24 = vld [vmem:[#allocation10 + $0x178] sm:$0xff] }
 0x671   :  { %1629 = vmatpush1.msra.mxu0 %v5733_v22  ;;  %4281 = vmatpush3.msra.mxu1 %v5869_v15  ;;  %v7070_v15 = vld [vmem:[#allocation46_spill] sm:$0xff] }
 0x672   :  { %1630 = vmatprep.subr.mxu0 %v5737_v25  ;;  %4282 = vmatprep.subr.mxu1 %v7034_v0 }
 0x673   :  { %1631 = vmatpush1.msra.mxu0 %v5741_v26  ;;  %4283 = vmatpush3.msra.mxu1 %v5875_v17  ;;  %v7067_v26 = vld [vmem:[#allocation35_spill] sm:$0xff]  ;;  %v1830_v17 = vld [vmem:[#allocation10 + $0x128] sm:$0xff] }
 0x674   :  { %1632 = vmatprep.subr.mxu0 %v5745_v21  ;;  %4284 = vmatprep.subr.mxu1 %v7034_v0 }
 0x675   :  { %1633 = vmatpush1.msra.mxu0 %v5749_v41  ;;  %4285 = vmatpush3.msra.mxu1 %v5881_v18  ;;  %v1831_v18 = vld [vmem:[#allocation10 + $0x130] sm:$0xff] }
 0x676   :  { %1634 = vmatprep.subr.mxu0 %v5753_v27  ;;  %4286 = vmatprep.subr.mxu1 %v7034_v0 }
 0x677   :  { %1635 = vmatpush1.msra.mxu0 %v5757_v45  ;;  %4287 = vmatpush3.msra.mxu1 %v5887_v19  ;;  %v1829_v19 = vld [vmem:[#allocation10 + $0x120] sm:$0xff] }
 0x678   :  { %1636 = vmatprep.subr.mxu0 %v5761_v28  ;;  %4288 = vmatprep.subr.mxu1 %v7034_v0  ;;  %v7068_v28 = vld [vmem:[#allocation36_spill] sm:$0xff] }
 0x679   :  { %1637 = vmatpush1.msra.mxu0 %v5765_v43  ;;  %4289 = vmatpush3.msra.mxu1 %v5893_v39  ;;  %v1827_v39 = vld [vmem:[#allocation10 + $0x110] sm:$0xff] }
 0x67a   :  { %1638 = vmatprep.subr.mxu0 %v5769_v29  ;;  %4290 = vmatprep.subr.mxu1 %v7034_v0 }
 0x67b   :  { %1639 = vmatpush1.msra.mxu0 %v5773_v4  ;;  %4291 = vmatpush3.msra.mxu1 %v5899_v40  ;;  %v1828_v40 = vld [vmem:[#allocation10 + $0x118] sm:$0xff] }
 0x67c   :  { %1640 = vmatprep.subr.mxu0 %v5777_v30  ;;  %4292 = vmatprep.subr.mxu1 %v7034_v0 }
 0x67d   :  { %1641 = vmatpush1.msra.mxu0 %v5781_v10  ;;  %4293 = vmatpush3.msra.mxu1 %v5905_v61  ;;  %v1826_v61 = vld [vmem:[#allocation10 + $0x108] sm:$0xff] }
 0x67e   :  { %1642 = vmatprep.subr.mxu0 %v5785_v31  ;;  %4294 = vmatprep.subr.mxu1 %v7034_v0 }
 0x67f   :  { %1643 = vmatpush1.msra.mxu0 %v5789_v44  ;;  %4295 = vmatpush3.msra.mxu1 %v5911_v46  ;;  %v1824_v46 = vld [vmem:[#allocation10 + $0xf8] sm:$0xff] }
 0x680   :  { %1644 = vmatprep.subr.mxu0 %v5793_v32  ;;  %4296 = vmatprep.subr.mxu1 %v7034_v0  ;;  %v7069_v32 = vld [vmem:[#allocation45_spill] sm:$0xff] }
 0x681   :  { %1645 = vmatpush1.msra.mxu0 %v5797_v50  ;;  %4297 = vmatpush3.msra.mxu1 %v5917_v47  ;;  %v1825_v47 = vld [vmem:[#allocation10 + $0x100] sm:$0xff] }
 0x682   :  { %1646 = vmatprep.subr.mxu0 %v5801_v33  ;;  %4298 = vmatprep.subr.mxu1 %v7034_v0 }
 0x683   :  { %1647 = vmatpush1.msra.mxu0 %v5805_v5  ;;  %4299 = vmatpush3.msra.mxu1 %v5923_v52  ;;  %v1823_v52 = vld [vmem:[#allocation10 + $0xf0] sm:$0xff] }
 0x684   :  { %1648 = vmatprep.subr.mxu0 %v5809_v34  ;;  %4300 = vmatprep.subr.mxu1 %v7034_v0 }
 0x685   :  { %1649 = vmatpush1.msra.mxu0 %v5813_v11  ;;  %4301 = vmatpush3.msra.mxu1 %v5929_v53  ;;  %v1821_v53 = vld [vmem:[#allocation10 + $0xe0] sm:$0xff] }
 0x686   :  { %1650 = vmatprep.subr.mxu0 %v5817_v35  ;;  %4302 = vmatprep.subr.mxu1 %v7034_v0 }
 0x687   :  { %1651 = vmatpush1.msra.mxu0 %v5821_v55  ;;  %4303 = vmatpush3.msra.mxu1 %v5935_v54  ;;  %v1822_v54 = vld [vmem:[#allocation10 + $0xe8] sm:$0xff] }
 0x688   :  { %1652 = vmatprep.subr.mxu0 %v5825_v36  ;;  %4304 = vmatprep.subr.mxu1 %v7034_v0  ;;  %v1838_v36 = vld [vmem:[#allocation10 + $0x168] sm:$0xff] }
 0x689   :  { %1653 = vmatpush1.msra.mxu0 %v5829_v42  ;;  %4305 = vmatpush3.msra.mxu1 %v5941_v57  ;;  %v1836_v42 = vld [vmem:[#allocation10 + $0x158] sm:$0xff] }
 0x68a   :  { %1654 = vmatprep.subr.mxu0 %v5833_v37  ;;  %4306 = vmatprep.subr.mxu1 %v7034_v0  ;;  %v1837_v37 = vld [vmem:[#allocation10 + $0x160] sm:$0xff]  ;;  %v1820_v57 = vld [vmem:[#allocation10 + $0xd8] sm:$0xff] }
 0x68b   :  { %1655 = vmatpush1.msra.mxu0 %v5837_v49  ;;  %4307 = vmatpush3.msra.mxu1 %v5947_v58  ;;  %v1835_v49 = vld [vmem:[#allocation10 + $0x150] sm:$0xff]  ;;  %v1818_v58 = vld [vmem:[#allocation10 + $0xc8] sm:$0xff] }
 0x68c   :  { %1656 = vmatprep.subr.mxu0 %v7064_v16  ;;  %4308 = vmatprep.subr.mxu1 %v7034_v0  ;;  %v1807_v16 = vld [vmem:[#allocation10 + $0x70] sm:$0xff] }
 0x68d   :  { %1657 = vmatpush1.msra.mxu0 %v7065_v62  ;;  %4309 = vmatpush3.msra.mxu1 %v7066_v20  ;;  %v1805_v62 = vld [vmem:[#allocation10 + $0x60] sm:$0xff]  ;;  %v1803_v20 = vld [vmem:[#allocation10 + $0x50] sm:$0xff] }
 0x68e   :  { %1690 = vmatprep.mubr.f32.mxu0 %v7034_v0  ;;  %4310 = vmatprep.mubr.msk.f32.mxu1 %vm5106_vm0, %v7034_v0 }
 0x68f   :  { %1897 = vmatprep.subr.mxu0 %v1839_v23  ;;  %4313 = vmatprep.subr.mxu1 %v1840_v24  ;;  %v1804_v23 = vld [vmem:[#allocation10 + $0x58] sm:$0xff] }
 0x72e   :  { %v1525_v22 = vpop.f32.mrf.mxu0  ;;  %v1596_v25 = vpop.f32.mrf.mxu1 }
 0x72f   :  { %v1604_v21 = vadd.f32 %v1525_v22, %v7067_v26  ;;  %v1800_v22 = vld [vmem:[#allocation10 + $0x38] sm:$0xff]  ;;  %v1799_v26 = vld [vmem:[#allocation10 + $0x30] sm:$0xff] }
 0x730   :  { %v4277_v41 = vpop.f32.mrf.mxu1  ;;  %v1527_v45 = vpop.f32.mrf.mxu0 }
 0x731   :  { %v3631_v27 = vmul.f32 -1.442695, %v1604_v21  ;;  %v1611_v43 = vadd.f32 %v1527_v45, %v7068_v28  ;;  %v1797_v21 = vld [vmem:[#allocation10 + $0x20] sm:$0xff]  ;;  %v1798_v41 = vld [vmem:[#allocation10 + $0x28] sm:$0xff]  ;;  %v1795_v28 = vld [vmem:[#allocation10 + $0x10] sm:$0xff] }
 0x732   :  { %v1794_v45 = vld [vmem:[#allocation10 + $0x8] sm:$0xff] }
 0x733   :  { %4748 = vpow2.f32 %v3631_v27  ;;  %v3632_v29 = vmul.f32 -1.442695, %v1611_v43  ;;  %v1796_v27 = vld [vmem:[#allocation10 + $0x18] sm:$0xff]  ;;  %v1793_v43 = vld [vmem:[#allocation10] sm:$0xff] }
 0x735   :  { %4750 = vpow2.f32 %v3632_v29  ;;  %v7071_v29 = vld [vmem:[#allocation25_spill] sm:$0xff] }
 0x740   :  { %v4749_v4 = vpop.eup %4748 }
 0x741   :  { %v1608_v30 = vadd.f32 1.0, %v4749_v4  ;;  %v7072_v4 = vld [vmem:[#allocation26_spill] sm:$0xff] }
 0x742   :  { %v4751_v10 = vpop.eup %4750 }
 0x743   :  { %4752 = vrcp.f32 %v1608_v30  ;;  %v1615_v33 = vadd.f32 1.0, %v4751_v10  ;;  %v7073_v30 = vld [vmem:[#allocation39_spill] sm:$0xff]  ;;  %v6065_v10 = vld [vmem:[#allocation12 + $0x170] sm:$0xff] }
 0x744   :  { %7074 = vst [vmem:[#allocation41_spill] sm:$0xff] %v6065_v10 }
 0x750   :  { %v4753_v31 = vpop.eup %4752 }
 0x751   :  { %v1618_v44 = vmul.f32 %v4753_v31, %v1596_v25  ;;  %v1801_v25 = vld [vmem:[#allocation10 + $0x40] sm:$0xff]  ;;  %v6068_v31 = vld [vmem:[#allocation12 + $0x168] sm:$0xff] }
 0x753   :  { %v1619_v50 = vadd.f32 %v1618_v44, %v7069_v32  ;;  %v6071_v44 = vld [vmem:[#allocation12 + $0x158] sm:$0xff] }
 0x754   :  { %v6080_v32 = vld [vmem:[#allocation12 + $0x138] sm:$0xff] }
 0x755   :  { %4754 = vtanh.f32 %v1619_v50  ;;  %v6083_v50 = vld [vmem:[#allocation12 + $0x128] sm:$0xff] }
 0x756   :  { %4756 = vrcp.f32 %v1615_v33  ;;  %v6086_v33 = vld [vmem:[#allocation12 + $0x120] sm:$0xff] }
 0x762   :  { %v4755_v5 = vpop.eup %4754 }
 0x763   :  { %v1621_v34 = vsub.f32 %v5965_v3, %v4755_v5  ;;  %v4757_v11 = vpop.eup %4756 }
 0x765   :  { %v1622_v35 = vmul.f32 %v4757_v11, %v1621_v34  ;;  %v6092_v34 = vld [vmem:[#allocation12 + $0x108] sm:$0xff]  ;;  %v6095_v11 = vld [vmem:[#allocation12 + $0xf8] sm:$0xff] }
 0x767   :  { %v6038_v55 = vadd.f32 %v4755_v5, %v1622_v35  ;;  %v6089_v5 = vld [vmem:[#allocation12 + $0x110] sm:$0xff] }
 0x768   :  { %v6098_v35 = vld [vmem:[#allocation12 + $0xf0] sm:$0xff] }
 0x769   :  { %1691 = vmatmul.mubr.f32.vlgmr.msra.gmra.mxu0 %v6038_v55  ;;  %4311 = vmatmul.mubr.f32.vlgmr.msra.gmra.mxu1 %v6038_v55 }
 0x76a   :  { %1898 = vmatpush1.msra.mxu0 %v1838_v36  ;;  %4314 = vmatpush3.msra.mxu1 %v1840_v24  ;;  %v1802_v24 = vld [vmem:[#allocation10 + $0x48] sm:$0xff]  ;;  %v6101_v36 = vld [vmem:[#allocation12 + $0xe0] sm:$0xff] }
 0x76b   :  { %1899 = vmatprep.subr.mxu0 %v1836_v42  ;;  %4315 = vmatprep.subr.mxu1 %v1837_v37  ;;  %v6104_v42 = vld [vmem:[#allocation12 + $0xd8] sm:$0xff] }
 0x76c   :  { %4345 = vmatprep.mubr.f32.mxu1 %v7070_v15  ;;  %1900 = vmatpush1.msra.mxu0 %v1835_v49  ;;  %v6110_v49 = vld [vmem:[#allocation12 + $0xc0] sm:$0xff] }
 0x76d   :  { %4316 = vmatpush3.msra.mxu1 %v1837_v37  ;;  %1901 = vmatprep.subr.mxu0 %v1833_v38  ;;  %v6107_v37 = vld [vmem:[#allocation12 + $0xc8] sm:$0xff]  ;;  %v6113_v38 = vld [vmem:[#allocation12 + $0xb0] sm:$0xff] }
 0x76e   :  { %4317 = vmatprep.subr.mxu1 %v1834_v56  ;;  %1902 = vmatpush1.msra.mxu0 %v1832_v14  ;;  %v6119_v14 = vld [vmem:[#allocation12 + $0x98] sm:$0xff] }
 0x76f   :  { %4318 = vmatpush3.msra.mxu1 %v1834_v56  ;;  %1903 = vmatprep.subr.mxu0 %v1830_v17  ;;  %v6116_v56 = vld [vmem:[#allocation12 + $0xa8] sm:$0xff]  ;;  %v6125_v17 = vld [vmem:[#allocation12 + $0x80] sm:$0xff] }
 0x770   :  { %4319 = vmatprep.subr.mxu1 %v1831_v18  ;;  %1904 = vmatpush1.msra.mxu0 %v1829_v19  ;;  %v6131_v19 = vld [vmem:[#allocation12 + $0x68] sm:$0xff] }
 0x771   :  { %4320 = vmatpush3.msra.mxu1 %v1831_v18  ;;  %1905 = vmatprep.subr.mxu0 %v1827_v39  ;;  %v6128_v18 = vld [vmem:[#allocation12 + $0x78] sm:$0xff]  ;;  %v6134_v39 = vld [vmem:[#allocation12 + $0x60] sm:$0xff] }
 0x772   :  { %4321 = vmatprep.subr.mxu1 %v1828_v40  ;;  %1906 = vmatpush1.msra.mxu0 %v1826_v61  ;;  %v6140_v61 = vld [vmem:[#allocation12 + $0x48] sm:$0xff] }
 0x773   :  { %4322 = vmatpush3.msra.mxu1 %v1828_v40  ;;  %1907 = vmatprep.subr.mxu0 %v1824_v46  ;;  %v6137_v40 = vld [vmem:[#allocation12 + $0x50] sm:$0xff]  ;;  %v6143_v46 = vld [vmem:[#allocation12 + $0x38] sm:$0xff] }
 0x774   :  { %4323 = vmatprep.subr.mxu1 %v1825_v47  ;;  %1908 = vmatpush1.msra.mxu0 %v1823_v52  ;;  %v6148_v52 = vld [vmem:[#allocation12 + $0x20] sm:$0xff] }
 0x775   :  { %4324 = vmatpush3.msra.mxu1 %v1825_v47  ;;  %1909 = vmatprep.subr.mxu0 %v1821_v53  ;;  %v6146_v47 = vld [vmem:[#allocation12 + $0x30] sm:$0xff]  ;;  %v6150_v53 = vld [vmem:[#allocation12 + $0x18] sm:$0xff] }
 0x776   :  { %4325 = vmatprep.subr.mxu1 %v1822_v54  ;;  %1910 = vmatpush1.msra.mxu0 %v1820_v57  ;;  %v6156_v57 = vld [vmem:[#allocation12] sm:$0xff] }
 0x777   :  { %4326 = vmatpush3.msra.mxu1 %v1822_v54  ;;  %1911 = vmatprep.subr.mxu0 %v1818_v58  ;;  %v6153_v54 = vld [vmem:[#allocation12 + $0x8] sm:$0xff]  ;;  %7076 = vst [vmem:[#allocation23_spill] sm:$0xff] %v6156_v57  ;;  %v6160_v58 = vld [vmem:[#allocation12 + $0x178] sm:$0xff] }
 0x778   :  { %4327 = vmatprep.subr.mxu1 %v1819_v59  ;;  %1912 = vmatpush1.msra.mxu0 %v1817_v60  ;;  %7075 = vst [vmem:[#allocation22_spill] sm:$0xff] %v6153_v54  ;;  %v6167_v60 = vld [vmem:[#allocation12 + $0x148] sm:$0xff] }
 0x779   :  { %4328 = vmatpush3.msra.mxu1 %v1819_v59  ;;  %1913 = vmatprep.subr.mxu0 %v1815_v6  ;;  %v6162_v59 = vld [vmem:[#allocation12 + $0x160] sm:$0xff]  ;;  %v6985_v6 = vmov 0  }
 0x77a   :  { %4329 = vmatprep.subr.mxu1 %v1816_v7  ;;  %1914 = vmatpush1.msra.mxu0 %v1814_v8  ;;  %v6180_v8 = vld [vmem:[%s6956_s1] sm:$0xff] }
 0x77b   :  { %4330 = vmatpush3.msra.mxu1 %v1816_v7  ;;  %1915 = vmatprep.subr.mxu0 %v1812_v9  ;;  %v6173_v7 = vld [vmem:[#allocation12 + $0x130] sm:$0xff]  ;;  %7077 = vst [vmem:[#allocation24_spill] sm:$0xff] %v6180_v8  ;;  %v6183_v9 = vld [vmem:[#allocation12 + $0x118] sm:$0xff]  ;;  %vm2303_vm1 = vcmp.eq.s32.totalorder %v6180_v8, 0 }
 0x77c   :  { %4331 = vmatprep.subr.mxu1 %v1813_v12  ;;  %1916 = vmatpush1.msra.mxu0 %v1811_v51  ;;  %v6189_v51 = vld [vmem:[#allocation12 + $0x100] sm:$0xff] }
 0x77d   :  { %4332 = vmatpush3.msra.mxu1 %v1813_v12  ;;  %1917 = vmatprep.subr.mxu0 %v1809_v48  ;;  %v2304_v12 = vsel %vm2303_vm1, 1, %v6985_v6  ;;  %v6193_v48 = vld [vmem:[#allocation12 + $0xe8] sm:$0xff] }
 0x77e   :  { %4333 = vmatprep.subr.mxu1 %v1810_v63  ;;  %1918 = vmatpush1.msra.mxu0 %v1808_v1  ;;  %v6201_v1 = vld [vmem:[#allocation12 + $0xb8] sm:$0xff] }
 0x77f   :  { %4334 = vmatpush3.msra.mxu1 %v1810_v63  ;;  %1919 = vmatprep.subr.mxu0 %v1806_v2  ;;  %v6197_v63 = vld [vmem:[#allocation12 + $0xd0] sm:$0xff]  ;;  %v6205_v2 = vld [vmem:[#allocation12 + $0xa0] sm:$0xff] }
 0x780   :  { %4335 = vmatprep.subr.mxu1 %v1807_v16  ;;  %1920 = vmatpush1.msra.mxu0 %v1805_v62  ;;  %v6213_v62 = vld [vmem:[#allocation12 + $0x70] sm:$0xff] }
 0x781   :  { %4336 = vmatpush3.msra.mxu1 %v1807_v16  ;;  %1921 = vmatprep.subr.mxu0 %v1803_v20  ;;  %v6209_v16 = vld [vmem:[#allocation12 + $0x88] sm:$0xff]  ;;  %v6217_v20 = vld [vmem:[#allocation12 + $0x58] sm:$0xff] }
 0x782   :  { %4337 = vmatprep.subr.mxu1 %v1804_v23  ;;  %1922 = vmatpush1.msra.mxu0 %v1802_v24  ;;  %v6225_v24 = vld [vmem:[#allocation12 + $0x28] sm:$0xff] }
 0x783   :  { %4338 = vmatpush3.msra.mxu1 %v1804_v23  ;;  %1923 = vmatprep.subr.mxu0 %v1800_v22  ;;  %v6221_v23 = vld [vmem:[#allocation12 + $0x40] sm:$0xff]  ;;  %7078 = vst [vmem:[#allocation29_spill] sm:$0xff] %v6225_v24  ;;  %v6229_v22 = vld [vmem:[#allocation12 + $0x10] sm:$0xff] }
 0x784   :  { %4339 = vmatprep.subr.mxu1 %v1801_v25  ;;  %1924 = vmatpush1.msra.mxu0 %v1799_v26  ;;  %7079 = vst [vmem:[#allocation30_spill] sm:$0xff] %v6229_v22 }
 0x785   :  { %4340 = vmatpush3.msra.mxu1 %v1801_v25  ;;  %1925 = vmatprep.subr.mxu0 %v1797_v21  ;;  %v7080_v21 = vld [vmem:[#allocation37_spill] sm:$0xff] }
 0x786   :  { %4341 = vmatprep.subr.mxu1 %v1798_v41  ;;  %1926 = vmatpush1.msra.mxu0 %v1796_v27 }
 0x787   :  { %4342 = vmatpush3.msra.mxu1 %v1798_v41  ;;  %1927 = vmatprep.subr.mxu0 %v1794_v45 }
 0x788   :  { %4343 = vmatprep.subr.mxu1 %v1795_v28  ;;  %1928 = vmatpush1.msra.mxu0 %v1793_v43  ;;  %v7081_v43 = vld [vmem:[#allocation38_spill] sm:$0xff] }
 0x789   :  { %1961 = vmatprep.mubr.f32.mxu0 %v7034_v0  ;;  %4344 = vmatpush3.msra.mxu1 %v1795_v28 }
 0x78a   :  { %1962 = vmatmul.mubr.f32.vlgmr.msra.gmra.mxu0 %v7070_v15  ;;  %4346 = vmatmul.mubr.f32.vlgmr.msra.gmra.mxu1 %v7071_v29  ;;  %v6122_v15 = vld [vmem:[#allocation12 + $0x90] sm:$0xff] }
 0x78b   :  { %4348 = vmatprep.mubr.f32.mxu1 %v7072_v4  ;;  %1967 = vmatprep.mubr.f32.mxu0 %v7034_v0 }
 0x78c   :  { %4357 = vmatprep.subr.mxu1 %v7034_v0  ;;  %2139 = vmatprep.subr.mxu0 %v6065_v10 }
 0x78d   :  { %2140 = vmatpush1.msra.mxu0 %v6068_v31  ;;  %4358 = vmatpush3.msra.mxu1 %v6160_v58 }
 0x78e   :  { %1968 = vmatmul.mubr.f32.gmra.mxu0 %v7071_v29  ;;  %4349 = vmatmul.mubr.f32.gmra.mxu1 %v7073_v30 }
 0x78f   :  { %4351 = vmatprep.mubr.f32.mxu1 %v5858_v13  ;;  %1973 = vmatprep.mubr.f32.mxu0 %v7034_v0 }
 0x790   :  { %2141 = vmatprep.subr.mxu0 %v6071_v44  ;;  %4359 = vmatprep.subr.mxu1 %v7034_v0 }
 0x791   :  { %4686 = vset.pattern.permute.xlu0 %v6985_v6  ;;  %4360 = vmatpush3.msra.mxu1 %v6162_v59 }
 0x792   :  { %1974 = vmatmul.mubr.f32.gmra.mxu0 %v7072_v4  ;;  %4352 = vmatmul.mubr.f32.gmra.mxu1 %v5965_v3 }
 0x793   :  { %4354 = vmatprep.mubr.f32.mxu1 %v6038_v55  ;;  %1979 = vmatprep.mubr.f32.mxu0 %v7034_v0 }
 0x794   :  { %4361 = vmatprep.subr.mxu1 %v7034_v0  ;;  %4687 = vset.pattern.permute.xlu1 %v6985_v6 }
 0x795   :  { %4362 = vmatpush3.msra.mxu1 %v6167_v60  ;;  %2306 = vperm.xlu0 %4686, %v2304_v12  }
 0x796   :  { %1980 = vmatmul.mubr.f32.gmra.mxu0 %v7073_v30  ;;  %4363 = vmatprep.subr.mxu1 %v7034_v0 }
 0x797   :  { %1985 = vmatprep.mubr.f32.mxu0 %v7034_v0  ;;  %4364 = vmatpush3.msra.mxu1 %v6173_v7 }
 0x798   :  { %4365 = vmatprep.subr.mxu1 %v7034_v0 }
 0x799   :  { %4366 = vmatpush3.msra.mxu1 %v6183_v9 }
 0x79a   :  { %1986 = vmatmul.mubr.f32.gmra.mxu0 %v5858_v13  ;;  %v6074_v13 = vld [vmem:[#allocation12 + $0x150] sm:$0xff]  ;;  %4367 = vmatprep.subr.mxu1 %v7034_v0 }
 0x79b   :  { %1991 = vmatprep.mubr.f32.mxu0 %v7034_v0  ;;  %2142 = vmatpush1.msra.mxu0 %v6074_v13 }
 0x79c   :  { %4368 = vmatpush3.msra.mxu1 %v6189_v51 }
 0x79d   :  { %4369 = vmatprep.subr.mxu1 %v7034_v0 }
 0x79e   :  { %1992 = vmatmul.mubr.f32.gmra.mxu0 %v5965_v3  ;;  %v6077_v3 = vld [vmem:[#allocation12 + $0x140] sm:$0xff]  ;;  %4370 = vmatpush3.msra.mxu1 %v6193_v48 }
 0x79f   :  { %1997 = vmatprep.mubr.f32.mxu0 %v7034_v0  ;;  %2143 = vmatprep.subr.mxu0 %v6077_v3 }
 0x7a0   :  { %2144 = vmatpush1.msra.mxu0 %v6080_v32  ;;  %4371 = vmatprep.subr.mxu1 %v7034_v0 }
 0x7a1   :  { %2145 = vmatprep.subr.mxu0 %v6083_v50  ;;  %4372 = vmatpush3.msra.mxu1 %v6197_v63 }
 0x7a2   :  { %1998 = vmatmul.mubr.f32.gmra.mxu0 %v6038_v55  ;;  %4373 = vmatprep.subr.mxu1 %v7034_v0 }
 0x7a3   :  { %2003 = vmatprep.mubr.f32.mxu0 %v7034_v0  ;;  %2146 = vmatpush1.msra.mxu0 %v6086_v33 }
 0x7a4   :  { %2147 = vmatprep.subr.mxu0 %v6089_v5  ;;  %4374 = vmatpush3.msra.mxu1 %v6201_v1 }
 0x7a5   :  { %2148 = vmatpush1.msra.mxu0 %v6092_v34  ;;  %4375 = vmatprep.subr.mxu1 %v7034_v0 }
 0x7a6   :  { %2149 = vmatprep.subr.mxu0 %v6095_v11  ;;  %4376 = vmatpush3.msra.mxu1 %v6205_v2 }
 0x7a7   :  { %2150 = vmatpush1.msra.mxu0 %v6098_v35  ;;  %4377 = vmatprep.subr.mxu1 %v7034_v0 }
 0x7a8   :  { %2151 = vmatprep.subr.mxu0 %v6101_v36  ;;  %4378 = vmatpush3.msra.mxu1 %v6209_v16 }
 0x7a9   :  { %2152 = vmatpush1.msra.mxu0 %v6104_v42  ;;  %4379 = vmatprep.subr.mxu1 %v7034_v0 }
 0x7aa   :  { %2153 = vmatprep.subr.mxu0 %v6107_v37  ;;  %4380 = vmatpush3.msra.mxu1 %v6213_v62 }
 0x7ab   :  { %2154 = vmatpush1.msra.mxu0 %v6110_v49  ;;  %4381 = vmatprep.subr.mxu1 %v7034_v0 }
 0x7ac   :  { %2155 = vmatprep.subr.mxu0 %v6113_v38  ;;  %4382 = vmatpush3.msra.mxu1 %v6217_v20 }
 0x7ad   :  { %2156 = vmatpush1.msra.mxu0 %v6116_v56  ;;  %4383 = vmatprep.subr.mxu1 %v7034_v0 }
 0x7ae   :  { %2157 = vmatprep.subr.mxu0 %v6119_v14  ;;  %4384 = vmatpush3.msra.mxu1 %v6221_v23 }
 0x7af   :  { %2158 = vmatpush1.msra.mxu0 %v6122_v15  ;;  %4385 = vmatprep.subr.mxu1 %v7034_v0 }
 0x7b0   :  { %2159 = vmatprep.subr.mxu0 %v6125_v17  ;;  %4386 = vmatpush3.msra.mxu1 %v6225_v24 }
 0x7b1   :  { %2160 = vmatpush1.msra.mxu0 %v6128_v18  ;;  %4387 = vmatprep.subr.mxu1 %v7034_v0 }
 0x7b2   :  { %2161 = vmatprep.subr.mxu0 %v6131_v19  ;;  %4388 = vmatpush3.msra.mxu1 %v6229_v22  ;;  %v7082_v22 = vld [vmem:[#allocation44_spill] sm:$0xff] }
 0x7b3   :  { %2162 = vmatpush1.msra.mxu0 %v6134_v39  ;;  %4392 = vmatprep.subr.mxu1 %v7034_v0 }
 0x7b4   :  { %2163 = vmatprep.subr.mxu0 %v6137_v40 }
 0x7b5   :  { %2164 = vmatpush1.msra.mxu0 %v6140_v61 }
 0x7b6   :  { %2165 = vmatprep.subr.mxu0 %v6143_v46 }
 0x7b7   :  { %2166 = vmatpush1.msra.mxu0 %v6146_v47 }
 0x7b8   :  { %2167 = vmatprep.subr.mxu0 %v6148_v52 }
 0x7b9   :  { %2168 = vmatpush1.msra.mxu0 %v6150_v53 }
 0x7ba   :  { %2169 = vmatprep.subr.mxu0 %v6153_v54 }
 0x7bb   :  { %2170 = vmatpush1.msra.mxu0 %v6156_v57 }
 0x7bc   :  { %2310 = vmatprep.subr.mxu0 %v6065_v10 }
 0x829   :  { %v1692_v25 = vpop.f32.mrf.mxu0  ;;  %v1763_v26 = vpop.f32.mrf.mxu1 }
 0x82a   :  { %v1771_v41 = vadd.f32 %v1692_v25, %v7080_v21 }
 0x82b   :  { %v4312_v27 = vpop.f32.mrf.mxu1  ;;  %v1694_v28 = vpop.f32.mrf.mxu0 }
 0x82c   :  { %v3633_v45 = vmul.f32 -1.442695, %v1771_v41  ;;  %v1778_v29 = vadd.f32 %v1694_v28, %v7081_v43 }
 0x82e   :  { %4758 = vpow2.f32 %v3633_v45  ;;  %v3634_v4 = vmul.f32 -1.442695, %v1778_v29 }
 0x830   :  { %4760 = vpow2.f32 %v3634_v4 }
 0x83b   :  { %v4759_v30 = vpop.eup %4758 }
 0x83c   :  { %v1775_v12 = vadd.f32 1.0, %v4759_v30 }
 0x83d   :  { %v4761_v6 = vpop.eup %4760 }
 0x83e   :  { %4762 = vrcp.f32 %v1775_v12  ;;  %v1782_v54 = vadd.f32 1.0, %v4761_v6  ;;  %v7087_v6 = vld [vmem:[#allocation24_spill] sm:$0xff] }
 0x83f   :  { %vm2474_vm2 = vcmp.eq.s32.totalorder %v7087_v6, 1 }
 0x84b   :  { %v4763_v8 = vpop.eup %4762 }
 0x84c   :  { %v1785_v10 = vmul.f32 %v4763_v8, %v1763_v26  ;;  %v7088_v8 = vmov 0   ;;  %v1963_v26 = vpop.f32.mrf.mxu0 }
 0x84e   :  { %v1786_v57 = vadd.f32 %v7082_v22, %v1785_v10  ;;  %v7084_v10 = vld [vmem:[#allocation23_spill] sm:$0xff]  ;;  %v2475_v22 = vsel %vm2474_vm2, 1, %v7088_v8  ;;  %v1965_v28 = vpop.f32.mrf.mxu0 }
 0x84f   :  { %2477 = vperm.xlu0 %4686, %v2475_v22  }
 0x850   :  { %4764 = vtanh.f32 %v1786_v57  ;;  %v7086_v57 = vld [vmem:[#allocation41_spill] sm:$0xff]  ;;  %v6313_v43 = vpop.f32.mrf.mxu0 }
 0x851   :  { %4766 = vrcp.f32 %v1782_v54  ;;  %v7085_v54 = vld [vmem:[#allocation30_spill] sm:$0xff]  ;;  %7089 = vst [vmem:[#allocation40_spill] sm:$0xff] %v6313_v43 }
 0x852   :  { %v6315_v29 = vpop.f32.mrf.mxu0 }
 0x853   :  { %7090 = vst [vmem:[#allocation31_spill] sm:$0xff] %v6315_v29 }
 0x854   :  { %v6317_v4 = vpop.f32.mrf.mxu0 }
 0x855   :  { %7091 = vst [vmem:[#allocation32_spill] sm:$0xff] %v6317_v4 }
 0x856   :  { %v6319_v30 = vpop.f32.mrf.mxu0 }
 0x857   :  { %7092 = vst [vmem:[#allocation43_spill] sm:$0xff] %v6319_v30 }
 0x858   :  { %v6321_v12 = vpop.f32.mrf.mxu0 }
 0x859   :  { %7093 = vst [vmem:[#allocation33_spill] sm:$0xff] %v6321_v12 }
 0x85d   :  { %v4765_v25 = vpop.eup %4764 }
 0x85e   :  { %v1788_v21 = vsub.f32 %v6038_v55, %v4765_v25  ;;  %v4767_v41 = vpop.eup %4766  ;;  %v7083_v55 = vld [vmem:[#allocation22_spill] sm:$0xff] }
 0x860   :  { %v1789_v27 = vmul.f32 %v4767_v41, %v1788_v21  ;;  %v6325_v21 = vpop.f32.mrf.mxu1 }
 0x861   :  { %7095 = vst [vmem:[#allocation42_spill] sm:$0xff] %v6325_v21 }
 0x862   :  { %v1790_v45 = vadd.f32 %v4765_v25, %v1789_v27  ;;  %v6323_v25 = vpop.f32.mrf.mxu0  ;;  %v2076_v27 = vpop.f32.mrf.mxu1 }
 0x863   :  { %7094 = vst [vmem:[#allocation34_spill] sm:$0xff] %v6323_v25 }
 0x864   :  { %2004 = vmatmul.mubr.f32.gmra.mxu0 %v1790_v45  ;;  %4355 = vmatmul.mubr.f32.gmra.mxu1 %v1790_v45  ;;  %v6327_v41 = vpop.f32.mrf.mxu0  ;;  %v6331_v22 = vpop.f32.mrf.mxu1 }
 0x865   :  { %2203 = vmatprep.mubr.f32.mxu0 %v7034_v0  ;;  %4389 = vmatprep.mubr.msk.f32.mxu1 %vm5106_vm0, %v7034_v0  ;;  %7096 = vst [vmem:[#allocation21_spill] sm:$0xff] %v6327_v41  ;;  %7098 = vst [vmem:[#allocation28_spill] sm:$0xff] %v6331_v22 }
 0x866   :  { %v6329_v45 = vpop.f32.mrf.mxu0  ;;  %v6335_v29 = vpop.f32.mrf.mxu1 }
 0x867   :  { %7097 = vst [vmem:[#allocation27_spill] sm:$0xff] %v6329_v45  ;;  %7100 = vst [vmem:[#allocation36_spill] sm:$0xff] %v6335_v29 }
 0x868   :  { %2204 = vmatmul.mubr.f32.vlgmr.msra.gmra.mxu0 %v7034_v0  ;;  %4390 = vmatmul.mubr.f32.vlgmr.msra.gmra.mxu1 %v7034_v0  ;;  %v6333_v43 = vpop.f32.mrf.mxu0  ;;  %v6339_v30 = vpop.f32.mrf.mxu1 }
 0x869   :  { %2311 = vmatpush1.msra.mxu0 %v6068_v31  ;;  %4393 = vmatpush3.msra.mxu1 %v6160_v58  ;;  %7099 = vst [vmem:[#allocation35_spill] sm:$0xff] %v6333_v43  ;;  %7102 = vst [vmem:[#allocation46_spill] sm:$0xff] %v6339_v30 }
 0x86a   :  { %2312 = vmatprep.subr.mxu0 %v6071_v44  ;;  %4394 = vmatprep.subr.mxu1 %v7034_v0  ;;  %v6337_v4 = vpop.f32.mrf.mxu0  ;;  %v6343_v25 = vpop.f32.mrf.mxu1 }
 0x86b   :  { %2313 = vmatpush1.msra.mxu0 %v6074_v13  ;;  %4395 = vmatpush3.msra.mxu1 %v6162_v59  ;;  %7101 = vst [vmem:[#allocation45_spill] sm:$0xff] %v6337_v4  ;;  %7104 = vst [vmem:[#allocation26_spill] sm:$0xff] %v6343_v25 }
 0x86c   :  { %2314 = vmatprep.subr.mxu0 %v6077_v3  ;;  %4396 = vmatprep.subr.mxu1 %v7034_v0  ;;  %v6341_v12 = vpop.f32.mrf.mxu0 }
 0x86d   :  { %2315 = vmatpush1.msra.mxu0 %v6080_v32  ;;  %4397 = vmatpush3.msra.mxu1 %v6167_v60  ;;  %7103 = vst [vmem:[#allocation25_spill] sm:$0xff] %v6341_v12 }
 0x86e   :  { %2316 = vmatprep.subr.mxu0 %v6083_v50  ;;  %4398 = vmatprep.subr.mxu1 %v7034_v0  ;;  %v6345_v21 = vpop.f32.mrf.mxu0 }
 0x86f   :  { %2317 = vmatpush1.msra.mxu0 %v6086_v33  ;;  %4399 = vmatpush3.msra.mxu1 %v6173_v7  ;;  %7105 = vst [vmem:[#allocation39_spill] sm:$0xff] %v6345_v21 }
 0x870   :  { %2318 = vmatprep.subr.mxu0 %v6089_v5  ;;  %4400 = vmatprep.subr.mxu1 %v7034_v0 }
 0x871   :  { %2319 = vmatpush1.msra.mxu0 %v6092_v34  ;;  %4401 = vmatpush3.msra.mxu1 %v6183_v9 }
 0x872   :  { %2320 = vmatprep.subr.mxu0 %v6095_v11  ;;  %4402 = vmatprep.subr.mxu1 %v7034_v0 }
 0x873   :  { %2321 = vmatpush1.msra.mxu0 %v6098_v35  ;;  %4403 = vmatpush3.msra.mxu1 %v6189_v51 }
 0x874   :  { %2322 = vmatprep.subr.mxu0 %v6101_v36  ;;  %4404 = vmatprep.subr.mxu1 %v7034_v0 }
 0x875   :  { %2323 = vmatpush1.msra.mxu0 %v6104_v42  ;;  %4405 = vmatpush3.msra.mxu1 %v6193_v48 }
 0x876   :  { %2324 = vmatprep.subr.mxu0 %v6107_v37  ;;  %4406 = vmatprep.subr.mxu1 %v7034_v0 }
 0x877   :  { %2325 = vmatpush1.msra.mxu0 %v6110_v49  ;;  %4407 = vmatpush3.msra.mxu1 %v6197_v63 }
 0x878   :  { %2326 = vmatprep.subr.mxu0 %v6113_v38  ;;  %4408 = vmatprep.subr.mxu1 %v7034_v0 }
 0x879   :  { %2327 = vmatpush1.msra.mxu0 %v6116_v56  ;;  %4409 = vmatpush3.msra.mxu1 %v6201_v1 }
 0x87a   :  { %2328 = vmatprep.subr.mxu0 %v6119_v14  ;;  %4410 = vmatprep.subr.mxu1 %v7034_v0 }
 0x87b   :  { %2329 = vmatpush1.msra.mxu0 %v6122_v15  ;;  %4411 = vmatpush3.msra.mxu1 %v6205_v2 }
 0x87c   :  { %2330 = vmatprep.subr.mxu0 %v6125_v17  ;;  %4412 = vmatprep.subr.mxu1 %v7034_v0 }
 0x87d   :  { %2331 = vmatpush1.msra.mxu0 %v6128_v18  ;;  %4413 = vmatpush3.msra.mxu1 %v6209_v16 }
 0x87e   :  { %2332 = vmatprep.subr.mxu0 %v6131_v19  ;;  %4414 = vmatprep.subr.mxu1 %v7034_v0 }
 0x87f   :  { %2333 = vmatpush1.msra.mxu0 %v6134_v39  ;;  %4415 = vmatpush3.msra.mxu1 %v6213_v62 }
 0x880   :  { %2334 = vmatprep.subr.mxu0 %v6137_v40  ;;  %4416 = vmatprep.subr.mxu1 %v7034_v0 }
 0x881   :  { %2335 = vmatpush1.msra.mxu0 %v6140_v61  ;;  %4417 = vmatpush3.msra.mxu1 %v6217_v20 }
 0x882   :  { %2336 = vmatprep.subr.mxu0 %v6143_v46  ;;  %4418 = vmatprep.subr.mxu1 %v7034_v0 }
 0x883   :  { %2337 = vmatpush1.msra.mxu0 %v6146_v47  ;;  %4419 = vmatpush3.msra.mxu1 %v6221_v23 }
 0x884   :  { %2338 = vmatprep.subr.mxu0 %v6148_v52  ;;  %4420 = vmatprep.subr.mxu1 %v7034_v0 }
 0x885   :  { %2339 = vmatpush1.msra.mxu0 %v6150_v53  ;;  %4421 = vmatpush3.msra.mxu1 %v6225_v24 }
 0x886   :  { %2340 = vmatprep.subr.mxu0 %v7083_v55  ;;  %4422 = vmatprep.subr.mxu1 %v7034_v0 }
 0x887   :  { %2341 = vmatpush1.msra.mxu0 %v7084_v10  ;;  %2374 = vmatprep.mubr.f32.mxu0 %v7034_v0 }
 0x888   :  { %4423 = vmatpush3.msra.mxu1 %v7085_v54  ;;  %4424 = vmatprep.mubr.msk.f32.mxu1 %vm5106_vm0, %v7034_v0 }
 0x889   :  { %2481 = vmatprep.subr.mxu0 %v7086_v57  ;;  %4427 = vmatprep.subr.mxu1 %v7034_v0 }
 0x924   :  { %v6347_v41 = vpop.f32.mrf.mxu0  ;;  %v6349_v8 = vpop.f32.mrf.mxu1 }
 0x925   :  { %7106 = vst [vmem:[#allocation37_spill] sm:$0xff] %v6347_v41  ;;  %7107 = vst [vmem:[#allocation38_spill] sm:$0xff] %v6349_v8 }
 0x926   :  { %v6351_v45 = vpop.f32.mrf.mxu0  ;;  %v6353_v22 = vpop.f32.mrf.mxu1 }
 0x927   :  { %7108 = vst [vmem:[#allocation44_spill] sm:$0xff] %v6351_v45  ;;  %7109 = vst [vmem:[#allocation47_spill] sm:$0xff] %v6353_v22 }
 0x928   :  { %v2205_v43 = vpop.f32.mrf.mxu0  ;;  %v2276_v29 = vpop.f32.mrf.mxu1 }
 0x929   :  { %v2283_v6 = vadd.f32 %v2205_v43, %v1963_v26 }
 0x92a   :  { %v4391_v4 = vpop.f32.mrf.mxu1  ;;  %v2207_v30 = vpop.f32.mrf.mxu0 }
 0x92b   :  { %v3635_v57 = vmul.f32 -1.442695, %v2283_v6  ;;  %v2290_v12 = vadd.f32 %v2207_v30, %v1965_v28  ;;  %v7117_v28 = vmov 0  }
 0x92d   :  { %4768 = vpow2.f32 %v3635_v57  ;;  %v3636_v54 = vmul.f32 -1.442695, %v2290_v12  ;;  %v7115_v57 = vld [vmem:[#allocation41_spill] sm:$0xff]  ;;  %v7118_v12 = vld [vmem:[#allocation40_spill] sm:$0xff] }
 0x92f   :  { %4770 = vpow2.f32 %v3636_v54  ;;  %v7114_v54 = vld [vmem:[#allocation30_spill] sm:$0xff] }
 0x93a   :  { %v4769_v25 = vpop.eup %4768 }
 0x93b   :  { %v2287_v10 = vadd.f32 1.0, %v4769_v25 }
 0x93c   :  { %v4771_v41 = vpop.eup %4770 }
 0x93d   :  { %4772 = vrcp.f32 %v2287_v10  ;;  %v2294_v55 = vadd.f32 1.0, %v4771_v41  ;;  %v7113_v10 = vld [vmem:[#allocation23_spill] sm:$0xff] }
 0x94a   :  { %v4773_v21 = vpop.eup %4772 }
 0x94b   :  { %v2297_v8 = vmul.f32 %v4773_v21, %v2276_v29 }
 0x94d   :  { %v2298_v45 = vadd.f32 %v2297_v8, %v2076_v27  ;;  %v7116_v8 = vld [vmem:[#allocation24_spill] sm:$0xff] }
 0x94e   :  { %vm2645_vm3 = vcmp.eq.s32.totalorder %v7116_v8, 2 }
 0x94f   :  { %4774 = vtanh.f32 %v2298_v45  ;;  %v2646_v29 = vsel %vm2645_vm3, 1, %v7117_v28  ;;  %v7119_v45 = vld [vmem:[#allocation31_spill] sm:$0xff]  ;;  %v7120_v28 = vld [vmem:[#allocation42_spill] sm:$0xff] }
 0x950   :  { %4776 = vrcp.f32 %v2294_v55  ;;  %v7112_v55 = vld [vmem:[#allocation22_spill] sm:$0xff]  ;;  %2648 = vperm.xlu1 %4687, %v2646_v29  }
 0x95c   :  { %v4775_v22 = vpop.eup %4774 }
 0x95d   :  { %v2300_v24 = vsub.f32 0.0, %v4775_v22  ;;  %v4777_v26 = vpop.eup %4776 }
 0x95f   :  { %v2301_v43 = vmul.f32 %v4777_v26, %v2300_v24  ;;  %v7111_v24 = vld [vmem:[#allocation29_spill] sm:$0xff] }
 0x961   :  { %v6355_v6 = vadd.f32 %v4775_v22, %v2301_v43 }
 0x963   :  { %7110 = vst [vmem:[#allocation48_spill] sm:$0xff] %v6355_v6  ;;  %2375 = vmatmul.mubr.f32.vlgmr.msra.gmra.mxu0 %v6355_v6  ;;  %4425 = vmatmul.mubr.f32.vlgmr.msra.gmra.mxu1 %v6355_v6 }
 0x964   :  { %2482 = vmatpush1.msra.mxu0 %v6068_v31  ;;  %4428 = vmatpush3.msra.mxu1 %v6160_v58 }
 0x965   :  { %2483 = vmatprep.subr.mxu0 %v6071_v44  ;;  %4429 = vmatprep.subr.mxu1 %v7034_v0 }
 0x966   :  { %2484 = vmatpush1.msra.mxu0 %v6074_v13  ;;  %4430 = vmatpush3.msra.mxu1 %v6162_v59 }
 0x967   :  { %2485 = vmatprep.subr.mxu0 %v6077_v3  ;;  %4431 = vmatprep.subr.mxu1 %v7034_v0 }
 0x968   :  { %2486 = vmatpush1.msra.mxu0 %v6080_v32  ;;  %4432 = vmatpush3.msra.mxu1 %v6167_v60 }
 0x969   :  { %2487 = vmatprep.subr.mxu0 %v6083_v50  ;;  %4433 = vmatprep.subr.mxu1 %v7034_v0 }
 0x96a   :  { %2488 = vmatpush1.msra.mxu0 %v6086_v33  ;;  %4434 = vmatpush3.msra.mxu1 %v6173_v7 }
 0x96b   :  { %2489 = vmatprep.subr.mxu0 %v6089_v5  ;;  %4435 = vmatprep.subr.mxu1 %v7034_v0 }
 0x96c   :  { %2490 = vmatpush1.msra.mxu0 %v6092_v34  ;;  %4436 = vmatpush3.msra.mxu1 %v6183_v9 }
 0x96d   :  { %2491 = vmatprep.subr.mxu0 %v6095_v11  ;;  %4437 = vmatprep.subr.mxu1 %v7034_v0 }
 0x96e   :  { %2492 = vmatpush1.msra.mxu0 %v6098_v35  ;;  %4438 = vmatpush3.msra.mxu1 %v6189_v51 }
 0x96f   :  { %2493 = vmatprep.subr.mxu0 %v6101_v36  ;;  %4439 = vmatprep.subr.mxu1 %v7034_v0 }
 0x970   :  { %2494 = vmatpush1.msra.mxu0 %v6104_v42  ;;  %4440 = vmatpush3.msra.mxu1 %v6193_v48 }
 0x971   :  { %2495 = vmatprep.subr.mxu0 %v6107_v37  ;;  %4441 = vmatprep.subr.mxu1 %v7034_v0 }
 0x972   :  { %2496 = vmatpush1.msra.mxu0 %v6110_v49  ;;  %4442 = vmatpush3.msra.mxu1 %v6197_v63 }
 0x973   :  { %2497 = vmatprep.subr.mxu0 %v6113_v38  ;;  %4443 = vmatprep.subr.mxu1 %v7034_v0 }
 0x974   :  { %2498 = vmatpush1.msra.mxu0 %v6116_v56  ;;  %4444 = vmatpush3.msra.mxu1 %v6201_v1 }
 0x975   :  { %2499 = vmatprep.subr.mxu0 %v6119_v14  ;;  %4445 = vmatprep.subr.mxu1 %v7034_v0 }
 0x976   :  { %2500 = vmatpush1.msra.mxu0 %v6122_v15  ;;  %4446 = vmatpush3.msra.mxu1 %v6205_v2 }
 0x977   :  { %2501 = vmatprep.subr.mxu0 %v6125_v17  ;;  %4447 = vmatprep.subr.mxu1 %v7034_v0 }
 0x978   :  { %2502 = vmatpush1.msra.mxu0 %v6128_v18  ;;  %4448 = vmatpush3.msra.mxu1 %v6209_v16 }
 0x979   :  { %2503 = vmatprep.subr.mxu0 %v6131_v19  ;;  %4449 = vmatprep.subr.mxu1 %v7034_v0 }
 0x97a   :  { %2504 = vmatpush1.msra.mxu0 %v6134_v39  ;;  %4450 = vmatpush3.msra.mxu1 %v6213_v62 }
 0x97b   :  { %2505 = vmatprep.subr.mxu0 %v6137_v40  ;;  %4451 = vmatprep.subr.mxu1 %v7034_v0 }
 0x97c   :  { %2506 = vmatpush1.msra.mxu0 %v6140_v61  ;;  %4452 = vmatpush3.msra.mxu1 %v6217_v20 }
 0x97d   :  { %2507 = vmatprep.subr.mxu0 %v6143_v46  ;;  %4453 = vmatprep.subr.mxu1 %v7034_v0 }
 0x97e   :  { %2508 = vmatpush1.msra.mxu0 %v6146_v47  ;;  %4454 = vmatpush3.msra.mxu1 %v6221_v23 }
 0x97f   :  { %2509 = vmatprep.subr.mxu0 %v6148_v52  ;;  %4455 = vmatprep.subr.mxu1 %v7034_v0 }
 0x980   :  { %2510 = vmatpush1.msra.mxu0 %v6150_v53  ;;  %4456 = vmatpush3.msra.mxu1 %v7111_v24 }
 0x981   :  { %2511 = vmatprep.subr.mxu0 %v7112_v55  ;;  %4457 = vmatprep.subr.mxu1 %v7034_v0 }
 0x982   :  { %2512 = vmatpush1.msra.mxu0 %v7113_v10  ;;  %2545 = vmatprep.mubr.f32.mxu0 %v7034_v0 }
 0x983   :  { %4458 = vmatpush3.msra.mxu1 %v7114_v54  ;;  %4459 = vmatprep.mubr.msk.f32.mxu1 %vm5106_vm0, %v7034_v0 }
 0x984   :  { %2652 = vmatprep.subr.mxu0 %v7115_v57  ;;  %4462 = vmatprep.subr.mxu1 %v7034_v0 }
 0xa23   :  { %v2376_v4 = vpop.f32.mrf.mxu0  ;;  %v2447_v30 = vpop.f32.mrf.mxu1 }
 0xa24   :  { %v2454_v25 = vadd.f32 %v2376_v4, %v7118_v12 }
 0xa25   :  { %v4426_v21 = vpop.f32.mrf.mxu1  ;;  %v2378_v27 = vpop.f32.mrf.mxu0 }
 0xa26   :  { %v3637_v41 = vmul.f32 -1.442695, %v2454_v25  ;;  %v2461_v22 = vadd.f32 %v2378_v27, %v7119_v45 }
 0xa28   :  { %4778 = vpow2.f32 %v3637_v41  ;;  %v3638_v26 = vmul.f32 -1.442695, %v2461_v22  ;;  %v7128_v22 = vld [vmem:[#allocation32_spill] sm:$0xff] }
 0xa2a   :  { %4780 = vpow2.f32 %v3638_v26 }
 0xa35   :  { %v4779_v43 = vpop.eup %4778 }
 0xa36   :  { %v2458_v57 = vadd.f32 1.0, %v4779_v43 }
 0xa37   :  { %v4781_v54 = vpop.eup %4780 }
 0xa38   :  { %4782 = vrcp.f32 %v2458_v57  ;;  %v2465_v55 = vadd.f32 1.0, %v4781_v54  ;;  %v7124_v54 = vld [vmem:[#allocation30_spill] sm:$0xff]  ;;  %v7125_v57 = vld [vmem:[#allocation41_spill] sm:$0xff] }
 0xa45   :  { %v4783_v8 = vpop.eup %4782 }
 0xa46   :  { %v2468_v10 = vmul.f32 %v4783_v8, %v2447_v30  ;;  %v7126_v8 = vld [vmem:[#allocation24_spill] sm:$0xff] }
 0xa47   :  { %vm2816_vm4 = vcmp.eq.s32.totalorder %v7126_v8, 3 }
 0xa48   :  { %v2469_v29 = vadd.f32 %v7120_v28, %v2468_v10  ;;  %v7123_v10 = vld [vmem:[#allocation23_spill] sm:$0xff]  ;;  %v7127_v28 = vmov 0  }
 0xa49   :  { %v2817_v30 = vsel %vm2816_vm4, 1, %v7127_v28  ;;  %v7130_v28 = vld [vmem:[#allocation36_spill] sm:$0xff] }
 0xa4a   :  { %4784 = vtanh.f32 %v2469_v29  ;;  %2819 = vperm.xlu1 %4687, %v2817_v30  }
 0xa4b   :  { %4786 = vrcp.f32 %v2465_v55  ;;  %v7122_v55 = vld [vmem:[#allocation22_spill] sm:$0xff] }
 0xa57   :  { %v4785_v4 = vpop.eup %4784 }
 0xa58   :  { %v2471_v12 = vsub.f32 %v6355_v6, %v4785_v4  ;;  %v4787_v25 = vpop.eup %4786 }
 0xa5a   :  { %v2472_v21 = vmul.f32 %v4787_v25, %v2471_v12  ;;  %v7129_v12 = vld [vmem:[#allocation43_spill] sm:$0xff] }
 0xa5c   :  { %v6432_v41 = vadd.f32 %v4785_v4, %v2472_v21 }
 0xa5e   :  { %7121 = vst [vmem:[#allocation29_spill] sm:$0xff] %v6432_v41  ;;  %2546 = vmatmul.mubr.f32.vlgmr.msra.gmra.mxu0 %v6432_v41  ;;  %4460 = vmatmul.mubr.f32.vlgmr.msra.gmra.mxu1 %v6432_v41 }
 0xa5f   :  { %2653 = vmatpush1.msra.mxu0 %v6068_v31  ;;  %4463 = vmatpush3.msra.mxu1 %v6160_v58 }
 0xa60   :  { %2654 = vmatprep.subr.mxu0 %v6071_v44  ;;  %4464 = vmatprep.subr.mxu1 %v7034_v0 }
 0xa61   :  { %2655 = vmatpush1.msra.mxu0 %v6074_v13  ;;  %4465 = vmatpush3.msra.mxu1 %v6162_v59 }
 0xa62   :  { %2656 = vmatprep.subr.mxu0 %v6077_v3  ;;  %4466 = vmatprep.subr.mxu1 %v7034_v0 }
 0xa63   :  { %2657 = vmatpush1.msra.mxu0 %v6080_v32  ;;  %4467 = vmatpush3.msra.mxu1 %v6167_v60 }
 0xa64   :  { %2658 = vmatprep.subr.mxu0 %v6083_v50  ;;  %4468 = vmatprep.subr.mxu1 %v7034_v0 }
 0xa65   :  { %2659 = vmatpush1.msra.mxu0 %v6086_v33  ;;  %4469 = vmatpush3.msra.mxu1 %v6173_v7 }
 0xa66   :  { %2660 = vmatprep.subr.mxu0 %v6089_v5  ;;  %4470 = vmatprep.subr.mxu1 %v7034_v0 }
 0xa67   :  { %2661 = vmatpush1.msra.mxu0 %v6092_v34  ;;  %4471 = vmatpush3.msra.mxu1 %v6183_v9 }
 0xa68   :  { %2662 = vmatprep.subr.mxu0 %v6095_v11  ;;  %4472 = vmatprep.subr.mxu1 %v7034_v0 }
 0xa69   :  { %2663 = vmatpush1.msra.mxu0 %v6098_v35  ;;  %4473 = vmatpush3.msra.mxu1 %v6189_v51 }
 0xa6a   :  { %2664 = vmatprep.subr.mxu0 %v6101_v36  ;;  %4474 = vmatprep.subr.mxu1 %v7034_v0 }
 0xa6b   :  { %2665 = vmatpush1.msra.mxu0 %v6104_v42  ;;  %4475 = vmatpush3.msra.mxu1 %v6193_v48 }
 0xa6c   :  { %2666 = vmatprep.subr.mxu0 %v6107_v37  ;;  %4476 = vmatprep.subr.mxu1 %v7034_v0 }
 0xa6d   :  { %2667 = vmatpush1.msra.mxu0 %v6110_v49  ;;  %4477 = vmatpush3.msra.mxu1 %v6197_v63 }
 0xa6e   :  { %2668 = vmatprep.subr.mxu0 %v6113_v38  ;;  %4478 = vmatprep.subr.mxu1 %v7034_v0 }
 0xa6f   :  { %2669 = vmatpush1.msra.mxu0 %v6116_v56  ;;  %4479 = vmatpush3.msra.mxu1 %v6201_v1 }
 0xa70   :  { %2670 = vmatprep.subr.mxu0 %v6119_v14  ;;  %4480 = vmatprep.subr.mxu1 %v7034_v0 }
 0xa71   :  { %2671 = vmatpush1.msra.mxu0 %v6122_v15  ;;  %4481 = vmatpush3.msra.mxu1 %v6205_v2 }
 0xa72   :  { %2672 = vmatprep.subr.mxu0 %v6125_v17  ;;  %4482 = vmatprep.subr.mxu1 %v7034_v0 }
 0xa73   :  { %2673 = vmatpush1.msra.mxu0 %v6128_v18  ;;  %4483 = vmatpush3.msra.mxu1 %v6209_v16 }
 0xa74   :  { %2674 = vmatprep.subr.mxu0 %v6131_v19  ;;  %4484 = vmatprep.subr.mxu1 %v7034_v0 }
 0xa75   :  { %2675 = vmatpush1.msra.mxu0 %v6134_v39  ;;  %4485 = vmatpush3.msra.mxu1 %v6213_v62 }
 0xa76   :  { %2676 = vmatprep.subr.mxu0 %v6137_v40  ;;  %4486 = vmatprep.subr.mxu1 %v7034_v0 }
 0xa77   :  { %2677 = vmatpush1.msra.mxu0 %v6140_v61  ;;  %4487 = vmatpush3.msra.mxu1 %v6217_v20 }
 0xa78   :  { %2678 = vmatprep.subr.mxu0 %v6143_v46  ;;  %4488 = vmatprep.subr.mxu1 %v7034_v0 }
 0xa79   :  { %2679 = vmatpush1.msra.mxu0 %v6146_v47  ;;  %4489 = vmatpush3.msra.mxu1 %v6221_v23 }
 0xa7a   :  { %2680 = vmatprep.subr.mxu0 %v6148_v52  ;;  %4490 = vmatprep.subr.mxu1 %v7034_v0 }
 0xa7b   :  { %2681 = vmatpush1.msra.mxu0 %v6150_v53  ;;  %4491 = vmatpush3.msra.mxu1 %v7111_v24 }
 0xa7c   :  { %2682 = vmatprep.subr.mxu0 %v7122_v55  ;;  %4492 = vmatprep.subr.mxu1 %v7034_v0 }
 0xa7d   :  { %2683 = vmatpush1.msra.mxu0 %v7123_v10  ;;  %2716 = vmatprep.mubr.f32.mxu0 %v7034_v0 }
 0xa7e   :  { %4493 = vmatpush3.msra.mxu1 %v7124_v54  ;;  %4494 = vmatprep.mubr.msk.f32.mxu1 %vm5106_vm0, %v7034_v0 }
 0xa7f   :  { %2823 = vmatprep.subr.mxu0 %v7125_v57  ;;  %4497 = vmatprep.subr.mxu1 %v7034_v0 }
 0xb1e   :  { %v2547_v27 = vpop.f32.mrf.mxu0  ;;  %v2618_v45 = vpop.f32.mrf.mxu1 }
 0xb1f   :  { %v2625_v26 = vadd.f32 %v2547_v27, %v7128_v22 }
 0xb20   :  { %v4461_v43 = vpop.f32.mrf.mxu1  ;;  %v2549_v4 = vpop.f32.mrf.mxu0 }
 0xb21   :  { %v3639_v29 = vmul.f32 -1.442695, %v2625_v26  ;;  %v2632_v25 = vadd.f32 %v2549_v4, %v7129_v12  ;;  %v6624_v4 = vld [vmem:[#allocation12 + $0x108] sm:$0xff]  ;;  %v6632_v12 = vld [vmem:[#allocation12 + $0xf0] sm:$0xff] }
 0xb23   :  { %4788 = vpow2.f32 %v3639_v29  ;;  %v3640_v21 = vmul.f32 -1.442695, %v2632_v25  ;;  %v6640_v25 = vld [vmem:[#allocation12 + $0xd8] sm:$0xff] }
 0xb25   :  { %4790 = vpow2.f32 %v3640_v21  ;;  %v6648_v21 = vld [vmem:[#allocation12 + $0xc0] sm:$0xff] }
 0xb30   :  { %v4789_v6 = vpop.eup %4788 }
 0xb31   :  { %v2629_v57 = vadd.f32 1.0, %v4789_v6 }
 0xb32   :  { %v4791_v54 = vpop.eup %4790 }
 0xb33   :  { %4792 = vrcp.f32 %v2629_v57  ;;  %v2636_v55 = vadd.f32 1.0, %v4791_v54  ;;  %v6600_v54 = vld [vmem:[#allocation12 + $0x150] sm:$0xff]  ;;  %v6656_v57 = vld [vmem:[#allocation12 + $0xa8] sm:$0xff] }
 0xb40   :  { %v4793_v8 = vpop.eup %4792 }
 0xb41   :  { %v2639_v10 = vmul.f32 %v4793_v8, %v2618_v45  ;;  %v6604_v8 = vld [vmem:[#allocation12 + $0x140] sm:$0xff] }
 0xb42   :  { %v6616_v45 = vld [vmem:[#allocation12 + $0x120] sm:$0xff] }
 0xb43   :  { %v2640_v30 = vadd.f32 %v2639_v10, %v7130_v28  ;;  %v6596_v10 = vld [vmem:[#allocation12 + $0x158] sm:$0xff] }
 0xb44   :  { %v6608_v28 = vld [vmem:[#allocation12 + $0x138] sm:$0xff] }
 0xb45   :  { %4794 = vtanh.f32 %v2640_v30  ;;  %v6664_v30 = vld [vmem:[#allocation12 + $0x90] sm:$0xff] }
 0xb46   :  { %4796 = vrcp.f32 %v2636_v55  ;;  %v6592_v55 = vld [vmem:[#allocation12 + $0x168] sm:$0xff] }
 0xb52   :  { %v4795_v27 = vpop.eup %4794 }
 0xb53   :  { %v2642_v22 = vsub.f32 %v6432_v41, %v4795_v27  ;;  %v4797_v26 = vpop.eup %4796 }
 0xb55   :  { %v2643_v43 = vmul.f32 %v4797_v26, %v2642_v22  ;;  %v6680_v22 = vld [vmem:[#allocation12 + $0x60] sm:$0xff]  ;;  %v6688_v26 = vld [vmem:[#allocation12 + $0x48] sm:$0xff] }
 0xb57   :  { %v6509_v29 = vadd.f32 %v4795_v27, %v2643_v43  ;;  %v6672_v27 = vld [vmem:[#allocation12 + $0x78] sm:$0xff]  ;;  %v6696_v43 = vld [vmem:[#allocation12 + $0x30] sm:$0xff] }
 0xb59   :  { %7131 = vst [vmem:[#allocation40_spill] sm:$0xff] %v6509_v29  ;;  %2717 = vmatmul.mubr.f32.vlgmr.msra.gmra.mxu0 %v6509_v29  ;;  %4495 = vmatmul.mubr.f32.vlgmr.msra.gmra.mxu1 %v6509_v29 }
 0xb5a   :  { %2824 = vmatpush1.msra.mxu0 %v6068_v31  ;;  %4498 = vmatpush3.msra.mxu1 %v6160_v58  ;;  %v7132_v31 = vld [vmem:[#allocation22_spill] sm:$0xff] }
 0xb5b   :  { %2825 = vmatprep.subr.mxu0 %v6071_v44  ;;  %4499 = vmatprep.subr.mxu1 %v7034_v0  ;;  %v7133_v44 = vld [vmem:[#allocation23_spill] sm:$0xff] }
 0xb5c   :  { %2826 = vmatpush1.msra.mxu0 %v6074_v13  ;;  %4500 = vmatpush3.msra.mxu1 %v6162_v59  ;;  %v7134_v13 = vld [vmem:[#allocation30_spill] sm:$0xff] }
 0xb5d   :  { %2827 = vmatprep.subr.mxu0 %v6077_v3  ;;  %4501 = vmatprep.subr.mxu1 %v7034_v0  ;;  %v6578_v3 = vld [vmem:[#allocation12 + $0x170] sm:$0xff] }
 0xb5e   :  { %2828 = vmatpush1.msra.mxu0 %v6080_v32  ;;  %4502 = vmatpush3.msra.mxu1 %v6167_v60  ;;  %v7135_v32 = vld [vmem:[#allocation24_spill] sm:$0xff] }
 0xb5f   :  { %2829 = vmatprep.subr.mxu0 %v6083_v50  ;;  %4503 = vmatprep.subr.mxu1 %v7034_v0  ;;  %vm2987_vm5 = vcmp.eq.s32.totalorder %v7135_v32, 4  ;;  %v7136_v50 = vmov 0  }
 0xb60   :  { %2830 = vmatpush1.msra.mxu0 %v6086_v33  ;;  %4504 = vmatpush3.msra.mxu1 %v6173_v7  ;;  %v2988_v33 = vsel %vm2987_vm5, 1, %v7136_v50 }
 0xb61   :  { %2831 = vmatprep.subr.mxu0 %v6089_v5  ;;  %4505 = vmatprep.subr.mxu1 %v7034_v0 }
 0xb62   :  { %2832 = vmatpush1.msra.mxu0 %v6092_v34  ;;  %4506 = vmatpush3.msra.mxu1 %v6183_v9 }
 0xb63   :  { %2833 = vmatprep.subr.mxu0 %v6095_v11  ;;  %4507 = vmatprep.subr.mxu1 %v7034_v0  ;;  %v7137_v11 = vld [vmem:[#allocation33_spill] sm:$0xff] }
 0xb64   :  { %2834 = vmatpush1.msra.mxu0 %v6098_v35  ;;  %4508 = vmatpush3.msra.mxu1 %v6189_v51 }
 0xb65   :  { %2835 = vmatprep.subr.mxu0 %v6101_v36  ;;  %4509 = vmatprep.subr.mxu1 %v7034_v0 }
 0xb66   :  { %2836 = vmatpush1.msra.mxu0 %v6104_v42  ;;  %4510 = vmatpush3.msra.mxu1 %v6193_v48 }
 0xb67   :  { %2837 = vmatprep.subr.mxu0 %v6107_v37  ;;  %4511 = vmatprep.subr.mxu1 %v7034_v0 }
 0xb68   :  { %2838 = vmatpush1.msra.mxu0 %v6110_v49  ;;  %4512 = vmatpush3.msra.mxu1 %v6197_v63  ;;  %v7138_v49 = vld [vmem:[#allocation34_spill] sm:$0xff] }
 0xb69   :  { %2839 = vmatprep.subr.mxu0 %v6113_v38  ;;  %4513 = vmatprep.subr.mxu1 %v7034_v0 }
 0xb6a   :  { %2840 = vmatpush1.msra.mxu0 %v6116_v56  ;;  %4514 = vmatpush3.msra.mxu1 %v6201_v1 }
 0xb6b   :  { %2841 = vmatprep.subr.mxu0 %v6119_v14  ;;  %4515 = vmatprep.subr.mxu1 %v7034_v0 }
 0xb6c   :  { %2842 = vmatpush1.msra.mxu0 %v6122_v15  ;;  %4516 = vmatpush3.msra.mxu1 %v6205_v2 }
 0xb6d   :  { %2843 = vmatprep.subr.mxu0 %v6125_v17  ;;  %4517 = vmatprep.subr.mxu1 %v7034_v0 }
 0xb6e   :  { %2844 = vmatpush1.msra.mxu0 %v6128_v18  ;;  %4518 = vmatpush3.msra.mxu1 %v6209_v16 }
 0xb6f   :  { %2845 = vmatprep.subr.mxu0 %v6131_v19  ;;  %4519 = vmatprep.subr.mxu1 %v7034_v0 }
 0xb70   :  { %2846 = vmatpush1.msra.mxu0 %v6134_v39  ;;  %4520 = vmatpush3.msra.mxu1 %v6213_v62  ;;  %v7139_v39 = vld [vmem:[#allocation28_spill] sm:$0xff] }
 0xb71   :  { %2847 = vmatprep.subr.mxu0 %v6137_v40  ;;  %4521 = vmatprep.subr.mxu1 %v7034_v0 }
 0xb72   :  { %2848 = vmatpush1.msra.mxu0 %v6140_v61  ;;  %4522 = vmatpush3.msra.mxu1 %v6217_v20 }
 0xb73   :  { %2849 = vmatprep.subr.mxu0 %v6143_v46  ;;  %4523 = vmatprep.subr.mxu1 %v7034_v0 }
 0xb74   :  { %2850 = vmatpush1.msra.mxu0 %v6146_v47  ;;  %4524 = vmatpush3.msra.mxu1 %v6221_v23 }
 0xb75   :  { %2851 = vmatprep.subr.mxu0 %v6148_v52  ;;  %4525 = vmatprep.subr.mxu1 %v7034_v0 }
 0xb76   :  { %2852 = vmatpush1.msra.mxu0 %v6150_v53  ;;  %4526 = vmatpush3.msra.mxu1 %v7111_v24 }
 0xb77   :  { %2853 = vmatprep.subr.mxu0 %v7132_v31  ;;  %4527 = vmatprep.subr.mxu1 %v7034_v0  ;;  %v6704_v31 = vld [vmem:[#allocation12 + $0x18] sm:$0xff] }
 0xb78   :  { %2854 = vmatpush1.msra.mxu0 %v7133_v44  ;;  %2887 = vmatprep.mubr.f32.mxu0 %v7034_v0  ;;  %v6712_v44 = vld [vmem:[#allocation12] sm:$0xff] }
 0xb79   :  { %4528 = vmatpush3.msra.mxu1 %v7134_v13  ;;  %4529 = vmatprep.mubr.msk.f32.mxu1 %vm5106_vm0, %v7034_v0  ;;  %7142 = vst [vmem:[#allocation41_spill] sm:$0xff] %v6712_v44 }
 0xb7a   :  { %2994 = vmatprep.subr.mxu0 %v6578_v3  ;;  %4532 = vmatprep.subr.mxu1 %v7034_v0 }
 0xb7b   :  { %2990 = vperm.xlu0 %4686, %v2988_v33  }
 0xc19   :  { %v2718_v5 = vpop.f32.mrf.mxu0  ;;  %v2789_v34 = vpop.f32.mrf.mxu1 }
 0xc1a   :  { %v2796_v35 = vadd.f32 %v2718_v5, %v7137_v11 }
 0xc1b   :  { %v4496_v36 = vpop.f32.mrf.mxu1  ;;  %v2720_v37 = vpop.f32.mrf.mxu0 }
 0xc1c   :  { %v3641_v42 = vmul.f32 -1.442695, %v2796_v35  ;;  %v2803_v38 = vadd.f32 %v2720_v37, %v7138_v49  ;;  %v7145_v36 = vld [vmem:[#allocation27_spill] sm:$0xff] }
 0xc1e   :  { %4798 = vpow2.f32 %v3641_v42  ;;  %v3642_v56 = vmul.f32 -1.442695, %v2803_v38 }
 0xc20   :  { %4800 = vpow2.f32 %v3642_v56 }
 0xc2b   :  { %v4799_v14 = vpop.eup %4798 }
 0xc2c   :  { %v2800_v15 = vadd.f32 1.0, %v4799_v14 }
 0xc2d   :  { %v4801_v17 = vpop.eup %4800 }
 0xc2e   :  { %4802 = vrcp.f32 %v2800_v15  ;;  %v2807_v61 = vadd.f32 1.0, %v4801_v17  ;;  %v7146_v17 = vld [vmem:[#allocation26_spill] sm:$0xff] }
 0xc3b   :  { %v4803_v18 = vpop.eup %4802 }
 0xc3c   :  { %v2810_v19 = vmul.f32 %v4803_v18, %v2789_v34 }
 0xc3e   :  { %v2811_v40 = vadd.f32 %v7139_v39, %v2810_v19 }
 0xc40   :  { %4804 = vtanh.f32 %v2811_v40 }
 0xc41   :  { %4806 = vrcp.f32 %v2807_v61 }
 0xc4d   :  { %v4805_v46 = vpop.eup %4804 }
 0xc4e   :  { %v2813_v47 = vsub.f32 %v6509_v29, %v4805_v46  ;;  %v4807_v52 = vpop.eup %4806 }
 0xc50   :  { %v2814_v53 = vmul.f32 %v4807_v52, %v2813_v47  ;;  %v6737_v52 = vld [vmem:[#allocation12 + $0x178] sm:$0xff] }
 0xc52   :  { %v6588_v6 = vadd.f32 %v4805_v46, %v2814_v53  ;;  %v6743_v53 = vld [vmem:[#allocation12 + $0x160] sm:$0xff] }
 0xc54   :  { %7140 = vst [vmem:[#allocation31_spill] sm:$0xff] %v6588_v6  ;;  %2888 = vmatmul.mubr.f32.vlgmr.msra.gmra.mxu0 %v6588_v6  ;;  %4530 = vmatmul.mubr.f32.vlgmr.msra.gmra.mxu1 %v6588_v6 }
 0xc55   :  { %2995 = vmatpush1.msra.mxu0 %v6592_v55  ;;  %4533 = vmatpush3.msra.mxu1 %v6160_v58  ;;  %v6612_v58 = vld [vmem:[#allocation12 + $0x128] sm:$0xff] }
 0xc56   :  { %2996 = vmatprep.subr.mxu0 %v6596_v10  ;;  %4534 = vmatprep.subr.mxu1 %v7034_v0 }
 0xc57   :  { %2997 = vmatpush1.msra.mxu0 %v6600_v54  ;;  %4535 = vmatpush3.msra.mxu1 %v6162_v59  ;;  %v6620_v59 = vld [vmem:[#allocation12 + $0x110] sm:$0xff] }
 0xc58   :  { %2998 = vmatprep.subr.mxu0 %v6604_v8  ;;  %4536 = vmatprep.subr.mxu1 %v7034_v0 }
 0xc59   :  { %2999 = vmatpush1.msra.mxu0 %v6608_v28  ;;  %4537 = vmatpush3.msra.mxu1 %v6167_v60  ;;  %v6628_v60 = vld [vmem:[#allocation12 + $0xf8] sm:$0xff] }
 0xc5a   :  { %3000 = vmatprep.subr.mxu0 %v6612_v58  ;;  %4538 = vmatprep.subr.mxu1 %v7034_v0 }
 0xc5b   :  { %3001 = vmatpush1.msra.mxu0 %v6616_v45  ;;  %4539 = vmatpush3.msra.mxu1 %v6173_v7  ;;  %v6636_v7 = vld [vmem:[#allocation12 + $0xe0] sm:$0xff] }
 0xc5c   :  { %3002 = vmatprep.subr.mxu0 %v6620_v59  ;;  %4540 = vmatprep.subr.mxu1 %v7034_v0 }
 0xc5d   :  { %3003 = vmatpush1.msra.mxu0 %v6624_v4  ;;  %4541 = vmatpush3.msra.mxu1 %v6183_v9  ;;  %v6644_v9 = vld [vmem:[#allocation12 + $0xc8] sm:$0xff] }
 0xc5e   :  { %3004 = vmatprep.subr.mxu0 %v6628_v60  ;;  %4542 = vmatprep.subr.mxu1 %v7034_v0 }
 0xc5f   :  { %3005 = vmatpush1.msra.mxu0 %v6632_v12  ;;  %4543 = vmatpush3.msra.mxu1 %v6189_v51  ;;  %v6652_v51 = vld [vmem:[#allocation12 + $0xb0] sm:$0xff] }
 0xc60   :  { %3006 = vmatprep.subr.mxu0 %v6636_v7  ;;  %4544 = vmatprep.subr.mxu1 %v7034_v0 }
 0xc61   :  { %3007 = vmatpush1.msra.mxu0 %v6640_v25  ;;  %4545 = vmatpush3.msra.mxu1 %v6193_v48  ;;  %v6660_v48 = vld [vmem:[#allocation12 + $0x98] sm:$0xff] }
 0xc62   :  { %3008 = vmatprep.subr.mxu0 %v6644_v9  ;;  %4546 = vmatprep.subr.mxu1 %v7034_v0 }
 0xc63   :  { %3009 = vmatpush1.msra.mxu0 %v6648_v21  ;;  %4547 = vmatpush3.msra.mxu1 %v6197_v63  ;;  %v6668_v63 = vld [vmem:[#allocation12 + $0x80] sm:$0xff] }
 0xc64   :  { %3010 = vmatprep.subr.mxu0 %v6652_v51  ;;  %4548 = vmatprep.subr.mxu1 %v7034_v0 }
 0xc65   :  { %3011 = vmatpush1.msra.mxu0 %v6656_v57  ;;  %4549 = vmatpush3.msra.mxu1 %v6201_v1  ;;  %v6676_v1 = vld [vmem:[#allocation12 + $0x68] sm:$0xff] }
 0xc66   :  { %3012 = vmatprep.subr.mxu0 %v6660_v48  ;;  %4550 = vmatprep.subr.mxu1 %v7034_v0 }
 0xc67   :  { %3013 = vmatpush1.msra.mxu0 %v6664_v30  ;;  %4551 = vmatpush3.msra.mxu1 %v6205_v2  ;;  %v6684_v2 = vld [vmem:[#allocation12 + $0x50] sm:$0xff] }
 0xc68   :  { %3014 = vmatprep.subr.mxu0 %v6668_v63  ;;  %4552 = vmatprep.subr.mxu1 %v7034_v0 }
 0xc69   :  { %3015 = vmatpush1.msra.mxu0 %v6672_v27  ;;  %4553 = vmatpush3.msra.mxu1 %v6209_v16  ;;  %v6692_v16 = vld [vmem:[#allocation12 + $0x38] sm:$0xff] }
 0xc6a   :  { %3016 = vmatprep.subr.mxu0 %v6676_v1  ;;  %4554 = vmatprep.subr.mxu1 %v7034_v0 }
 0xc6b   :  { %3017 = vmatpush1.msra.mxu0 %v6680_v22  ;;  %4555 = vmatpush3.msra.mxu1 %v6213_v62  ;;  %v6700_v62 = vld [vmem:[#allocation12 + $0x20] sm:$0xff] }
 0xc6c   :  { %3018 = vmatprep.subr.mxu0 %v6684_v2  ;;  %4556 = vmatprep.subr.mxu1 %v7034_v0 }
 0xc6d   :  { %3019 = vmatpush1.msra.mxu0 %v6688_v26  ;;  %4557 = vmatpush3.msra.mxu1 %v6217_v20  ;;  %v6708_v20 = vld [vmem:[#allocation12 + $0x8] sm:$0xff] }
 0xc6e   :  { %3020 = vmatprep.subr.mxu0 %v6692_v16  ;;  %4558 = vmatprep.subr.mxu1 %v7034_v0  ;;  %7141 = vst [vmem:[#allocation42_spill] sm:$0xff] %v6708_v20 }
 0xc6f   :  { %3021 = vmatpush1.msra.mxu0 %v6696_v43  ;;  %4559 = vmatpush3.msra.mxu1 %v6221_v23  ;;  %v6724_v23 = vld [vmem:[%s6956_s1] sm:$0xff] }
 0xc70   :  { %3022 = vmatprep.subr.mxu0 %v6700_v62  ;;  %4560 = vmatprep.subr.mxu1 %v7034_v0  ;;  %7143 = vst [vmem:[#allocation32_spill] sm:$0xff] %v6724_v23  ;;  %vm3158_vm6 = vcmp.eq.s32.totalorder %v6724_v23, 5  ;;  %vm3329_vm7 = vcmp.eq.s32.totalorder %v6724_v23, 6 }
 0xc71   :  { %3023 = vmatpush1.msra.mxu0 %v6704_v31  ;;  %4561 = vmatpush3.msra.mxu1 %v7111_v24  ;;  %v3159_v24 = vsel %vm3158_vm6, 1, %v7136_v50 }
 0xc72   :  { %3024 = vmatprep.subr.mxu0 %v6708_v20  ;;  %4562 = vmatprep.subr.mxu1 %v7034_v0 }
 0xc73   :  { %3025 = vmatpush1.msra.mxu0 %v6712_v44  ;;  %3058 = vmatprep.mubr.f32.mxu0 %v7034_v0 }
 0xc74   :  { %4563 = vmatpush3.msra.mxu1 %v7134_v13  ;;  %4564 = vmatprep.mubr.msk.f32.mxu1 %vm5106_vm0, %v7034_v0  ;;  %v7144_v13 = vld [vmem:[#allocation21_spill] sm:$0xff] }
 0xc75   :  { %3165 = vmatprep.subr.mxu0 %v6578_v3  ;;  %4567 = vmatprep.subr.mxu1 %v7034_v0 }
 0xc76   :  { %3161 = vperm.xlu1 %4687, %v3159_v24   ;;  %v6749_v24 = vld [vmem:[#allocation12 + $0x148] sm:$0xff] }
 0xd14   :  { %v2889_v32 = vpop.f32.mrf.mxu0  ;;  %v2960_v33 = vpop.f32.mrf.mxu1 }
 0xd15   :  { %v2967_v5 = vadd.f32 %v2889_v32, %v7144_v13  ;;  %v6755_v32 = vld [vmem:[#allocation12 + $0x130] sm:$0xff]  ;;  %v6767_v13 = vld [vmem:[#allocation12 + $0x100] sm:$0xff] }
 0xd16   :  { %v4531_v34 = vpop.f32.mrf.mxu1  ;;  %v2891_v35 = vpop.f32.mrf.mxu0 }
 0xd17   :  { %v3643_v11 = vmul.f32 -1.442695, %v2967_v5  ;;  %v2974_v42 = vadd.f32 %v2891_v35, %v7145_v36  ;;  %v6773_v5 = vld [vmem:[#allocation12 + $0xe8] sm:$0xff]  ;;  %v6779_v34 = vld [vmem:[#allocation12 + $0xd0] sm:$0xff]  ;;  %v6791_v35 = vld [vmem:[#allocation12 + $0xa0] sm:$0xff] }
 0xd18   :  { %v6797_v36 = vld [vmem:[#allocation12 + $0x88] sm:$0xff] }
 0xd19   :  { %4808 = vpow2.f32 %v3643_v11  ;;  %v3644_v37 = vmul.f32 -1.442695, %v2974_v42  ;;  %v6785_v11 = vld [vmem:[#allocation12 + $0xb8] sm:$0xff]  ;;  %v6803_v42 = vld [vmem:[#allocation12 + $0x70] sm:$0xff] }
 0xd1b   :  { %4810 = vpow2.f32 %v3644_v37  ;;  %v6809_v37 = vld [vmem:[#allocation12 + $0x58] sm:$0xff] }
 0xd26   :  { %v4809_v49 = vpop.eup %4808 }
 0xd27   :  { %v2971_v38 = vadd.f32 1.0, %v4809_v49  ;;  %v6815_v49 = vld [vmem:[#allocation12 + $0x40] sm:$0xff] }
 0xd28   :  { %v4811_v56 = vpop.eup %4810 }
 0xd29   :  { %4812 = vrcp.f32 %v2971_v38  ;;  %v2978_v19 = vadd.f32 1.0, %v4811_v56  ;;  %v6821_v38 = vld [vmem:[#allocation12 + $0x28] sm:$0xff]  ;;  %v6828_v56 = vld [vmem:[#allocation12 + $0x10] sm:$0xff] }
 0xd2a   :  { %7147 = vst [vmem:[#allocation43_spill] sm:$0xff] %v6828_v56 }
 0xd36   :  { %v4813_v14 = vpop.eup %4812 }
 0xd37   :  { %v2981_v15 = vmul.f32 %v4813_v14, %v2960_v33  ;;  %v6761_v33 = vld [vmem:[#allocation12 + $0x118] sm:$0xff]  ;;  %v3330_v14 = vsel %vm3329_vm7, 1, %v7136_v50  ;;  %v7150_v50 = vld [vmem:[#allocation46_spill] sm:$0xff] }
 0xd38   :  { %3332 = vperm.xlu0 %4686, %v3330_v14  }
 0xd39   :  { %v2982_v18 = vadd.f32 %v2981_v15, %v7146_v17 }
 0xd3b   :  { %4814 = vtanh.f32 %v2982_v18  ;;  %v7148_v18 = vld [vmem:[#allocation35_spill] sm:$0xff] }
 0xd3c   :  { %4816 = vrcp.f32 %v2978_v19 }
 0xd48   :  { %v4815_v39 = vpop.eup %4814 }
 0xd49   :  { %v2984_v40 = vsub.f32 %v6588_v6, %v4815_v39  ;;  %v4817_v61 = vpop.eup %4816 }
 0xd4b   :  { %v2985_v46 = vmul.f32 %v4817_v61, %v2984_v40 }
 0xd4d   :  { %v6732_v47 = vadd.f32 %v4815_v39, %v2985_v46  ;;  %v7149_v46 = vld [vmem:[#allocation45_spill] sm:$0xff] }
 0xd4f   :  { %3059 = vmatmul.mubr.f32.vlgmr.msra.gmra.mxu0 %v6732_v47  ;;  %4565 = vmatmul.mubr.f32.vlgmr.msra.gmra.mxu1 %v6732_v47 }
 0xd50   :  { %3166 = vmatpush1.msra.mxu0 %v6592_v55  ;;  %4568 = vmatpush3.msra.mxu1 %v6737_v52 }
 0xd51   :  { %3167 = vmatprep.subr.mxu0 %v6596_v10  ;;  %4569 = vmatprep.subr.mxu1 %v7034_v0 }
 0xd52   :  { %3168 = vmatpush1.msra.mxu0 %v6600_v54  ;;  %4570 = vmatpush3.msra.mxu1 %v6743_v53 }
 0xd53   :  { %3169 = vmatprep.subr.mxu0 %v6604_v8  ;;  %4571 = vmatprep.subr.mxu1 %v7034_v0 }
 0xd54   :  { %3170 = vmatpush1.msra.mxu0 %v6608_v28  ;;  %4572 = vmatpush3.msra.mxu1 %v6749_v24 }
 0xd55   :  { %3171 = vmatprep.subr.mxu0 %v6612_v58  ;;  %4573 = vmatprep.subr.mxu1 %v7034_v0 }
 0xd56   :  { %3172 = vmatpush1.msra.mxu0 %v6616_v45  ;;  %4574 = vmatpush3.msra.mxu1 %v6755_v32 }
 0xd57   :  { %3173 = vmatprep.subr.mxu0 %v6620_v59  ;;  %4575 = vmatprep.subr.mxu1 %v7034_v0 }
 0xd58   :  { %3174 = vmatpush1.msra.mxu0 %v6624_v4  ;;  %4576 = vmatpush3.msra.mxu1 %v6761_v33 }
 0xd59   :  { %3175 = vmatprep.subr.mxu0 %v6628_v60  ;;  %4577 = vmatprep.subr.mxu1 %v7034_v0 }
 0xd5a   :  { %3176 = vmatpush1.msra.mxu0 %v6632_v12  ;;  %4578 = vmatpush3.msra.mxu1 %v6767_v13 }
 0xd5b   :  { %3177 = vmatprep.subr.mxu0 %v6636_v7  ;;  %4579 = vmatprep.subr.mxu1 %v7034_v0 }
 0xd5c   :  { %3178 = vmatpush1.msra.mxu0 %v6640_v25  ;;  %4580 = vmatpush3.msra.mxu1 %v6773_v5 }
 0xd5d   :  { %3179 = vmatprep.subr.mxu0 %v6644_v9  ;;  %4581 = vmatprep.subr.mxu1 %v7034_v0 }
 0xd5e   :  { %3180 = vmatpush1.msra.mxu0 %v6648_v21  ;;  %4582 = vmatpush3.msra.mxu1 %v6779_v34 }
 0xd5f   :  { %3181 = vmatprep.subr.mxu0 %v6652_v51  ;;  %4583 = vmatprep.subr.mxu1 %v7034_v0 }
 0xd60   :  { %3182 = vmatpush1.msra.mxu0 %v6656_v57  ;;  %4584 = vmatpush3.msra.mxu1 %v6785_v11 }
 0xd61   :  { %3183 = vmatprep.subr.mxu0 %v6660_v48  ;;  %4585 = vmatprep.subr.mxu1 %v7034_v0 }
 0xd62   :  { %3184 = vmatpush1.msra.mxu0 %v6664_v30  ;;  %4586 = vmatpush3.msra.mxu1 %v6791_v35 }
 0xd63   :  { %3185 = vmatprep.subr.mxu0 %v6668_v63  ;;  %4587 = vmatprep.subr.mxu1 %v7034_v0 }
 0xd64   :  { %3186 = vmatpush1.msra.mxu0 %v6672_v27  ;;  %4588 = vmatpush3.msra.mxu1 %v6797_v36 }
 0xd65   :  { %3187 = vmatprep.subr.mxu0 %v6676_v1  ;;  %4589 = vmatprep.subr.mxu1 %v7034_v0 }
 0xd66   :  { %3188 = vmatpush1.msra.mxu0 %v6680_v22  ;;  %4590 = vmatpush3.msra.mxu1 %v6803_v42 }
 0xd67   :  { %3189 = vmatprep.subr.mxu0 %v6684_v2  ;;  %4591 = vmatprep.subr.mxu1 %v7034_v0 }
 0xd68   :  { %3190 = vmatpush1.msra.mxu0 %v6688_v26  ;;  %4592 = vmatpush3.msra.mxu1 %v6809_v37 }
 0xd69   :  { %3191 = vmatprep.subr.mxu0 %v6692_v16  ;;  %4593 = vmatprep.subr.mxu1 %v7034_v0 }
 0xd6a   :  { %3192 = vmatpush1.msra.mxu0 %v6696_v43  ;;  %4594 = vmatpush3.msra.mxu1 %v6815_v49 }
 0xd6b   :  { %3193 = vmatprep.subr.mxu0 %v6700_v62  ;;  %4595 = vmatprep.subr.mxu1 %v7034_v0 }
 0xd6c   :  { %3194 = vmatpush1.msra.mxu0 %v6704_v31  ;;  %4596 = vmatpush3.msra.mxu1 %v6821_v38 }
 0xd6d   :  { %3195 = vmatprep.subr.mxu0 %v6708_v20  ;;  %4597 = vmatprep.subr.mxu1 %v7034_v0 }
 0xd6e   :  { %3196 = vmatpush1.msra.mxu0 %v6712_v44  ;;  %3229 = vmatprep.mubr.f32.mxu0 %v7034_v0 }
 0xd6f   :  { %4598 = vmatpush3.msra.mxu1 %v6828_v56  ;;  %4599 = vmatprep.mubr.msk.f32.mxu1 %vm5106_vm0, %v7034_v0 }
 0xd70   :  { %3336 = vmatprep.subr.mxu0 %v6578_v3  ;;  %4602 = vmatprep.subr.mxu1 %v7034_v0 }
 0xe0f   :  { %v3060_v15 = vpop.f32.mrf.mxu0  ;;  %v3131_v17 = vpop.f32.mrf.mxu1 }
 0xe10   :  { %v3138_v19 = vadd.f32 %v3060_v15, %v7148_v18 }
 0xe11   :  { %v4566_v39 = vpop.f32.mrf.mxu1  ;;  %v3062_v61 = vpop.f32.mrf.mxu0 }
 0xe12   :  { %v3645_v40 = vmul.f32 -1.442695, %v3138_v19  ;;  %v3145_v6 = vadd.f32 %v3062_v61, %v7149_v46 }
 0xe14   :  { %4818 = vpow2.f32 %v3645_v40  ;;  %v3646_v29 = vmul.f32 -1.442695, %v3145_v6  ;;  %v7154_v6 = vld [vmem:[#allocation32_spill] sm:$0xff] }
 0xe15   :  { %vm3500_vm8 = vcmp.eq.s32.totalorder %v7154_v6, 7 }
 0xe16   :  { %4820 = vpow2.f32 %v3646_v29  ;;  %v7152_v29 = vld [vmem:[#allocation41_spill] sm:$0xff] }
 0xe21   :  { %v4819_v41 = vpop.eup %4818 }
 0xe22   :  { %v3142_v3 = vadd.f32 1.0, %v4819_v41  ;;  %v7151_v41 = vld [vmem:[#allocation42_spill] sm:$0xff] }
 0xe23   :  { %v4821_v56 = vpop.eup %4820 }
 0xe24   :  { %4822 = vrcp.f32 %v3142_v3  ;;  %v3149_v20 = vadd.f32 1.0, %v4821_v56 }
 0xe31   :  { %v4823_v23 = vpop.eup %4822 }
 0xe32   :  { %v3152_v44 = vmul.f32 %v4823_v23, %v3131_v17  ;;  %v3516_v23 = vld [vmem:[#allocation13 + $0x48] sm:$0xff]  ;;  %v7160_v17 = vld [vmem:[#allocation44_spill] sm:$0xff] }
 0xe34   :  { %v3153_v14 = vadd.f32 %v7150_v50, %v3152_v44  ;;  %v7153_v50 = vld [vmem:[#allocation43_spill] sm:$0xff]  ;;  %v3517_v44 = vld [vmem:[#allocation13 + $0x50] sm:$0xff] }
 0xe36   :  { %4824 = vtanh.f32 %v3153_v14 }
 0xe37   :  { %4826 = vrcp.f32 %v3149_v20  ;;  %v3518_v20 = vld [vmem:[#allocation13 + $0x58] sm:$0xff] }
 0xe43   :  { %v4825_v15 = vpop.eup %4824 }
 0xe44   :  { %v3155_v18 = vsub.f32 %v6732_v47, %v4825_v15  ;;  %v4827_v19 = vpop.eup %4826 }
 0xe46   :  { %v3156_v39 = vmul.f32 %v4827_v19, %v3155_v18 }
 0xe48   :  { %v6841_v40 = vadd.f32 %v4825_v15, %v3156_v39 }
 0xe4a   :  { %3230 = vmatmul.mubr.f32.vlgmr.msra.gmra.mxu0 %v6841_v40  ;;  %4600 = vmatmul.mubr.f32.vlgmr.msra.gmra.mxu1 %v6841_v40 }
 0xe4b   :  { %3337 = vmatpush1.msra.mxu0 %v6592_v55  ;;  %4603 = vmatpush3.msra.mxu1 %v6737_v52  ;;  %v7155_v55 = vmov 0   ;;  %v3515_v52 = vld [vmem:[#allocation13 + $0x40] sm:$0xff] }
 0xe4c   :  { %3338 = vmatprep.subr.mxu0 %v6596_v10  ;;  %4604 = vmatprep.subr.mxu1 %v7034_v0  ;;  %v3501_v10 = vsel %vm3500_vm8, 1, %v7155_v55 }
 0xe4d   :  { %3339 = vmatpush1.msra.mxu0 %v6600_v54  ;;  %4605 = vmatpush3.msra.mxu1 %v6743_v53  ;;  %v3514_v53 = vld [vmem:[#allocation13 + $0x38] sm:$0xff] }
 0xe4e   :  { %3340 = vmatprep.subr.mxu0 %v6604_v8  ;;  %4606 = vmatprep.subr.mxu1 %v7034_v0 }
 0xe4f   :  { %3341 = vmatpush1.msra.mxu0 %v6608_v28  ;;  %4607 = vmatpush3.msra.mxu1 %v6749_v24  ;;  %v7156_v28 = vld [vmem:[#allocation25_spill] sm:$0xff]  ;;  %v3513_v24 = vld [vmem:[#allocation13 + $0x30] sm:$0xff] }
 0xe50   :  { %3342 = vmatprep.subr.mxu0 %v6612_v58  ;;  %4608 = vmatprep.subr.mxu1 %v7034_v0 }
 0xe51   :  { %3343 = vmatpush1.msra.mxu0 %v6616_v45  ;;  %4609 = vmatpush3.msra.mxu1 %v6755_v32  ;;  %v3512_v32 = vld [vmem:[#allocation13 + $0x28] sm:$0xff] }
 0xe52   :  { %3344 = vmatprep.subr.mxu0 %v6620_v59  ;;  %4610 = vmatprep.subr.mxu1 %v7034_v0 }
 0xe53   :  { %3345 = vmatpush1.msra.mxu0 %v6624_v4  ;;  %4611 = vmatpush3.msra.mxu1 %v6761_v33  ;;  %v3511_v33 = vld [vmem:[#allocation13 + $0x20] sm:$0xff] }
 0xe54   :  { %3346 = vmatprep.subr.mxu0 %v6628_v60  ;;  %4612 = vmatprep.subr.mxu1 %v7034_v0  ;;  %v7157_v60 = vld [vmem:[#allocation39_spill] sm:$0xff] }
 0xe55   :  { %3347 = vmatpush1.msra.mxu0 %v6632_v12  ;;  %4613 = vmatpush3.msra.mxu1 %v6767_v13  ;;  %v3510_v13 = vld [vmem:[#allocation13 + $0x18] sm:$0xff] }
 0xe56   :  { %3348 = vmatprep.subr.mxu0 %v6636_v7  ;;  %4614 = vmatprep.subr.mxu1 %v7034_v0 }
 0xe57   :  { %3349 = vmatpush1.msra.mxu0 %v6640_v25  ;;  %4615 = vmatpush3.msra.mxu1 %v6773_v5  ;;  %v3509_v5 = vld [vmem:[#allocation13 + $0x10] sm:$0xff] }
 0xe58   :  { %3350 = vmatprep.subr.mxu0 %v6644_v9  ;;  %4616 = vmatprep.subr.mxu1 %v7034_v0 }
 0xe59   :  { %3351 = vmatpush1.msra.mxu0 %v6648_v21  ;;  %4617 = vmatpush3.msra.mxu1 %v6779_v34  ;;  %v3508_v34 = vld [vmem:[#allocation13 + $0x8] sm:$0xff] }
 0xe5a   :  { %3352 = vmatprep.subr.mxu0 %v6652_v51  ;;  %4618 = vmatprep.subr.mxu1 %v7034_v0 }
 0xe5b   :  { %3353 = vmatpush1.msra.mxu0 %v6656_v57  ;;  %4619 = vmatpush3.msra.mxu1 %v6785_v11  ;;  %v3507_v11 = vld [vmem:[#allocation13] sm:$0xff] }
 0xe5c   :  { %3354 = vmatprep.subr.mxu0 %v6660_v48  ;;  %4620 = vmatprep.subr.mxu1 %v7034_v0  ;;  %v7158_v48 = vld [vmem:[#allocation47_spill] sm:$0xff] }
 0xe5d   :  { %3355 = vmatpush1.msra.mxu0 %v6664_v30  ;;  %4621 = vmatpush3.msra.mxu1 %v6791_v35 }
 0xe5e   :  { %3356 = vmatprep.subr.mxu0 %v6668_v63  ;;  %4622 = vmatprep.subr.mxu1 %v7034_v0 }
 0xe5f   :  { %3357 = vmatpush1.msra.mxu0 %v6672_v27  ;;  %4623 = vmatpush3.msra.mxu1 %v6797_v36 }
 0xe60   :  { %3358 = vmatprep.subr.mxu0 %v6676_v1  ;;  %4624 = vmatprep.subr.mxu1 %v7034_v0 }
 0xe61   :  { %3359 = vmatpush1.msra.mxu0 %v6680_v22  ;;  %4625 = vmatpush3.msra.mxu1 %v6803_v42  ;;  %v7159_v42 = vld [vmem:[#allocation37_spill] sm:$0xff] }
 0xe62   :  { %3360 = vmatprep.subr.mxu0 %v6684_v2  ;;  %4626 = vmatprep.subr.mxu1 %v7034_v0 }
 0xe63   :  { %3361 = vmatpush1.msra.mxu0 %v6688_v26  ;;  %4627 = vmatpush3.msra.mxu1 %v6809_v37 }
 0xe64   :  { %3362 = vmatprep.subr.mxu0 %v6692_v16  ;;  %4628 = vmatprep.subr.mxu1 %v7034_v0  ;;  %v3522_v16 = vld [vmem:[#allocation13 + $0x78] sm:$0xff] }
 0xe65   :  { %3363 = vmatpush1.msra.mxu0 %v6696_v43  ;;  %4629 = vmatpush3.msra.mxu1 %v6815_v49  ;;  %v3521_v43 = vld [vmem:[#allocation13 + $0x70] sm:$0xff] }
 0xe66   :  { %3364 = vmatprep.subr.mxu0 %v6700_v62  ;;  %4630 = vmatprep.subr.mxu1 %v7034_v0  ;;  %v3520_v62 = vld [vmem:[#allocation13 + $0x68] sm:$0xff] }
 0xe67   :  { %3365 = vmatpush1.msra.mxu0 %v6704_v31  ;;  %4631 = vmatpush3.msra.mxu1 %v6821_v38  ;;  %v3519_v31 = vld [vmem:[#allocation13 + $0x60] sm:$0xff] }
 0xe68   :  { %3366 = vmatprep.subr.mxu0 %v7151_v41  ;;  %4632 = vmatprep.subr.mxu1 %v7034_v0 }
 0xe69   :  { %3367 = vmatpush1.msra.mxu0 %v7152_v29  ;;  %3400 = vmatprep.mubr.f32.mxu0 %v7034_v0  ;;  %v2307_v29 = vpop.permute.xlu0 %2306 }
 0xe6a   :  { %4633 = vmatpush3.msra.mxu1 %v7153_v50  ;;  %4634 = vmatprep.mubr.msk.f32.mxu1 %vm5106_vm0, %v7034_v0  ;;  %v2649_v50 = vpop.permute.xlu1 %2648  ;;  %vm2308_vm9 = vcmp.eq.s32.totalorder %v2307_v29, 1 }
 0xe6b   :  { %4637 = vmatprep.subr.mxu0 %v7034_v0  ;;  %3503 = vperm.xlu1 %4687, %v3501_v10   ;;  %vm2650_vm11 = vcmp.eq.s32.totalorder %v2649_v50, 1 }
 0xe6d   :  { %v2478_v6 = vpop.permute.xlu0 %2477 }
 0xe6e   :  { %v2820_v55 = vpop.permute.xlu1 %2819  ;;  %vm2479_vm10 = vcmp.eq.s32.totalorder %v2478_v6, 1 }
 0xe6f   :  { %vm2821_vm12 = vcmp.eq.s32.totalorder %v2820_v55, 1 }
 0xe71   :  { %v2991_v10 = vpop.permute.xlu0 %2990 }
 0xe72   :  { %vm2992_vm13 = vcmp.eq.s32.totalorder %v2991_v10, 1 }
 0xf0a   :  { %v3231_v54 = vpop.f32.mrf.mxu0  ;;  %v3302_v8 = vpop.f32.mrf.mxu1 }
 0xf0b   :  { %v3309_v58 = vadd.f32 %v3231_v54, %v7156_v28  ;;  %v3162_v54 = vpop.permute.xlu1 %3161  ;;  %v7162_v28 = vld [vmem:[#allocation48_spill] sm:$0xff] }
 0xf0c   :  { %v4601_v45 = vpop.f32.mrf.mxu1  ;;  %v3233_v4 = vpop.f32.mrf.mxu0  ;;  %vm3163_vm14 = vcmp.eq.s32.totalorder %v3162_v54, 1 }
 0xf0d   :  { %v3647_v59 = vmul.f32 -1.442695, %v3309_v58  ;;  %v3316_v12 = vadd.f32 %v3233_v4, %v7157_v60  ;;  %v2309_v58 = vsel %vm2308_vm9, %v7162_v28, 0.0  ;;  %v3333_v45 = vpop.permute.xlu0 %3332 }
 0xf0e   :  { %vm3334_vm15 = vcmp.eq.s32.totalorder %v3333_v45, 1 }
 0xf0f   :  { %4828 = vpow2.f32 %v3647_v59  ;;  %v3648_v7 = vmul.f32 -1.442695, %v3316_v12  ;;  %v7163_v59 = vld [vmem:[#allocation29_spill] sm:$0xff] }
 0xf10   :  { %v2480_v4 = vsel %vm2479_vm10, %v7163_v59, %v2309_v58 }
 0xf11   :  { %4830 = vpow2.f32 %v3648_v7  ;;  %v7164_v7 = vld [vmem:[#allocation40_spill] sm:$0xff] }
 0xf1c   :  { %v4829_v25 = vpop.eup %4828 }
 0xf1d   :  { %v3313_v9 = vadd.f32 1.0, %v4829_v25  ;;  %v2651_v25 = vsel %vm2650_vm11, %v7164_v7, %v2480_v4 }
 0xf1e   :  { %v4831_v21 = vpop.eup %4830 }
 0xf1f   :  { %4832 = vrcp.f32 %v3313_v9  ;;  %v3320_v63 = vadd.f32 1.0, %v4831_v21  ;;  %v7165_v9 = vld [vmem:[#allocation31_spill] sm:$0xff] }
 0xf20   :  { %v2822_v21 = vsel %vm2821_vm12, %v7165_v9, %v2651_v25 }
 0xf2c   :  { %v4833_v51 = vpop.eup %4832 }
 0xf2d   :  { %v3323_v57 = vmul.f32 %v4833_v51, %v3302_v8 }
 0xf2f   :  { %v3324_v30 = vadd.f32 %v3323_v57, %v7158_v48  ;;  %v3504_v57 = vpop.permute.xlu1 %3503  ;;  %v2993_v48 = vsel %vm2992_vm13, %v6732_v47, %v2822_v21 }
 0xf31   :  { %4834 = vtanh.f32 %v3324_v30  ;;  %v3164_v30 = vsel %vm3163_vm14, %v6841_v40, %v2993_v48 }
 0xf32   :  { %4836 = vrcp.f32 %v3320_v63 }
 0xf3e   :  { %v4835_v27 = vpop.eup %4834 }
 0xf3f   :  { %v3326_v1 = vsub.f32 %v6841_v40, %v4835_v27  ;;  %v4837_v22 = vpop.eup %4836 }
 0xf41   :  { %v3327_v2 = vmul.f32 %v4837_v22, %v3326_v1  ;;  %v3651_v22 = vld [vmem:[%s6962_s7] ss:$0 sm:$0xff] }
 0xf43   :  { %v6917_v26 = vadd.f32 %v4835_v27, %v3327_v2 }
 0xf45   :  { %3401 = vmatmul.mubr.f32.vlgmr.msra.gmra.mxu0 %v6917_v26  ;;  %4635 = vmatmul.mubr.f32.vlgmr.msra.gmra.mxu1 %v6917_v26  ;;  %v3335_v27 = vsel %vm3334_vm15, %v6917_v26, %v3164_v30 }
 0xf46   :  { %4669 = vmatprep.mubr.msk.f32.mxu0 %vm5106_vm0, %v7034_v0  ;;  %4638 = vmatpush3.msra.mxu0 %v3522_v16  ;;  %vm3505_vm0 = vcmp.eq.s32.totalorder %v3504_v57, 1 }
 0xf47   :  { %4639 = vmatprep.subr.mxu0 %v7034_v0 }
 0xf48   :  { %4640 = vmatpush3.msra.mxu0 %v3521_v43 }
 0xf49   :  { %4641 = vmatprep.subr.mxu0 %v7034_v0 }
 0xf4a   :  { %4642 = vmatpush3.msra.mxu0 %v3520_v62 }
 0xf4b   :  { %4643 = vmatprep.subr.mxu0 %v7034_v0 }
 0xf4c   :  { %4644 = vmatpush3.msra.mxu0 %v3519_v31 }
 0xf4d   :  { %4645 = vmatprep.subr.mxu0 %v7034_v0 }
 0xf4e   :  { %4646 = vmatpush3.msra.mxu0 %v3518_v20 }
 0xf4f   :  { %4647 = vmatprep.subr.mxu0 %v7034_v0 }
 0xf50   :  { %4648 = vmatpush3.msra.mxu0 %v3517_v44 }
 0xf51   :  { %4649 = vmatprep.subr.mxu0 %v7034_v0 }
 0xf52   :  { %4650 = vmatpush3.msra.mxu0 %v3516_v23 }
 0xf53   :  { %4651 = vmatprep.subr.mxu0 %v7034_v0 }
 0xf54   :  { %4652 = vmatpush3.msra.mxu0 %v3515_v52 }
 0xf55   :  { %4653 = vmatprep.subr.mxu0 %v7034_v0 }
 0xf56   :  { %4654 = vmatpush3.msra.mxu0 %v3514_v53 }
 0xf57   :  { %4655 = vmatprep.subr.mxu0 %v7034_v0 }
 0xf58   :  { %4656 = vmatpush3.msra.mxu0 %v3513_v24 }
 0xf59   :  { %4657 = vmatprep.subr.mxu0 %v7034_v0 }
 0xf5a   :  { %4658 = vmatpush3.msra.mxu0 %v3512_v32 }
 0xf5b   :  { %4659 = vmatprep.subr.mxu0 %v7034_v0 }
 0xf5c   :  { %4660 = vmatpush3.msra.mxu0 %v3511_v33 }
 0xf5d   :  { %4661 = vmatprep.subr.mxu0 %v7034_v0 }
 0xf5e   :  { %4662 = vmatpush3.msra.mxu0 %v3510_v13 }
 0xf5f   :  { %4663 = vmatprep.subr.mxu0 %v7034_v0 }
 0xf60   :  { %4664 = vmatpush3.msra.mxu0 %v3509_v5 }
 0xf61   :  { %4665 = vmatprep.subr.mxu0 %v7034_v0 }
 0xf62   :  { %4666 = vmatpush3.msra.mxu0 %v3508_v34 }
 0xf63   :  { %4667 = vmatprep.subr.mxu0 %v7034_v0  ;;  %v7161_v0 = vld [vmem:[#allocation38_spill] sm:$0xff] }
 0xf64   :  { %4668 = vmatpush3.msra.mxu0 %v3507_v11 }
0x1005   :  { %v3402_v35 = vpop.f32.mrf.mxu0  ;;  %v3473_v36 = vpop.f32.mrf.mxu1 }
0x1006   :  { %v3480_v37 = vadd.f32 %v3402_v35, %v7159_v42 }
0x1007   :  { %v4636_v49 = vpop.f32.mrf.mxu1  ;;  %v3404_v56 = vpop.f32.mrf.mxu0 }
0x1008   :  { %v3649_v38 = vmul.f32 -1.442695, %v3480_v37  ;;  %v3487_v61 = vadd.f32 %v3404_v56, %v7160_v17 }
0x100a   :  { %4838 = vpow2.f32 %v3649_v38  ;;  %v3650_v46 = vmul.f32 -1.442695, %v3487_v61 }
0x100c   :  { %4840 = vpow2.f32 %v3650_v46 }
0x1017   :  { %v4839_v3 = vpop.eup %4838 }
0x1018   :  { %v3484_v14 = vadd.f32 1.0, %v4839_v3 }
0x1019   :  { %v4841_v15 = vpop.eup %4840 }
0x101a   :  { %4842 = vrcp.f32 %v3484_v14  ;;  %v3491_v41 = vadd.f32 1.0, %v4841_v15 }
0x1027   :  { %v4843_v18 = vpop.eup %4842 }
0x1028   :  { %v3494_v19 = vmul.f32 %v4843_v18, %v3473_v36 }
0x102a   :  { %v3495_v39 = vadd.f32 %v7161_v0, %v3494_v19 }
0x102c   :  { %4844 = vtanh.f32 %v3495_v39 }
0x102d   :  { %4846 = vrcp.f32 %v3491_v41 }
0x1039   :  { %v4845_v8 = vpop.eup %4844 }
0x103a   :  { %v3497_v60 = vsub.f32 %v6917_v26, %v4845_v8  ;;  %v4847_v12 = vpop.eup %4846 }
0x103c   :  { %v3498_v51 = vmul.f32 %v4847_v12, %v3497_v60 }
0x103e   :  { %v3499_v63 = vadd.f32 %v4845_v8, %v3498_v51 }
0x1040   :  { %v3506_v1 = vsel %vm3505_vm0, %v3499_v63, %v3335_v27 }
0x1041   :  { %4670 = vmatmul.mubr.f32.vlgmr.msra.gmra.mxu0 %v3506_v1 }
0x1101   :  { %v3596_v2 = vpop.f32.mrf.mxu0 }
0x1102   :  { %v3597_v16 = vadd.f32 %v3651_v22, %v3596_v2 }
0x1103   :  { %v4671_v43 = vpop.f32.mrf.mxu0 }
0x1104   :  { %3600 = vst [vmem:[#allocation15] sm:$0xff] %v3597_v16 }
0x1105   :  { %5076 = shalt.err (!%p5073_p6)
}
0x1106   :  { %3610 = dma.vmem_to_hbm [thread:$0]  %s3608_s17, 128, %s6963_s8, [#allocation6]  }
0x1107   :  { %5093 = dma.done.wait [#allocation6], 128  }
0x1108   :  { %5094 = vsyncadd [#allocation6], 4294967168 }
0x1109   :  { %3614 = vsyncpa [#allocation5], 1 }
0x110a   :  { %3615 = vsyncpa [#allocation8], 1 }
0x110b   :  { %3616 = vsyncpa [#allocation11], 1 }
0x110c   :  { %3617 = vsyncpa [#allocation14], 1 }
0x110d   :  { %3618 = vsyncpa [#allocation6], 1 }

// kernel: tpu_custom_call.1
= control target key start
LH: loop header
LB: loop body
LE: loop exit
PB: predicated region body
PF: predicated region fallthrough
CT: control target
= control target key end

     0   :  { %13 = vsyncpa [#allocation5], 0  ;;  %s6955_s0 = inlined_call_operand.hbm [shape: f32[8,8,128], index: 0, kind: input, shape index: {}]   ;;  %s6956_s1 = inlined_call_operand.vmem [shape: s32[8,1], index: 1, kind: input, shape index: {}]   ;;  %s6957_s2 = inlined_call_operand.hbm [shape: f32[128,384], index: 2, kind: input, shape index: {}]   ;;  %s6958_s3 = inlined_call_operand.hbm [shape: f32[128,384], index: 3, kind: input, shape index: {}]   ;;  %s6959_s4 = inlined_call_operand.hbm [shape: f32[128,384], index: 4, kind: input, shape index: {}]   ;;  %s6960_s5 = inlined_call_operand.hbm [shape: f32[128,384], index: 5, kind: input, shape index: {}]   ;;  %s6961_s6 = inlined_call_operand.hbm [shape: f32[128,128], index: 6, kind: input, shape index: {}]   ;;  %s6962_s7 = inlined_call_operand.vmem [shape: f32[1,128], index: 7, kind: input, shape index: {}]   ;;  %s6963_s8 = inlined_call_operand.hbm [shape: f32[8,128], index: 8, kind: output, shape index: {}]  }
   0x1   :  { %14 = vsyncpa [#allocation8], 0 }
   0x2   :  { %15 = vsyncpa [#allocation11], 0 }
   0x3   :  { %16 = vsyncpa [#allocation14], 0 }
   0x4   :  { %17 = vsyncpa [#allocation6], 0  ;;  %s5095_s27 = smov [#allocation7]  }
   0x5   :  { %s37_s28 = sshll.u32 %s5095_s27, 4  ;;  %s38_s28 = int_to_ptr.vmem [resolvable:$true] %s37_s28 }
   0x6   :  { %s4953_s29 = scalar_lea.vmem %s38_s28, 6144  ;;  %p4958_p1 = scmp.lt.s32.totalorder %s38_s28, %s38_s28 }
   0x7   :  { %p4954_p0 = scmp.ne.s32.totalorder %s38_s28, %s4953_s29  ;;  %p4959_p2 = scmp.lt.s32.totalorder %s4953_s29, %s4953_s29 }
   0x9   :  { %p4960_p3 = por %p4959_p2, %p4958_p1 }
   0xb   :  { %p4961_p4 = pnand %p4960_p3, %p4954_p0 }
   0xd   :  { %4964 = shalt.err (!%p4961_p4)
}
   0xe   :  { %s5096_s30 = smov 384   ;;  %s5097_s9 = smov 24  }
   0xf   :  { %43 = dma.hbm_to_vmem [thread:$0]  %s6957_s2, 6144, %s38_s28, [#allocation8], %s5096_s30, %s5096_s30, %s5097_s9  }
  0x10   :  { %s5098_s12 = smov [#allocation10]   ;;  %s5099_s14 = smov [#allocation4]  }
  0x11   :  { %s61_s13 = sshll.u32 %s5098_s12, 4  ;;  %s23_s15 = sshll.u32 %s5099_s14, 4  ;;  %s62_s13 = int_to_ptr.vmem [resolvable:$true] %s61_s13  ;;  %s24_s15 = int_to_ptr.vmem [resolvable:$true] %s23_s15 }
  0x12   :  { %s4973_s16 = scalar_lea.vmem %s62_s13, 6144  ;;  %p4978_p6 = scmp.lt.s32.totalorder %s62_s13, %s62_s13 }
  0x13   :  { %p4974_p5 = scmp.ne.s32.totalorder %s62_s13, %s4973_s16  ;;  %p4979_p7 = scmp.lt.s32.totalorder %s4973_s16, %s4973_s16 }
  0x15   :  { %p4980_p8 = por %p4979_p7, %p4978_p6 }
  0x17   :  { %p4981_p9 = pnand %p4980_p8, %p4974_p5 }
  0x19   :  { %4984 = shalt.err (!%p4981_p9)
}
  0x1a   :  { %67 = dma.hbm_to_vmem [thread:$0]  %s6959_s4, 6144, %s62_s13, [#allocation11], %s5096_s30, %s5096_s30, %s5097_s9  }
  0x1b   :  { %s4993_s2 = scalar_lea.vmem %s24_s15, 1024  ;;  %p4998_p11 = scmp.lt.s32.totalorder %s24_s15, %s24_s15 }
  0x1c   :  { %p4994_p10 = scmp.ne.s32.totalorder %s24_s15, %s4993_s2  ;;  %p4999_p12 = scmp.lt.s32.totalorder %s4993_s2, %s4993_s2 }
  0x1e   :  { %p5000_p13 = por %p4999_p12, %p4998_p11 }
  0x20   :  { %p5001_p0 = pnand %p5000_p13, %p4994_p10 }
  0x22   :  { %5004 = shalt.err (!%p5001_p0)
}
  0x23   :  { %s5100_s19 = smov 128   ;;  %s5101_s20 = smov 8  }
  0x24   :  { %29 = dma.hbm_to_vmem [thread:$0]  %s6955_s0, 1024, %s24_s15, [#allocation5], %s5100_s19, %s5100_s19, %s5101_s20  }
  0x25   :  { %s5102_s23 = smov [#allocation9]   ;;  %s5103_s4 = smov [#allocation12]  }
  0x26   :  { %s49_s24 = sshll.u32 %s5102_s23, 4  ;;  %s73_s25 = sshll.u32 %s5103_s4, 4  ;;  %s50_s24 = int_to_ptr.vmem [resolvable:$true] %s49_s24  ;;  %s74_s25 = int_to_ptr.vmem [resolvable:$true] %s73_s25 }
  0x27   :  { %s5013_s26 = scalar_lea.vmem %s50_s24, 6144  ;;  %p5018_p2 = scmp.lt.s32.totalorder %s50_s24, %s50_s24 }
  0x28   :  { %p5014_p1 = scmp.ne.s32.totalorder %s50_s24, %s5013_s26  ;;  %p5019_p3 = scmp.lt.s32.totalorder %s5013_s26, %s5013_s26 }
  0x2a   :  { %p5020_p4 = por %p5019_p3, %p5018_p2 }
  0x2c   :  { %p5021_p5 = pnand %p5020_p4, %p5014_p1 }
  0x2e   :  { %5024 = shalt.err (!%p5021_p5)
}
  0x2f   :  { %55 = dma.hbm_to_vmem [thread:$0]  %s6958_s3, 6144, %s50_s24, [#allocation8], %s5096_s30, %s5096_s30, %s5097_s9  }
  0x30   :  { %s5033_s0 = scalar_lea.vmem %s74_s25, 6144  ;;  %p5038_p7 = scmp.lt.s32.totalorder %s74_s25, %s74_s25 }
  0x31   :  { %p5034_p6 = scmp.ne.s32.totalorder %s74_s25, %s5033_s0  ;;  %p5039_p8 = scmp.lt.s32.totalorder %s5033_s0, %s5033_s0 }
  0x33   :  { %p5040_p9 = por %p5039_p8, %p5038_p7 }
  0x35   :  { %p5041_p10 = pnand %p5040_p9, %p5034_p6 }
  0x37   :  { %5044 = shalt.err (!%p5041_p10)
}
  0x38   :  { %79 = dma.hbm_to_vmem [thread:$0]  %s6960_s5, 6144, %s74_s25, [#allocation11], %s5096_s30, %s5096_s30, %s5097_s9  }
  0x39   :  { %s5104_s11 = smov [#allocation13]  }
  0x3a   :  { %s85_s12 = sshll.u32 %s5104_s11, 4  ;;  %s86_s12 = int_to_ptr.vmem [resolvable:$true] %s85_s12 }
  0x3b   :  { %s5053_s13 = scalar_lea.vmem %s86_s12, 2048  ;;  %p5058_p12 = scmp.lt.s32.totalorder %s86_s12, %s86_s12 }
  0x3c   :  { %p5054_p11 = scmp.ne.s32.totalorder %s86_s12, %s5053_s13  ;;  %p5059_p13 = scmp.lt.s32.totalorder %s5053_s13, %s5053_s13 }
  0x3e   :  { %p5060_p0 = por %p5059_p13, %p5058_p12 }
  0x40   :  { %p5061_p1 = pnand %p5060_p0, %p5054_p11 }
  0x42   :  { %5064 = shalt.err (!%p5061_p1)
}
  0x43   :  { %91 = dma.hbm_to_vmem [thread:$0]  %s6961_s6, 2048, %s86_s12, [#allocation14], %s5100_s19, %s5100_s19, %s5101_s20  }
  0x44   :  { %5085 = dma.done.wait [#allocation5], 1024  }
  0x45   :  { %5086 = vsyncadd [#allocation5], 4294966272 }
  0x46   :  { %5087 = dma.done.wait [#allocation8], 12288  }
  0x47   :  { %5088 = vsyncadd [#allocation8], 4294955008 }
  0x48   :  { %5089 = dma.done.wait [#allocation11], 12288  }
  0x49   :  { %5090 = vsyncadd [#allocation11], 4294955008 }
  0x4a   :  { %5091 = dma.done.wait [#allocation14], 2048  }
  0x4b   :  { %5092 = vsyncadd [#allocation14], 4294965248  ;;  %v6964_v0 = vmov 0.0   ;;  %v159_v1 = vld [vmem:[#allocation7 + $0x170] sm:$0xff]  ;;  %v158_v2 = vld [vmem:[#allocation7 + $0x168] sm:$0xff]  ;;  %vm5106_vm0 = vmmov 0  }
  0x4c   :  { %281 = vmatprep.mubr.f32.mxu0 %v6964_v0  ;;  %v156_v3 = vld [vmem:[#allocation7 + $0x158] sm:$0xff]  ;;  %217 = vmatprep.subr.mxu0 %v159_v1  ;;  %v155_v4 = vld [vmem:[#allocation7 + $0x150] sm:$0xff]  ;;  %v153_v5 = vld [vmem:[#allocation7 + $0x140] sm:$0xff]  ;;  %s5108_s16 = smov [#allocation15]  }
  0x4d   :  { %218 = vmatpush1.msra.mxu0 %v158_v2  ;;  %v152_v6 = vld [vmem:[#allocation7 + $0x138] sm:$0xff]  ;;  %v150_v7 = vld [vmem:[#allocation7 + $0x128] sm:$0xff]  ;;  %v149_v8 = vld [vmem:[#allocation7 + $0x120] sm:$0xff]  ;;  %s3607_s17 = sshll.u32 %s5108_s16, 4  ;;  %s3608_s17 = int_to_ptr.vmem [resolvable:$true] %s3607_s17 }
  0x4e   :  { %219 = vmatprep.subr.mxu0 %v156_v3  ;;  %v147_v9 = vld [vmem:[#allocation7 + $0x110] sm:$0xff]  ;;  %v146_v10 = vld [vmem:[#allocation7 + $0x108] sm:$0xff]  ;;  %v144_v11 = vld [vmem:[#allocation7 + $0xf8] sm:$0xff]  ;;  %s5065_s18 = scalar_lea.vmem %s3608_s17, 128  ;;  %p5070_p3 = scmp.lt.s32.totalorder %s3608_s17, %s3608_s17 }
  0x4f   :  { %220 = vmatpush1.msra.mxu0 %v155_v4  ;;  %v143_v12 = vld [vmem:[#allocation7 + $0xf0] sm:$0xff]  ;;  %v141_v13 = vld [vmem:[#allocation7 + $0xe0] sm:$0xff]  ;;  %v140_v15 = vld [vmem:[#allocation7 + $0xd8] sm:$0xff]  ;;  %p5066_p2 = scmp.ne.s32.totalorder %s3608_s17, %s5065_s18  ;;  %p5071_p4 = scmp.lt.s32.totalorder %s5065_s18, %s5065_s18 }
  0x50   :  { %221 = vmatprep.subr.mxu0 %v153_v5  ;;  %v5191_v14 = vld [vmem:[#allocation4] sm:$0xff]  ;;  %v160_v16 = vld [vmem:[#allocation7 + $0x178] sm:$0xff]  ;;  %v138_v17 = vld [vmem:[#allocation7 + $0xc8] sm:$0xff] }
  0x51   :  { %222 = vmatpush1.msra.mxu0 %v152_v6  ;;  %4021 = vmatprep.mubr.f32.mxu1 %v5191_v14  ;;  %v157_v18 = vld [vmem:[#allocation7 + $0x160] sm:$0xff]  ;;  %v154_v20 = vld [vmem:[#allocation7 + $0x148] sm:$0xff]  ;;  %v135_v21 = vld [vmem:[#allocation7 + $0xb0] sm:$0xff]  ;;  %p5072_p5 = por %p5071_p4, %p5070_p3 }
  0x52   :  { %223 = vmatprep.subr.mxu0 %v150_v7  ;;  %3989 = vmatprep.subr.mxu1 %v160_v16  ;;  %v137_v19 = vld [vmem:[#allocation7 + $0xc0] sm:$0xff]  ;;  %v134_v22 = vld [vmem:[#allocation7 + $0xa8] sm:$0xff]  ;;  %v151_v23 = vld [vmem:[#allocation7 + $0x130] sm:$0xff] }
  0x53   :  { %224 = vmatpush1.msra.mxu0 %v149_v8  ;;  %3990 = vmatpush3.msra.mxu1 %v160_v16  ;;  %v132_v24 = vld [vmem:[#allocation7 + $0x98] sm:$0xff]  ;;  %v131_v25 = vld [vmem:[#allocation7 + $0x90] sm:$0xff]  ;;  %v129_v27 = vld [vmem:[#allocation7 + $0x80] sm:$0xff]  ;;  %p5073_p6 = pnand %p5072_p5, %p5066_p2 }
  0x54   :  { %225 = vmatprep.subr.mxu0 %v147_v9  ;;  %3991 = vmatprep.subr.mxu1 %v157_v18  ;;  %v148_v26 = vld [vmem:[#allocation7 + $0x118] sm:$0xff]  ;;  %v145_v29 = vld [vmem:[#allocation7 + $0x100] sm:$0xff]  ;;  %v126_v30 = vld [vmem:[#allocation7 + $0x68] sm:$0xff] }
  0x55   :  { %226 = vmatpush1.msra.mxu0 %v146_v10  ;;  %3992 = vmatpush3.msra.mxu1 %v157_v18  ;;  %v128_v28 = vld [vmem:[#allocation7 + $0x78] sm:$0xff]  ;;  %v125_v31 = vld [vmem:[#allocation7 + $0x60] sm:$0xff]  ;;  %v142_v32 = vld [vmem:[#allocation7 + $0xe8] sm:$0xff] }
  0x56   :  { %227 = vmatprep.subr.mxu0 %v144_v11  ;;  %3993 = vmatprep.subr.mxu1 %v154_v20  ;;  %v123_v33 = vld [vmem:[#allocation7 + $0x50] sm:$0xff]  ;;  %v122_v34 = vld [vmem:[#allocation7 + $0x48] sm:$0xff]  ;;  %v120_v36 = vld [vmem:[#allocation7 + $0x38] sm:$0xff] }
  0x57   :  { %228 = vmatpush1.msra.mxu0 %v143_v12  ;;  %3994 = vmatpush3.msra.mxu1 %v154_v20  ;;  %v139_v35 = vld [vmem:[#allocation7 + $0xd0] sm:$0xff]  ;;  %v136_v38 = vld [vmem:[#allocation7 + $0xb8] sm:$0xff]  ;;  %v117_v39 = vld [vmem:[#allocation7 + $0x20] sm:$0xff] }
  0x58   :  { %229 = vmatprep.subr.mxu0 %v141_v13  ;;  %3995 = vmatprep.subr.mxu1 %v151_v23  ;;  %v119_v37 = vld [vmem:[#allocation7 + $0x30] sm:$0xff]  ;;  %v116_v40 = vld [vmem:[#allocation7 + $0x18] sm:$0xff]  ;;  %v133_v41 = vld [vmem:[#allocation7 + $0xa0] sm:$0xff] }
  0x59   :  { %230 = vmatpush1.msra.mxu0 %v140_v15  ;;  %3996 = vmatpush3.msra.mxu1 %v151_v23  ;;  %v114_v42 = vld [vmem:[#allocation7 + $0x8] sm:$0xff]  ;;  %v113_v43 = vld [vmem:[#allocation7] sm:$0xff]  ;;  %v5194_v45 = vld [vmem:[#allocation9 + $0x170] sm:$0xff] }
  0x5a   :  { %231 = vmatprep.subr.mxu0 %v138_v17  ;;  %3997 = vmatprep.subr.mxu1 %v148_v26  ;;  %v130_v44 = vld [vmem:[#allocation7 + $0x88] sm:$0xff]  ;;  %7008 = vst [vmem:[#allocation21_spill] sm:$0xff] %v5194_v45  ;;  %v5198_v47 = vld [vmem:[#allocation9 + $0x158] sm:$0xff]  ;;  %v5202_v48 = vld [vmem:[#allocation9 + $0x150] sm:$0xff] }
  0x5b   :  { %232 = vmatpush1.msra.mxu0 %v137_v19  ;;  %3998 = vmatpush3.msra.mxu1 %v148_v26  ;;  %v5196_v46 = vld [vmem:[#allocation9 + $0x168] sm:$0xff]  ;;  %v127_v49 = vld [vmem:[#allocation7 + $0x70] sm:$0xff]  ;;  %v5208_v51 = vld [vmem:[#allocation9 + $0x140] sm:$0xff] }
  0x5c   :  { %233 = vmatprep.subr.mxu0 %v135_v21  ;;  %3999 = vmatprep.subr.mxu1 %v145_v29  ;;  %v5206_v50 = vld [vmem:[#allocation4 + $0x8] sm:$0xff]  ;;  %v5211_v52 = vld [vmem:[#allocation9 + $0x138] sm:$0xff]  ;;  %v5218_v54 = vld [vmem:[#allocation9 + $0x120] sm:$0xff] }
  0x5d   :  { %234 = vmatpush1.msra.mxu0 %v134_v22  ;;  %4000 = vmatpush3.msra.mxu1 %v145_v29  ;;  %v5214_v53 = vld [vmem:[#allocation9 + $0x128] sm:$0xff]  ;;  %v124_v55 = vld [vmem:[#allocation7 + $0x58] sm:$0xff]  ;;  %v5222_v56 = vld [vmem:[#allocation4 + $0x10] sm:$0xff] }
  0x5e   :  { %235 = vmatprep.subr.mxu0 %v132_v24  ;;  %4001 = vmatprep.subr.mxu1 %v142_v32  ;;  %v5224_v57 = vld [vmem:[#allocation9 + $0x110] sm:$0xff]  ;;  %v5227_v58 = vld [vmem:[#allocation9 + $0x108] sm:$0xff]  ;;  %v5230_v59 = vld [vmem:[#allocation9 + $0xf8] sm:$0xff] }
  0x5f   :  { %236 = vmatpush1.msra.mxu0 %v131_v25  ;;  %4002 = vmatpush3.msra.mxu1 %v142_v32  ;;  %v5234_v60 = vld [vmem:[#allocation9 + $0xf0] sm:$0xff]  ;;  %v121_v61 = vld [vmem:[#allocation7 + $0x40] sm:$0xff]  ;;  %v5238_v62 = vld [vmem:[#allocation4 + $0x18] sm:$0xff] }
  0x60   :  { %237 = vmatprep.subr.mxu0 %v129_v27  ;;  %4003 = vmatprep.subr.mxu1 %v139_v35  ;;  %v5240_v63 = vld [vmem:[#allocation9 + $0xe0] sm:$0xff]  ;;  %v5243_v1 = vld [vmem:[#allocation9 + $0xd8] sm:$0xff]  ;;  %v5246_v2 = vld [vmem:[#allocation9 + $0xc8] sm:$0xff] }
  0x61   :  { %238 = vmatpush1.msra.mxu0 %v128_v28  ;;  %4004 = vmatpush3.msra.mxu1 %v139_v35  ;;  %v5250_v3 = vld [vmem:[#allocation9 + $0xc0] sm:$0xff]  ;;  %v118_v4 = vld [vmem:[#allocation7 + $0x28] sm:$0xff]  ;;  %v5256_v6 = vld [vmem:[#allocation9 + $0xb0] sm:$0xff] }
  0x62   :  { %239 = vmatprep.subr.mxu0 %v126_v30  ;;  %4005 = vmatprep.subr.mxu1 %v136_v38  ;;  %v5254_v5 = vld [vmem:[#allocation4 + $0x20] sm:$0xff]  ;;  %v5259_v7 = vld [vmem:[#allocation9 + $0xa8] sm:$0xff]  ;;  %v5262_v8 = vld [vmem:[#allocation9 + $0x98] sm:$0xff] }
  0x63   :  { %240 = vmatpush1.msra.mxu0 %v125_v31  ;;  %4006 = vmatpush3.msra.mxu1 %v136_v38  ;;  %v5266_v9 = vld [vmem:[#allocation9 + $0x90] sm:$0xff]  ;;  %v214_v11 = vld [vmem:[#allocation4 + $0x28] sm:$0xff]  ;;  %v5270_v12 = vld [vmem:[#allocation9 + $0x80] sm:$0xff] }
  0x64   :  { %241 = vmatprep.subr.mxu0 %v123_v33  ;;  %4007 = vmatprep.subr.mxu1 %v133_v41  ;;  %v115_v10 = vld [vmem:[#allocation7 + $0x10] sm:$0xff]  ;;  %v5273_v13 = vld [vmem:[#allocation9 + $0x78] sm:$0xff]  ;;  %v5279_v15 = vld [vmem:[#allocation9 + $0x60] sm:$0xff] }
  0x65   :  { %242 = vmatpush1.msra.mxu0 %v122_v34  ;;  %4008 = vmatpush3.msra.mxu1 %v133_v41  ;;  %v215_v16 = vld [vmem:[#allocation4 + $0x30] sm:$0xff]  ;;  %v5286_v18 = vld [vmem:[#allocation9 + $0x48] sm:$0xff]  ;;  %v5289_v19 = vld [vmem:[#allocation9 + $0x38] sm:$0xff] }
  0x66   :  { %243 = vmatprep.subr.mxu0 %v120_v36  ;;  %4009 = vmatprep.subr.mxu1 %v130_v44  ;;  %v5283_v17 = vld [vmem:[#allocation9 + $0x50] sm:$0xff]  ;;  %v5295_v21 = vld [vmem:[#allocation9 + $0x178] sm:$0xff]  ;;  %v5299_v23 = vld [vmem:[#allocation9 + $0x20] sm:$0xff] }
  0x67   :  { %244 = vmatpush1.msra.mxu0 %v119_v37  ;;  %4010 = vmatpush3.msra.mxu1 %v130_v44  ;;  %v5293_v20 = vld [vmem:[#allocation9 + $0x30] sm:$0xff]  ;;  %v216_v22 = vld [vmem:[#allocation4 + $0x38] sm:$0xff]  ;;  %v5306_v25 = vld [vmem:[#allocation9 + $0x8] sm:$0xff] }
  0x68   :  { %245 = vmatprep.subr.mxu0 %v117_v39  ;;  %4011 = vmatprep.subr.mxu1 %v127_v49  ;;  %v5302_v24 = vld [vmem:[#allocation9 + $0x18] sm:$0xff]  ;;  %7009 = vst [vmem:[#allocation22_spill] sm:$0xff] %v5306_v25  ;;  %v5310_v26 = vld [vmem:[#allocation9] sm:$0xff]  ;;  %v5318_v28 = vld [vmem:[#allocation9 + $0x148] sm:$0xff] }
  0x69   :  { %246 = vmatpush1.msra.mxu0 %v116_v40  ;;  %4012 = vmatpush3.msra.mxu1 %v127_v49  ;;  %7010 = vst [vmem:[#allocation23_spill] sm:$0xff] %v5310_v26  ;;  %v5312_v27 = vld [vmem:[#allocation9 + $0x160] sm:$0xff]  ;;  %v5324_v29 = vld [vmem:[#allocation9 + $0x130] sm:$0xff]  ;;  %v5329_v30 = vld [vmem:[#allocation9 + $0x118] sm:$0xff] }
  0x6a   :  { %247 = vmatprep.subr.mxu0 %v114_v42  ;;  %4013 = vmatprep.subr.mxu1 %v124_v55  ;;  %v5335_v31 = vld [vmem:[#allocation9 + $0x100] sm:$0xff]  ;;  %v5341_v32 = vld [vmem:[#allocation9 + $0xe8] sm:$0xff]  ;;  %v5345_v33 = vld [vmem:[#allocation9 + $0xd0] sm:$0xff] }
  0x6b   :  { %248 = vmatpush1.msra.mxu0 %v113_v43  ;;  %4014 = vmatpush3.msra.mxu1 %v124_v55  ;;  %v5351_v34 = vld [vmem:[#allocation9 + $0xb8] sm:$0xff]  ;;  %v5357_v35 = vld [vmem:[#allocation9 + $0xa0] sm:$0xff]  ;;  %v5363_v36 = vld [vmem:[#allocation9 + $0x88] sm:$0xff] }
  0x6c   :  { %282 = vmatmul.mubr.f32.vlgmr.msra.gmra.mxu0 %v5191_v14  ;;  %459 = vmatprep.subr.mxu0 %v5194_v45  ;;  %v5276_v14 = vld [vmem:[#allocation9 + $0x68] sm:$0xff]  ;;  %v5369_v37 = vld [vmem:[#allocation9 + $0x70] sm:$0xff]  ;;  %v5375_v38 = vld [vmem:[#allocation9 + $0x58] sm:$0xff] }
  0x6d   :  { %460 = vmatpush1.msra.mxu0 %v5196_v46  ;;  %287 = vmatprep.mubr.f32.mxu0 %v6964_v0  ;;  %v5381_v39 = vld [vmem:[#allocation9 + $0x40] sm:$0xff]  ;;  %v5387_v40 = vld [vmem:[#allocation9 + $0x28] sm:$0xff]  ;;  %v5393_v41 = vld [vmem:[#allocation9 + $0x10] sm:$0xff] }
  0x6e   :  { %461 = vmatprep.subr.mxu0 %v5198_v47  ;;  %4015 = vmatprep.subr.mxu1 %v121_v61  ;;  %7011 = vst [vmem:[#allocation24_spill] sm:$0xff] %v5393_v41 }
  0x6f   :  { %462 = vmatpush1.msra.mxu0 %v5202_v48  ;;  %4016 = vmatpush3.msra.mxu1 %v121_v61 }
  0x70   :  { %288 = vmatmul.mubr.f32.gmra.mxu0 %v5206_v50  ;;  %463 = vmatprep.subr.mxu0 %v5208_v51 }
  0x71   :  { %464 = vmatpush1.msra.mxu0 %v5211_v52  ;;  %293 = vmatprep.mubr.f32.mxu0 %v6964_v0 }
  0x72   :  { %465 = vmatprep.subr.mxu0 %v5214_v53  ;;  %4017 = vmatprep.subr.mxu1 %v118_v4 }
  0x73   :  { %466 = vmatpush1.msra.mxu0 %v5218_v54  ;;  %4018 = vmatpush3.msra.mxu1 %v118_v4 }
  0x74   :  { %294 = vmatmul.mubr.f32.gmra.mxu0 %v5222_v56  ;;  %467 = vmatprep.subr.mxu0 %v5224_v57 }
  0x75   :  { %468 = vmatpush1.msra.mxu0 %v5227_v58  ;;  %299 = vmatprep.mubr.f32.mxu0 %v6964_v0 }
  0x76   :  { %469 = vmatprep.subr.mxu0 %v5230_v59  ;;  %4019 = vmatprep.subr.mxu1 %v115_v10 }
  0x77   :  { %470 = vmatpush1.msra.mxu0 %v5234_v60  ;;  %4020 = vmatpush3.msra.mxu1 %v115_v10 }
  0x78   :  { %300 = vmatmul.mubr.f32.gmra.mxu0 %v5238_v62  ;;  %471 = vmatprep.subr.mxu0 %v5240_v63 }
  0x79   :  { %472 = vmatpush1.msra.mxu0 %v5243_v1  ;;  %305 = vmatprep.mubr.f32.mxu0 %v6964_v0 }
  0x7a   :  { %473 = vmatprep.subr.mxu0 %v5246_v2  ;;  %4033 = vmatprep.subr.mxu1 %v6964_v0 }
  0x7b   :  { %474 = vmatpush1.msra.mxu0 %v5250_v3  ;;  %4022 = vmatmul.mubr.f32.vlgmr.msra.gmra.mxu1 %v5206_v50 }
  0x7c   :  { %306 = vmatmul.mubr.f32.gmra.mxu0 %v5254_v5  ;;  %475 = vmatprep.subr.mxu0 %v5256_v6 }
  0x7d   :  { %476 = vmatpush1.msra.mxu0 %v5259_v7  ;;  %311 = vmatprep.mubr.f32.mxu0 %v6964_v0 }
  0x7e   :  { %477 = vmatprep.subr.mxu0 %v5262_v8  ;;  %4034 = vmatpush3.msra.mxu1 %v5295_v21 }
  0x7f   :  { %478 = vmatpush1.msra.mxu0 %v5266_v9  ;;  %4035 = vmatprep.subr.mxu1 %v6964_v0 }
  0x80   :  { %312 = vmatmul.mubr.f32.gmra.mxu0 %v214_v11  ;;  %479 = vmatprep.subr.mxu0 %v5270_v12 }
  0x81   :  { %480 = vmatpush1.msra.mxu0 %v5273_v13  ;;  %317 = vmatprep.mubr.f32.mxu0 %v6964_v0 }
  0x82   :  { %481 = vmatprep.subr.mxu0 %v5276_v14  ;;  %4036 = vmatpush3.msra.mxu1 %v5312_v27 }
  0x83   :  { %482 = vmatpush1.msra.mxu0 %v5279_v15  ;;  %4037 = vmatprep.subr.mxu1 %v6964_v0 }
  0x84   :  { %318 = vmatmul.mubr.f32.gmra.mxu0 %v215_v16  ;;  %483 = vmatprep.subr.mxu0 %v5283_v17 }
  0x85   :  { %484 = vmatpush1.msra.mxu0 %v5286_v18  ;;  %323 = vmatprep.mubr.f32.mxu0 %v6964_v0 }
  0x86   :  { %485 = vmatprep.subr.mxu0 %v5289_v19  ;;  %4038 = vmatpush3.msra.mxu1 %v5318_v28 }
  0x87   :  { %486 = vmatpush1.msra.mxu0 %v5293_v20  ;;  %4024 = vmatprep.mubr.f32.mxu1 %v5222_v56 }
  0x88   :  { %324 = vmatmul.mubr.f32.gmra.mxu0 %v216_v22  ;;  %487 = vmatprep.subr.mxu0 %v5299_v23 }
  0x89   :  { %488 = vmatpush1.msra.mxu0 %v5302_v24  ;;  %523 = vmatprep.mubr.f32.mxu0 %v6964_v0 }
  0x8a   :  { %489 = vmatprep.subr.mxu0 %v5306_v25  ;;  %4039 = vmatprep.subr.mxu1 %v6964_v0 }
  0x8b   :  { %490 = vmatpush1.msra.mxu0 %v5310_v26  ;;  %4025 = vmatmul.mubr.f32.gmra.mxu1 %v5238_v62 }
  0x8c   :  { %524 = vmatmul.mubr.f32.vlgmr.msra.gmra.mxu0 %v6964_v0  ;;  %4040 = vmatpush3.msra.mxu1 %v5324_v29 }
  0x8d   :  { %4027 = vmatprep.mubr.f32.mxu1 %v5254_v5  ;;  %4041 = vmatprep.subr.mxu1 %v6964_v0 }
  0x8e   :  { %624 = vmatprep.subr.mxu0 %v5194_v45  ;;  %4042 = vmatpush3.msra.mxu1 %v5329_v30 }
  0x8f   :  { %625 = vmatpush1.msra.mxu0 %v5196_v46  ;;  %4043 = vmatprep.subr.mxu1 %v6964_v0 }
  0x90   :  { %4028 = vmatmul.mubr.f32.gmra.mxu1 %v214_v11  ;;  %626 = vmatprep.subr.mxu0 %v5198_v47 }
  0x91   :  { %4044 = vmatpush3.msra.mxu1 %v5335_v31  ;;  %4030 = vmatprep.mubr.f32.mxu1 %v215_v16 }
  0x92   :  { %4045 = vmatprep.subr.mxu1 %v6964_v0  ;;  %627 = vmatpush1.msra.mxu0 %v5202_v48 }
  0x93   :  { %4046 = vmatpush3.msra.mxu1 %v5341_v32  ;;  %628 = vmatprep.subr.mxu0 %v5208_v51 }
  0x94   :  { %4047 = vmatprep.subr.mxu1 %v6964_v0  ;;  %4031 = vmatmul.mubr.f32.gmra.mxu1 %v216_v22 }
  0x95   :  { %4048 = vmatpush3.msra.mxu1 %v5345_v33  ;;  %4065 = vmatprep.mubr.msk.f32.mxu1 %vm5106_vm0, %v6964_v0 }
  0x96   :  { %4049 = vmatprep.subr.mxu1 %v6964_v0  ;;  %629 = vmatpush1.msra.mxu0 %v5211_v52 }
  0x97   :  { %4050 = vmatpush3.msra.mxu1 %v5351_v34  ;;  %630 = vmatprep.subr.mxu0 %v5214_v53 }
  0x98   :  { %4051 = vmatprep.subr.mxu1 %v6964_v0  ;;  %631 = vmatpush1.msra.mxu0 %v5218_v54 }
  0x99   :  { %4052 = vmatpush3.msra.mxu1 %v5357_v35  ;;  %632 = vmatprep.subr.mxu0 %v5224_v57 }
  0x9a   :  { %4053 = vmatprep.subr.mxu1 %v6964_v0  ;;  %633 = vmatpush1.msra.mxu0 %v5227_v58 }
  0x9b   :  { %4054 = vmatpush3.msra.mxu1 %v5363_v36  ;;  %634 = vmatprep.subr.mxu0 %v5230_v59 }
  0x9c   :  { %4055 = vmatprep.subr.mxu1 %v6964_v0  ;;  %635 = vmatpush1.msra.mxu0 %v5234_v60 }
  0x9d   :  { %4056 = vmatpush3.msra.mxu1 %v5369_v37  ;;  %636 = vmatprep.subr.mxu0 %v5240_v63 }
  0x9e   :  { %4057 = vmatprep.subr.mxu1 %v6964_v0  ;;  %637 = vmatpush1.msra.mxu0 %v5243_v1 }
  0x9f   :  { %4058 = vmatpush3.msra.mxu1 %v5375_v38  ;;  %638 = vmatprep.subr.mxu0 %v5246_v2 }
  0xa0   :  { %4059 = vmatprep.subr.mxu1 %v6964_v0  ;;  %639 = vmatpush1.msra.mxu0 %v5250_v3 }
  0xa1   :  { %4060 = vmatpush3.msra.mxu1 %v5381_v39  ;;  %640 = vmatprep.subr.mxu0 %v5256_v6 }
  0xa2   :  { %4061 = vmatprep.subr.mxu1 %v6964_v0  ;;  %641 = vmatpush1.msra.mxu0 %v5259_v7 }
  0xa3   :  { %4062 = vmatpush3.msra.mxu1 %v5387_v40  ;;  %642 = vmatprep.subr.mxu0 %v5262_v8 }
  0xa4   :  { %4063 = vmatprep.subr.mxu1 %v6964_v0  ;;  %643 = vmatpush1.msra.mxu0 %v5266_v9 }
  0xa5   :  { %4064 = vmatpush3.msra.mxu1 %v5393_v41  ;;  %644 = vmatprep.subr.mxu0 %v5270_v12 }
  0xa6   :  { %4066 = vmatmul.mubr.f32.vlgmr.msra.gmra.mxu1 %v6964_v0  ;;  %4068 = vmatprep.subr.mxu1 %v6964_v0 }
  0xa7   :  { %4069 = vmatpush3.msra.mxu1 %v5295_v21  ;;  %645 = vmatpush1.msra.mxu0 %v5273_v13 }
  0xa8   :  { %4070 = vmatprep.subr.mxu1 %v6964_v0  ;;  %646 = vmatprep.subr.mxu0 %v5276_v14 }
  0xa9   :  { %4071 = vmatpush3.msra.mxu1 %v5312_v27  ;;  %647 = vmatpush1.msra.mxu0 %v5279_v15 }
  0xaa   :  { %4072 = vmatprep.subr.mxu1 %v6964_v0  ;;  %648 = vmatprep.subr.mxu0 %v5283_v17 }
  0xab   :  { %4073 = vmatpush3.msra.mxu1 %v5318_v28  ;;  %649 = vmatpush1.msra.mxu0 %v5286_v18 }
  0xac   :  { %4074 = vmatprep.subr.mxu1 %v6964_v0  ;;  %650 = vmatprep.subr.mxu0 %v5289_v19 }
  0xad   :  { %4075 = vmatpush3.msra.mxu1 %v5324_v29  ;;  %651 = vmatpush1.msra.mxu0 %v5293_v20 }
  0xae   :  { %4076 = vmatprep.subr.mxu1 %v6964_v0  ;;  %652 = vmatprep.subr.mxu0 %v5299_v23 }
  0xaf   :  { %4077 = vmatpush3.msra.mxu1 %v5329_v30  ;;  %653 = vmatpush1.msra.mxu0 %v5302_v24 }
  0xb0   :  { %4078 = vmatprep.subr.mxu1 %v6964_v0  ;;  %654 = vmatprep.subr.mxu0 %v5306_v25 }
  0xb1   :  { %4079 = vmatpush3.msra.mxu1 %v5335_v31  ;;  %655 = vmatpush1.msra.mxu0 %v5310_v26 }
  0xb2   :  { %4080 = vmatprep.subr.mxu1 %v6964_v0  ;;  %688 = vmatprep.mubr.f32.mxu0 %v6964_v0 }
  0xb3   :  { %4081 = vmatpush3.msra.mxu1 %v5341_v32  ;;  %4100 = vmatprep.mubr.msk.f32.mxu1 %vm5106_vm0, %v6964_v0 }
  0xb4   :  { %4082 = vmatprep.subr.mxu1 %v6964_v0  ;;  %791 = vmatprep.subr.mxu0 %v5194_v45 }
  0xb5   :  { %4083 = vmatpush3.msra.mxu1 %v5345_v33 }
  0xb6   :  { %4084 = vmatprep.subr.mxu1 %v6964_v0 }
  0xb7   :  { %4085 = vmatpush3.msra.mxu1 %v5351_v34 }
  0xb8   :  { %4086 = vmatprep.subr.mxu1 %v6964_v0 }
  0xb9   :  { %4087 = vmatpush3.msra.mxu1 %v5357_v35 }
  0xba   :  { %4088 = vmatprep.subr.mxu1 %v6964_v0 }
  0xbb   :  { %4089 = vmatpush3.msra.mxu1 %v5363_v36 }
  0xbc   :  { %4090 = vmatprep.subr.mxu1 %v6964_v0 }
  0xbd   :  { %4091 = vmatpush3.msra.mxu1 %v5369_v37 }
  0xbe   :  { %4092 = vmatprep.subr.mxu1 %v6964_v0 }
  0xbf   :  { %4093 = vmatpush3.msra.mxu1 %v5375_v38 }
  0xc0   :  { %4094 = vmatprep.subr.mxu1 %v6964_v0 }
  0xc1   :  { %4095 = vmatpush3.msra.mxu1 %v5381_v39 }
  0xc2   :  { %4096 = vmatprep.subr.mxu1 %v6964_v0 }
  0xc3   :  { %4097 = vmatpush3.msra.mxu1 %v5387_v40 }
  0xc4   :  { %4098 = vmatprep.subr.mxu1 %v6964_v0 }
  0xc5   :  { %4099 = vmatpush3.msra.mxu1 %v5393_v41 }
  0xc6   :  { %4103 = vmatprep.subr.mxu1 %v6964_v0 }
 0x12c   :  { %v283_v42 = vpop.f32.mrf.mxu0 }
 0x12e   :  { %v285_v43 = vpop.f32.mrf.mxu0 }
 0x130   :  { %v5452_v44 = vpop.f32.mrf.mxu0 }
 0x131   :  { %7012 = vst [vmem:[#allocation25_spill] sm:$0xff] %v5452_v44 }
 0x132   :  { %v5454_v49 = vpop.f32.mrf.mxu0 }
 0x133   :  { %7013 = vst [vmem:[#allocation26_spill] sm:$0xff] %v5454_v49 }
 0x134   :  { %v5456_v50 = vpop.f32.mrf.mxu0 }
 0x135   :  { %7014 = vst [vmem:[#allocation27_spill] sm:$0xff] %v5456_v50 }
 0x136   :  { %v5458_v55 = vpop.f32.mrf.mxu0 }
 0x137   :  { %7015 = vst [vmem:[#allocation28_spill] sm:$0xff] %v5458_v55 }
 0x138   :  { %v5460_v56 = vpop.f32.mrf.mxu0 }
 0x139   :  { %7016 = vst [vmem:[#allocation29_spill] sm:$0xff] %v5460_v56 }
 0x13a   :  { %v5462_v61 = vpop.f32.mrf.mxu0 }
 0x13b   :  { %7017 = vst [vmem:[#allocation30_spill] sm:$0xff] %v5462_v61  ;;  %v5480_v55 = vpop.f32.mrf.mxu1 }
 0x13c   :  { %v5464_v62 = vpop.f32.mrf.mxu0  ;;  %7026 = vst [vmem:[#allocation39_spill] sm:$0xff] %v5480_v55 }
 0x13d   :  { %7018 = vst [vmem:[#allocation31_spill] sm:$0xff] %v5464_v62  ;;  %v396_v50 = vpop.f32.mrf.mxu1 }
 0x13e   :  { %v5466_v4 = vpop.f32.mrf.mxu0 }
 0x13f   :  { %7019 = vst [vmem:[#allocation32_spill] sm:$0xff] %v5466_v4 }
 0x140   :  { %v5468_v5 = vpop.f32.mrf.mxu0 }
 0x141   :  { %7020 = vst [vmem:[#allocation33_spill] sm:$0xff] %v5468_v5 }
 0x142   :  { %v5470_v10 = vpop.f32.mrf.mxu0 }
 0x143   :  { %7021 = vst [vmem:[#allocation34_spill] sm:$0xff] %v5470_v10 }
 0x144   :  { %v5472_v11 = vpop.f32.mrf.mxu0 }
 0x145   :  { %7022 = vst [vmem:[#allocation35_spill] sm:$0xff] %v5472_v11 }
 0x146   :  { %v5474_v16 = vpop.f32.mrf.mxu0 }
 0x147   :  { %7023 = vst [vmem:[#allocation36_spill] sm:$0xff] %v5474_v16 }
 0x148   :  { %v5476_v22 = vpop.f32.mrf.mxu0 }
 0x149   :  { %7024 = vst [vmem:[#allocation37_spill] sm:$0xff] %v5476_v22 }
 0x14a   :  { %v5478_v0 = vpop.f32.mrf.mxu0 }
 0x14b   :  { %7025 = vst [vmem:[#allocation38_spill] sm:$0xff] %v5478_v0  ;;  %v5482_v49 = vpop.f32.mrf.mxu1 }
 0x14c   :  { %v525_v56 = vpop.f32.mrf.mxu0  ;;  %7027 = vst [vmem:[#allocation40_spill] sm:$0xff] %v5482_v49 }
 0x14d   :  { %v603_v61 = vadd.f32 %v525_v56, %v283_v42  ;;  %v5484_v5 = vpop.f32.mrf.mxu1 }
 0x14e   :  { %7028 = vst [vmem:[#allocation41_spill] sm:$0xff] %v5484_v5  ;;  %v527_v10 = vpop.f32.mrf.mxu0 }
 0x14f   :  { %v3619_v62 = vmul.f32 -1.442695, %v603_v61  ;;  %v610_v4 = vadd.f32 %v527_v10, %v285_v43 }
 0x150   :  { %v5486_v11 = vpop.f32.mrf.mxu1 }
 0x151   :  { %4688 = vpow2.f32 %v3619_v62  ;;  %7029 = vst [vmem:[#allocation42_spill] sm:$0xff] %v5486_v11  ;;  %v3620_v16 = vmul.f32 -1.442695, %v610_v4 }
 0x152   :  { %v5488_v44 = vpop.f32.mrf.mxu1 }
 0x153   :  { %7030 = vst [vmem:[#allocation43_spill] sm:$0xff] %v5488_v44  ;;  %4690 = vpow2.f32 %v3620_v16 }
 0x154   :  { %v5490_v55 = vpop.f32.mrf.mxu1 }
 0x155   :  { %7031 = vst [vmem:[#allocation44_spill] sm:$0xff] %v5490_v55 }
 0x156   :  { %v5492_v42 = vpop.f32.mrf.mxu1 }
 0x157   :  { %7032 = vst [vmem:[#allocation45_spill] sm:$0xff] %v5492_v42 }
 0x15e   :  { %v4689_v22 = vpop.eup %4688 }
 0x15f   :  { %v607_v0 = vadd.f32 1.0, %v4689_v22 }
 0x160   :  { %v4691_v62 = vpop.eup %4690 }
 0x161   :  { %4692 = vrcp.f32 %v607_v0  ;;  %v614_v45 = vadd.f32 1.0, %v4691_v62  ;;  %v7034_v0 = vmov 0.0  }
 0x166   :  { %v596_v56 = vpop.f32.mrf.mxu1 }
 0x168   :  { %v4067_v61 = vpop.f32.mrf.mxu1 }
 0x169   :  { %v7037_v61 = vld [vmem:[#allocation26_spill] sm:$0xff] }
 0x16e   :  { %v4693_v49 = vpop.eup %4692 }
 0x16f   :  { %v617_v5 = vmul.f32 %v4693_v49, %v596_v56 }
 0x171   :  { %v618_v43 = vadd.f32 %v617_v5, %v396_v50  ;;  %v7036_v50 = vld [vmem:[#allocation25_spill] sm:$0xff] }
 0x173   :  { %4694 = vtanh.f32 %v618_v43 }
 0x174   :  { %4696 = vrcp.f32 %v614_v45  ;;  %v7035_v45 = vld [vmem:[#allocation21_spill] sm:$0xff] }
 0x180   :  { %v4695_v4 = vpop.eup %4694 }
 0x181   :  { %v620_v10 = vsub.f32 0.0, %v4695_v4  ;;  %v4697_v11 = vpop.eup %4696 }
 0x183   :  { %v621_v44 = vmul.f32 %v4697_v11, %v620_v10 }
 0x185   :  { %v5494_v22 = vadd.f32 %v4695_v4, %v621_v44 }
 0x187   :  { %7033 = vst [vmem:[#allocation46_spill] sm:$0xff] %v5494_v22  ;;  %689 = vmatmul.mubr.f32.vlgmr.msra.gmra.mxu0 %v5494_v22  ;;  %4101 = vmatmul.mubr.f32.vlgmr.msra.gmra.mxu1 %v5494_v22 }
 0x188   :  { %792 = vmatpush1.msra.mxu0 %v5196_v46  ;;  %4104 = vmatpush3.msra.mxu1 %v5295_v21 }
 0x189   :  { %793 = vmatprep.subr.mxu0 %v5198_v47  ;;  %4105 = vmatprep.subr.mxu1 %v7034_v0 }
 0x18a   :  { %794 = vmatpush1.msra.mxu0 %v5202_v48  ;;  %4106 = vmatpush3.msra.mxu1 %v5312_v27 }
 0x18b   :  { %795 = vmatprep.subr.mxu0 %v5208_v51  ;;  %4107 = vmatprep.subr.mxu1 %v7034_v0 }
 0x18c   :  { %796 = vmatpush1.msra.mxu0 %v5211_v52  ;;  %4108 = vmatpush3.msra.mxu1 %v5318_v28 }
 0x18d   :  { %797 = vmatprep.subr.mxu0 %v5214_v53  ;;  %4109 = vmatprep.subr.mxu1 %v7034_v0 }
 0x18e   :  { %798 = vmatpush1.msra.mxu0 %v5218_v54  ;;  %4110 = vmatpush3.msra.mxu1 %v5324_v29 }
 0x18f   :  { %799 = vmatprep.subr.mxu0 %v5224_v57  ;;  %4111 = vmatprep.subr.mxu1 %v7034_v0 }
 0x190   :  { %800 = vmatpush1.msra.mxu0 %v5227_v58  ;;  %4112 = vmatpush3.msra.mxu1 %v5329_v30 }
 0x191   :  { %801 = vmatprep.subr.mxu0 %v5230_v59  ;;  %4113 = vmatprep.subr.mxu1 %v7034_v0 }
 0x192   :  { %802 = vmatpush1.msra.mxu0 %v5234_v60  ;;  %4114 = vmatpush3.msra.mxu1 %v5335_v31 }
 0x193   :  { %803 = vmatprep.subr.mxu0 %v5240_v63  ;;  %4115 = vmatprep.subr.mxu1 %v7034_v0 }
 0x194   :  { %804 = vmatpush1.msra.mxu0 %v5243_v1  ;;  %4116 = vmatpush3.msra.mxu1 %v5341_v32 }
 0x195   :  { %805 = vmatprep.subr.mxu0 %v5246_v2  ;;  %4117 = vmatprep.subr.mxu1 %v7034_v0 }
 0x196   :  { %806 = vmatpush1.msra.mxu0 %v5250_v3  ;;  %4118 = vmatpush3.msra.mxu1 %v5345_v33 }
 0x197   :  { %807 = vmatprep.subr.mxu0 %v5256_v6  ;;  %4119 = vmatprep.subr.mxu1 %v7034_v0 }
 0x198   :  { %808 = vmatpush1.msra.mxu0 %v5259_v7  ;;  %4120 = vmatpush3.msra.mxu1 %v5351_v34 }
 0x199   :  { %809 = vmatprep.subr.mxu0 %v5262_v8  ;;  %4121 = vmatprep.subr.mxu1 %v7034_v0 }
 0x19a   :  { %810 = vmatpush1.msra.mxu0 %v5266_v9  ;;  %4122 = vmatpush3.msra.mxu1 %v5357_v35 }
 0x19b   :  { %811 = vmatprep.subr.mxu0 %v5270_v12  ;;  %4123 = vmatprep.subr.mxu1 %v7034_v0 }
 0x19c   :  { %812 = vmatpush1.msra.mxu0 %v5273_v13  ;;  %4124 = vmatpush3.msra.mxu1 %v5363_v36 }
 0x19d   :  { %813 = vmatprep.subr.mxu0 %v5276_v14  ;;  %4125 = vmatprep.subr.mxu1 %v7034_v0 }
 0x19e   :  { %814 = vmatpush1.msra.mxu0 %v5279_v15  ;;  %4126 = vmatpush3.msra.mxu1 %v5369_v37 }
 0x19f   :  { %815 = vmatprep.subr.mxu0 %v5283_v17  ;;  %4127 = vmatprep.subr.mxu1 %v7034_v0 }
 0x1a0   :  { %816 = vmatpush1.msra.mxu0 %v5286_v18  ;;  %4128 = vmatpush3.msra.mxu1 %v5375_v38 }
 0x1a1   :  { %817 = vmatprep.subr.mxu0 %v5289_v19  ;;  %4129 = vmatprep.subr.mxu1 %v7034_v0 }
 0x1a2   :  { %818 = vmatpush1.msra.mxu0 %v5293_v20  ;;  %4130 = vmatpush3.msra.mxu1 %v5381_v39 }
 0x1a3   :  { %819 = vmatprep.subr.mxu0 %v5299_v23  ;;  %4131 = vmatprep.subr.mxu1 %v7034_v0 }
 0x1a4   :  { %820 = vmatpush1.msra.mxu0 %v5302_v24  ;;  %4132 = vmatpush3.msra.mxu1 %v5387_v40 }
 0x1a5   :  { %821 = vmatprep.subr.mxu0 %v5306_v25  ;;  %4133 = vmatprep.subr.mxu1 %v7034_v0 }
 0x1a6   :  { %822 = vmatpush1.msra.mxu0 %v5310_v26  ;;  %855 = vmatprep.mubr.f32.mxu0 %v7034_v0 }
 0x1a7   :  { %4134 = vmatpush3.msra.mxu1 %v5393_v41  ;;  %4135 = vmatprep.mubr.msk.f32.mxu1 %vm5106_vm0, %v7034_v0  ;;  %v7038_v41 = vld [vmem:[#allocation39_spill] sm:$0xff] }
 0x1a8   :  { %958 = vmatprep.subr.mxu0 %v7035_v45  ;;  %4138 = vmatprep.subr.mxu1 %v7034_v0 }
 0x247   :  { %v690_v44 = vpop.f32.mrf.mxu0  ;;  %v761_v49 = vpop.f32.mrf.mxu1 }
 0x248   :  { %v769_v5 = vadd.f32 %v690_v44, %v7036_v50 }
 0x249   :  { %v4102_v11 = vpop.f32.mrf.mxu1  ;;  %v692_v56 = vpop.f32.mrf.mxu0 }
 0x24a   :  { %v3621_v16 = vmul.f32 -1.442695, %v769_v5  ;;  %v776_v62 = vadd.f32 %v692_v56, %v7037_v61 }
 0x24c   :  { %4698 = vpow2.f32 %v3621_v16  ;;  %v3622_v43 = vmul.f32 -1.442695, %v776_v62 }
 0x24e   :  { %4700 = vpow2.f32 %v3622_v43 }
 0x259   :  { %v4699_v4 = vpop.eup %4698 }
 0x25a   :  { %v773_v10 = vadd.f32 1.0, %v4699_v4  ;;  %v7045_v4 = vld [vmem:[#allocation28_spill] sm:$0xff] }
 0x25b   :  { %v4701_v55 = vpop.eup %4700 }
 0x25c   :  { %4702 = vrcp.f32 %v773_v10  ;;  %v780_v25 = vadd.f32 1.0, %v4701_v55  ;;  %v7043_v55 = vld [vmem:[#allocation21_spill] sm:$0xff] }
 0x269   :  { %v4703_v42 = vpop.eup %4702 }
 0x26a   :  { %v783_v45 = vmul.f32 %v4703_v42, %v761_v49  ;;  %v7044_v49 = vld [vmem:[#allocation27_spill] sm:$0xff] }
 0x26c   :  { %v784_v26 = vadd.f32 %v7038_v41, %v783_v45  ;;  %v7042_v41 = vld [vmem:[#allocation24_spill] sm:$0xff] }
 0x26e   :  { %4704 = vtanh.f32 %v784_v26  ;;  %v7041_v26 = vld [vmem:[#allocation23_spill] sm:$0xff] }
 0x26f   :  { %4706 = vrcp.f32 %v780_v25  ;;  %v7040_v25 = vld [vmem:[#allocation22_spill] sm:$0xff] }
 0x27b   :  { %v4705_v44 = vpop.eup %4704 }
 0x27c   :  { %v786_v50 = vsub.f32 %v5494_v22, %v4705_v44  ;;  %v4707_v5 = vpop.eup %4706 }
 0x27e   :  { %v787_v11 = vmul.f32 %v4707_v5, %v786_v50 }
 0x280   :  { %v5569_v16 = vadd.f32 %v4705_v44, %v787_v11 }
 0x282   :  { %7039 = vst [vmem:[#allocation25_spill] sm:$0xff] %v5569_v16  ;;  %856 = vmatmul.mubr.f32.vlgmr.msra.gmra.mxu0 %v5569_v16  ;;  %4136 = vmatmul.mubr.f32.vlgmr.msra.gmra.mxu1 %v5569_v16 }
 0x283   :  { %959 = vmatpush1.msra.mxu0 %v5196_v46  ;;  %4139 = vmatpush3.msra.mxu1 %v5295_v21 }
 0x284   :  { %960 = vmatprep.subr.mxu0 %v5198_v47  ;;  %4140 = vmatprep.subr.mxu1 %v7034_v0 }
 0x285   :  { %961 = vmatpush1.msra.mxu0 %v5202_v48  ;;  %4141 = vmatpush3.msra.mxu1 %v5312_v27 }
 0x286   :  { %962 = vmatprep.subr.mxu0 %v5208_v51  ;;  %4142 = vmatprep.subr.mxu1 %v7034_v0 }
 0x287   :  { %963 = vmatpush1.msra.mxu0 %v5211_v52  ;;  %4143 = vmatpush3.msra.mxu1 %v5318_v28 }
 0x288   :  { %964 = vmatprep.subr.mxu0 %v5214_v53  ;;  %4144 = vmatprep.subr.mxu1 %v7034_v0 }
 0x289   :  { %965 = vmatpush1.msra.mxu0 %v5218_v54  ;;  %4145 = vmatpush3.msra.mxu1 %v5324_v29 }
 0x28a   :  { %966 = vmatprep.subr.mxu0 %v5224_v57  ;;  %4146 = vmatprep.subr.mxu1 %v7034_v0 }
 0x28b   :  { %967 = vmatpush1.msra.mxu0 %v5227_v58  ;;  %4147 = vmatpush3.msra.mxu1 %v5329_v30 }
 0x28c   :  { %968 = vmatprep.subr.mxu0 %v5230_v59  ;;  %4148 = vmatprep.subr.mxu1 %v7034_v0 }
 0x28d   :  { %969 = vmatpush1.msra.mxu0 %v5234_v60  ;;  %4149 = vmatpush3.msra.mxu1 %v5335_v31 }
 0x28e   :  { %970 = vmatprep.subr.mxu0 %v5240_v63  ;;  %4150 = vmatprep.subr.mxu1 %v7034_v0 }
 0x28f   :  { %971 = vmatpush1.msra.mxu0 %v5243_v1  ;;  %4151 = vmatpush3.msra.mxu1 %v5341_v32 }
 0x290   :  { %972 = vmatprep.subr.mxu0 %v5246_v2  ;;  %4152 = vmatprep.subr.mxu1 %v7034_v0 }
 0x291   :  { %973 = vmatpush1.msra.mxu0 %v5250_v3  ;;  %4153 = vmatpush3.msra.mxu1 %v5345_v33 }
 0x292   :  { %974 = vmatprep.subr.mxu0 %v5256_v6  ;;  %4154 = vmatprep.subr.mxu1 %v7034_v0 }
 0x293   :  { %975 = vmatpush1.msra.mxu0 %v5259_v7  ;;  %4155 = vmatpush3.msra.mxu1 %v5351_v34 }
 0x294   :  { %976 = vmatprep.subr.mxu0 %v5262_v8  ;;  %4156 = vmatprep.subr.mxu1 %v7034_v0 }
 0x295   :  { %977 = vmatpush1.msra.mxu0 %v5266_v9  ;;  %4157 = vmatpush3.msra.mxu1 %v5357_v35 }
 0x296   :  { %978 = vmatprep.subr.mxu0 %v5270_v12  ;;  %4158 = vmatprep.subr.mxu1 %v7034_v0 }
 0x297   :  { %979 = vmatpush1.msra.mxu0 %v5273_v13  ;;  %4159 = vmatpush3.msra.mxu1 %v5363_v36 }
 0x298   :  { %980 = vmatprep.subr.mxu0 %v5276_v14  ;;  %4160 = vmatprep.subr.mxu1 %v7034_v0 }
 0x299   :  { %981 = vmatpush1.msra.mxu0 %v5279_v15  ;;  %4161 = vmatpush3.msra.mxu1 %v5369_v37 }
 0x29a   :  { %982 = vmatprep.subr.mxu0 %v5283_v17  ;;  %4162 = vmatprep.subr.mxu1 %v7034_v0 }
 0x29b   :  { %983 = vmatpush1.msra.mxu0 %v5286_v18  ;;  %4163 = vmatpush3.msra.mxu1 %v5375_v38 }
 0x29c   :  { %984 = vmatprep.subr.mxu0 %v5289_v19  ;;  %4164 = vmatprep.subr.mxu1 %v7034_v0 }
 0x29d   :  { %985 = vmatpush1.msra.mxu0 %v5293_v20  ;;  %4165 = vmatpush3.msra.mxu1 %v5381_v39 }
 0x29e   :  { %986 = vmatprep.subr.mxu0 %v5299_v23  ;;  %4166 = vmatprep.subr.mxu1 %v7034_v0 }
 0x29f   :  { %987 = vmatpush1.msra.mxu0 %v5302_v24  ;;  %4167 = vmatpush3.msra.mxu1 %v5387_v40 }
 0x2a0   :  { %988 = vmatprep.subr.mxu0 %v7040_v25  ;;  %4168 = vmatprep.subr.mxu1 %v7034_v0 }
 0x2a1   :  { %989 = vmatpush1.msra.mxu0 %v7041_v26  ;;  %1022 = vmatprep.mubr.f32.mxu0 %v7034_v0 }
 0x2a2   :  { %4169 = vmatpush3.msra.mxu1 %v7042_v41  ;;  %4170 = vmatprep.mubr.msk.f32.mxu1 %vm5106_vm0, %v7034_v0  ;;  %v7046_v41 = vld [vmem:[#allocation41_spill] sm:$0xff] }
 0x2a3   :  { %1125 = vmatprep.subr.mxu0 %v7043_v55  ;;  %4173 = vmatprep.subr.mxu1 %v7034_v0 }
 0x342   :  { %v857_v42 = vpop.f32.mrf.mxu0  ;;  %v928_v45 = vpop.f32.mrf.mxu1 }
 0x343   :  { %v936_v56 = vadd.f32 %v857_v42, %v7044_v49 }
 0x344   :  { %v4137_v61 = vpop.f32.mrf.mxu1  ;;  %v859_v43 = vpop.f32.mrf.mxu0 }
 0x345   :  { %v3623_v62 = vmul.f32 -1.442695, %v936_v56  ;;  %v943_v10 = vadd.f32 %v859_v43, %v7045_v4  ;;  %v5765_v43 = vld [vmem:[#allocation9 + $0xf0] sm:$0xff]  ;;  %v5773_v4 = vld [vmem:[#allocation9 + $0xd8] sm:$0xff] }
 0x347   :  { %4708 = vpow2.f32 %v3623_v62  ;;  %v3624_v44 = vmul.f32 -1.442695, %v943_v10  ;;  %v5781_v10 = vld [vmem:[#allocation9 + $0xc0] sm:$0xff] }
 0x349   :  { %4710 = vpow2.f32 %v3624_v44  ;;  %v5789_v44 = vld [vmem:[#allocation9 + $0xa8] sm:$0xff] }
 0x354   :  { %v4709_v50 = vpop.eup %4708 }
 0x355   :  { %v940_v5 = vadd.f32 1.0, %v4709_v50  ;;  %v5797_v50 = vld [vmem:[#allocation9 + $0x90] sm:$0xff] }
 0x356   :  { %v4711_v11 = vpop.eup %4710 }
 0x357   :  { %4712 = vrcp.f32 %v940_v5  ;;  %v947_v25 = vadd.f32 1.0, %v4711_v11  ;;  %v5805_v5 = vld [vmem:[#allocation9 + $0x78] sm:$0xff]  ;;  %v5813_v11 = vld [vmem:[#allocation9 + $0x60] sm:$0xff] }
 0x364   :  { %v4713_v22 = vpop.eup %4712 }
 0x365   :  { %v950_v55 = vmul.f32 %v4713_v22, %v928_v45  ;;  %v5733_v22 = vld [vmem:[#allocation9 + $0x150] sm:$0xff]  ;;  %v5757_v45 = vld [vmem:[#allocation9 + $0x108] sm:$0xff] }
 0x367   :  { %v951_v26 = vadd.f32 %v950_v55, %v7046_v41  ;;  %v5749_v41 = vld [vmem:[#allocation9 + $0x120] sm:$0xff]  ;;  %v5821_v55 = vld [vmem:[#allocation9 + $0x48] sm:$0xff] }
 0x369   :  { %4714 = vtanh.f32 %v951_v26  ;;  %v5741_v26 = vld [vmem:[#allocation9 + $0x138] sm:$0xff] }
 0x36a   :  { %4716 = vrcp.f32 %v947_v25  ;;  %v5737_v25 = vld [vmem:[#allocation9 + $0x140] sm:$0xff] }
 0x376   :  { %v4715_v42 = vpop.eup %4714 }
 0x377   :  { %v953_v49 = vsub.f32 %v5569_v16, %v4715_v42  ;;  %v4717_v56 = vpop.eup %4716 }
 0x379   :  { %v954_v61 = vmul.f32 %v4717_v56, %v953_v49  ;;  %v5837_v49 = vld [vmem:[#allocation9 + $0x18] sm:$0xff]  ;;  %v5845_v56 = vld [vmem:[#allocation9] sm:$0xff] }
 0x37a   :  { %7056 = vst [vmem:[#allocation27_spill] sm:$0xff] %v5845_v56 }
 0x37b   :  { %v5644_v62 = vadd.f32 %v4715_v42, %v954_v61  ;;  %v5829_v42 = vld [vmem:[#allocation9 + $0x30] sm:$0xff]  ;;  %v7057_v61 = vld [vmem:[#allocation31_spill] sm:$0xff] }
 0x37d   :  { %7047 = vst [vmem:[#allocation26_spill] sm:$0xff] %v5644_v62  ;;  %1023 = vmatmul.mubr.f32.vlgmr.msra.gmra.mxu0 %v5644_v62  ;;  %4171 = vmatmul.mubr.f32.vlgmr.msra.gmra.mxu1 %v5644_v62 }
 0x37e   :  { %1126 = vmatpush1.msra.mxu0 %v5196_v46  ;;  %4174 = vmatpush3.msra.mxu1 %v5295_v21  ;;  %v7048_v46 = vld [vmem:[#allocation22_spill] sm:$0xff] }
 0x37f   :  { %1127 = vmatprep.subr.mxu0 %v5198_v47  ;;  %4175 = vmatprep.subr.mxu1 %v7034_v0  ;;  %v7049_v47 = vld [vmem:[#allocation23_spill] sm:$0xff] }
 0x380   :  { %1128 = vmatpush1.msra.mxu0 %v5202_v48  ;;  %4176 = vmatpush3.msra.mxu1 %v5312_v27  ;;  %v7050_v48 = vld [vmem:[#allocation24_spill] sm:$0xff] }
 0x381   :  { %1129 = vmatprep.subr.mxu0 %v5208_v51  ;;  %4177 = vmatprep.subr.mxu1 %v7034_v0  ;;  %v5713_v51 = vld [vmem:[#allocation9 + $0x170] sm:$0xff] }
 0x382   :  { %1130 = vmatpush1.msra.mxu0 %v5211_v52  ;;  %4178 = vmatpush3.msra.mxu1 %v5318_v28 }
 0x383   :  { %1131 = vmatprep.subr.mxu0 %v5214_v53  ;;  %4179 = vmatprep.subr.mxu1 %v7034_v0 }
 0x384   :  { %1132 = vmatpush1.msra.mxu0 %v5218_v54  ;;  %4180 = vmatpush3.msra.mxu1 %v5324_v29  ;;  %v7051_v54 = vld [vmem:[#allocation29_spill] sm:$0xff] }
 0x385   :  { %1133 = vmatprep.subr.mxu0 %v5224_v57  ;;  %4181 = vmatprep.subr.mxu1 %v7034_v0 }
 0x386   :  { %1134 = vmatpush1.msra.mxu0 %v5227_v58  ;;  %4182 = vmatpush3.msra.mxu1 %v5329_v30 }
 0x387   :  { %1135 = vmatprep.subr.mxu0 %v5230_v59  ;;  %4183 = vmatprep.subr.mxu1 %v7034_v0 }
 0x388   :  { %1136 = vmatpush1.msra.mxu0 %v5234_v60  ;;  %4184 = vmatpush3.msra.mxu1 %v5335_v31 }
 0x389   :  { %1137 = vmatprep.subr.mxu0 %v5240_v63  ;;  %4185 = vmatprep.subr.mxu1 %v7034_v0  ;;  %v7052_v63 = vld [vmem:[#allocation30_spill] sm:$0xff] }
 0x38a   :  { %1138 = vmatpush1.msra.mxu0 %v5243_v1  ;;  %4186 = vmatpush3.msra.mxu1 %v5341_v32 }
 0x38b   :  { %1139 = vmatprep.subr.mxu0 %v5246_v2  ;;  %4187 = vmatprep.subr.mxu1 %v7034_v0 }
 0x38c   :  { %1140 = vmatpush1.msra.mxu0 %v5250_v3  ;;  %4188 = vmatpush3.msra.mxu1 %v5345_v33 }
 0x38d   :  { %1141 = vmatprep.subr.mxu0 %v5256_v6  ;;  %4189 = vmatprep.subr.mxu1 %v7034_v0 }
 0x38e   :  { %1142 = vmatpush1.msra.mxu0 %v5259_v7  ;;  %4190 = vmatpush3.msra.mxu1 %v5351_v34 }
 0x38f   :  { %1143 = vmatprep.subr.mxu0 %v5262_v8  ;;  %4191 = vmatprep.subr.mxu1 %v7034_v0 }
 0x390   :  { %1144 = vmatpush1.msra.mxu0 %v5266_v9  ;;  %4192 = vmatpush3.msra.mxu1 %v5357_v35 }
 0x391   :  { %1145 = vmatprep.subr.mxu0 %v5270_v12  ;;  %4193 = vmatprep.subr.mxu1 %v7034_v0  ;;  %v7053_v12 = vld [vmem:[#allocation40_spill] sm:$0xff] }
 0x392   :  { %1146 = vmatpush1.msra.mxu0 %v5273_v13  ;;  %4194 = vmatpush3.msra.mxu1 %v5363_v36 }
 0x393   :  { %1147 = vmatprep.subr.mxu0 %v5276_v14  ;;  %4195 = vmatprep.subr.mxu1 %v7034_v0 }
 0x394   :  { %1148 = vmatpush1.msra.mxu0 %v5279_v15  ;;  %4196 = vmatpush3.msra.mxu1 %v5369_v37 }
 0x395   :  { %1149 = vmatprep.subr.mxu0 %v5283_v17  ;;  %4197 = vmatprep.subr.mxu1 %v7034_v0 }
 0x396   :  { %1150 = vmatpush1.msra.mxu0 %v5286_v18  ;;  %4198 = vmatpush3.msra.mxu1 %v5375_v38 }
 0x397   :  { %1151 = vmatprep.subr.mxu0 %v5289_v19  ;;  %4199 = vmatprep.subr.mxu1 %v7034_v0 }
 0x398   :  { %1152 = vmatpush1.msra.mxu0 %v5293_v20  ;;  %4200 = vmatpush3.msra.mxu1 %v5381_v39 }
 0x399   :  { %1153 = vmatprep.subr.mxu0 %v5299_v23  ;;  %4201 = vmatprep.subr.mxu1 %v7034_v0  ;;  %v5725_v23 = vld [vmem:[#allocation9 + $0x168] sm:$0xff] }
 0x39a   :  { %1154 = vmatpush1.msra.mxu0 %v5302_v24  ;;  %4202 = vmatpush3.msra.mxu1 %v5387_v40  ;;  %v5729_v24 = vld [vmem:[#allocation9 + $0x158] sm:$0xff] }
 0x39b   :  { %1155 = vmatprep.subr.mxu0 %v7048_v46  ;;  %4203 = vmatprep.subr.mxu1 %v7034_v0 }
 0x39c   :  { %1156 = vmatpush1.msra.mxu0 %v7049_v47  ;;  %1189 = vmatprep.mubr.f32.mxu0 %v7034_v0 }
 0x39d   :  { %4204 = vmatpush3.msra.mxu1 %v7050_v48  ;;  %4205 = vmatprep.mubr.msk.f32.mxu1 %vm5106_vm0, %v7034_v0 }
 0x39e   :  { %1292 = vmatprep.subr.mxu0 %v5713_v51  ;;  %4208 = vmatprep.subr.mxu1 %v7034_v0 }
 0x43d   :  { %v1024_v52 = vpop.f32.mrf.mxu0  ;;  %v1095_v53 = vpop.f32.mrf.mxu1 }
 0x43e   :  { %v1103_v57 = vadd.f32 %v1024_v52, %v7051_v54  ;;  %v7058_v54 = vld [vmem:[#allocation32_spill] sm:$0xff] }
 0x43f   :  { %v4172_v58 = vpop.f32.mrf.mxu1  ;;  %v1026_v60 = vpop.f32.mrf.mxu0 }
 0x440   :  { %v3625_v59 = vmul.f32 -1.442695, %v1103_v57  ;;  %v1110_v1 = vadd.f32 %v1026_v60, %v7052_v63 }
 0x442   :  { %4718 = vpow2.f32 %v3625_v59  ;;  %v3626_v2 = vmul.f32 -1.442695, %v1110_v1 }
 0x444   :  { %4720 = vpow2.f32 %v3626_v2  ;;  %v7059_v2 = vld [vmem:[#allocation43_spill] sm:$0xff] }
 0x44f   :  { %v4719_v3 = vpop.eup %4718 }
 0x450   :  { %v1107_v6 = vadd.f32 1.0, %v4719_v3 }
 0x451   :  { %v4721_v7 = vpop.eup %4720 }
 0x452   :  { %4722 = vrcp.f32 %v1107_v6  ;;  %v1114_v14 = vadd.f32 1.0, %v4721_v7 }
 0x45f   :  { %v4723_v8 = vpop.eup %4722 }
 0x460   :  { %v1117_v9 = vmul.f32 %v4723_v8, %v1095_v53 }
 0x462   :  { %v1118_v13 = vadd.f32 %v7053_v12, %v1117_v9 }
 0x464   :  { %4724 = vtanh.f32 %v1118_v13 }
 0x465   :  { %4726 = vrcp.f32 %v1114_v14  ;;  %v5863_v14 = vld [vmem:[#allocation9 + $0x178] sm:$0xff] }
 0x471   :  { %v4725_v15 = vpop.eup %4724 }
 0x472   :  { %v1120_v17 = vsub.f32 %v5644_v62, %v4725_v15  ;;  %v4727_v18 = vpop.eup %4726 }
 0x474   :  { %v1121_v19 = vmul.f32 %v4727_v18, %v1120_v17  ;;  %v5875_v17 = vld [vmem:[#allocation9 + $0x148] sm:$0xff]  ;;  %v5881_v18 = vld [vmem:[#allocation9 + $0x130] sm:$0xff] }
 0x476   :  { %v5721_v20 = vadd.f32 %v4725_v15, %v1121_v19  ;;  %v5869_v15 = vld [vmem:[#allocation9 + $0x160] sm:$0xff]  ;;  %v5887_v19 = vld [vmem:[#allocation9 + $0x118] sm:$0xff] }
 0x478   :  { %7054 = vst [vmem:[#allocation39_spill] sm:$0xff] %v5721_v20  ;;  %1190 = vmatmul.mubr.f32.vlgmr.msra.gmra.mxu0 %v5721_v20  ;;  %4206 = vmatmul.mubr.f32.vlgmr.msra.gmra.mxu1 %v5721_v20 }
 0x479   :  { %1293 = vmatpush1.msra.mxu0 %v5725_v23  ;;  %4209 = vmatpush3.msra.mxu1 %v5295_v21  ;;  %v5745_v21 = vld [vmem:[#allocation9 + $0x128] sm:$0xff] }
 0x47a   :  { %1294 = vmatprep.subr.mxu0 %v5729_v24  ;;  %4210 = vmatprep.subr.mxu1 %v7034_v0 }
 0x47b   :  { %1295 = vmatpush1.msra.mxu0 %v5733_v22  ;;  %4211 = vmatpush3.msra.mxu1 %v5312_v27  ;;  %v5753_v27 = vld [vmem:[#allocation9 + $0x110] sm:$0xff] }
 0x47c   :  { %1296 = vmatprep.subr.mxu0 %v5737_v25  ;;  %4212 = vmatprep.subr.mxu1 %v7034_v0 }
 0x47d   :  { %1297 = vmatpush1.msra.mxu0 %v5741_v26  ;;  %4213 = vmatpush3.msra.mxu1 %v5318_v28  ;;  %v5761_v28 = vld [vmem:[#allocation9 + $0xf8] sm:$0xff] }
 0x47e   :  { %1298 = vmatprep.subr.mxu0 %v5745_v21  ;;  %4214 = vmatprep.subr.mxu1 %v7034_v0 }
 0x47f   :  { %1299 = vmatpush1.msra.mxu0 %v5749_v41  ;;  %4215 = vmatpush3.msra.mxu1 %v5324_v29  ;;  %v5769_v29 = vld [vmem:[#allocation9 + $0xe0] sm:$0xff] }
 0x480   :  { %1300 = vmatprep.subr.mxu0 %v5753_v27  ;;  %4216 = vmatprep.subr.mxu1 %v7034_v0 }
 0x481   :  { %1301 = vmatpush1.msra.mxu0 %v5757_v45  ;;  %4217 = vmatpush3.msra.mxu1 %v5329_v30  ;;  %v5777_v30 = vld [vmem:[#allocation9 + $0xc8] sm:$0xff] }
 0x482   :  { %1302 = vmatprep.subr.mxu0 %v5761_v28  ;;  %4218 = vmatprep.subr.mxu1 %v7034_v0 }
 0x483   :  { %1303 = vmatpush1.msra.mxu0 %v5765_v43  ;;  %4219 = vmatpush3.msra.mxu1 %v5335_v31  ;;  %v5785_v31 = vld [vmem:[#allocation9 + $0xb0] sm:$0xff] }
 0x484   :  { %1304 = vmatprep.subr.mxu0 %v5769_v29  ;;  %4220 = vmatprep.subr.mxu1 %v7034_v0 }
 0x485   :  { %1305 = vmatpush1.msra.mxu0 %v5773_v4  ;;  %4221 = vmatpush3.msra.mxu1 %v5341_v32  ;;  %v5793_v32 = vld [vmem:[#allocation9 + $0x98] sm:$0xff] }
 0x486   :  { %1306 = vmatprep.subr.mxu0 %v5777_v30  ;;  %4222 = vmatprep.subr.mxu1 %v7034_v0 }
 0x487   :  { %1307 = vmatpush1.msra.mxu0 %v5781_v10  ;;  %4223 = vmatpush3.msra.mxu1 %v5345_v33  ;;  %v5801_v33 = vld [vmem:[#allocation9 + $0x80] sm:$0xff] }
 0x488   :  { %1308 = vmatprep.subr.mxu0 %v5785_v31  ;;  %4224 = vmatprep.subr.mxu1 %v7034_v0 }
 0x489   :  { %1309 = vmatpush1.msra.mxu0 %v5789_v44  ;;  %4225 = vmatpush3.msra.mxu1 %v5351_v34  ;;  %v5809_v34 = vld [vmem:[#allocation9 + $0x68] sm:$0xff] }
 0x48a   :  { %1310 = vmatprep.subr.mxu0 %v5793_v32  ;;  %4226 = vmatprep.subr.mxu1 %v7034_v0 }
 0x48b   :  { %1311 = vmatpush1.msra.mxu0 %v5797_v50  ;;  %4227 = vmatpush3.msra.mxu1 %v5357_v35  ;;  %v5817_v35 = vld [vmem:[#allocation9 + $0x50] sm:$0xff] }
 0x48c   :  { %1312 = vmatprep.subr.mxu0 %v5801_v33  ;;  %4228 = vmatprep.subr.mxu1 %v7034_v0 }
 0x48d   :  { %1313 = vmatpush1.msra.mxu0 %v5805_v5  ;;  %4229 = vmatpush3.msra.mxu1 %v5363_v36  ;;  %v5825_v36 = vld [vmem:[#allocation9 + $0x38] sm:$0xff] }
 0x48e   :  { %1314 = vmatprep.subr.mxu0 %v5809_v34  ;;  %4230 = vmatprep.subr.mxu1 %v7034_v0 }
 0x48f   :  { %1315 = vmatpush1.msra.mxu0 %v5813_v11  ;;  %4231 = vmatpush3.msra.mxu1 %v5369_v37  ;;  %v5833_v37 = vld [vmem:[#allocation9 + $0x20] sm:$0xff] }
 0x490   :  { %1316 = vmatprep.subr.mxu0 %v5817_v35  ;;  %4232 = vmatprep.subr.mxu1 %v7034_v0 }
 0x491   :  { %1317 = vmatpush1.msra.mxu0 %v5821_v55  ;;  %4233 = vmatpush3.msra.mxu1 %v5375_v38  ;;  %v5841_v38 = vld [vmem:[#allocation9 + $0x8] sm:$0xff] }
 0x492   :  { %1318 = vmatprep.subr.mxu0 %v5825_v36  ;;  %4234 = vmatprep.subr.mxu1 %v7034_v0  ;;  %7055 = vst [vmem:[#allocation21_spill] sm:$0xff] %v5841_v38 }
 0x493   :  { %1319 = vmatpush1.msra.mxu0 %v5829_v42  ;;  %4235 = vmatpush3.msra.mxu1 %v5381_v39 }
 0x494   :  { %1320 = vmatprep.subr.mxu0 %v5833_v37  ;;  %4236 = vmatprep.subr.mxu1 %v7034_v0 }
 0x495   :  { %1321 = vmatpush1.msra.mxu0 %v5837_v49  ;;  %4237 = vmatpush3.msra.mxu1 %v5387_v40 }
 0x496   :  { %1322 = vmatprep.subr.mxu0 %v5841_v38  ;;  %4238 = vmatprep.subr.mxu1 %v7034_v0 }
 0x497   :  { %1323 = vmatpush1.msra.mxu0 %v5845_v56  ;;  %1356 = vmatprep.mubr.f32.mxu0 %v7034_v0 }
 0x498   :  { %4239 = vmatpush3.msra.mxu1 %v7050_v48  ;;  %4240 = vmatprep.mubr.msk.f32.mxu1 %vm5106_vm0, %v7034_v0 }
 0x499   :  { %1459 = vmatprep.subr.mxu0 %v5713_v51  ;;  %4243 = vmatprep.subr.mxu1 %v7034_v0 }
 0x538   :  { %v1191_v39 = vpop.f32.mrf.mxu0  ;;  %v1262_v40 = vpop.f32.mrf.mxu1 }
 0x539   :  { %v1270_v46 = vadd.f32 %v1191_v39, %v7057_v61  ;;  %v5893_v39 = vld [vmem:[#allocation9 + $0x100] sm:$0xff]  ;;  %v5905_v61 = vld [vmem:[#allocation9 + $0xd0] sm:$0xff] }
 0x53a   :  { %v4207_v47 = vpop.f32.mrf.mxu1  ;;  %v1193_v53 = vpop.f32.mrf.mxu0 }
 0x53b   :  { %v3627_v52 = vmul.f32 -1.442695, %v1270_v46  ;;  %v1277_v57 = vadd.f32 %v1193_v53, %v7058_v54  ;;  %v5911_v46 = vld [vmem:[#allocation9 + $0xb8] sm:$0xff]  ;;  %v5917_v47 = vld [vmem:[#allocation9 + $0xa0] sm:$0xff]  ;;  %v5929_v53 = vld [vmem:[#allocation9 + $0x70] sm:$0xff] }
 0x53c   :  { %v5935_v54 = vld [vmem:[#allocation9 + $0x58] sm:$0xff] }
 0x53d   :  { %4728 = vpow2.f32 %v3627_v52  ;;  %v3628_v58 = vmul.f32 -1.442695, %v1277_v57  ;;  %v5923_v52 = vld [vmem:[#allocation9 + $0x88] sm:$0xff]  ;;  %v5941_v57 = vld [vmem:[#allocation9 + $0x40] sm:$0xff] }
 0x53f   :  { %4730 = vpow2.f32 %v3628_v58  ;;  %v5947_v58 = vld [vmem:[#allocation9 + $0x28] sm:$0xff] }
 0x54a   :  { %v4729_v59 = vpop.eup %4728 }
 0x54b   :  { %v1274_v48 = vadd.f32 1.0, %v4729_v59  ;;  %v5954_v59 = vld [vmem:[#allocation9 + $0x10] sm:$0xff] }
 0x54c   :  { %v4731_v60 = vpop.eup %4730  ;;  %7060 = vst [vmem:[#allocation28_spill] sm:$0xff] %v5954_v59 }
 0x54d   :  { %4732 = vrcp.f32 %v1274_v48  ;;  %v1281_v6 = vadd.f32 1.0, %v4731_v60 }
 0x55a   :  { %v4733_v63 = vpop.eup %4732 }
 0x55b   :  { %v1284_v1 = vmul.f32 %v4733_v63, %v1262_v40  ;;  %v5899_v40 = vld [vmem:[#allocation9 + $0xe8] sm:$0xff] }
 0x55c   :  { %v7061_v63 = vld [vmem:[#allocation33_spill] sm:$0xff] }
 0x55d   :  { %v1285_v3 = vadd.f32 %v1284_v1, %v7059_v2 }
 0x55f   :  { %4734 = vtanh.f32 %v1285_v3 }
 0x560   :  { %4736 = vrcp.f32 %v1281_v6 }
 0x56c   :  { %v4735_v7 = vpop.eup %4734 }
 0x56d   :  { %v1287_v8 = vsub.f32 %v5721_v20, %v4735_v7  ;;  %v4737_v9 = vpop.eup %4736 }
 0x56f   :  { %v1288_v12 = vmul.f32 %v4737_v9, %v1287_v8 }
 0x571   :  { %v5858_v13 = vadd.f32 %v4735_v7, %v1288_v12  ;;  %v7062_v7 = vld [vmem:[#allocation34_spill] sm:$0xff] }
 0x573   :  { %1357 = vmatmul.mubr.f32.vlgmr.msra.gmra.mxu0 %v5858_v13  ;;  %4241 = vmatmul.mubr.f32.vlgmr.msra.gmra.mxu1 %v5858_v13 }
 0x574   :  { %1460 = vmatpush1.msra.mxu0 %v5725_v23  ;;  %4244 = vmatpush3.msra.mxu1 %v5863_v14 }
 0x575   :  { %1461 = vmatprep.subr.mxu0 %v5729_v24  ;;  %4245 = vmatprep.subr.mxu1 %v7034_v0 }
 0x576   :  { %1462 = vmatpush1.msra.mxu0 %v5733_v22  ;;  %4246 = vmatpush3.msra.mxu1 %v5869_v15 }
 0x577   :  { %1463 = vmatprep.subr.mxu0 %v5737_v25  ;;  %4247 = vmatprep.subr.mxu1 %v7034_v0 }
 0x578   :  { %1464 = vmatpush1.msra.mxu0 %v5741_v26  ;;  %4248 = vmatpush3.msra.mxu1 %v5875_v17 }
 0x579   :  { %1465 = vmatprep.subr.mxu0 %v5745_v21  ;;  %4249 = vmatprep.subr.mxu1 %v7034_v0 }
 0x57a   :  { %1466 = vmatpush1.msra.mxu0 %v5749_v41  ;;  %4250 = vmatpush3.msra.mxu1 %v5881_v18 }
 0x57b   :  { %1467 = vmatprep.subr.mxu0 %v5753_v27  ;;  %4251 = vmatprep.subr.mxu1 %v7034_v0 }
 0x57c   :  { %1468 = vmatpush1.msra.mxu0 %v5757_v45  ;;  %4252 = vmatpush3.msra.mxu1 %v5887_v19 }
 0x57d   :  { %1469 = vmatprep.subr.mxu0 %v5761_v28  ;;  %4253 = vmatprep.subr.mxu1 %v7034_v0 }
 0x57e   :  { %1470 = vmatpush1.msra.mxu0 %v5765_v43  ;;  %4254 = vmatpush3.msra.mxu1 %v5893_v39 }
 0x57f   :  { %1471 = vmatprep.subr.mxu0 %v5769_v29  ;;  %4255 = vmatprep.subr.mxu1 %v7034_v0 }
 0x580   :  { %1472 = vmatpush1.msra.mxu0 %v5773_v4  ;;  %4256 = vmatpush3.msra.mxu1 %v5899_v40 }
 0x581   :  { %1473 = vmatprep.subr.mxu0 %v5777_v30  ;;  %4257 = vmatprep.subr.mxu1 %v7034_v0 }
 0x582   :  { %1474 = vmatpush1.msra.mxu0 %v5781_v10  ;;  %4258 = vmatpush3.msra.mxu1 %v5905_v61 }
 0x583   :  { %1475 = vmatprep.subr.mxu0 %v5785_v31  ;;  %4259 = vmatprep.subr.mxu1 %v7034_v0 }
 0x584   :  { %1476 = vmatpush1.msra.mxu0 %v5789_v44  ;;  %4260 = vmatpush3.msra.mxu1 %v5911_v46 }
 0x585   :  { %1477 = vmatprep.subr.mxu0 %v5793_v32  ;;  %4261 = vmatprep.subr.mxu1 %v7034_v0 }
 0x586   :  { %1478 = vmatpush1.msra.mxu0 %v5797_v50  ;;  %4262 = vmatpush3.msra.mxu1 %v5917_v47 }
 0x587   :  { %1479 = vmatprep.subr.mxu0 %v5801_v33  ;;  %4263 = vmatprep.subr.mxu1 %v7034_v0 }
 0x588   :  { %1480 = vmatpush1.msra.mxu0 %v5805_v5  ;;  %4264 = vmatpush3.msra.mxu1 %v5923_v52 }
 0x589   :  { %1481 = vmatprep.subr.mxu0 %v5809_v34  ;;  %4265 = vmatprep.subr.mxu1 %v7034_v0 }
 0x58a   :  { %1482 = vmatpush1.msra.mxu0 %v5813_v11  ;;  %4266 = vmatpush3.msra.mxu1 %v5929_v53 }
 0x58b   :  { %1483 = vmatprep.subr.mxu0 %v5817_v35  ;;  %4267 = vmatprep.subr.mxu1 %v7034_v0 }
 0x58c   :  { %1484 = vmatpush1.msra.mxu0 %v5821_v55  ;;  %4268 = vmatpush3.msra.mxu1 %v5935_v54 }
 0x58d   :  { %1485 = vmatprep.subr.mxu0 %v5825_v36  ;;  %4269 = vmatprep.subr.mxu1 %v7034_v0 }
 0x58e   :  { %1486 = vmatpush1.msra.mxu0 %v5829_v42  ;;  %4270 = vmatpush3.msra.mxu1 %v5941_v57 }
 0x58f   :  { %1487 = vmatprep.subr.mxu0 %v5833_v37  ;;  %4271 = vmatprep.subr.mxu1 %v7034_v0 }
 0x590   :  { %1488 = vmatpush1.msra.mxu0 %v5837_v49  ;;  %4272 = vmatpush3.msra.mxu1 %v5947_v58 }
 0x591   :  { %1489 = vmatprep.subr.mxu0 %v5841_v38  ;;  %4273 = vmatprep.subr.mxu1 %v7034_v0 }
 0x592   :  { %1490 = vmatpush1.msra.mxu0 %v5845_v56  ;;  %1523 = vmatprep.mubr.f32.mxu0 %v7034_v0 }
 0x593   :  { %4274 = vmatpush3.msra.mxu1 %v5954_v59  ;;  %4275 = vmatprep.mubr.msk.f32.mxu1 %vm5106_vm0, %v7034_v0  ;;  %v7063_v59 = vld [vmem:[#allocation42_spill] sm:$0xff] }
 0x594   :  { %1626 = vmatprep.subr.mxu0 %v5713_v51  ;;  %4278 = vmatprep.subr.mxu1 %v7034_v0 }
 0x633   :  { %v1358_v48 = vpop.f32.mrf.mxu0  ;;  %v1429_v60 = vpop.f32.mrf.mxu1 }
 0x634   :  { %v1437_v1 = vadd.f32 %v1358_v48, %v7061_v63 }
 0x635   :  { %v4242_v2 = vpop.f32.mrf.mxu1  ;;  %v1360_v6 = vpop.f32.mrf.mxu0 }
 0x636   :  { %v3629_v3 = vmul.f32 -1.442695, %v1437_v1  ;;  %v1444_v8 = vadd.f32 %v1360_v6, %v7062_v7  ;;  %v1815_v6 = vld [vmem:[#allocation10 + $0xb0] sm:$0xff]  ;;  %v1816_v7 = vld [vmem:[#allocation10 + $0xb8] sm:$0xff] }
 0x638   :  { %4738 = vpow2.f32 %v3629_v3  ;;  %v3630_v9 = vmul.f32 -1.442695, %v1444_v8  ;;  %v1814_v8 = vld [vmem:[#allocation10 + $0xa8] sm:$0xff] }
 0x63a   :  { %4740 = vpow2.f32 %v3630_v9  ;;  %v1812_v9 = vld [vmem:[#allocation10 + $0x98] sm:$0xff] }
 0x645   :  { %v4739_v12 = vpop.eup %4738 }
 0x646   :  { %v1441_v20 = vadd.f32 1.0, %v4739_v12  ;;  %v1813_v12 = vld [vmem:[#allocation10 + $0xa0] sm:$0xff] }
 0x647   :  { %v4741_v62 = vpop.eup %4740 }
 0x648   :  { %4742 = vrcp.f32 %v1441_v20  ;;  %v1448_v38 = vadd.f32 1.0, %v4741_v62  ;;  %v7065_v62 = vld [vmem:[#allocation27_spill] sm:$0xff]  ;;  %v7066_v20 = vld [vmem:[#allocation28_spill] sm:$0xff] }
 0x655   :  { %v4743_v16 = vpop.eup %4742 }
 0x656   :  { %v1451_v51 = vmul.f32 %v4743_v16, %v1429_v60  ;;  %v7064_v16 = vld [vmem:[#allocation21_spill] sm:$0xff]  ;;  %v1817_v60 = vld [vmem:[#allocation10 + $0xc0] sm:$0xff] }
 0x658   :  { %v1452_v56 = vadd.f32 %v7063_v59, %v1451_v51  ;;  %v1819_v59 = vld [vmem:[#allocation10 + $0xd0] sm:$0xff] }
 0x659   :  { %v1811_v51 = vld [vmem:[#allocation10 + $0x90] sm:$0xff] }
 0x65a   :  { %4744 = vtanh.f32 %v1452_v56  ;;  %v1834_v56 = vld [vmem:[#allocation10 + $0x148] sm:$0xff] }
 0x65b   :  { %4746 = vrcp.f32 %v1448_v38  ;;  %v1833_v38 = vld [vmem:[#allocation10 + $0x140] sm:$0xff] }
 0x667   :  { %v4745_v48 = vpop.eup %4744 }
 0x668   :  { %v1454_v63 = vsub.f32 %v5858_v13, %v4745_v48  ;;  %v4747_v1 = vpop.eup %4746 }
 0x66a   :  { %v1455_v2 = vmul.f32 %v4747_v1, %v1454_v63  ;;  %v1810_v63 = vld [vmem:[#allocation10 + $0x88] sm:$0xff]  ;;  %v1808_v1 = vld [vmem:[#allocation10 + $0x78] sm:$0xff] }
 0x66c   :  { %v5965_v3 = vadd.f32 %v4745_v48, %v1455_v2  ;;  %v1809_v48 = vld [vmem:[#allocation10 + $0x80] sm:$0xff]  ;;  %v1806_v2 = vld [vmem:[#allocation10 + $0x68] sm:$0xff] }
 0x66e   :  { %1524 = vmatmul.mubr.f32.vlgmr.msra.gmra.mxu0 %v5965_v3  ;;  %4276 = vmatmul.mubr.f32.vlgmr.msra.gmra.mxu1 %v5965_v3 }
 0x66f   :  { %1627 = vmatpush1.msra.mxu0 %v5725_v23  ;;  %4279 = vmatpush3.msra.mxu1 %v5863_v14  ;;  %v1839_v23 = vld [vmem:[#allocation10 + $0x170] sm:$0xff]  ;;  %v1832_v14 = vld [vmem:[#allocation10 + $0x138] sm:$0xff] }
 0x670   :  { %1628 = vmatprep.subr.mxu0 %v5729_v24  ;;  %4280 = vmatprep.subr.mxu1 %v7034_v0  ;;  %v1840_v24 = vld [vmem:[#allocation10 + $0x178] sm:$0xff] }
 0x671   :  { %1629 = vmatpush1.msra.mxu0 %v5733_v22  ;;  %4281 = vmatpush3.msra.mxu1 %v5869_v15  ;;  %v7070_v15 = vld [vmem:[#allocation46_spill] sm:$0xff] }
 0x672   :  { %1630 = vmatprep.subr.mxu0 %v5737_v25  ;;  %4282 = vmatprep.subr.mxu1 %v7034_v0 }
 0x673   :  { %1631 = vmatpush1.msra.mxu0 %v5741_v26  ;;  %4283 = vmatpush3.msra.mxu1 %v5875_v17  ;;  %v7067_v26 = vld [vmem:[#allocation35_spill] sm:$0xff]  ;;  %v1830_v17 = vld [vmem:[#allocation10 + $0x128] sm:$0xff] }
 0x674   :  { %1632 = vmatprep.subr.mxu0 %v5745_v21  ;;  %4284 = vmatprep.subr.mxu1 %v7034_v0 }
 0x675   :  { %1633 = vmatpush1.msra.mxu0 %v5749_v41  ;;  %4285 = vmatpush3.msra.mxu1 %v5881_v18  ;;  %v1831_v18 = vld [vmem:[#allocation10 + $0x130] sm:$0xff] }
 0x676   :  { %1634 = vmatprep.subr.mxu0 %v5753_v27  ;;  %4286 = vmatprep.subr.mxu1 %v7034_v0 }
 0x677   :  { %1635 = vmatpush1.msra.mxu0 %v5757_v45  ;;  %4287 = vmatpush3.msra.mxu1 %v5887_v19  ;;  %v1829_v19 = vld [vmem:[#allocation10 + $0x120] sm:$0xff] }
 0x678   :  { %1636 = vmatprep.subr.mxu0 %v5761_v28  ;;  %4288 = vmatprep.subr.mxu1 %v7034_v0  ;;  %v7068_v28 = vld [vmem:[#allocation36_spill] sm:$0xff] }
 0x679   :  { %1637 = vmatpush1.msra.mxu0 %v5765_v43  ;;  %4289 = vmatpush3.msra.mxu1 %v5893_v39  ;;  %v1827_v39 = vld [vmem:[#allocation10 + $0x110] sm:$0xff] }
 0x67a   :  { %1638 = vmatprep.subr.mxu0 %v5769_v29  ;;  %4290 = vmatprep.subr.mxu1 %v7034_v0 }
 0x67b   :  { %1639 = vmatpush1.msra.mxu0 %v5773_v4  ;;  %4291 = vmatpush3.msra.mxu1 %v5899_v40  ;;  %v1828_v40 = vld [vmem:[#allocation10 + $0x118] sm:$0xff] }
 0x67c   :  { %1640 = vmatprep.subr.mxu0 %v5777_v30  ;;  %4292 = vmatprep.subr.mxu1 %v7034_v0 }
 0x67d   :  { %1641 = vmatpush1.msra.mxu0 %v5781_v10  ;;  %4293 = vmatpush3.msra.mxu1 %v5905_v61  ;;  %v1826_v61 = vld [vmem:[#allocation10 + $0x108] sm:$0xff] }
 0x67e   :  { %1642 = vmatprep.subr.mxu0 %v5785_v31  ;;  %4294 = vmatprep.subr.mxu1 %v7034_v0 }
 0x67f   :  { %1643 = vmatpush1.msra.mxu0 %v5789_v44  ;;  %4295 = vmatpush3.msra.mxu1 %v5911_v46  ;;  %v1824_v46 = vld [vmem:[#allocation10 + $0xf8] sm:$0xff] }
 0x680   :  { %1644 = vmatprep.subr.mxu0 %v5793_v32  ;;  %4296 = vmatprep.subr.mxu1 %v7034_v0  ;;  %v7069_v32 = vld [vmem:[#allocation45_spill] sm:$0xff] }
 0x681   :  { %1645 = vmatpush1.msra.mxu0 %v5797_v50  ;;  %4297 = vmatpush3.msra.mxu1 %v5917_v47  ;;  %v1825_v47 = vld [vmem:[#allocation10 + $0x100] sm:$0xff] }
 0x682   :  { %1646 = vmatprep.subr.mxu0 %v5801_v33  ;;  %4298 = vmatprep.subr.mxu1 %v7034_v0 }
 0x683   :  { %1647 = vmatpush1.msra.mxu0 %v5805_v5  ;;  %4299 = vmatpush3.msra.mxu1 %v5923_v52  ;;  %v1823_v52 = vld [vmem:[#allocation10 + $0xf0] sm:$0xff] }
 0x684   :  { %1648 = vmatprep.subr.mxu0 %v5809_v34  ;;  %4300 = vmatprep.subr.mxu1 %v7034_v0 }
 0x685   :  { %1649 = vmatpush1.msra.mxu0 %v5813_v11  ;;  %4301 = vmatpush3.msra.mxu1 %v5929_v53  ;;  %v1821_v53 = vld [vmem:[#allocation10 + $0xe0] sm:$0xff] }
 0x686   :  { %1650 = vmatprep.subr.mxu0 %v5817_v35  ;;  %4302 = vmatprep.subr.mxu1 %v7034_v0 }
 0x687   :  { %1651 = vmatpush1.msra.mxu0 %v5821_v55  ;;  %4303 = vmatpush3.msra.mxu1 %v5935_v54  ;;  %v1822_v54 = vld [vmem:[#allocation10 + $0xe8] sm:$0xff] }
 0x688   :  { %1652 = vmatprep.subr.mxu0 %v5825_v36  ;;  %4304 = vmatprep.subr.mxu1 %v7034_v0  ;;  %v1838_v36 = vld [vmem:[#allocation10 + $0x168] sm:$0xff] }
 0x689   :  { %1653 = vmatpush1.msra.mxu0 %v5829_v42  ;;  %4305 = vmatpush3.msra.mxu1 %v5941_v57  ;;  %v1836_v42 = vld [vmem:[#allocation10 + $0x158] sm:$0xff] }
 0x68a   :  { %1654 = vmatprep.subr.mxu0 %v5833_v37  ;;  %4306 = vmatprep.subr.mxu1 %v7034_v0  ;;  %v1837_v37 = vld [vmem:[#allocation10 + $0x160] sm:$0xff]  ;;  %v1820_v57 = vld [vmem:[#allocation10 + $0xd8] sm:$0xff] }
 0x68b   :  { %1655 = vmatpush1.msra.mxu0 %v5837_v49  ;;  %4307 = vmatpush3.msra.mxu1 %v5947_v58  ;;  %v1835_v49 = vld [vmem:[#allocation10 + $0x150] sm:$0xff]  ;;  %v1818_v58 = vld [vmem:[#allocation10 + $0xc8] sm:$0xff] }
 0x68c   :  { %1656 = vmatprep.subr.mxu0 %v7064_v16  ;;  %4308 = vmatprep.subr.mxu1 %v7034_v0  ;;  %v1807_v16 = vld [vmem:[#allocation10 + $0x70] sm:$0xff] }
 0x68d   :  { %1657 = vmatpush1.msra.mxu0 %v7065_v62  ;;  %4309 = vmatpush3.msra.mxu1 %v7066_v20  ;;  %v1805_v62 = vld [vmem:[#allocation10 + $0x60] sm:$0xff]  ;;  %v1803_v20 = vld [vmem:[#allocation10 + $0x50] sm:$0xff] }
 0x68e   :  { %1690 = vmatprep.mubr.f32.mxu0 %v7034_v0  ;;  %4310 = vmatprep.mubr.msk.f32.mxu1 %vm5106_vm0, %v7034_v0 }
 0x68f   :  { %1897 = vmatprep.subr.mxu0 %v1839_v23  ;;  %4313 = vmatprep.subr.mxu1 %v1840_v24  ;;  %v1804_v23 = vld [vmem:[#allocation10 + $0x58] sm:$0xff] }
 0x72e   :  { %v1525_v22 = vpop.f32.mrf.mxu0  ;;  %v1596_v25 = vpop.f32.mrf.mxu1 }
 0x72f   :  { %v1604_v21 = vadd.f32 %v1525_v22, %v7067_v26  ;;  %v1800_v22 = vld [vmem:[#allocation10 + $0x38] sm:$0xff]  ;;  %v1799_v26 = vld [vmem:[#allocation10 + $0x30] sm:$0xff] }
 0x730   :  { %v4277_v41 = vpop.f32.mrf.mxu1  ;;  %v1527_v45 = vpop.f32.mrf.mxu0 }
 0x731   :  { %v3631_v27 = vmul.f32 -1.442695, %v1604_v21  ;;  %v1611_v43 = vadd.f32 %v1527_v45, %v7068_v28  ;;  %v1797_v21 = vld [vmem:[#allocation10 + $0x20] sm:$0xff]  ;;  %v1798_v41 = vld [vmem:[#allocation10 + $0x28] sm:$0xff]  ;;  %v1795_v28 = vld [vmem:[#allocation10 + $0x10] sm:$0xff] }
 0x732   :  { %v1794_v45 = vld [vmem:[#allocation10 + $0x8] sm:$0xff] }
 0x733   :  { %4748 = vpow2.f32 %v3631_v27  ;;  %v3632_v29 = vmul.f32 -1.442695, %v1611_v43  ;;  %v1796_v27 = vld [vmem:[#allocation10 + $0x18] sm:$0xff]  ;;  %v1793_v43 = vld [vmem:[#allocation10] sm:$0xff] }
 0x735   :  { %4750 = vpow2.f32 %v3632_v29  ;;  %v7071_v29 = vld [vmem:[#allocation25_spill] sm:$0xff] }
 0x740   :  { %v4749_v4 = vpop.eup %4748 }
 0x741   :  { %v1608_v30 = vadd.f32 1.0, %v4749_v4  ;;  %v7072_v4 = vld [vmem:[#allocation26_spill] sm:$0xff] }
 0x742   :  { %v4751_v10 = vpop.eup %4750 }
 0x743   :  { %4752 = vrcp.f32 %v1608_v30  ;;  %v1615_v33 = vadd.f32 1.0, %v4751_v10  ;;  %v7073_v30 = vld [vmem:[#allocation39_spill] sm:$0xff]  ;;  %v6065_v10 = vld [vmem:[#allocation12 + $0x170] sm:$0xff] }
 0x744   :  { %7074 = vst [vmem:[#allocation41_spill] sm:$0xff] %v6065_v10 }
 0x750   :  { %v4753_v31 = vpop.eup %4752 }
 0x751   :  { %v1618_v44 = vmul.f32 %v4753_v31, %v1596_v25  ;;  %v1801_v25 = vld [vmem:[#allocation10 + $0x40] sm:$0xff]  ;;  %v6068_v31 = vld [vmem:[#allocation12 + $0x168] sm:$0xff] }
 0x753   :  { %v1619_v50 = vadd.f32 %v1618_v44, %v7069_v32  ;;  %v6071_v44 = vld [vmem:[#allocation12 + $0x158] sm:$0xff] }
 0x754   :  { %v6080_v32 = vld [vmem:[#allocation12 + $0x138] sm:$0xff] }
 0x755   :  { %4754 = vtanh.f32 %v1619_v50  ;;  %v6083_v50 = vld [vmem:[#allocation12 + $0x128] sm:$0xff] }
 0x756   :  { %4756 = vrcp.f32 %v1615_v33  ;;  %v6086_v33 = vld [vmem:[#allocation12 + $0x120] sm:$0xff] }
 0x762   :  { %v4755_v5 = vpop.eup %4754 }
 0x763   :  { %v1621_v34 = vsub.f32 %v5965_v3, %v4755_v5  ;;  %v4757_v11 = vpop.eup %4756 }
 0x765   :  { %v1622_v35 = vmul.f32 %v4757_v11, %v1621_v34  ;;  %v6092_v34 = vld [vmem:[#allocation12 + $0x108] sm:$0xff]  ;;  %v6095_v11 = vld [vmem:[#allocation12 + $0xf8] sm:$0xff] }
 0x767   :  { %v6038_v55 = vadd.f32 %v4755_v5, %v1622_v35  ;;  %v6089_v5 = vld [vmem:[#allocation12 + $0x110] sm:$0xff] }
 0x768   :  { %v6098_v35 = vld [vmem:[#allocation12 + $0xf0] sm:$0xff] }
 0x769   :  { %1691 = vmatmul.mubr.f32.vlgmr.msra.gmra.mxu0 %v6038_v55  ;;  %4311 = vmatmul.mubr.f32.vlgmr.msra.gmra.mxu1 %v6038_v55 }
 0x76a   :  { %1898 = vmatpush1.msra.mxu0 %v1838_v36  ;;  %4314 = vmatpush3.msra.mxu1 %v1840_v24  ;;  %v1802_v24 = vld [vmem:[#allocation10 + $0x48] sm:$0xff]  ;;  %v6101_v36 = vld [vmem:[#allocation12 + $0xe0] sm:$0xff] }
 0x76b   :  { %1899 = vmatprep.subr.mxu0 %v1836_v42  ;;  %4315 = vmatprep.subr.mxu1 %v1837_v37  ;;  %v6104_v42 = vld [vmem:[#allocation12 + $0xd8] sm:$0xff] }
 0x76c   :  { %4345 = vmatprep.mubr.f32.mxu1 %v7070_v15  ;;  %1900 = vmatpush1.msra.mxu0 %v1835_v49  ;;  %v6110_v49 = vld [vmem:[#allocation12 + $0xc0] sm:$0xff] }
 0x76d   :  { %4316 = vmatpush3.msra.mxu1 %v1837_v37  ;;  %1901 = vmatprep.subr.mxu0 %v1833_v38  ;;  %v6107_v37 = vld [vmem:[#allocation12 + $0xc8] sm:$0xff]  ;;  %v6113_v38 = vld [vmem:[#allocation12 + $0xb0] sm:$0xff] }
 0x76e   :  { %4317 = vmatprep.subr.mxu1 %v1834_v56  ;;  %1902 = vmatpush1.msra.mxu0 %v1832_v14  ;;  %v6119_v14 = vld [vmem:[#allocation12 + $0x98] sm:$0xff] }
 0x76f   :  { %4318 = vmatpush3.msra.mxu1 %v1834_v56  ;;  %1903 = vmatprep.subr.mxu0 %v1830_v17  ;;  %v6116_v56 = vld [vmem:[#allocation12 + $0xa8] sm:$0xff]  ;;  %v6125_v17 = vld [vmem:[#allocation12 + $0x80] sm:$0xff] }
 0x770   :  { %4319 = vmatprep.subr.mxu1 %v1831_v18  ;;  %1904 = vmatpush1.msra.mxu0 %v1829_v19  ;;  %v6131_v19 = vld [vmem:[#allocation12 + $0x68] sm:$0xff] }
 0x771   :  { %4320 = vmatpush3.msra.mxu1 %v1831_v18  ;;  %1905 = vmatprep.subr.mxu0 %v1827_v39  ;;  %v6128_v18 = vld [vmem:[#allocation12 + $0x78] sm:$0xff]  ;;  %v6134_v39 = vld [vmem:[#allocation12 + $0x60] sm:$0xff] }
 0x772   :  { %4321 = vmatprep.subr.mxu1 %v1828_v40  ;;  %1906 = vmatpush1.msra.mxu0 %v1826_v61  ;;  %v6140_v61 = vld [vmem:[#allocation12 + $0x48] sm:$0xff] }
 0x773   :  { %4322 = vmatpush3.msra.mxu1 %v1828_v40  ;;  %1907 = vmatprep.subr.mxu0 %v1824_v46  ;;  %v6137_v40 = vld [vmem:[#allocation12 + $0x50] sm:$0xff]  ;;  %v6143_v46 = vld [vmem:[#allocation12 + $0x38] sm:$0xff] }
 0x774   :  { %4323 = vmatprep.subr.mxu1 %v1825_v47  ;;  %1908 = vmatpush1.msra.mxu0 %v1823_v52  ;;  %v6148_v52 = vld [vmem:[#allocation12 + $0x20] sm:$0xff] }
 0x775   :  { %4324 = vmatpush3.msra.mxu1 %v1825_v47  ;;  %1909 = vmatprep.subr.mxu0 %v1821_v53  ;;  %v6146_v47 = vld [vmem:[#allocation12 + $0x30] sm:$0xff]  ;;  %v6150_v53 = vld [vmem:[#allocation12 + $0x18] sm:$0xff] }
 0x776   :  { %4325 = vmatprep.subr.mxu1 %v1822_v54  ;;  %1910 = vmatpush1.msra.mxu0 %v1820_v57  ;;  %v6156_v57 = vld [vmem:[#allocation12] sm:$0xff] }
 0x777   :  { %4326 = vmatpush3.msra.mxu1 %v1822_v54  ;;  %1911 = vmatprep.subr.mxu0 %v1818_v58  ;;  %v6153_v54 = vld [vmem:[#allocation12 + $0x8] sm:$0xff]  ;;  %7076 = vst [vmem:[#allocation23_spill] sm:$0xff] %v6156_v57  ;;  %v6160_v58 = vld [vmem:[#allocation12 + $0x178] sm:$0xff] }
 0x778   :  { %4327 = vmatprep.subr.mxu1 %v1819_v59  ;;  %1912 = vmatpush1.msra.mxu0 %v1817_v60  ;;  %7075 = vst [vmem:[#allocation22_spill] sm:$0xff] %v6153_v54  ;;  %v6167_v60 = vld [vmem:[#allocation12 + $0x148] sm:$0xff] }
 0x779   :  { %4328 = vmatpush3.msra.mxu1 %v1819_v59  ;;  %1913 = vmatprep.subr.mxu0 %v1815_v6  ;;  %v6162_v59 = vld [vmem:[#allocation12 + $0x160] sm:$0xff]  ;;  %v6985_v6 = vmov 0  }
 0x77a   :  { %4329 = vmatprep.subr.mxu1 %v1816_v7  ;;  %1914 = vmatpush1.msra.mxu0 %v1814_v8  ;;  %v6180_v8 = vld [vmem:[%s6956_s1] sm:$0xff] }
 0x77b   :  { %4330 = vmatpush3.msra.mxu1 %v1816_v7  ;;  %1915 = vmatprep.subr.mxu0 %v1812_v9  ;;  %v6173_v7 = vld [vmem:[#allocation12 + $0x130] sm:$0xff]  ;;  %7077 = vst [vmem:[#allocation24_spill] sm:$0xff] %v6180_v8  ;;  %v6183_v9 = vld [vmem:[#allocation12 + $0x118] sm:$0xff]  ;;  %vm2303_vm1 = vcmp.eq.s32.totalorder %v6180_v8, 0 }
 0x77c   :  { %4331 = vmatprep.subr.mxu1 %v1813_v12  ;;  %1916 = vmatpush1.msra.mxu0 %v1811_v51  ;;  %v6189_v51 = vld [vmem:[#allocation12 + $0x100] sm:$0xff] }
 0x77d   :  { %4332 = vmatpush3.msra.mxu1 %v1813_v12  ;;  %1917 = vmatprep.subr.mxu0 %v1809_v48  ;;  %v2304_v12 = vsel %vm2303_vm1, 1, %v6985_v6  ;;  %v6193_v48 = vld [vmem:[#allocation12 + $0xe8] sm:$0xff] }
 0x77e   :  { %4333 = vmatprep.subr.mxu1 %v1810_v63  ;;  %1918 = vmatpush1.msra.mxu0 %v1808_v1  ;;  %v6201_v1 = vld [vmem:[#allocation12 + $0xb8] sm:$0xff] }
 0x77f   :  { %4334 = vmatpush3.msra.mxu1 %v1810_v63  ;;  %1919 = vmatprep.subr.mxu0 %v1806_v2  ;;  %v6197_v63 = vld [vmem:[#allocation12 + $0xd0] sm:$0xff]  ;;  %v6205_v2 = vld [vmem:[#allocation12 + $0xa0] sm:$0xff] }
 0x780   :  { %4335 = vmatprep.subr.mxu1 %v1807_v16  ;;  %1920 = vmatpush1.msra.mxu0 %v1805_v62  ;;  %v6213_v62 = vld [vmem:[#allocation12 + $0x70] sm:$0xff] }
 0x781   :  { %4336 = vmatpush3.msra.mxu1 %v1807_v16  ;;  %1921 = vmatprep.subr.mxu0 %v1803_v20  ;;  %v6209_v16 = vld [vmem:[#allocation12 + $0x88] sm:$0xff]  ;;  %v6217_v20 = vld [vmem:[#allocation12 + $0x58] sm:$0xff] }
 0x782   :  { %4337 = vmatprep.subr.mxu1 %v1804_v23  ;;  %1922 = vmatpush1.msra.mxu0 %v1802_v24  ;;  %v6225_v24 = vld [vmem:[#allocation12 + $0x28] sm:$0xff] }
 0x783   :  { %4338 = vmatpush3.msra.mxu1 %v1804_v23  ;;  %1923 = vmatprep.subr.mxu0 %v1800_v22  ;;  %v6221_v23 = vld [vmem:[#allocation12 + $0x40] sm:$0xff]  ;;  %7078 = vst [vmem:[#allocation29_spill] sm:$0xff] %v6225_v24  ;;  %v6229_v22 = vld [vmem:[#allocation12 + $0x10] sm:$0xff] }
 0x784   :  { %4339 = vmatprep.subr.mxu1 %v1801_v25  ;;  %1924 = vmatpush1.msra.mxu0 %v1799_v26  ;;  %7079 = vst [vmem:[#allocation30_spill] sm:$0xff] %v6229_v22 }
 0x785   :  { %4340 = vmatpush3.msra.mxu1 %v1801_v25  ;;  %1925 = vmatprep.subr.mxu0 %v1797_v21  ;;  %v7080_v21 = vld [vmem:[#allocation37_spill] sm:$0xff] }
 0x786   :  { %4341 = vmatprep.subr.mxu1 %v1798_v41  ;;  %1926 = vmatpush1.msra.mxu0 %v1796_v27 }
 0x787   :  { %4342 = vmatpush3.msra.mxu1 %v1798_v41  ;;  %1927 = vmatprep.subr.mxu0 %v1794_v45 }
 0x788   :  { %4343 = vmatprep.subr.mxu1 %v1795_v28  ;;  %1928 = vmatpush1.msra.mxu0 %v1793_v43  ;;  %v7081_v43 = vld [vmem:[#allocation38_spill] sm:$0xff] }
 0x789   :  { %1961 = vmatprep.mubr.f32.mxu0 %v7034_v0  ;;  %4344 = vmatpush3.msra.mxu1 %v1795_v28 }
 0x78a   :  { %1962 = vmatmul.mubr.f32.vlgmr.msra.gmra.mxu0 %v7070_v15  ;;  %4346 = vmatmul.mubr.f32.vlgmr.msra.gmra.mxu1 %v7071_v29  ;;  %v6122_v15 = vld [vmem:[#allocation12 + $0x90] sm:$0xff] }
 0x78b   :  { %4348 = vmatprep.mubr.f32.mxu1 %v7072_v4  ;;  %1967 = vmatprep.mubr.f32.mxu0 %v7034_v0 }
 0x78c   :  { %4357 = vmatprep.subr.mxu1 %v7034_v0  ;;  %2139 = vmatprep.subr.mxu0 %v6065_v10 }
 0x78d   :  { %2140 = vmatpush1.msra.mxu0 %v6068_v31  ;;  %4358 = vmatpush3.msra.mxu1 %v6160_v58 }
 0x78e   :  { %1968 = vmatmul.mubr.f32.gmra.mxu0 %v7071_v29  ;;  %4349 = vmatmul.mubr.f32.gmra.mxu1 %v7073_v30 }
 0x78f   :  { %4351 = vmatprep.mubr.f32.mxu1 %v5858_v13  ;;  %1973 = vmatprep.mubr.f32.mxu0 %v7034_v0 }
 0x790   :  { %2141 = vmatprep.subr.mxu0 %v6071_v44  ;;  %4359 = vmatprep.subr.mxu1 %v7034_v0 }
 0x791   :  { %4686 = vset.pattern.permute.xlu0 %v6985_v6  ;;  %4360 = vmatpush3.msra.mxu1 %v6162_v59 }
 0x792   :  { %1974 = vmatmul.mubr.f32.gmra.mxu0 %v7072_v4  ;;  %4352 = vmatmul.mubr.f32.gmra.mxu1 %v5965_v3 }
 0x793   :  { %4354 = vmatprep.mubr.f32.mxu1 %v6038_v55  ;;  %1979 = vmatprep.mubr.f32.mxu0 %v7034_v0 }
 0x794   :  { %4361 = vmatprep.subr.mxu1 %v7034_v0  ;;  %4687 = vset.pattern.permute.xlu1 %v6985_v6 }
 0x795   :  { %4362 = vmatpush3.msra.mxu1 %v6167_v60  ;;  %2306 = vperm.xlu0 %4686, %v2304_v12  }
 0x796   :  { %1980 = vmatmul.mubr.f32.gmra.mxu0 %v7073_v30  ;;  %4363 = vmatprep.subr.mxu1 %v7034_v0 }
 0x797   :  { %1985 = vmatprep.mubr.f32.mxu0 %v7034_v0  ;;  %4364 = vmatpush3.msra.mxu1 %v6173_v7 }
 0x798   :  { %4365 = vmatprep.subr.mxu1 %v7034_v0 }
 0x799   :  { %4366 = vmatpush3.msra.mxu1 %v6183_v9 }
 0x79a   :  { %1986 = vmatmul.mubr.f32.gmra.mxu0 %v5858_v13  ;;  %v6074_v13 = vld [vmem:[#allocation12 + $0x150] sm:$0xff]  ;;  %4367 = vmatprep.subr.mxu1 %v7034_v0 }
 0x79b   :  { %1991 = vmatprep.mubr.f32.mxu0 %v7034_v0  ;;  %2142 = vmatpush1.msra.mxu0 %v6074_v13 }
 0x79c   :  { %4368 = vmatpush3.msra.mxu1 %v6189_v51 }
 0x79d   :  { %4369 = vmatprep.subr.mxu1 %v7034_v0 }
 0x79e   :  { %1992 = vmatmul.mubr.f32.gmra.mxu0 %v5965_v3  ;;  %v6077_v3 = vld [vmem:[#allocation12 + $0x140] sm:$0xff]  ;;  %4370 = vmatpush3.msra.mxu1 %v6193_v48 }
 0x79f   :  { %1997 = vmatprep.mubr.f32.mxu0 %v7034_v0  ;;  %2143 = vmatprep.subr.mxu0 %v6077_v3 }
 0x7a0   :  { %2144 = vmatpush1.msra.mxu0 %v6080_v32  ;;  %4371 = vmatprep.subr.mxu1 %v7034_v0 }
 0x7a1   :  { %2145 = vmatprep.subr.mxu0 %v6083_v50  ;;  %4372 = vmatpush3.msra.mxu1 %v6197_v63 }
 0x7a2   :  { %1998 = vmatmul.mubr.f32.gmra.mxu0 %v6038_v55  ;;  %4373 = vmatprep.subr.mxu1 %v7034_v0 }
 0x7a3   :  { %2003 = vmatprep.mubr.f32.mxu0 %v7034_v0  ;;  %2146 = vmatpush1.msra.mxu0 %v6086_v33 }
 0x7a4   :  { %2147 = vmatprep.subr.mxu0 %v6089_v5  ;;  %4374 = vmatpush3.msra.mxu1 %v6201_v1 }
 0x7a5   :  { %2148 = vmatpush1.msra.mxu0 %v6092_v34  ;;  %4375 = vmatprep.subr.mxu1 %v7034_v0 }
 0x7a6   :  { %2149 = vmatprep.subr.mxu0 %v6095_v11  ;;  %4376 = vmatpush3.msra.mxu1 %v6205_v2 }
 0x7a7   :  { %2150 = vmatpush1.msra.mxu0 %v6098_v35  ;;  %4377 = vmatprep.subr.mxu1 %v7034_v0 }
 0x7a8   :  { %2151 = vmatprep.subr.mxu0 %v6101_v36  ;;  %4378 = vmatpush3.msra.mxu1 %v6209_v16 }
 0x7a9   :  { %2152 = vmatpush1.msra.mxu0 %v6104_v42  ;;  %4379 = vmatprep.subr.mxu1 %v7034_v0 }
 0x7aa   :  { %2153 = vmatprep.subr.mxu0 %v6107_v37  ;;  %4380 = vmatpush3.msra.mxu1 %v6213_v62 }
 0x7ab   :  { %2154 = vmatpush1.msra.mxu0 %v6110_v49  ;;  %4381 = vmatprep.subr.mxu1 %v7034_v0 }
 0x7ac   :  { %2155 = vmatprep.subr.mxu0 %v6113_v38  ;;  %4382 = vmatpush3.msra.mxu1 %v6217_v20 }
 0x7ad   :  { %2156 = vmatpush1.msra.mxu0 %v6116_v56  ;;  %4383 = vmatprep.subr.mxu1 %v7034_v0 }
 0x7ae   :  { %2157 = vmatprep.subr.mxu0 %v6119_v14  ;;  %4384 = vmatpush3.msra.mxu1 %v6221_v23 }
 0x7af   :  { %2158 = vmatpush1.msra.mxu0 %v6122_v15  ;;  %4385 = vmatprep.subr.mxu1 %v7034_v0 }
 0x7b0   :  { %2159 = vmatprep.subr.mxu0 %v6125_v17  ;;  %4386 = vmatpush3.msra.mxu1 %v6225_v24 }
 0x7b1   :  { %2160 = vmatpush1.msra.mxu0 %v6128_v18  ;;  %4387 = vmatprep.subr.mxu1 %v7034_v0 }
 0x7b2   :  { %2161 = vmatprep.subr.mxu0 %v6131_v19  ;;  %4388 = vmatpush3.msra.mxu1 %v6229_v22  ;;  %v7082_v22 = vld [vmem:[#allocation44_spill] sm:$0xff] }
 0x7b3   :  { %2162 = vmatpush1.msra.mxu0 %v6134_v39  ;;  %4392 = vmatprep.subr.mxu1 %v7034_v0 }
 0x7b4   :  { %2163 = vmatprep.subr.mxu0 %v6137_v40 }
 0x7b5   :  { %2164 = vmatpush1.msra.mxu0 %v6140_v61 }
 0x7b6   :  { %2165 = vmatprep.subr.mxu0 %v6143_v46 }
 0x7b7   :  { %2166 = vmatpush1.msra.mxu0 %v6146_v47 }
 0x7b8   :  { %2167 = vmatprep.subr.mxu0 %v6148_v52 }
 0x7b9   :  { %2168 = vmatpush1.msra.mxu0 %v6150_v53 }
 0x7ba   :  { %2169 = vmatprep.subr.mxu0 %v6153_v54 }
 0x7bb   :  { %2170 = vmatpush1.msra.mxu0 %v6156_v57 }
 0x7bc   :  { %2310 = vmatprep.subr.mxu0 %v6065_v10 }
 0x829   :  { %v1692_v25 = vpop.f32.mrf.mxu0  ;;  %v1763_v26 = vpop.f32.mrf.mxu1 }
 0x82a   :  { %v1771_v41 = vadd.f32 %v1692_v25, %v7080_v21 }
 0x82b   :  { %v4312_v27 = vpop.f32.mrf.mxu1  ;;  %v1694_v28 = vpop.f32.mrf.mxu0 }
 0x82c   :  { %v3633_v45 = vmul.f32 -1.442695, %v1771_v41  ;;  %v1778_v29 = vadd.f32 %v1694_v28, %v7081_v43 }
 0x82e   :  { %4758 = vpow2.f32 %v3633_v45  ;;  %v3634_v4 = vmul.f32 -1.442695, %v1778_v29 }
 0x830   :  { %4760 = vpow2.f32 %v3634_v4 }
 0x83b   :  { %v4759_v30 = vpop.eup %4758 }
 0x83c   :  { %v1775_v12 = vadd.f32 1.0, %v4759_v30 }
 0x83d   :  { %v4761_v6 = vpop.eup %4760 }
 0x83e   :  { %4762 = vrcp.f32 %v1775_v12  ;;  %v1782_v54 = vadd.f32 1.0, %v4761_v6  ;;  %v7087_v6 = vld [vmem:[#allocation24_spill] sm:$0xff] }
 0x83f   :  { %vm2474_vm2 = vcmp.eq.s32.totalorder %v7087_v6, 1 }
 0x84b   :  { %v4763_v8 = vpop.eup %4762 }
 0x84c   :  { %v1785_v10 = vmul.f32 %v4763_v8, %v1763_v26  ;;  %v7088_v8 = vmov 0   ;;  %v1963_v26 = vpop.f32.mrf.mxu0 }
 0x84e   :  { %v1786_v57 = vadd.f32 %v7082_v22, %v1785_v10  ;;  %v7084_v10 = vld [vmem:[#allocation23_spill] sm:$0xff]  ;;  %v2475_v22 = vsel %vm2474_vm2, 1, %v7088_v8  ;;  %v1965_v28 = vpop.f32.mrf.mxu0 }
 0x84f   :  { %2477 = vperm.xlu0 %4686, %v2475_v22  }
 0x850   :  { %4764 = vtanh.f32 %v1786_v57  ;;  %v7086_v57 = vld [vmem:[#allocation41_spill] sm:$0xff]  ;;  %v6313_v43 = vpop.f32.mrf.mxu0 }
 0x851   :  { %4766 = vrcp.f32 %v1782_v54  ;;  %v7085_v54 = vld [vmem:[#allocation30_spill] sm:$0xff]  ;;  %7089 = vst [vmem:[#allocation40_spill] sm:$0xff] %v6313_v43 }
 0x852   :  { %v6315_v29 = vpop.f32.mrf.mxu0 }
 0x853   :  { %7090 = vst [vmem:[#allocation31_spill] sm:$0xff] %v6315_v29 }
 0x854   :  { %v6317_v4 = vpop.f32.mrf.mxu0 }
 0x855   :  { %7091 = vst [vmem:[#allocation32_spill] sm:$0xff] %v6317_v4 }
 0x856   :  { %v6319_v30 = vpop.f32.mrf.mxu0 }
 0x857   :  { %7092 = vst [vmem:[#allocation43_spill] sm:$0xff] %v6319_v30 }
 0x858   :  { %v6321_v12 = vpop.f32.mrf.mxu0 }
 0x859   :  { %7093 = vst [vmem:[#allocation33_spill] sm:$0xff] %v6321_v12 }
 0x85d   :  { %v4765_v25 = vpop.eup %4764 }
 0x85e   :  { %v1788_v21 = vsub.f32 %v6038_v55, %v4765_v25  ;;  %v4767_v41 = vpop.eup %4766  ;;  %v7083_v55 = vld [vmem:[#allocation22_spill] sm:$0xff] }
 0x860   :  { %v1789_v27 = vmul.f32 %v4767_v41, %v1788_v21  ;;  %v6325_v21 = vpop.f32.mrf.mxu1 }
 0x861   :  { %7095 = vst [vmem:[#allocation42_spill] sm:$0xff] %v6325_v21 }
 0x862   :  { %v1790_v45 = vadd.f32 %v4765_v25, %v1789_v27  ;;  %v6323_v25 = vpop.f32.mrf.mxu0  ;;  %v2076_v27 = vpop.f32.mrf.mxu1 }
 0x863   :  { %7094 = vst [vmem:[#allocation34_spill] sm:$0xff] %v6323_v25 }
 0x864   :  { %2004 = vmatmul.mubr.f32.gmra.mxu0 %v1790_v45  ;;  %4355 = vmatmul.mubr.f32.gmra.mxu1 %v1790_v45  ;;  %v6327_v41 = vpop.f32.mrf.mxu0  ;;  %v6331_v22 = vpop.f32.mrf.mxu1 }
 0x865   :  { %2203 = vmatprep.mubr.f32.mxu0 %v7034_v0  ;;  %4389 = vmatprep.mubr.msk.f32.mxu1 %vm5106_vm0, %v7034_v0  ;;  %7096 = vst [vmem:[#allocation21_spill] sm:$0xff] %v6327_v41  ;;  %7098 = vst [vmem:[#allocation28_spill] sm:$0xff] %v6331_v22 }
 0x866   :  { %v6329_v45 = vpop.f32.mrf.mxu0  ;;  %v6335_v29 = vpop.f32.mrf.mxu1 }
 0x867   :  { %7097 = vst [vmem:[#allocation27_spill] sm:$0xff] %v6329_v45  ;;  %7100 = vst [vmem:[#allocation36_spill] sm:$0xff] %v6335_v29 }
 0x868   :  { %2204 = vmatmul.mubr.f32.vlgmr.msra.gmra.mxu0 %v7034_v0  ;;  %4390 = vmatmul.mubr.f32.vlgmr.msra.gmra.mxu1 %v7034_v0  ;;  %v6333_v43 = vpop.f32.mrf.mxu0  ;;  %v6339_v30 = vpop.f32.mrf.mxu1 }
 0x869   :  { %2311 = vmatpush1.msra.mxu0 %v6068_v31  ;;  %4393 = vmatpush3.msra.mxu1 %v6160_v58  ;;  %7099 = vst [vmem:[#allocation35_spill] sm:$0xff] %v6333_v43  ;;  %7102 = vst [vmem:[#allocation46_spill] sm:$0xff] %v6339_v30 }
 0x86a   :  { %2312 = vmatprep.subr.mxu0 %v6071_v44  ;;  %4394 = vmatprep.subr.mxu1 %v7034_v0  ;;  %v6337_v4 = vpop.f32.mrf.mxu0  ;;  %v6343_v25 = vpop.f32.mrf.mxu1 }
 0x86b   :  { %2313 = vmatpush1.msra.mxu0 %v6074_v13  ;;  %4395 = vmatpush3.msra.mxu1 %v6162_v59  ;;  %7101 = vst [vmem:[#allocation45_spill] sm:$0xff] %v6337_v4  ;;  %7104 = vst [vmem:[#allocation26_spill] sm:$0xff] %v6343_v25 }
 0x86c   :  { %2314 = vmatprep.subr.mxu0 %v6077_v3  ;;  %4396 = vmatprep.subr.mxu1 %v7034_v0  ;;  %v6341_v12 = vpop.f32.mrf.mxu0 }
 0x86d   :  { %2315 = vmatpush1.msra.mxu0 %v6080_v32  ;;  %4397 = vmatpush3.msra.mxu1 %v6167_v60  ;;  %7103 = vst [vmem:[#allocation25_spill] sm:$0xff] %v6341_v12 }
 0x86e   :  { %2316 = vmatprep.subr.mxu0 %v6083_v50  ;;  %4398 = vmatprep.subr.mxu1 %v7034_v0  ;;  %v6345_v21 = vpop.f32.mrf.mxu0 }
 0x86f   :  { %2317 = vmatpush1.msra.mxu0 %v6086_v33  ;;  %4399 = vmatpush3.msra.mxu1 %v6173_v7  ;;  %7105 = vst [vmem:[#allocation39_spill] sm:$0xff] %v6345_v21 }
 0x870   :  { %2318 = vmatprep.subr.mxu0 %v6089_v5  ;;  %4400 = vmatprep.subr.mxu1 %v7034_v0 }
 0x871   :  { %2319 = vmatpush1.msra.mxu0 %v6092_v34  ;;  %4401 = vmatpush3.msra.mxu1 %v6183_v9 }
 0x872   :  { %2320 = vmatprep.subr.mxu0 %v6095_v11  ;;  %4402 = vmatprep.subr.mxu1 %v7034_v0 }
 0x873   :  { %2321 = vmatpush1.msra.mxu0 %v6098_v35  ;;  %4403 = vmatpush3.msra.mxu1 %v6189_v51 }
 0x874   :  { %2322 = vmatprep.subr.mxu0 %v6101_v36  ;;  %4404 = vmatprep.subr.mxu1 %v7034_v0 }
 0x875   :  { %2323 = vmatpush1.msra.mxu0 %v6104_v42  ;;  %4405 = vmatpush3.msra.mxu1 %v6193_v48 }
 0x876   :  { %2324 = vmatprep.subr.mxu0 %v6107_v37  ;;  %4406 = vmatprep.subr.mxu1 %v7034_v0 }
 0x877   :  { %2325 = vmatpush1.msra.mxu0 %v6110_v49  ;;  %4407 = vmatpush3.msra.mxu1 %v6197_v63 }
 0x878   :  { %2326 = vmatprep.subr.mxu0 %v6113_v38  ;;  %4408 = vmatprep.subr.mxu1 %v7034_v0 }
 0x879   :  { %2327 = vmatpush1.msra.mxu0 %v6116_v56  ;;  %4409 = vmatpush3.msra.mxu1 %v6201_v1 }
 0x87a   :  { %2328 = vmatprep.subr.mxu0 %v6119_v14  ;;  %4410 = vmatprep.subr.mxu1 %v7034_v0 }
 0x87b   :  { %2329 = vmatpush1.msra.mxu0 %v6122_v15  ;;  %4411 = vmatpush3.msra.mxu1 %v6205_v2 }
 0x87c   :  { %2330 = vmatprep.subr.mxu0 %v6125_v17  ;;  %4412 = vmatprep.subr.mxu1 %v7034_v0 }
 0x87d   :  { %2331 = vmatpush1.msra.mxu0 %v6128_v18  ;;  %4413 = vmatpush3.msra.mxu1 %v6209_v16 }
 0x87e   :  { %2332 = vmatprep.subr.mxu0 %v6131_v19  ;;  %4414 = vmatprep.subr.mxu1 %v7034_v0 }
 0x87f   :  { %2333 = vmatpush1.msra.mxu0 %v6134_v39  ;;  %4415 = vmatpush3.msra.mxu1 %v6213_v62 }
 0x880   :  { %2334 = vmatprep.subr.mxu0 %v6137_v40  ;;  %4416 = vmatprep.subr.mxu1 %v7034_v0 }
 0x881   :  { %2335 = vmatpush1.msra.mxu0 %v6140_v61  ;;  %4417 = vmatpush3.msra.mxu1 %v6217_v20 }
 0x882   :  { %2336 = vmatprep.subr.mxu0 %v6143_v46  ;;  %4418 = vmatprep.subr.mxu1 %v7034_v0 }
 0x883   :  { %2337 = vmatpush1.msra.mxu0 %v6146_v47  ;;  %4419 = vmatpush3.msra.mxu1 %v6221_v23 }
 0x884   :  { %2338 = vmatprep.subr.mxu0 %v6148_v52  ;;  %4420 = vmatprep.subr.mxu1 %v7034_v0 }
 0x885   :  { %2339 = vmatpush1.msra.mxu0 %v6150_v53  ;;  %4421 = vmatpush3.msra.mxu1 %v6225_v24 }
 0x886   :  { %2340 = vmatprep.subr.mxu0 %v7083_v55  ;;  %4422 = vmatprep.subr.mxu1 %v7034_v0 }
 0x887   :  { %2341 = vmatpush1.msra.mxu0 %v7084_v10  ;;  %2374 = vmatprep.mubr.f32.mxu0 %v7034_v0 }
 0x888   :  { %4423 = vmatpush3.msra.mxu1 %v7085_v54  ;;  %4424 = vmatprep.mubr.msk.f32.mxu1 %vm5106_vm0, %v7034_v0 }
 0x889   :  { %2481 = vmatprep.subr.mxu0 %v7086_v57  ;;  %4427 = vmatprep.subr.mxu1 %v7034_v0 }
 0x924   :  { %v6347_v41 = vpop.f32.mrf.mxu0  ;;  %v6349_v8 = vpop.f32.mrf.mxu1 }
 0x925   :  { %7106 = vst [vmem:[#allocation37_spill] sm:$0xff] %v6347_v41  ;;  %7107 = vst [vmem:[#allocation38_spill] sm:$0xff] %v6349_v8 }
 0x926   :  { %v6351_v45 = vpop.f32.mrf.mxu0  ;;  %v6353_v22 = vpop.f32.mrf.mxu1 }
 0x927   :  { %7108 = vst [vmem:[#allocation44_spill] sm:$0xff] %v6351_v45  ;;  %7109 = vst [vmem:[#allocation47_spill] sm:$0xff] %v6353_v22 }
 0x928   :  { %v2205_v43 = vpop.f32.mrf.mxu0  ;;  %v2276_v29 = vpop.f32.mrf.mxu1 }
 0x929   :  { %v2283_v6 = vadd.f32 %v2205_v43, %v1963_v26 }
 0x92a   :  { %v4391_v4 = vpop.f32.mrf.mxu1  ;;  %v2207_v30 = vpop.f32.mrf.mxu0 }
 0x92b   :  { %v3635_v57 = vmul.f32 -1.442695, %v2283_v6  ;;  %v2290_v12 = vadd.f32 %v2207_v30, %v1965_v28  ;;  %v7117_v28 = vmov 0  }
 0x92d   :  { %4768 = vpow2.f32 %v3635_v57  ;;  %v3636_v54 = vmul.f32 -1.442695, %v2290_v12  ;;  %v7115_v57 = vld [vmem:[#allocation41_spill] sm:$0xff]  ;;  %v7118_v12 = vld [vmem:[#allocation40_spill] sm:$0xff] }
 0x92f   :  { %4770 = vpow2.f32 %v3636_v54  ;;  %v7114_v54 = vld [vmem:[#allocation30_spill] sm:$0xff] }
 0x93a   :  { %v4769_v25 = vpop.eup %4768 }
 0x93b   :  { %v2287_v10 = vadd.f32 1.0, %v4769_v25 }
 0x93c   :  { %v4771_v41 = vpop.eup %4770 }
 0x93d   :  { %4772 = vrcp.f32 %v2287_v10  ;;  %v2294_v55 = vadd.f32 1.0, %v4771_v41  ;;  %v7113_v10 = vld [vmem:[#allocation23_spill] sm:$0xff] }
 0x94a   :  { %v4773_v21 = vpop.eup %4772 }
 0x94b   :  { %v2297_v8 = vmul.f32 %v4773_v21, %v2276_v29 }
 0x94d   :  { %v2298_v45 = vadd.f32 %v2297_v8, %v2076_v27  ;;  %v7116_v8 = vld [vmem:[#allocation24_spill] sm:$0xff] }
 0x94e   :  { %vm2645_vm3 = vcmp.eq.s32.totalorder %v7116_v8, 2 }
 0x94f   :  { %4774 = vtanh.f32 %v2298_v45  ;;  %v2646_v29 = vsel %vm2645_vm3, 1, %v7117_v28  ;;  %v7119_v45 = vld [vmem:[#allocation31_spill] sm:$0xff]  ;;  %v7120_v28 = vld [vmem:[#allocation42_spill] sm:$0xff] }
 0x950   :  { %4776 = vrcp.f32 %v2294_v55  ;;  %v7112_v55 = vld [vmem:[#allocation22_spill] sm:$0xff]  ;;  %2648 = vperm.xlu1 %4687, %v2646_v29  }
 0x95c   :  { %v4775_v22 = vpop.eup %4774 }
 0x95d   :  { %v2300_v24 = vsub.f32 0.0, %v4775_v22  ;;  %v4777_v26 = vpop.eup %4776 }
 0x95f   :  { %v2301_v43 = vmul.f32 %v4777_v26, %v2300_v24  ;;  %v7111_v24 = vld [vmem:[#allocation29_spill] sm:$0xff] }
 0x961   :  { %v6355_v6 = vadd.f32 %v4775_v22, %v2301_v43 }
 0x963   :  { %7110 = vst [vmem:[#allocation48_spill] sm:$0xff] %v6355_v6  ;;  %2375 = vmatmul.mubr.f32.vlgmr.msra.gmra.mxu0 %v6355_v6  ;;  %4425 = vmatmul.mubr.f32.vlgmr.msra.gmra.mxu1 %v6355_v6 }
 0x964   :  { %2482 = vmatpush1.msra.mxu0 %v6068_v31  ;;  %4428 = vmatpush3.msra.mxu1 %v6160_v58 }
 0x965   :  { %2483 = vmatprep.subr.mxu0 %v6071_v44  ;;  %4429 = vmatprep.subr.mxu1 %v7034_v0 }
 0x966   :  { %2484 = vmatpush1.msra.mxu0 %v6074_v13  ;;  %4430 = vmatpush3.msra.mxu1 %v6162_v59 }
 0x967   :  { %2485 = vmatprep.subr.mxu0 %v6077_v3  ;;  %4431 = vmatprep.subr.mxu1 %v7034_v0 }
 0x968   :  { %2486 = vmatpush1.msra.mxu0 %v6080_v32  ;;  %4432 = vmatpush3.msra.mxu1 %v6167_v60 }
 0x969   :  { %2487 = vmatprep.subr.mxu0 %v6083_v50  ;;  %4433 = vmatprep.subr.mxu1 %v7034_v0 }
 0x96a   :  { %2488 = vmatpush1.msra.mxu0 %v6086_v33  ;;  %4434 = vmatpush3.msra.mxu1 %v6173_v7 }
 0x96b   :  { %2489 = vmatprep.subr.mxu0 %v6089_v5  ;;  %4435 = vmatprep.subr.mxu1 %v7034_v0 }
 0x96c   :  { %2490 = vmatpush1.msra.mxu0 %v6092_v34  ;;  %4436 = vmatpush3.msra.mxu1 %v6183_v9 }
 0x96d   :  { %2491 = vmatprep.subr.mxu0 %v6095_v11  ;;  %4437 = vmatprep.subr.mxu1 %v7034_v0 }
 0x96e   :  { %2492 = vmatpush1.msra.mxu0 %v6098_v35  ;;  %4438 = vmatpush3.msra.mxu1 %v6189_v51 }
 0x96f   :  { %2493 = vmatprep.subr.mxu0 %v6101_v36  ;;  %4439 = vmatprep.subr.mxu1 %v7034_v0 }
 0x970   :  { %2494 = vmatpush1.msra.mxu0 %v6104_v42  ;;  %4440 = vmatpush3.msra.mxu1 %v6193_v48 }
 0x971   :  { %2495 = vmatprep.subr.mxu0 %v6107_v37  ;;  %4441 = vmatprep.subr.mxu1 %v7034_v0 }
 0x972   :  { %2496 = vmatpush1.msra.mxu0 %v6110_v49  ;;  %4442 = vmatpush3.msra.mxu1 %v6197_v63 }
 0x973   :  { %2497 = vmatprep.subr.mxu0 %v6113_v38  ;;  %4443 = vmatprep.subr.mxu1 %v7034_v0 }
 0x974   :  { %2498 = vmatpush1.msra.mxu0 %v6116_v56  ;;  %4444 = vmatpush3.msra.mxu1 %v6201_v1 }
 0x975   :  { %2499 = vmatprep.subr.mxu0 %v6119_v14  ;;  %4445 = vmatprep.subr.mxu1 %v7034_v0 }
 0x976   :  { %2500 = vmatpush1.msra.mxu0 %v6122_v15  ;;  %4446 = vmatpush3.msra.mxu1 %v6205_v2 }
 0x977   :  { %2501 = vmatprep.subr.mxu0 %v6125_v17  ;;  %4447 = vmatprep.subr.mxu1 %v7034_v0 }
 0x978   :  { %2502 = vmatpush1.msra.mxu0 %v6128_v18  ;;  %4448 = vmatpush3.msra.mxu1 %v6209_v16 }
 0x979   :  { %2503 = vmatprep.subr.mxu0 %v6131_v19  ;;  %4449 = vmatprep.subr.mxu1 %v7034_v0 }
 0x97a   :  { %2504 = vmatpush1.msra.mxu0 %v6134_v39  ;;  %4450 = vmatpush3.msra.mxu1 %v6213_v62 }
 0x97b   :  { %2505 = vmatprep.subr.mxu0 %v6137_v40  ;;  %4451 = vmatprep.subr.mxu1 %v7034_v0 }
 0x97c   :  { %2506 = vmatpush1.msra.mxu0 %v6140_v61  ;;  %4452 = vmatpush3.msra.mxu1 %v6217_v20 }
 0x97d   :  { %2507 = vmatprep.subr.mxu0 %v6143_v46  ;;  %4453 = vmatprep.subr.mxu1 %v7034_v0 }
 0x97e   :  { %2508 = vmatpush1.msra.mxu0 %v6146_v47  ;;  %4454 = vmatpush3.msra.mxu1 %v6221_v23 }
 0x97f   :  { %2509 = vmatprep.subr.mxu0 %v6148_v52  ;;  %4455 = vmatprep.subr.mxu1 %v7034_v0 }
 0x980   :  { %2510 = vmatpush1.msra.mxu0 %v6150_v53  ;;  %4456 = vmatpush3.msra.mxu1 %v7111_v24 }
 0x981   :  { %2511 = vmatprep.subr.mxu0 %v7112_v55  ;;  %4457 = vmatprep.subr.mxu1 %v7034_v0 }
 0x982   :  { %2512 = vmatpush1.msra.mxu0 %v7113_v10  ;;  %2545 = vmatprep.mubr.f32.mxu0 %v7034_v0 }
 0x983   :  { %4458 = vmatpush3.msra.mxu1 %v7114_v54  ;;  %4459 = vmatprep.mubr.msk.f32.mxu1 %vm5106_vm0, %v7034_v0 }
 0x984   :  { %2652 = vmatprep.subr.mxu0 %v7115_v57  ;;  %4462 = vmatprep.subr.mxu1 %v7034_v0 }
 0xa23   :  { %v2376_v4 = vpop.f32.mrf.mxu0  ;;  %v2447_v30 = vpop.f32.mrf.mxu1 }
 0xa24   :  { %v2454_v25 = vadd.f32 %v2376_v4, %v7118_v12 }
 0xa25   :  { %v4426_v21 = vpop.f32.mrf.mxu1  ;;  %v2378_v27 = vpop.f32.mrf.mxu0 }
 0xa26   :  { %v3637_v41 = vmul.f32 -1.442695, %v2454_v25  ;;  %v2461_v22 = vadd.f32 %v2378_v27, %v7119_v45 }
 0xa28   :  { %4778 = vpow2.f32 %v3637_v41  ;;  %v3638_v26 = vmul.f32 -1.442695, %v2461_v22  ;;  %v7128_v22 = vld [vmem:[#allocation32_spill] sm:$0xff] }
 0xa2a   :  { %4780 = vpow2.f32 %v3638_v26 }
 0xa35   :  { %v4779_v43 = vpop.eup %4778 }
 0xa36   :  { %v2458_v57 = vadd.f32 1.0, %v4779_v43 }
 0xa37   :  { %v4781_v54 = vpop.eup %4780 }
 0xa38   :  { %4782 = vrcp.f32 %v2458_v57  ;;  %v2465_v55 = vadd.f32 1.0, %v4781_v54  ;;  %v7124_v54 = vld [vmem:[#allocation30_spill] sm:$0xff]  ;;  %v7125_v57 = vld [vmem:[#allocation41_spill] sm:$0xff] }
 0xa45   :  { %v4783_v8 = vpop.eup %4782 }
 0xa46   :  { %v2468_v10 = vmul.f32 %v4783_v8, %v2447_v30  ;;  %v7126_v8 = vld [vmem:[#allocation24_spill] sm:$0xff] }
 0xa47   :  { %vm2816_vm4 = vcmp.eq.s32.totalorder %v7126_v8, 3 }
 0xa48   :  { %v2469_v29 = vadd.f32 %v7120_v28, %v2468_v10  ;;  %v7123_v10 = vld [vmem:[#allocation23_spill] sm:$0xff]  ;;  %v7127_v28 = vmov 0  }
 0xa49   :  { %v2817_v30 = vsel %vm2816_vm4, 1, %v7127_v28  ;;  %v7130_v28 = vld [vmem:[#allocation36_spill] sm:$0xff] }
 0xa4a   :  { %4784 = vtanh.f32 %v2469_v29  ;;  %2819 = vperm.xlu1 %4687, %v2817_v30  }
 0xa4b   :  { %4786 = vrcp.f32 %v2465_v55  ;;  %v7122_v55 = vld [vmem:[#allocation22_spill] sm:$0xff] }
 0xa57   :  { %v4785_v4 = vpop.eup %4784 }
 0xa58   :  { %v2471_v12 = vsub.f32 %v6355_v6, %v4785_v4  ;;  %v4787_v25 = vpop.eup %4786 }
 0xa5a   :  { %v2472_v21 = vmul.f32 %v4787_v25, %v2471_v12  ;;  %v7129_v12 = vld [vmem:[#allocation43_spill] sm:$0xff] }
 0xa5c   :  { %v6432_v41 = vadd.f32 %v4785_v4, %v2472_v21 }
 0xa5e   :  { %7121 = vst [vmem:[#allocation29_spill] sm:$0xff] %v6432_v41  ;;  %2546 = vmatmul.mubr.f32.vlgmr.msra.gmra.mxu0 %v6432_v41  ;;  %4460 = vmatmul.mubr.f32.vlgmr.msra.gmra.mxu1 %v6432_v41 }
 0xa5f   :  { %2653 = vmatpush1.msra.mxu0 %v6068_v31  ;;  %4463 = vmatpush3.msra.mxu1 %v6160_v58 }
 0xa60   :  { %2654 = vmatprep.subr.mxu0 %v6071_v44  ;;  %4464 = vmatprep.subr.mxu1 %v7034_v0 }
 0xa61   :  { %2655 = vmatpush1.msra.mxu0 %v6074_v13  ;;  %4465 = vmatpush3.msra.mxu1 %v6162_v59 }
 0xa62   :  { %2656 = vmatprep.subr.mxu0 %v6077_v3  ;;  %4466 = vmatprep.subr.mxu1 %v7034_v0 }
 0xa63   :  { %2657 = vmatpush1.msra.mxu0 %v6080_v32  ;;  %4467 = vmatpush3.msra.mxu1 %v6167_v60 }
 0xa64   :  { %2658 = vmatprep.subr.mxu0 %v6083_v50  ;;  %4468 = vmatprep.subr.mxu1 %v7034_v0 }
 0xa65   :  { %2659 = vmatpush1.msra.mxu0 %v6086_v33  ;;  %4469 = vmatpush3.msra.mxu1 %v6173_v7 }
 0xa66   :  { %2660 = vmatprep.subr.mxu0 %v6089_v5  ;;  %4470 = vmatprep.subr.mxu1 %v7034_v0 }
 0xa67   :  { %2661 = vmatpush1.msra.mxu0 %v6092_v34  ;;  %4471 = vmatpush3.msra.mxu1 %v6183_v9 }
 0xa68   :  { %2662 = vmatprep.subr.mxu0 %v6095_v11  ;;  %4472 = vmatprep.subr.mxu1 %v7034_v0 }
 0xa69   :  { %2663 = vmatpush1.msra.mxu0 %v6098_v35  ;;  %4473 = vmatpush3.msra.mxu1 %v6189_v51 }
 0xa6a   :  { %2664 = vmatprep.subr.mxu0 %v6101_v36  ;;  %4474 = vmatprep.subr.mxu1 %v7034_v0 }
 0xa6b   :  { %2665 = vmatpush1.msra.mxu0 %v6104_v42  ;;  %4475 = vmatpush3.msra.mxu1 %v6193_v48 }
 0xa6c   :  { %2666 = vmatprep.subr.mxu0 %v6107_v37  ;;  %4476 = vmatprep.subr.mxu1 %v7034_v0 }
 0xa6d   :  { %2667 = vmatpush1.msra.mxu0 %v6110_v49  ;;  %4477 = vmatpush3.msra.mxu1 %v6197_v63 }
 0xa6e   :  { %2668 = vmatprep.subr.mxu0 %v6113_v38  ;;  %4478 = vmatprep.subr.mxu1 %v7034_v0 }
 0xa6f   :  { %2669 = vmatpush1.msra.mxu0 %v6116_v56  ;;  %4479 = vmatpush3.msra.mxu1 %v6201_v1 }
 0xa70   :  { %2670 = vmatprep.subr.mxu0 %v6119_v14  ;;  %4480 = vmatprep.subr.mxu1 %v7034_v0 }
 0xa71   :  { %2671 = vmatpush1.msra.mxu0 %v6122_v15  ;;  %4481 = vmatpush3.msra.mxu1 %v6205_v2 }
 0xa72   :  { %2672 = vmatprep.subr.mxu0 %v6125_v17  ;;  %4482 = vmatprep.subr.mxu1 %v7034_v0 }
 0xa73   :  { %2673 = vmatpush1.msra.mxu0 %v6128_v18  ;;  %4483 = vmatpush3.msra.mxu1 %v6209_v16 }
 0xa74   :  { %2674 = vmatprep.subr.mxu0 %v6131_v19  ;;  %4484 = vmatprep.subr.mxu1 %v7034_v0 }
 0xa75   :  { %2675 = vmatpush1.msra.mxu0 %v6134_v39  ;;  %4485 = vmatpush3.msra.mxu1 %v6213_v62 }
 0xa76   :  { %2676 = vmatprep.subr.mxu0 %v6137_v40  ;;  %4486 = vmatprep.subr.mxu1 %v7034_v0 }
 0xa77   :  { %2677 = vmatpush1.msra.mxu0 %v6140_v61  ;;  %4487 = vmatpush3.msra.mxu1 %v6217_v20 }
 0xa78   :  { %2678 = vmatprep.subr.mxu0 %v6143_v46  ;;  %4488 = vmatprep.subr.mxu1 %v7034_v0 }
 0xa79   :  { %2679 = vmatpush1.msra.mxu0 %v6146_v47  ;;  %4489 = vmatpush3.msra.mxu1 %v6221_v23 }
 0xa7a   :  { %2680 = vmatprep.subr.mxu0 %v6148_v52  ;;  %4490 = vmatprep.subr.mxu1 %v7034_v0 }
 0xa7b   :  { %2681 = vmatpush1.msra.mxu0 %v6150_v53  ;;  %4491 = vmatpush3.msra.mxu1 %v7111_v24 }
 0xa7c   :  { %2682 = vmatprep.subr.mxu0 %v7122_v55  ;;  %4492 = vmatprep.subr.mxu1 %v7034_v0 }
 0xa7d   :  { %2683 = vmatpush1.msra.mxu0 %v7123_v10  ;;  %2716 = vmatprep.mubr.f32.mxu0 %v7034_v0 }
 0xa7e   :  { %4493 = vmatpush3.msra.mxu1 %v7124_v54  ;;  %4494 = vmatprep.mubr.msk.f32.mxu1 %vm5106_vm0, %v7034_v0 }
 0xa7f   :  { %2823 = vmatprep.subr.mxu0 %v7125_v57  ;;  %4497 = vmatprep.subr.mxu1 %v7034_v0 }
 0xb1e   :  { %v2547_v27 = vpop.f32.mrf.mxu0  ;;  %v2618_v45 = vpop.f32.mrf.mxu1 }
 0xb1f   :  { %v2625_v26 = vadd.f32 %v2547_v27, %v7128_v22 }
 0xb20   :  { %v4461_v43 = vpop.f32.mrf.mxu1  ;;  %v2549_v4 = vpop.f32.mrf.mxu0 }
 0xb21   :  { %v3639_v29 = vmul.f32 -1.442695, %v2625_v26  ;;  %v2632_v25 = vadd.f32 %v2549_v4, %v7129_v12  ;;  %v6624_v4 = vld [vmem:[#allocation12 + $0x108] sm:$0xff]  ;;  %v6632_v12 = vld [vmem:[#allocation12 + $0xf0] sm:$0xff] }
 0xb23   :  { %4788 = vpow2.f32 %v3639_v29  ;;  %v3640_v21 = vmul.f32 -1.442695, %v2632_v25  ;;  %v6640_v25 = vld [vmem:[#allocation12 + $0xd8] sm:$0xff] }
 0xb25   :  { %4790 = vpow2.f32 %v3640_v21  ;;  %v6648_v21 = vld [vmem:[#allocation12 + $0xc0] sm:$0xff] }
 0xb30   :  { %v4789_v6 = vpop.eup %4788 }
 0xb31   :  { %v2629_v57 = vadd.f32 1.0, %v4789_v6 }
 0xb32   :  { %v4791_v54 = vpop.eup %4790 }
 0xb33   :  { %4792 = vrcp.f32 %v2629_v57  ;;  %v2636_v55 = vadd.f32 1.0, %v4791_v54  ;;  %v6600_v54 = vld [vmem:[#allocation12 + $0x150] sm:$0xff]  ;;  %v6656_v57 = vld [vmem:[#allocation12 + $0xa8] sm:$0xff] }
 0xb40   :  { %v4793_v8 = vpop.eup %4792 }
 0xb41   :  { %v2639_v10 = vmul.f32 %v4793_v8, %v2618_v45  ;;  %v6604_v8 = vld [vmem:[#allocation12 + $0x140] sm:$0xff] }
 0xb42   :  { %v6616_v45 = vld [vmem:[#allocation12 + $0x120] sm:$0xff] }
 0xb43   :  { %v2640_v30 = vadd.f32 %v2639_v10, %v7130_v28  ;;  %v6596_v10 = vld [vmem:[#allocation12 + $0x158] sm:$0xff] }
 0xb44   :  { %v6608_v28 = vld [vmem:[#allocation12 + $0x138] sm:$0xff] }
 0xb45   :  { %4794 = vtanh.f32 %v2640_v30  ;;  %v6664_v30 = vld [vmem:[#allocation12 + $0x90] sm:$0xff] }
 0xb46   :  { %4796 = vrcp.f32 %v2636_v55  ;;  %v6592_v55 = vld [vmem:[#allocation12 + $0x168] sm:$0xff] }
 0xb52   :  { %v4795_v27 = vpop.eup %4794 }
 0xb53   :  { %v2642_v22 = vsub.f32 %v6432_v41, %v4795_v27  ;;  %v4797_v26 = vpop.eup %4796 }
 0xb55   :  { %v2643_v43 = vmul.f32 %v4797_v26, %v2642_v22  ;;  %v6680_v22 = vld [vmem:[#allocation12 + $0x60] sm:$0xff]  ;;  %v6688_v26 = vld [vmem:[#allocation12 + $0x48] sm:$0xff] }
 0xb57   :  { %v6509_v29 = vadd.f32 %v4795_v27, %v2643_v43  ;;  %v6672_v27 = vld [vmem:[#allocation12 + $0x78] sm:$0xff]  ;;  %v6696_v43 = vld [vmem:[#allocation12 + $0x30] sm:$0xff] }
 0xb59   :  { %7131 = vst [vmem:[#allocation40_spill] sm:$0xff] %v6509_v29  ;;  %2717 = vmatmul.mubr.f32.vlgmr.msra.gmra.mxu0 %v6509_v29  ;;  %4495 = vmatmul.mubr.f32.vlgmr.msra.gmra.mxu1 %v6509_v29 }
 0xb5a   :  { %2824 = vmatpush1.msra.mxu0 %v6068_v31  ;;  %4498 = vmatpush3.msra.mxu1 %v6160_v58  ;;  %v7132_v31 = vld [vmem:[#allocation22_spill] sm:$0xff] }
 0xb5b   :  { %2825 = vmatprep.subr.mxu0 %v6071_v44  ;;  %4499 = vmatprep.subr.mxu1 %v7034_v0  ;;  %v7133_v44 = vld [vmem:[#allocation23_spill] sm:$0xff] }
 0xb5c   :  { %2826 = vmatpush1.msra.mxu0 %v6074_v13  ;;  %4500 = vmatpush3.msra.mxu1 %v6162_v59  ;;  %v7134_v13 = vld [vmem:[#allocation30_spill] sm:$0xff] }
 0xb5d   :  { %2827 = vmatprep.subr.mxu0 %v6077_v3  ;;  %4501 = vmatprep.subr.mxu1 %v7034_v0  ;;  %v6578_v3 = vld [vmem:[#allocation12 + $0x170] sm:$0xff] }
 0xb5e   :  { %2828 = vmatpush1.msra.mxu0 %v6080_v32  ;;  %4502 = vmatpush3.msra.mxu1 %v6167_v60  ;;  %v7135_v32 = vld [vmem:[#allocation24_spill] sm:$0xff] }
 0xb5f   :  { %2829 = vmatprep.subr.mxu0 %v6083_v50  ;;  %4503 = vmatprep.subr.mxu1 %v7034_v0  ;;  %vm2987_vm5 = vcmp.eq.s32.totalorder %v7135_v32, 4  ;;  %v7136_v50 = vmov 0  }
 0xb60   :  { %2830 = vmatpush1.msra.mxu0 %v6086_v33  ;;  %4504 = vmatpush3.msra.mxu1 %v6173_v7  ;;  %v2988_v33 = vsel %vm2987_vm5, 1, %v7136_v50 }
 0xb61   :  { %2831 = vmatprep.subr.mxu0 %v6089_v5  ;;  %4505 = vmatprep.subr.mxu1 %v7034_v0 }
 0xb62   :  { %2832 = vmatpush1.msra.mxu0 %v6092_v34  ;;  %4506 = vmatpush3.msra.mxu1 %v6183_v9 }
 0xb63   :  { %2833 = vmatprep.subr.mxu0 %v6095_v11  ;;  %4507 = vmatprep.subr.mxu1 %v7034_v0  ;;  %v7137_v11 = vld [vmem:[#allocation33_spill] sm:$0xff] }
 0xb64   :  { %2834 = vmatpush1.msra.mxu0 %v6098_v35  ;;  %4508 = vmatpush3.msra.mxu1 %v6189_v51 }
 0xb65   :  { %2835 = vmatprep.subr.mxu0 %v6101_v36  ;;  %4509 = vmatprep.subr.mxu1 %v7034_v0 }
 0xb66   :  { %2836 = vmatpush1.msra.mxu0 %v6104_v42  ;;  %4510 = vmatpush3.msra.mxu1 %v6193_v48 }
 0xb67   :  { %2837 = vmatprep.subr.mxu0 %v6107_v37  ;;  %4511 = vmatprep.subr.mxu1 %v7034_v0 }
 0xb68   :  { %2838 = vmatpush1.msra.mxu0 %v6110_v49  ;;  %4512 = vmatpush3.msra.mxu1 %v6197_v63  ;;  %v7138_v49 = vld [vmem:[#allocation34_spill] sm:$0xff] }
 0xb69   :  { %2839 = vmatprep.subr.mxu0 %v6113_v38  ;;  %4513 = vmatprep.subr.mxu1 %v7034_v0 }
 0xb6a   :  { %2840 = vmatpush1.msra.mxu0 %v6116_v56  ;;  %4514 = vmatpush3.msra.mxu1 %v6201_v1 }
 0xb6b   :  { %2841 = vmatprep.subr.mxu0 %v6119_v14  ;;  %4515 = vmatprep.subr.mxu1 %v7034_v0 }
 0xb6c   :  { %2842 = vmatpush1.msra.mxu0 %v6122_v15  ;;  %4516 = vmatpush3.msra.mxu1 %v6205_v2 }
 0xb6d   :  { %2843 = vmatprep.subr.mxu0 %v6125_v17  ;;  %4517 = vmatprep.subr.mxu1 %v7034_v0 }
 0xb6e   :  { %2844 = vmatpush1.msra.mxu0 %v6128_v18  ;;  %4518 = vmatpush3.msra.mxu1 %v6209_v16 }
 0xb6f   :  { %2845 = vmatprep.subr.mxu0 %v6131_v19  ;;  %4519 = vmatprep.subr.mxu1 %v7034_v0 }
 0xb70   :  { %2846 = vmatpush1.msra.mxu0 %v6134_v39  ;;  %4520 = vmatpush3.msra.mxu1 %v6213_v62  ;;  %v7139_v39 = vld [vmem:[#allocation28_spill] sm:$0xff] }
 0xb71   :  { %2847 = vmatprep.subr.mxu0 %v6137_v40  ;;  %4521 = vmatprep.subr.mxu1 %v7034_v0 }
 0xb72   :  { %2848 = vmatpush1.msra.mxu0 %v6140_v61  ;;  %4522 = vmatpush3.msra.mxu1 %v6217_v20 }
 0xb73   :  { %2849 = vmatprep.subr.mxu0 %v6143_v46  ;;  %4523 = vmatprep.subr.mxu1 %v7034_v0 }
 0xb74   :  { %2850 = vmatpush1.msra.mxu0 %v6146_v47  ;;  %4524 = vmatpush3.msra.mxu1 %v6221_v23 }
 0xb75   :  { %2851 = vmatprep.subr.mxu0 %v6148_v52  ;;  %4525 = vmatprep.subr.mxu1 %v7034_v0 }
 0xb76   :  { %2852 = vmatpush1.msra.mxu0 %v6150_v53  ;;  %4526 = vmatpush3.msra.mxu1 %v7111_v24 }
 0xb77   :  { %2853 = vmatprep.subr.mxu0 %v7132_v31  ;;  %4527 = vmatprep.subr.mxu1 %v7034_v0  ;;  %v6704_v31 = vld [vmem:[#allocation12 + $0x18] sm:$0xff] }
 0xb78   :  { %2854 = vmatpush1.msra.mxu0 %v7133_v44  ;;  %2887 = vmatprep.mubr.f32.mxu0 %v7034_v0  ;;  %v6712_v44 = vld [vmem:[#allocation12] sm:$0xff] }
 0xb79   :  { %4528 = vmatpush3.msra.mxu1 %v7134_v13  ;;  %4529 = vmatprep.mubr.msk.f32.mxu1 %vm5106_vm0, %v7034_v0  ;;  %7142 = vst [vmem:[#allocation41_spill] sm:$0xff] %v6712_v44 }
 0xb7a   :  { %2994 = vmatprep.subr.mxu0 %v6578_v3  ;;  %4532 = vmatprep.subr.mxu1 %v7034_v0 }
 0xb7b   :  { %2990 = vperm.xlu0 %4686, %v2988_v33  }
 0xc19   :  { %v2718_v5 = vpop.f32.mrf.mxu0  ;;  %v2789_v34 = vpop.f32.mrf.mxu1 }
 0xc1a   :  { %v2796_v35 = vadd.f32 %v2718_v5, %v7137_v11 }
 0xc1b   :  { %v4496_v36 = vpop.f32.mrf.mxu1  ;;  %v2720_v37 = vpop.f32.mrf.mxu0 }
 0xc1c   :  { %v3641_v42 = vmul.f32 -1.442695, %v2796_v35  ;;  %v2803_v38 = vadd.f32 %v2720_v37, %v7138_v49  ;;  %v7145_v36 = vld [vmem:[#allocation27_spill] sm:$0xff] }
 0xc1e   :  { %4798 = vpow2.f32 %v3641_v42  ;;  %v3642_v56 = vmul.f32 -1.442695, %v2803_v38 }
 0xc20   :  { %4800 = vpow2.f32 %v3642_v56 }
 0xc2b   :  { %v4799_v14 = vpop.eup %4798 }
 0xc2c   :  { %v2800_v15 = vadd.f32 1.0, %v4799_v14 }
 0xc2d   :  { %v4801_v17 = vpop.eup %4800 }
 0xc2e   :  { %4802 = vrcp.f32 %v2800_v15  ;;  %v2807_v61 = vadd.f32 1.0, %v4801_v17  ;;  %v7146_v17 = vld [vmem:[#allocation26_spill] sm:$0xff] }
 0xc3b   :  { %v4803_v18 = vpop.eup %4802 }
 0xc3c   :  { %v2810_v19 = vmul.f32 %v4803_v18, %v2789_v34 }
 0xc3e   :  { %v2811_v40 = vadd.f32 %v7139_v39, %v2810_v19 }
 0xc40   :  { %4804 = vtanh.f32 %v2811_v40 }
 0xc41   :  { %4806 = vrcp.f32 %v2807_v61 }
 0xc4d   :  { %v4805_v46 = vpop.eup %4804 }
 0xc4e   :  { %v2813_v47 = vsub.f32 %v6509_v29, %v4805_v46  ;;  %v4807_v52 = vpop.eup %4806 }
 0xc50   :  { %v2814_v53 = vmul.f32 %v4807_v52, %v2813_v47  ;;  %v6737_v52 = vld [vmem:[#allocation12 + $0x178] sm:$0xff] }
 0xc52   :  { %v6588_v6 = vadd.f32 %v4805_v46, %v2814_v53  ;;  %v6743_v53 = vld [vmem:[#allocation12 + $0x160] sm:$0xff] }
 0xc54   :  { %7140 = vst [vmem:[#allocation31_spill] sm:$0xff] %v6588_v6  ;;  %2888 = vmatmul.mubr.f32.vlgmr.msra.gmra.mxu0 %v6588_v6  ;;  %4530 = vmatmul.mubr.f32.vlgmr.msra.gmra.mxu1 %v6588_v6 }
 0xc55   :  { %2995 = vmatpush1.msra.mxu0 %v6592_v55  ;;  %4533 = vmatpush3.msra.mxu1 %v6160_v58  ;;  %v6612_v58 = vld [vmem:[#allocation12 + $0x128] sm:$0xff] }
 0xc56   :  { %2996 = vmatprep.subr.mxu0 %v6596_v10  ;;  %4534 = vmatprep.subr.mxu1 %v7034_v0 }
 0xc57   :  { %2997 = vmatpush1.msra.mxu0 %v6600_v54  ;;  %4535 = vmatpush3.msra.mxu1 %v6162_v59  ;;  %v6620_v59 = vld [vmem:[#allocation12 + $0x110] sm:$0xff] }
 0xc58   :  { %2998 = vmatprep.subr.mxu0 %v6604_v8  ;;  %4536 = vmatprep.subr.mxu1 %v7034_v0 }
 0xc59   :  { %2999 = vmatpush1.msra.mxu0 %v6608_v28  ;;  %4537 = vmatpush3.msra.mxu1 %v6167_v60  ;;  %v6628_v60 = vld [vmem:[#allocation12 + $0xf8] sm:$0xff] }
 0xc5a   :  { %3000 = vmatprep.subr.mxu0 %v6612_v58  ;;  %4538 = vmatprep.subr.mxu1 %v7034_v0 }
 0xc5b   :  { %3001 = vmatpush1.msra.mxu0 %v6616_v45  ;;  %4539 = vmatpush3.msra.mxu1 %v6173_v7  ;;  %v6636_v7 = vld [vmem:[#allocation12 + $0xe0] sm:$0xff] }
 0xc5c   :  { %3002 = vmatprep.subr.mxu0 %v6620_v59  ;;  %4540 = vmatprep.subr.mxu1 %v7034_v0 }
 0xc5d   :  { %3003 = vmatpush1.msra.mxu0 %v6624_v4  ;;  %4541 = vmatpush3.msra.mxu1 %v6183_v9  ;;  %v6644_v9 = vld [vmem:[#allocation12 + $0xc8] sm:$0xff] }
 0xc5e   :  { %3004 = vmatprep.subr.mxu0 %v6628_v60  ;;  %4542 = vmatprep.subr.mxu1 %v7034_v0 }
 0xc5f   :  { %3005 = vmatpush1.msra.mxu0 %v6632_v12  ;;  %4543 = vmatpush3.msra.mxu1 %v6189_v51  ;;  %v6652_v51 = vld [vmem:[#allocation12 + $0xb0] sm:$0xff] }
 0xc60   :  { %3006 = vmatprep.subr.mxu0 %v6636_v7  ;;  %4544 = vmatprep.subr.mxu1 %v7034_v0 }
 0xc61   :  { %3007 = vmatpush1.msra.mxu0 %v6640_v25  ;;  %4545 = vmatpush3.msra.mxu1 %v6193_v48  ;;  %v6660_v48 = vld [vmem:[#allocation12 + $0x98] sm:$0xff] }
 0xc62   :  { %3008 = vmatprep.subr.mxu0 %v6644_v9  ;;  %4546 = vmatprep.subr.mxu1 %v7034_v0 }
 0xc63   :  { %3009 = vmatpush1.msra.mxu0 %v6648_v21  ;;  %4547 = vmatpush3.msra.mxu1 %v6197_v63  ;;  %v6668_v63 = vld [vmem:[#allocation12 + $0x80] sm:$0xff] }
 0xc64   :  { %3010 = vmatprep.subr.mxu0 %v6652_v51  ;;  %4548 = vmatprep.subr.mxu1 %v7034_v0 }
 0xc65   :  { %3011 = vmatpush1.msra.mxu0 %v6656_v57  ;;  %4549 = vmatpush3.msra.mxu1 %v6201_v1  ;;  %v6676_v1 = vld [vmem:[#allocation12 + $0x68] sm:$0xff] }
 0xc66   :  { %3012 = vmatprep.subr.mxu0 %v6660_v48  ;;  %4550 = vmatprep.subr.mxu1 %v7034_v0 }
 0xc67   :  { %3013 = vmatpush1.msra.mxu0 %v6664_v30  ;;  %4551 = vmatpush3.msra.mxu1 %v6205_v2  ;;  %v6684_v2 = vld [vmem:[#allocation12 + $0x50] sm:$0xff] }
 0xc68   :  { %3014 = vmatprep.subr.mxu0 %v6668_v63  ;;  %4552 = vmatprep.subr.mxu1 %v7034_v0 }
 0xc69   :  { %3015 = vmatpush1.msra.mxu0 %v6672_v27  ;;  %4553 = vmatpush3.msra.mxu1 %v6209_v16  ;;  %v6692_v16 = vld [vmem:[#allocation12 + $0x38] sm:$0xff] }
 0xc6a   :  { %3016 = vmatprep.subr.mxu0 %v6676_v1  ;;  %4554 = vmatprep.subr.mxu1 %v7034_v0 }
 0xc6b   :  { %3017 = vmatpush1.msra.mxu0 %v6680_v22  ;;  %4555 = vmatpush3.msra.mxu1 %v6213_v62  ;;  %v6700_v62 = vld [vmem:[#allocation12 + $0x20] sm:$0xff] }
 0xc6c   :  { %3018 = vmatprep.subr.mxu0 %v6684_v2  ;;  %4556 = vmatprep.subr.mxu1 %v7034_v0 }
 0xc6d   :  { %3019 = vmatpush1.msra.mxu0 %v6688_v26  ;;  %4557 = vmatpush3.msra.mxu1 %v6217_v20  ;;  %v6708_v20 = vld [vmem:[#allocation12 + $0x8] sm:$0xff] }
 0xc6e   :  { %3020 = vmatprep.subr.mxu0 %v6692_v16  ;;  %4558 = vmatprep.subr.mxu1 %v7034_v0  ;;  %7141 = vst [vmem:[#allocation42_spill] sm:$0xff] %v6708_v20 }
 0xc6f   :  { %3021 = vmatpush1.msra.mxu0 %v6696_v43  ;;  %4559 = vmatpush3.msra.mxu1 %v6221_v23  ;;  %v6724_v23 = vld [vmem:[%s6956_s1] sm:$0xff] }
 0xc70   :  { %3022 = vmatprep.subr.mxu0 %v6700_v62  ;;  %4560 = vmatprep.subr.mxu1 %v7034_v0  ;;  %7143 = vst [vmem:[#allocation32_spill] sm:$0xff] %v6724_v23  ;;  %vm3158_vm6 = vcmp.eq.s32.totalorder %v6724_v23, 5  ;;  %vm3329_vm7 = vcmp.eq.s32.totalorder %v6724_v23, 6 }
 0xc71   :  { %3023 = vmatpush1.msra.mxu0 %v6704_v31  ;;  %4561 = vmatpush3.msra.mxu1 %v7111_v24  ;;  %v3159_v24 = vsel %vm3158_vm6, 1, %v7136_v50 }
 0xc72   :  { %3024 = vmatprep.subr.mxu0 %v6708_v20  ;;  %4562 = vmatprep.subr.mxu1 %v7034_v0 }
 0xc73   :  { %3025 = vmatpush1.msra.mxu0 %v6712_v44  ;;  %3058 = vmatprep.mubr.f32.mxu0 %v7034_v0 }
 0xc74   :  { %4563 = vmatpush3.msra.mxu1 %v7134_v13  ;;  %4564 = vmatprep.mubr.msk.f32.mxu1 %vm5106_vm0, %v7034_v0  ;;  %v7144_v13 = vld [vmem:[#allocation21_spill] sm:$0xff] }
 0xc75   :  { %3165 = vmatprep.subr.mxu0 %v6578_v3  ;;  %4567 = vmatprep.subr.mxu1 %v7034_v0 }
 0xc76   :  { %3161 = vperm.xlu1 %4687, %v3159_v24   ;;  %v6749_v24 = vld [vmem:[#allocation12 + $0x148] sm:$0xff] }
 0xd14   :  { %v2889_v32 = vpop.f32.mrf.mxu0  ;;  %v2960_v33 = vpop.f32.mrf.mxu1 }
 0xd15   :  { %v2967_v5 = vadd.f32 %v2889_v32, %v7144_v13  ;;  %v6755_v32 = vld [vmem:[#allocation12 + $0x130] sm:$0xff]  ;;  %v6767_v13 = vld [vmem:[#allocation12 + $0x100] sm:$0xff] }
 0xd16   :  { %v4531_v34 = vpop.f32.mrf.mxu1  ;;  %v2891_v35 = vpop.f32.mrf.mxu0 }
 0xd17   :  { %v3643_v11 = vmul.f32 -1.442695, %v2967_v5  ;;  %v2974_v42 = vadd.f32 %v2891_v35, %v7145_v36  ;;  %v6773_v5 = vld [vmem:[#allocation12 + $0xe8] sm:$0xff]  ;;  %v6779_v34 = vld [vmem:[#allocation12 + $0xd0] sm:$0xff]  ;;  %v6791_v35 = vld [vmem:[#allocation12 + $0xa0] sm:$0xff] }
 0xd18   :  { %v6797_v36 = vld [vmem:[#allocation12 + $0x88] sm:$0xff] }
 0xd19   :  { %4808 = vpow2.f32 %v3643_v11  ;;  %v3644_v37 = vmul.f32 -1.442695, %v2974_v42  ;;  %v6785_v11 = vld [vmem:[#allocation12 + $0xb8] sm:$0xff]  ;;  %v6803_v42 = vld [vmem:[#allocation12 + $0x70] sm:$0xff] }
 0xd1b   :  { %4810 = vpow2.f32 %v3644_v37  ;;  %v6809_v37 = vld [vmem:[#allocation12 + $0x58] sm:$0xff] }
 0xd26   :  { %v4809_v49 = vpop.eup %4808 }
 0xd27   :  { %v2971_v38 = vadd.f32 1.0, %v4809_v49  ;;  %v6815_v49 = vld [vmem:[#allocation12 + $0x40] sm:$0xff] }
 0xd28   :  { %v4811_v56 = vpop.eup %4810 }
 0xd29   :  { %4812 = vrcp.f32 %v2971_v38  ;;  %v2978_v19 = vadd.f32 1.0, %v4811_v56  ;;  %v6821_v38 = vld [vmem:[#allocation12 + $0x28] sm:$0xff]  ;;  %v6828_v56 = vld [vmem:[#allocation12 + $0x10] sm:$0xff] }
 0xd2a   :  { %7147 = vst [vmem:[#allocation43_spill] sm:$0xff] %v6828_v56 }
 0xd36   :  { %v4813_v14 = vpop.eup %4812 }
 0xd37   :  { %v2981_v15 = vmul.f32 %v4813_v14, %v2960_v33  ;;  %v6761_v33 = vld [vmem:[#allocation12 + $0x118] sm:$0xff]  ;;  %v3330_v14 = vsel %vm3329_vm7, 1, %v7136_v50  ;;  %v7150_v50 = vld [vmem:[#allocation46_spill] sm:$0xff] }
 0xd38   :  { %3332 = vperm.xlu0 %4686, %v3330_v14  }
 0xd39   :  { %v2982_v18 = vadd.f32 %v2981_v15, %v7146_v17 }
 0xd3b   :  { %4814 = vtanh.f32 %v2982_v18  ;;  %v7148_v18 = vld [vmem:[#allocation35_spill] sm:$0xff] }
 0xd3c   :  { %4816 = vrcp.f32 %v2978_v19 }
 0xd48   :  { %v4815_v39 = vpop.eup %4814 }
 0xd49   :  { %v2984_v40 = vsub.f32 %v6588_v6, %v4815_v39  ;;  %v4817_v61 = vpop.eup %4816 }
 0xd4b   :  { %v2985_v46 = vmul.f32 %v4817_v61, %v2984_v40 }
 0xd4d   :  { %v6732_v47 = vadd.f32 %v4815_v39, %v2985_v46  ;;  %v7149_v46 = vld [vmem:[#allocation45_spill] sm:$0xff] }
 0xd4f   :  { %3059 = vmatmul.mubr.f32.vlgmr.msra.gmra.mxu0 %v6732_v47  ;;  %4565 = vmatmul.mubr.f32.vlgmr.msra.gmra.mxu1 %v6732_v47 }
 0xd50   :  { %3166 = vmatpush1.msra.mxu0 %v6592_v55  ;;  %4568 = vmatpush3.msra.mxu1 %v6737_v52 }
 0xd51   :  { %3167 = vmatprep.subr.mxu0 %v6596_v10  ;;  %4569 = vmatprep.subr.mxu1 %v7034_v0 }
 0xd52   :  { %3168 = vmatpush1.msra.mxu0 %v6600_v54  ;;  %4570 = vmatpush3.msra.mxu1 %v6743_v53 }
 0xd53   :  { %3169 = vmatprep.subr.mxu0 %v6604_v8  ;;  %4571 = vmatprep.subr.mxu1 %v7034_v0 }
 0xd54   :  { %3170 = vmatpush1.msra.mxu0 %v6608_v28  ;;  %4572 = vmatpush3.msra.mxu1 %v6749_v24 }
 0xd55   :  { %3171 = vmatprep.subr.mxu0 %v6612_v58  ;;  %4573 = vmatprep.subr.mxu1 %v7034_v0 }
 0xd56   :  { %3172 = vmatpush1.msra.mxu0 %v6616_v45  ;;  %4574 = vmatpush3.msra.mxu1 %v6755_v32 }
 0xd57   :  { %3173 = vmatprep.subr.mxu0 %v6620_v59  ;;  %4575 = vmatprep.subr.mxu1 %v7034_v0 }
 0xd58   :  { %3174 = vmatpush1.msra.mxu0 %v6624_v4  ;;  %4576 = vmatpush3.msra.mxu1 %v6761_v33 }
 0xd59   :  { %3175 = vmatprep.subr.mxu0 %v6628_v60  ;;  %4577 = vmatprep.subr.mxu1 %v7034_v0 }
 0xd5a   :  { %3176 = vmatpush1.msra.mxu0 %v6632_v12  ;;  %4578 = vmatpush3.msra.mxu1 %v6767_v13 }
 0xd5b   :  { %3177 = vmatprep.subr.mxu0 %v6636_v7  ;;  %4579 = vmatprep.subr.mxu1 %v7034_v0 }
 0xd5c   :  { %3178 = vmatpush1.msra.mxu0 %v6640_v25  ;;  %4580 = vmatpush3.msra.mxu1 %v6773_v5 }
 0xd5d   :  { %3179 = vmatprep.subr.mxu0 %v6644_v9  ;;  %4581 = vmatprep.subr.mxu1 %v7034_v0 }
 0xd5e   :  { %3180 = vmatpush1.msra.mxu0 %v6648_v21  ;;  %4582 = vmatpush3.msra.mxu1 %v6779_v34 }
 0xd5f   :  { %3181 = vmatprep.subr.mxu0 %v6652_v51  ;;  %4583 = vmatprep.subr.mxu1 %v7034_v0 }
 0xd60   :  { %3182 = vmatpush1.msra.mxu0 %v6656_v57  ;;  %4584 = vmatpush3.msra.mxu1 %v6785_v11 }
 0xd61   :  { %3183 = vmatprep.subr.mxu0 %v6660_v48  ;;  %4585 = vmatprep.subr.mxu1 %v7034_v0 }
 0xd62   :  { %3184 = vmatpush1.msra.mxu0 %v6664_v30  ;;  %4586 = vmatpush3.msra.mxu1 %v6791_v35 }
 0xd63   :  { %3185 = vmatprep.subr.mxu0 %v6668_v63  ;;  %4587 = vmatprep.subr.mxu1 %v7034_v0 }
 0xd64   :  { %3186 = vmatpush1.msra.mxu0 %v6672_v27  ;;  %4588 = vmatpush3.msra.mxu1 %v6797_v36 }
 0xd65   :  { %3187 = vmatprep.subr.mxu0 %v6676_v1  ;;  %4589 = vmatprep.subr.mxu1 %v7034_v0 }
 0xd66   :  { %3188 = vmatpush1.msra.mxu0 %v6680_v22  ;;  %4590 = vmatpush3.msra.mxu1 %v6803_v42 }
 0xd67   :  { %3189 = vmatprep.subr.mxu0 %v6684_v2  ;;  %4591 = vmatprep.subr.mxu1 %v7034_v0 }
 0xd68   :  { %3190 = vmatpush1.msra.mxu0 %v6688_v26  ;;  %4592 = vmatpush3.msra.mxu1 %v6809_v37 }
 0xd69   :  { %3191 = vmatprep.subr.mxu0 %v6692_v16  ;;  %4593 = vmatprep.subr.mxu1 %v7034_v0 }
 0xd6a   :  { %3192 = vmatpush1.msra.mxu0 %v6696_v43  ;;  %4594 = vmatpush3.msra.mxu1 %v6815_v49 }
 0xd6b   :  { %3193 = vmatprep.subr.mxu0 %v6700_v62  ;;  %4595 = vmatprep.subr.mxu1 %v7034_v0 }
 0xd6c   :  { %3194 = vmatpush1.msra.mxu0 %v6704_v31  ;;  %4596 = vmatpush3.msra.mxu1 %v6821_v38 }
 0xd6d   :  { %3195 = vmatprep.subr.mxu0 %v6708_v20  ;;  %4597 = vmatprep.subr.mxu1 %v7034_v0 }
 0xd6e   :  { %3196 = vmatpush1.msra.mxu0 %v6712_v44  ;;  %3229 = vmatprep.mubr.f32.mxu0 %v7034_v0 }
 0xd6f   :  { %4598 = vmatpush3.msra.mxu1 %v6828_v56  ;;  %4599 = vmatprep.mubr.msk.f32.mxu1 %vm5106_vm0, %v7034_v0 }
 0xd70   :  { %3336 = vmatprep.subr.mxu0 %v6578_v3  ;;  %4602 = vmatprep.subr.mxu1 %v7034_v0 }
 0xe0f   :  { %v3060_v15 = vpop.f32.mrf.mxu0  ;;  %v3131_v17 = vpop.f32.mrf.mxu1 }
 0xe10   :  { %v3138_v19 = vadd.f32 %v3060_v15, %v7148_v18 }
 0xe11   :  { %v4566_v39 = vpop.f32.mrf.mxu1  ;;  %v3062_v61 = vpop.f32.mrf.mxu0 }
 0xe12   :  { %v3645_v40 = vmul.f32 -1.442695, %v3138_v19  ;;  %v3145_v6 = vadd.f32 %v3062_v61, %v7149_v46 }
 0xe14   :  { %4818 = vpow2.f32 %v3645_v40  ;;  %v3646_v29 = vmul.f32 -1.442695, %v3145_v6  ;;  %v7154_v6 = vld [vmem:[#allocation32_spill] sm:$0xff] }
 0xe15   :  { %vm3500_vm8 = vcmp.eq.s32.totalorder %v7154_v6, 7 }
 0xe16   :  { %4820 = vpow2.f32 %v3646_v29  ;;  %v7152_v29 = vld [vmem:[#allocation41_spill] sm:$0xff] }
 0xe21   :  { %v4819_v41 = vpop.eup %4818 }
 0xe22   :  { %v3142_v3 = vadd.f32 1.0, %v4819_v41  ;;  %v7151_v41 = vld [vmem:[#allocation42_spill] sm:$0xff] }
 0xe23   :  { %v4821_v56 = vpop.eup %4820 }
 0xe24   :  { %4822 = vrcp.f32 %v3142_v3  ;;  %v3149_v20 = vadd.f32 1.0, %v4821_v56 }
 0xe31   :  { %v4823_v23 = vpop.eup %4822 }
 0xe32   :  { %v3152_v44 = vmul.f32 %v4823_v23, %v3131_v17  ;;  %v3516_v23 = vld [vmem:[#allocation13 + $0x48] sm:$0xff]  ;;  %v7160_v17 = vld [vmem:[#allocation44_spill] sm:$0xff] }
 0xe34   :  { %v3153_v14 = vadd.f32 %v7150_v50, %v3152_v44  ;;  %v7153_v50 = vld [vmem:[#allocation43_spill] sm:$0xff]  ;;  %v3517_v44 = vld [vmem:[#allocation13 + $0x50] sm:$0xff] }
 0xe36   :  { %4824 = vtanh.f32 %v3153_v14 }
 0xe37   :  { %4826 = vrcp.f32 %v3149_v20  ;;  %v3518_v20 = vld [vmem:[#allocation13 + $0x58] sm:$0xff] }
 0xe43   :  { %v4825_v15 = vpop.eup %4824 }
 0xe44   :  { %v3155_v18 = vsub.f32 %v6732_v47, %v4825_v15  ;;  %v4827_v19 = vpop.eup %4826 }
 0xe46   :  { %v3156_v39 = vmul.f32 %v4827_v19, %v3155_v18 }
 0xe48   :  { %v6841_v40 = vadd.f32 %v4825_v15, %v3156_v39 }
 0xe4a   :  { %3230 = vmatmul.mubr.f32.vlgmr.msra.gmra.mxu0 %v6841_v40  ;;  %4600 = vmatmul.mubr.f32.vlgmr.msra.gmra.mxu1 %v6841_v40 }
 0xe4b   :  { %3337 = vmatpush1.msra.mxu0 %v6592_v55  ;;  %4603 = vmatpush3.msra.mxu1 %v6737_v52  ;;  %v7155_v55 = vmov 0   ;;  %v3515_v52 = vld [vmem:[#allocation13 + $0x40] sm:$0xff] }
 0xe4c   :  { %3338 = vmatprep.subr.mxu0 %v6596_v10  ;;  %4604 = vmatprep.subr.mxu1 %v7034_v0  ;;  %v3501_v10 = vsel %vm3500_vm8, 1, %v7155_v55 }
 0xe4d   :  { %3339 = vmatpush1.msra.mxu0 %v6600_v54  ;;  %4605 = vmatpush3.msra.mxu1 %v6743_v53  ;;  %v3514_v53 = vld [vmem:[#allocation13 + $0x38] sm:$0xff] }
 0xe4e   :  { %3340 = vmatprep.subr.mxu0 %v6604_v8  ;;  %4606 = vmatprep.subr.mxu1 %v7034_v0 }
 0xe4f   :  { %3341 = vmatpush1.msra.mxu0 %v6608_v28  ;;  %4607 = vmatpush3.msra.mxu1 %v6749_v24  ;;  %v7156_v28 = vld [vmem:[#allocation25_spill] sm:$0xff]  ;;  %v3513_v24 = vld [vmem:[#allocation13 + $0x30] sm:$0xff] }
 0xe50   :  { %3342 = vmatprep.subr.mxu0 %v6612_v58  ;;  %4608 = vmatprep.subr.mxu1 %v7034_v0 }
 0xe51   :  { %3343 = vmatpush1.msra.mxu0 %v6616_v45  ;;  %4609 = vmatpush3.msra.mxu1 %v6755_v32  ;;  %v3512_v32 = vld [vmem:[#allocation13 + $0x28] sm:$0xff] }
 0xe52   :  { %3344 = vmatprep.subr.mxu0 %v6620_v59  ;;  %4610 = vmatprep.subr.mxu1 %v7034_v0 }
 0xe53   :  { %3345 = vmatpush1.msra.mxu0 %v6624_v4  ;;  %4611 = vmatpush3.msra.mxu1 %v6761_v33  ;;  %v3511_v33 = vld [vmem:[#allocation13 + $0x20] sm:$0xff] }
 0xe54   :  { %3346 = vmatprep.subr.mxu0 %v6628_v60  ;;  %4612 = vmatprep.subr.mxu1 %v7034_v0  ;;  %v7157_v60 = vld [vmem:[#allocation39_spill] sm:$0xff] }
 0xe55   :  { %3347 = vmatpush1.msra.mxu0 %v6632_v12  ;;  %4613 = vmatpush3.msra.mxu1 %v6767_v13  ;;  %v3510_v13 = vld [vmem:[#allocation13 + $0x18] sm:$0xff] }
 0xe56   :  { %3348 = vmatprep.subr.mxu0 %v6636_v7  ;;  %4614 = vmatprep.subr.mxu1 %v7034_v0 }
 0xe57   :  { %3349 = vmatpush1.msra.mxu0 %v6640_v25  ;;  %4615 = vmatpush3.msra.mxu1 %v6773_v5  ;;  %v3509_v5 = vld [vmem:[#allocation13 + $0x10] sm:$0xff] }
 0xe58   :  { %3350 = vmatprep.subr.mxu0 %v6644_v9  ;;  %4616 = vmatprep.subr.mxu1 %v7034_v0 }
 0xe59   :  { %3351 = vmatpush1.msra.mxu0 %v6648_v21  ;;  %4617 = vmatpush3.msra.mxu1 %v6779_v34  ;;  %v3508_v34 = vld [vmem:[#allocation13 + $0x8] sm:$0xff] }
 0xe5a   :  { %3352 = vmatprep.subr.mxu0 %v6652_v51  ;;  %4618 = vmatprep.subr.mxu1 %v7034_v0 }
 0xe5b   :  { %3353 = vmatpush1.msra.mxu0 %v6656_v57  ;;  %4619 = vmatpush3.msra.mxu1 %v6785_v11  ;;  %v3507_v11 = vld [vmem:[#allocation13] sm:$0xff] }
 0xe5c   :  { %3354 = vmatprep.subr.mxu0 %v6660_v48  ;;  %4620 = vmatprep.subr.mxu1 %v7034_v0  ;;  %v7158_v48 = vld [vmem:[#allocation47_spill] sm:$0xff] }
 0xe5d   :  { %3355 = vmatpush1.msra.mxu0 %v6664_v30  ;;  %4621 = vmatpush3.msra.mxu1 %v6791_v35 }
 0xe5e   :  { %3356 = vmatprep.subr.mxu0 %v6668_v63  ;;  %4622 = vmatprep.subr.mxu1 %v7034_v0 }
 0xe5f   :  { %3357 = vmatpush1.msra.mxu0 %v6672_v27  ;;  %4623 = vmatpush3.msra.mxu1 %v6797_v36 }
 0xe60   :  { %3358 = vmatprep.subr.mxu0 %v6676_v1  ;;  %4624 = vmatprep.subr.mxu1 %v7034_v0 }
 0xe61   :  { %3359 = vmatpush1.msra.mxu0 %v6680_v22  ;;  %4625 = vmatpush3.msra.mxu1 %v6803_v42  ;;  %v7159_v42 = vld [vmem:[#allocation37_spill] sm:$0xff] }
 0xe62   :  { %3360 = vmatprep.subr.mxu0 %v6684_v2  ;;  %4626 = vmatprep.subr.mxu1 %v7034_v0 }
 0xe63   :  { %3361 = vmatpush1.msra.mxu0 %v6688_v26  ;;  %4627 = vmatpush3.msra.mxu1 %v6809_v37 }
 0xe64   :  { %3362 = vmatprep.subr.mxu0 %v6692_v16  ;;  %4628 = vmatprep.subr.mxu1 %v7034_v0  ;;  %v3522_v16 = vld [vmem:[#allocation13 + $0x78] sm:$0xff] }
 0xe65   :  { %3363 = vmatpush1.msra.mxu0 %v6696_v43  ;;  %4629 = vmatpush3.msra.mxu1 %v6815_v49  ;;  %v3521_v43 = vld [vmem:[#allocation13 + $0x70] sm:$0xff] }
 0xe66   :  { %3364 = vmatprep.subr.mxu0 %v6700_v62  ;;  %4630 = vmatprep.subr.mxu1 %v7034_v0  ;;  %v3520_v62 = vld [vmem:[#allocation13 + $0x68] sm:$0xff] }
 0xe67   :  { %3365 = vmatpush1.msra.mxu0 %v6704_v31  ;;  %4631 = vmatpush3.msra.mxu1 %v6821_v38  ;;  %v3519_v31 = vld [vmem:[#allocation13 + $0x60] sm:$0xff] }
 0xe68   :  { %3366 = vmatprep.subr.mxu0 %v7151_v41  ;;  %4632 = vmatprep.subr.mxu1 %v7034_v0 }
 0xe69   :  { %3367 = vmatpush1.msra.mxu0 %v7152_v29  ;;  %3400 = vmatprep.mubr.f32.mxu0 %v7034_v0  ;;  %v2307_v29 = vpop.permute.xlu0 %2306 }
 0xe6a   :  { %4633 = vmatpush3.msra.mxu1 %v7153_v50  ;;  %4634 = vmatprep.mubr.msk.f32.mxu1 %vm5106_vm0, %v7034_v0  ;;  %v2649_v50 = vpop.permute.xlu1 %2648  ;;  %vm2308_vm9 = vcmp.eq.s32.totalorder %v2307_v29, 1 }
 0xe6b   :  { %4637 = vmatprep.subr.mxu0 %v7034_v0  ;;  %3503 = vperm.xlu1 %4687, %v3501_v10   ;;  %vm2650_vm11 = vcmp.eq.s32.totalorder %v2649_v50, 1 }
 0xe6d   :  { %v2478_v6 = vpop.permute.xlu0 %2477 }
 0xe6e   :  { %v2820_v55 = vpop.permute.xlu1 %2819  ;;  %vm2479_vm10 = vcmp.eq.s32.totalorder %v2478_v6, 1 }
 0xe6f   :  { %vm2821_vm12 = vcmp.eq.s32.totalorder %v2820_v55, 1 }
 0xe71   :  { %v2991_v10 = vpop.permute.xlu0 %2990 }
 0xe72   :  { %vm2992_vm13 = vcmp.eq.s32.totalorder %v2991_v10, 1 }
 0xf0a   :  { %v3231_v54 = vpop.f32.mrf.mxu0  ;;  %v3302_v8 = vpop.f32.mrf.mxu1 }
 0xf0b   :  { %v3309_v58 = vadd.f32 %v3231_v54, %v7156_v28  ;;  %v3162_v54 = vpop.permute.xlu1 %3161  ;;  %v7162_v28 = vld [vmem:[#allocation48_spill] sm:$0xff] }
 0xf0c   :  { %v4601_v45 = vpop.f32.mrf.mxu1  ;;  %v3233_v4 = vpop.f32.mrf.mxu0  ;;  %vm3163_vm14 = vcmp.eq.s32.totalorder %v3162_v54, 1 }
 0xf0d   :  { %v3647_v59 = vmul.f32 -1.442695, %v3309_v58  ;;  %v3316_v12 = vadd.f32 %v3233_v4, %v7157_v60  ;;  %v2309_v58 = vsel %vm2308_vm9, %v7162_v28, 0.0  ;;  %v3333_v45 = vpop.permute.xlu0 %3332 }
 0xf0e   :  { %vm3334_vm15 = vcmp.eq.s32.totalorder %v3333_v45, 1 }
 0xf0f   :  { %4828 = vpow2.f32 %v3647_v59  ;;  %v3648_v7 = vmul.f32 -1.442695, %v3316_v12  ;;  %v7163_v59 = vld [vmem:[#allocation29_spill] sm:$0xff] }
 0xf10   :  { %v2480_v4 = vsel %vm2479_vm10, %v7163_v59, %v2309_v58 }
 0xf11   :  { %4830 = vpow2.f32 %v3648_v7  ;;  %v7164_v7 = vld [vmem:[#allocation40_spill] sm:$0xff] }
 0xf1c   :  { %v4829_v25 = vpop.eup %4828 }
 0xf1d   :  { %v3313_v9 = vadd.f32 1.0, %v4829_v25  ;;  %v2651_v25 = vsel %vm2650_vm11, %v7164_v7, %v2480_v4 }
 0xf1e   :  { %v4831_v21 = vpop.eup %4830 }
 0xf1f   :  { %4832 = vrcp.f32 %v3313_v9  ;;  %v3320_v63 = vadd.f32 1.0, %v4831_v21  ;;  %v7165_v9 = vld [vmem:[#allocation31_spill] sm:$0xff] }
 0xf20   :  { %v2822_v21 = vsel %vm2821_vm12, %v7165_v9, %v2651_v25 }
 0xf2c   :  { %v4833_v51 = vpop.eup %4832 }
 0xf2d   :  { %v3323_v57 = vmul.f32 %v4833_v51, %v3302_v8 }
 0xf2f   :  { %v3324_v30 = vadd.f32 %v3323_v57, %v7158_v48  ;;  %v3504_v57 = vpop.permute.xlu1 %3503  ;;  %v2993_v48 = vsel %vm2992_vm13, %v6732_v47, %v2822_v21 }
 0xf31   :  { %4834 = vtanh.f32 %v3324_v30  ;;  %v3164_v30 = vsel %vm3163_vm14, %v6841_v40, %v2993_v48 }
 0xf32   :  { %4836 = vrcp.f32 %v3320_v63 }
 0xf3e   :  { %v4835_v27 = vpop.eup %4834 }
 0xf3f   :  { %v3326_v1 = vsub.f32 %v6841_v40, %v4835_v27  ;;  %v4837_v22 = vpop.eup %4836 }
 0xf41   :  { %v3327_v2 = vmul.f32 %v4837_v22, %v3326_v1  ;;  %v3651_v22 = vld [vmem:[%s6962_s7] ss:$0 sm:$0xff] }
 0xf43   :  { %v6917_v26 = vadd.f32 %v4835_v27, %v3327_v2 }
 0xf45   :  { %3401 = vmatmul.mubr.f32.vlgmr.msra.gmra.mxu0 %v6917_v26  ;;  %4635 = vmatmul.mubr.f32.vlgmr.msra.gmra.mxu1 %v6917_v26  ;;  %v3335_v27 = vsel %vm3334_vm15, %v6917_v26, %v3164_v30 }
 0xf46   :  { %4669 = vmatprep.mubr.msk.f32.mxu0 %vm5106_vm0, %v7034_v0  ;;  %4638 = vmatpush3.msra.mxu0 %v3522_v16  ;;  %vm3505_vm0 = vcmp.eq.s32.totalorder %v3504_v57, 1 }
 0xf47   :  { %4639 = vmatprep.subr.mxu0 %v7034_v0 }
 0xf48   :  { %4640 = vmatpush3.msra.mxu0 %v3521_v43 }
 0xf49   :  { %4641 = vmatprep.subr.mxu0 %v7034_v0 }
 0xf4a   :  { %4642 = vmatpush3.msra.mxu0 %v3520_v62 }
 0xf4b   :  { %4643 = vmatprep.subr.mxu0 %v7034_v0 }
 0xf4c   :  { %4644 = vmatpush3.msra.mxu0 %v3519_v31 }
 0xf4d   :  { %4645 = vmatprep.subr.mxu0 %v7034_v0 }
 0xf4e   :  { %4646 = vmatpush3.msra.mxu0 %v3518_v20 }
 0xf4f   :  { %4647 = vmatprep.subr.mxu0 %v7034_v0 }
 0xf50   :  { %4648 = vmatpush3.msra.mxu0 %v3517_v44 }
 0xf51   :  { %4649 = vmatprep.subr.mxu0 %v7034_v0 }
 0xf52   :  { %4650 = vmatpush3.msra.mxu0 %v3516_v23 }
 0xf53   :  { %4651 = vmatprep.subr.mxu0 %v7034_v0 }
 0xf54   :  { %4652 = vmatpush3.msra.mxu0 %v3515_v52 }
 0xf55   :  { %4653 = vmatprep.subr.mxu0 %v7034_v0 }
 0xf56   :  { %4654 = vmatpush3.msra.mxu0 %v3514_v53 }
 0xf57   :  { %4655 = vmatprep.subr.mxu0 %v7034_v0 }
 0xf58   :  { %4656 = vmatpush3.msra.mxu0 %v3513_v24 }
 0xf59   :  { %4657 = vmatprep.subr.mxu0 %v7034_v0 }
 0xf5a   :  { %4658 = vmatpush3.msra.mxu0 %v3512_v32 }
 0xf5b   :  { %4659 = vmatprep.subr.mxu0 %v7034_v0 }
 0xf5c   :  { %4660 = vmatpush3.msra.mxu0 %v3511_v33 }
 0xf5d   :  { %4661 = vmatprep.subr.mxu0 %v7034_v0 }
 0xf5e   :  { %4662 = vmatpush3.msra.mxu0 %v3510_v13 }
 0xf5f   :  { %4663 = vmatprep.subr.mxu0 %v7034_v0 }
 0xf60   :  { %4664 = vmatpush3.msra.mxu0 %v3509_v5 }
 0xf61   :  { %4665 = vmatprep.subr.mxu0 %v7034_v0 }
 0xf62   :  { %4666 = vmatpush3.msra.mxu0 %v3508_v34 }
 0xf63   :  { %4667 = vmatprep.subr.mxu0 %v7034_v0  ;;  %v7161_v0 = vld [vmem:[#allocation38_spill] sm:$0xff] }
 0xf64   :  { %4668 = vmatpush3.msra.mxu0 %v3507_v11 }
0x1005   :  { %v3402_v35 = vpop.f32.mrf.mxu0  ;;  %v3473_v36 = vpop.f32.mrf.mxu1 }
0x1006   :  { %v3480_v37 = vadd.f32 %v3402_v35, %v7159_v42 }
0x1007   :  { %v4636_v49 = vpop.f32.mrf.mxu1  ;;  %v3404_v56 = vpop.f32.mrf.mxu0 }
0x1008   :  { %v3649_v38 = vmul.f32 -1.442695, %v3480_v37  ;;  %v3487_v61 = vadd.f32 %v3404_v56, %v7160_v17 }
0x100a   :  { %4838 = vpow2.f32 %v3649_v38  ;;  %v3650_v46 = vmul.f32 -1.442695, %v3487_v61 }
0x100c   :  { %4840 = vpow2.f32 %v3650_v46 }
0x1017   :  { %v4839_v3 = vpop.eup %4838 }
0x1018   :  { %v3484_v14 = vadd.f32 1.0, %v4839_v3 }
0x1019   :  { %v4841_v15 = vpop.eup %4840 }
0x101a   :  { %4842 = vrcp.f32 %v3484_v14  ;;  %v3491_v41 = vadd.f32 1.0, %v4841_v15 }
0x1027   :  { %v4843_v18 = vpop.eup %4842 }
0x1028   :  { %v3494_v19 = vmul.f32 %v4843_v18, %v3473_v36 }
0x102a   :  { %v3495_v39 = vadd.f32 %v7161_v0, %v3494_v19 }
0x102c   :  { %4844 = vtanh.f32 %v3495_v39 }
0x102d   :  { %4846 = vrcp.f32 %v3491_v41 }
0x1039   :  { %v4845_v8 = vpop.eup %4844 }
0x103a   :  { %v3497_v60 = vsub.f32 %v6917_v26, %v4845_v8  ;;  %v4847_v12 = vpop.eup %4846 }
0x103c   :  { %v3498_v51 = vmul.f32 %v4847_v12, %v3497_v60 }
0x103e   :  { %v3499_v63 = vadd.f32 %v4845_v8, %v3498_v51 }
0x1040   :  { %v3506_v1 = vsel %vm3505_vm0, %v3499_v63, %v3335_v27 }
0x1041   :  { %4670 = vmatmul.mubr.f32.vlgmr.msra.gmra.mxu0 %v3506_v1 }
0x1101   :  { %v3596_v2 = vpop.f32.mrf.mxu0 }
0x1102   :  { %v3597_v16 = vadd.f32 %v3651_v22, %v3596_v2 }
0x1103   :  { %v4671_v43 = vpop.f32.mrf.mxu0 }
0x1104   :  { %3600 = vst [vmem:[#allocation15] sm:$0xff] %v3597_v16 }
0x1105   :  { %5076 = shalt.err (!%p5073_p6)
}
0x1106   :  { %3610 = dma.vmem_to_hbm [thread:$0]  %s3608_s17, 128, %s6963_s8, [#allocation6]  }
0x1107   :  { %5093 = dma.done.wait [#allocation6], 128  }
0x1108   :  { %5094 = vsyncadd [#allocation6], 4294967168 }
0x1109   :  { %3614 = vsyncpa [#allocation5], 1 }
0x110a   :  { %3615 = vsyncpa [#allocation8], 1 }
0x110b   :  { %3616 = vsyncpa [#allocation11], 1 }
0x110c   :  { %3617 = vsyncpa [#allocation14], 1 }
0x110d   :  { %3618 = vsyncpa [#allocation6], 1 }

</bundles_post_ra>
